<compile_context>
chip_gen: v6e
topology: v6e:2x2x1
jax: 0.10.0
libtpu: 0.0.40
codegen_flags: <defaults>
</compile_context>

<pallas_src>
import functools
import numpy as np

import jax
import jax.numpy as jnp
from jax import lax
from jax.experimental import pallas as pl
from jax.experimental.pallas import tpu as pltpu


def _round_up(x, m):
    return ((x + m - 1) // m) * m


def _gaussian_1d(window_size: int, sigma: float = 1.5) -> np.ndarray:
    xs = np.arange(window_size, dtype=np.float64)
    g = np.exp(-((xs - window_size // 2) ** 2) / (2.0 * sigma ** 2))
    g = g / g.sum()
    return g.astype(np.float32)


def _filter_bands(H, W, K):
    """Banded Gaussian-tap matrices: (Ho_pad, H) and (W, Wo_pad), f32."""
    g = _gaussian_1d(K)
    Ho, Wo = H - K + 1, W - K + 1
    Ho_pad = _round_up(Ho, 8)
    Wo_pad = _round_up(Wo, 128)
    bh = np.zeros((Ho_pad, H), np.float32)
    for o in range(Ho):
        bh[o, o:o + K] = g
    bw = np.zeros((W, Wo_pad), np.float32)
    for v in range(Wo):
        bw[v:v + K, v] = g
    return bh, bw, Ho, Wo


def _pool_bands(H, W):
    """Banded 2x2 average-pool matrices: (H/2, H) and (W, W/2), f32."""
    Hp, Wp = H // 2, W // 2
    ph = np.zeros((Hp, H), np.float32)
    pw = np.zeros((W, Wp), np.float32)
    for i in range(Hp):
        ph[i, 2 * i] = 0.5
        ph[i, 2 * i + 1] = 0.5
    for j in range(Wp):
        pw[2 * j, j] = 0.5
        pw[2 * j + 1, j] = 0.5
    return ph, pw


def _level_kernel(c12_ref, bh_ref, bw_ref, ph_ref, pw_ref, x_ref, y_ref,
                  stats_ref, p1_ref, p2_ref, *, Ho, Wo):
    x = x_ref[...].astype(jnp.float32)      # (bn, H, W)
    y = y_ref[...].astype(jnp.float32)
    bn = x.shape[0]

    C1 = c12_ref[0]
    C2 = c12_ref[1]

    # ---- separable Gaussian filter of the 5 statistics as banded MXU matmuls ----
    S = jnp.concatenate([x, y, x * x, y * y, x * y], axis=0)      # (5*bn, H, W)

    bw = bw_ref[...]                                              # (W, Wo_pad)
    bh = bh_ref[...]                                              # (Ho_pad, H)
    bw_b = jnp.broadcast_to(bw, (5 * bn,) + bw.shape)
    bh_b = jnp.broadcast_to(bh, (5 * bn,) + bh.shape)

    t = jnp.einsum('nhw,nwv->nhv', S, bw_b,
                   preferred_element_type=jnp.float32)            # (5bn, H, Wo_pad)
    filt = jnp.einsum('noh,nhv->nov', bh_b, t,
                      preferred_element_type=jnp.float32)         # (5bn, Ho_pad, Wo_pad)

    mu1 = filt[0 * bn:1 * bn]
    mu2 = filt[1 * bn:2 * bn]
    e11 = filt[2 * bn:3 * bn]
    e22 = filt[3 * bn:4 * bn]
    e12 = filt[4 * bn:5 * bn]

    mu1_sq = mu1 * mu1
    mu2_sq = mu2 * mu2
    mu1_mu2 = mu1 * mu2
    sigma1_sq = e11 - mu1_sq
    sigma2_sq = e22 - mu2_sq
    sigma12 = e12 - mu1_mu2

    v1 = 2.0 * sigma12 + C2
    v2 = sigma1_sq + sigma2_sq + C2
    inv_v2 = pl.reciprocal(v2, approx=True)            # shared EUP reciprocal
    cs_map = v1 * inv_v2
    ssim_map = (2.0 * mu1_mu2 + C1) * v1 * inv_v2 * \
        pl.reciprocal(mu1_sq + mu2_sq + C1, approx=True)

    # mask out the sublane / lane padding of the filtered maps
    Ho_pad, Wo_pad = filt.shape[1], filt.shape[2]
    row = lax.broadcasted_iota(jnp.int32, (Ho_pad, Wo_pad), 0)
    col = lax.broadcasted_iota(jnp.int32, (Ho_pad, Wo_pad), 1)
    mask = ((row < Ho) & (col < Wo)).astype(jnp.float32)

    ssim_sum = jnp.sum(ssim_map * mask)
    cs_sum = jnp.sum(cs_map * mask)

    # ---- fused 2x2 average pooling (next level's inputs), also on the MXU ----
    ph = ph_ref[...]                                              # (H/2, H)
    pw = pw_ref[...]                                              # (W, W/2)
    ph_b = jnp.broadcast_to(ph, (bn,) + ph.shape)
    pw_b = jnp.broadcast_to(pw, (bn,) + pw.shape)

    def pool(img):
        th = jnp.einsum('noh,nhw->now', ph_b, img,
                        preferred_element_type=jnp.float32)
        return jnp.einsum('nhw,nwv->nhv', th, pw_b,
                          preferred_element_type=jnp.float32)

    p1 = pool(x)
    p2 = pool(y)
    p1_ref[...] = p1.astype(p1_ref.dtype)
    p2_ref[...] = p2.astype(p2_ref.dtype)

    # per-block partial stats packed in a lane-dense (8, 128) slab
    p1_min = jnp.min(p1)
    p1_max = jnp.max(p1)
    r = lax.broadcasted_iota(jnp.int32, (8, 128), 0)
    c = lax.broadcasted_iota(jnp.int32, (8, 128), 1)
    first = (r == 0)
    vals = jnp.where(first & (c == 0), ssim_sum, 0.0)
    vals = vals + jnp.where(first & (c == 1), cs_sum, 0.0)
    vals = vals + jnp.where(first & (c == 2), p1_min, 0.0)
    vals = vals + jnp.where(first & (c == 3), p1_max, 0.0)
    stats_ref[0] = vals.astype(jnp.float32)


def _pick_block(n, cap=4):
    b = min(n, cap)
    while n % b:
        b -= 1
    return b


def _ssim_level_call(img1, img2, c12, *, window_size, block_n):
    """One MS-SSIM scale. Returns (ssim, cs, pooled1, pooled2, min, max of pooled1)."""
    N, H, W = img1.shape
    K = min(window_size, H, W)            # real_size = min(window_size, h, w)
    bh_np, bw_np, Ho, Wo = _filter_bands(H, W, K)
    ph_np, pw_np = _pool_bands(H, W)
    Hp, Wp = H // 2, W // 2

    bn = block_n
    G = N // bn

    bh = jnp.asarray(bh_np)
    bw = jnp.asarray(bw_np)
    ph = jnp.asarray(ph_np)
    pw = jnp.asarray(pw_np)

    kernel = functools.partial(_level_kernel, Ho=Ho, Wo=Wo)

    stats, pooled1, pooled2 = pl.pallas_call(
        kernel,
        out_shape=(
            jax.ShapeDtypeStruct((G, 8, 128), jnp.float32),
            jax.ShapeDtypeStruct((N, Hp, Wp), img1.dtype),
            jax.ShapeDtypeStruct((N, Hp, Wp), img2.dtype),
        ),
        grid=(G,),
        in_specs=[
            pl.BlockSpec(memory_space=pltpu.MemorySpace.SMEM),     # [C1, C2]
            pl.BlockSpec(bh.shape, lambda i: (0, 0)),              # Gaussian H band
            pl.BlockSpec(bw.shape, lambda i: (0, 0)),              # Gaussian W band
            pl.BlockSpec(ph.shape, lambda i: (0, 0)),              # pool H band
            pl.BlockSpec(pw.shape, lambda i: (0, 0)),              # pool W band
            pl.BlockSpec((bn, H, W), lambda i: (i, 0, 0)),         # img1 block
            pl.BlockSpec((bn, H, W), lambda i: (i, 0, 0)),         # img2 block
        ],
        out_specs=(
            pl.BlockSpec((1, 8, 128), lambda i: (i, 0, 0)),        # partial stats
            pl.BlockSpec((bn, Hp, Wp), lambda i: (i, 0, 0)),       # pooled img1
            pl.BlockSpec((bn, Hp, Wp), lambda i: (i, 0, 0)),       # pooled img2
        ),
        compiler_params=pltpu.CompilerParams(
            dimension_semantics=("parallel",),                     # 2 TCs on v7x
            vmem_limit_bytes=48 * 1024 * 1024,                     # fits v7x 64 MiB
        ),
    )(c12, bh, bw, ph, pw, img1, img2)

    count = float(N * Ho * Wo)
    ssim_val = stats[:, 0, 0].sum() / count      # size_average=True full mean
    cs_val = stats[:, 0, 1].sum() / count
    nxt_min = stats[:, 0, 2].min()
    nxt_max = stats[:, 0, 3].max()
    return ssim_val, cs_val, pooled1, pooled2, nxt_min, nxt_max


@functools.partial(jax.jit, static_argnames=("window_size",))
def msssim_pallas(img1, img2, window_size=11):
    weights = jnp.array([0.0448, 0.2856, 0.3001, 0.2363, 0.1333], jnp.float32)
    levels = int(weights.shape[0])

    B, C, H, W = img1.shape
    N = B * C
    x = img1.reshape(N, H, W)
    y = img2.reshape(N, H, W)

    # dynamic-range heuristic of the reference (val_range=None); level 0 needs a
    # global reduce up front, deeper levels reuse the kernel's pooled min/max.
    cur_max = jnp.max(x)
    cur_min = jnp.min(x)

    mssim, mcs = [], []
    for _ in range(levels):
        max_val = jnp.where(cur_max > 128.0, 255.0, 1.0)
        min_val = jnp.where(cur_min < -0.5, -1.0, 0.0)
        L = max_val - min_val
        c12 = jnp.stack([(0.01 * L) ** 2, (0.03 * L) ** 2]).astype(jnp.float32)

        bn = _pick_block(x.shape[0], 4)
        s, c, xp, yp, nmin, nmax = _ssim_level_call(
            x, y, c12, window_size=window_size, block_n=bn)
        mssim.append(s)
        mcs.append(c)
        x, y = xp, yp
        cur_min, cur_max = nmin, nmax

    mssim = jnp.stack(mssim)
    mcs = jnp.stack(mcs)
    # MSSSIM.forward uses normalize=True
    mssim = (mssim + 1.0) / 2.0
    mcs = (mcs + 1.0) / 2.0
    pow1 = mcs ** weights
    pow2 = mssim ** weights
    # reference-faithful combine (pow2[-1] broadcasts across the cs terms)
    return jnp.prod(pow1[:-1] * pow2[-1])


class MSSSIM:
    """JAX/Pallas port of the PyTorch MSSSIM module (forward only)."""

    def __init__(self, window_size=11, size_average=True, channel=3):
        self.window_size = window_size
        self.size_average = size_average   # True -> full mean inside the kernels
        self.channel = channel             # actual channels come from the input

    def __call__(self, img1, img2):
        return msssim_pallas(img1, img2, window_size=self.window_size)


if __name__ == "__main__":
    key = jax.random.PRNGKey(0)
    k1, k2 = jax.random.split(key)
    # 5 MS-SSIM levels with 2x2 pooling after each -> spatial must be >= 32
    img1 = jax.random.uniform(k1, (2, 3, 32, 32), dtype=jnp.float32)
    img2 = jax.random.uniform(k2, (2, 3, 32, 32), dtype=jnp.float32)

    loss = MSSSIM(window_size=11, size_average=True, channel=3)
    out = loss(img1, img2)
    jax.block_until_ready(out)
    print("KERNEL_OK")
</pallas_src>

<mosaic_0001>
module attributes {stable_mosaic.version = 11 : i64} {
  func.func @_level_kernel(%arg0: i32, %arg1: memref<2xf32, #tpu.memory_space<smem>>, %arg2: memref<24x32xf32, #tpu.memory_space<vmem>>, %arg3: memref<32x128xf32, #tpu.memory_space<vmem>>, %arg4: memref<16x32xf32, #tpu.memory_space<vmem>>, %arg5: memref<32x16xf32, #tpu.memory_space<vmem>>, %arg6: memref<3x32x32xf32, #tpu.memory_space<vmem>>, %arg7: memref<3x32x32xf32, #tpu.memory_space<vmem>>, %arg8: memref<1x8x128xf32, #tpu.memory_space<vmem>>, %arg9: memref<3x16x16xf32, #tpu.memory_space<vmem>>, %arg10: memref<3x16x16xf32, #tpu.memory_space<vmem>>) attributes {dimension_semantics = [#tpu.dimension_semantics<parallel>], iteration_bounds = array<i64: 2>, scalar_prefetch = 0 : i64, scratch_operands = 0 : i64, tpu.core_type = #tpu.core_type<tc>, window_params = [{transform_indices = @transform_0, window_bounds = array<i64: 2>}, {pipeline_mode = #tpu.pipeline_mode<synchronous>, transform_indices = @transform_1, window_bounds = array<i64: 24, 32>}, {pipeline_mode = #tpu.pipeline_mode<synchronous>, transform_indices = @transform_2, window_bounds = array<i64: 32, 128>}, {pipeline_mode = #tpu.pipeline_mode<synchronous>, transform_indices = @transform_3, window_bounds = array<i64: 16, 32>}, {pipeline_mode = #tpu.pipeline_mode<synchronous>, transform_indices = @transform_4, window_bounds = array<i64: 32, 16>}, {transform_indices = @transform_5, window_bounds = array<i64: 3, 32, 32>}, {transform_indices = @transform_6, window_bounds = array<i64: 3, 32, 32>}, {transform_indices = @transform_7, window_bounds = array<i64: 1, 8, 128>}, {transform_indices = @transform_8, window_bounds = array<i64: 3, 16, 16>}, {transform_indices = @transform_9, window_bounds = array<i64: 3, 16, 16>}]} {
    %c0 = arith.constant 0 : index
    %c0_0 = arith.constant 0 : index
    %c0_1 = arith.constant 0 : index
    %0 = vector.load %arg6[%c0, %c0_0, %c0_1] : memref<3x32x32xf32, #tpu.memory_space<vmem>>, vector<3x32x32xf32>
    %c0_2 = arith.constant 0 : index
    %c0_3 = arith.constant 0 : index
    %c0_4 = arith.constant 0 : index
    %1 = vector.load %arg7[%c0_2, %c0_3, %c0_4] : memref<3x32x32xf32, #tpu.memory_space<vmem>>, vector<3x32x32xf32>
    %c0_5 = arith.constant 0 : index
    %2 = memref.load %arg1[%c0_5] : memref<2xf32, #tpu.memory_space<smem>>
    %c1 = arith.constant 1 : index
    %3 = memref.load %arg1[%c1] : memref<2xf32, #tpu.memory_space<smem>>
    %4 = arith.mulf %0, %0 : vector<3x32x32xf32>
    %5 = arith.mulf %1, %1 : vector<3x32x32xf32>
    %6 = arith.mulf %0, %1 : vector<3x32x32xf32>
    %7 = tpu.concatenate %0, %1, %4, %5, %6 in 0 : vector<3x32x32xf32>, vector<3x32x32xf32>, vector<3x32x32xf32>, vector<3x32x32xf32>, vector<3x32x32xf32> -> vector<15x32x32xf32>
    %c0_6 = arith.constant 0 : index
    %c0_7 = arith.constant 0 : index
    %8 = vector.load %arg3[%c0_6, %c0_7] : memref<32x128xf32, #tpu.memory_space<vmem>>, vector<32x128xf32>
    %c0_8 = arith.constant 0 : index
    %c0_9 = arith.constant 0 : index
    %9 = vector.load %arg2[%c0_8, %c0_9] : memref<24x32xf32, #tpu.memory_space<vmem>>, vector<24x32xf32>
    %10 = vector.shape_cast %8 : vector<32x128xf32> to vector<1x32x128xf32>
    %11 = vector.broadcast %10 : vector<1x32x128xf32> to vector<15x32x128xf32>
    %12 = vector.shape_cast %9 : vector<24x32xf32> to vector<1x24x32xf32>
    %13 = vector.broadcast %12 : vector<1x24x32xf32> to vector<15x24x32xf32>
    "tpu.trace_start"() <{level = 10 : i32, message = "nhw,nwv->nhv"}> : () -> ()
    %cst = arith.constant dense<0.000000e+00> : vector<15x32x128xf32>
    %14 = tpu.matmul %7, %11, %cst {dimension_numbers = #tpu.dot_dimension_numbers<[2], [1], [1], [2], [0, 0, 0, 1, 1, 2], [0], [0]>} : vector<15x32x32xf32>, vector<15x32x128xf32>, vector<15x32x128xf32> -> vector<15x32x128xf32>
    "tpu.trace_stop"() : () -> ()
    "tpu.trace_start"() <{level = 10 : i32, message = "noh,nhv->nov"}> : () -> ()
    %cst_10 = arith.constant dense<0.000000e+00> : vector<15x24x128xf32>
    %15 = tpu.matmul %13, %14, %cst_10 {dimension_numbers = #tpu.dot_dimension_numbers<[2], [1], [1], [2], [0, 0, 0, 1, 1, 2], [0], [0]>} : vector<15x24x32xf32>, vector<15x32x128xf32>, vector<15x24x128xf32> -> vector<15x24x128xf32>
    "tpu.trace_stop"() : () -> ()
    %16 = vector.extract_strided_slice %15 {offsets = [0, 0, 0], sizes = [3, 24, 128], strides = [1, 1, 1]} : vector<15x24x128xf32> to vector<3x24x128xf32>
    %17 = vector.extract_strided_slice %15 {offsets = [3, 0, 0], sizes = [3, 24, 128], strides = [1, 1, 1]} : vector<15x24x128xf32> to vector<3x24x128xf32>
    %18 = vector.extract_strided_slice %15 {offsets = [6, 0, 0], sizes = [3, 24, 128], strides = [1, 1, 1]} : vector<15x24x128xf32> to vector<3x24x128xf32>
    %19 = vector.extract_strided_slice %15 {offsets = [9, 0, 0], sizes = [3, 24, 128], strides = [1, 1, 1]} : vector<15x24x128xf32> to vector<3x24x128xf32>
    %20 = vector.extract_strided_slice %15 {offsets = [12, 0, 0], sizes = [3, 24, 128], strides = [1, 1, 1]} : vector<15x24x128xf32> to vector<3x24x128xf32>
    %21 = arith.mulf %16, %16 : vector<3x24x128xf32>
    %22 = arith.mulf %17, %17 : vector<3x24x128xf32>
    %23 = arith.mulf %16, %17 : vector<3x24x128xf32>
    %24 = arith.subf %18, %21 : vector<3x24x128xf32>
    %25 = arith.subf %19, %22 : vector<3x24x128xf32>
    %26 = arith.subf %20, %23 : vector<3x24x128xf32>
    %cst_11 = arith.constant 2.000000e+00 : f32
    %27 = vector.broadcast %cst_11 : f32 to vector<3x24x128xf32>
    %28 = arith.mulf %27, %26 : vector<3x24x128xf32>
    %29 = vector.broadcast %3 : f32 to vector<3x24x128xf32>
    %30 = arith.addf %28, %29 : vector<3x24x128xf32>
    %31 = arith.addf %24, %25 : vector<3x24x128xf32>
    %32 = vector.broadcast %3 : f32 to vector<3x24x128xf32>
    %33 = arith.addf %31, %32 : vector<3x24x128xf32>
    %34 = tpu.reciprocal %33 {approx = true} : vector<3x24x128xf32> -> vector<3x24x128xf32>
    %35 = arith.mulf %30, %34 : vector<3x24x128xf32>
    %cst_12 = arith.constant 2.000000e+00 : f32
    %36 = vector.broadcast %cst_12 : f32 to vector<3x24x128xf32>
    %37 = arith.mulf %36, %23 : vector<3x24x128xf32>
    %38 = vector.broadcast %2 : f32 to vector<3x24x128xf32>
    %39 = arith.addf %37, %38 : vector<3x24x128xf32>
    %40 = arith.mulf %39, %30 : vector<3x24x128xf32>
    %41 = arith.mulf %40, %34 : vector<3x24x128xf32>
    %42 = arith.addf %21, %22 : vector<3x24x128xf32>
    %43 = vector.broadcast %2 : f32 to vector<3x24x128xf32>
    %44 = arith.addf %42, %43 : vector<3x24x128xf32>
    %45 = tpu.reciprocal %44 {approx = true} : vector<3x24x128xf32> -> vector<3x24x128xf32>
    %46 = arith.mulf %41, %45 : vector<3x24x128xf32>
    %47 = tpu.iota {dimensions = array<i32: 0>} : vector<24x128xi32>
    %48 = tpu.iota {dimensions = array<i32: 1>} : vector<24x128xi32>
    %c22_i32 = arith.constant 22 : i32
    %49 = vector.broadcast %c22_i32 : i32 to vector<24x128xi32>
    %50 = arith.cmpi slt, %47, %49 : vector<24x128xi32>
    %c22_i32_13 = arith.constant 22 : i32
    %51 = vector.broadcast %c22_i32_13 : i32 to vector<24x128xi32>
    %52 = arith.cmpi slt, %48, %51 : vector<24x128xi32>
    %53 = arith.andi %50, %52 : vector<24x128xi1>
    %54 = arith.extui %53 : vector<24x128xi1> to vector<24x128xi32>
    %55 = arith.sitofp %54 : vector<24x128xi32> to vector<24x128xf32>
    %56 = vector.shape_cast %55 : vector<24x128xf32> to vector<1x24x128xf32>
    %57 = vector.broadcast %56 : vector<1x24x128xf32> to vector<3x24x128xf32>
    %58 = arith.mulf %46, %57 : vector<3x24x128xf32>
    %59 = vector.shape_cast %58 : vector<3x24x128xf32> to vector<1x3x24x128xf32>
    %cst_14 = arith.constant dense<0.000000e+00> : vector<1xf32>
    %60 = vector.multi_reduction <add>, %59, %cst_14 [1, 2, 3] : vector<1x3x24x128xf32> to vector<1xf32>
    %61 = vector.shape_cast %60 : vector<1xf32> to vector<1x1x1x1xf32>
    %62 = vector.extract %61[0, 0, 0, 0] : f32 from vector<1x1x1x1xf32>
    %63 = vector.shape_cast %55 : vector<24x128xf32> to vector<1x24x128xf32>
    %64 = vector.broadcast %63 : vector<1x24x128xf32> to vector<3x24x128xf32>
    %65 = arith.mulf %35, %64 : vector<3x24x128xf32>
    %66 = vector.shape_cast %65 : vector<3x24x128xf32> to vector<1x3x24x128xf32>
    %cst_15 = arith.constant dense<0.000000e+00> : vector<1xf32>
    %67 = vector.multi_reduction <add>, %66, %cst_15 [1, 2, 3] : vector<1x3x24x128xf32> to vector<1xf32>
    %68 = vector.shape_cast %67 : vector<1xf32> to vector<1x1x1x1xf32>
    %69 = vector.extract %68[0, 0, 0, 0] : f32 from vector<1x1x1x1xf32>
    %c0_16 = arith.constant 0 : index
    %c0_17 = arith.constant 0 : index
    %70 = vector.load %arg4[%c0_16, %c0_17] : memref<16x32xf32, #tpu.memory_space<vmem>>, vector<16x32xf32>
    %c0_18 = arith.constant 0 : index
    %c0_19 = arith.constant 0 : index
    %71 = vector.load %arg5[%c0_18, %c0_19] : memref<32x16xf32, #tpu.memory_space<vmem>>, vector<32x16xf32>
    %72 = vector.shape_cast %70 : vector<16x32xf32> to vector<1x16x32xf32>
    %73 = vector.broadcast %72 : vector<1x16x32xf32> to vector<3x16x32xf32>
    %74 = vector.shape_cast %71 : vector<32x16xf32> to vector<1x32x16xf32>
    %75 = vector.broadcast %74 : vector<1x32x16xf32> to vector<3x32x16xf32>
    "tpu.trace_start"() <{level = 10 : i32, message = "noh,nhw->now"}> : () -> ()
    %cst_20 = arith.constant dense<0.000000e+00> : vector<3x16x32xf32>
    %76 = tpu.matmul %73, %0, %cst_20 {dimension_numbers = #tpu.dot_dimension_numbers<[2], [1], [1], [2], [0, 0, 0, 1, 1, 2], [0], [0]>} : vector<3x16x32xf32>, vector<3x32x32xf32>, vector<3x16x32xf32> -> vector<3x16x32xf32>
    "tpu.trace_stop"() : () -> ()
    "tpu.trace_start"() <{level = 10 : i32, message = "nhw,nwv->nhv"}> : () -> ()
    %cst_21 = arith.constant dense<0.000000e+00> : vector<3x16x16xf32>
    %77 = tpu.matmul %76, %75, %cst_21 {dimension_numbers = #tpu.dot_dimension_numbers<[2], [1], [1], [2], [0, 0, 0, 1, 1, 2], [0], [0]>} : vector<3x16x32xf32>, vector<3x32x16xf32>, vector<3x16x16xf32> -> vector<3x16x16xf32>
    "tpu.trace_stop"() : () -> ()
    "tpu.trace_start"() <{level = 10 : i32, message = "noh,nhw->now"}> : () -> ()
    %cst_22 = arith.constant dense<0.000000e+00> : vector<3x16x32xf32>
    %78 = tpu.matmul %73, %1, %cst_22 {dimension_numbers = #tpu.dot_dimension_numbers<[2], [1], [1], [2], [0, 0, 0, 1, 1, 2], [0], [0]>} : vector<3x16x32xf32>, vector<3x32x32xf32>, vector<3x16x32xf32> -> vector<3x16x32xf32>
    "tpu.trace_stop"() : () -> ()
    "tpu.trace_start"() <{level = 10 : i32, message = "nhw,nwv->nhv"}> : () -> ()
    %cst_23 = arith.constant dense<0.000000e+00> : vector<3x16x16xf32>
    %79 = tpu.matmul %78, %75, %cst_23 {dimension_numbers = #tpu.dot_dimension_numbers<[2], [1], [1], [2], [0, 0, 0, 1, 1, 2], [0], [0]>} : vector<3x16x32xf32>, vector<3x32x16xf32>, vector<3x16x16xf32> -> vector<3x16x16xf32>
    "tpu.trace_stop"() : () -> ()
    %c0_24 = arith.constant 0 : index
    %c0_25 = arith.constant 0 : index
    %c0_26 = arith.constant 0 : index
    %80 = vector.load %arg9[%c0_24, %c0_25, %c0_26] : memref<3x16x16xf32, #tpu.memory_space<vmem>>, vector<3x16x16xf32>
    tpu.vector_store %arg9[%c0_24, %c0_25, %c0_26], %77 {strides = array<i32>} : memref<3x16x16xf32, #tpu.memory_space<vmem>>, vector<3x16x16xf32>,
    %c0_27 = arith.constant 0 : index
    %c0_28 = arith.constant 0 : index
    %c0_29 = arith.constant 0 : index
    %81 = vector.load %arg10[%c0_27, %c0_28, %c0_29] : memref<3x16x16xf32, #tpu.memory_space<vmem>>, vector<3x16x16xf32>
    tpu.vector_store %arg10[%c0_27, %c0_28, %c0_29], %79 {strides = array<i32>} : memref<3x16x16xf32, #tpu.memory_space<vmem>>, vector<3x16x16xf32>,
    %82 = vector.shape_cast %77 : vector<3x16x16xf32> to vector<1x3x16x16xf32>
    %cst_30 = arith.constant dense<0x7F800000> : vector<1xf32>
    %83 = vector.multi_reduction <minimumf>, %82, %cst_30 [1, 2, 3] : vector<1x3x16x16xf32> to vector<1xf32>
    %84 = vector.shape_cast %83 : vector<1xf32> to vector<1x1x1x1xf32>
    %85 = vector.extract %84[0, 0, 0, 0] : f32 from vector<1x1x1x1xf32>
    %86 = vector.shape_cast %77 : vector<3x16x16xf32> to vector<1x3x16x16xf32>
    %cst_31 = arith.constant dense<0xFF800000> : vector<1xf32>
    %87 = vector.multi_reduction <maximumf>, %86, %cst_31 [1, 2, 3] : vector<1x3x16x16xf32> to vector<1xf32>
    %88 = vector.shape_cast %87 : vector<1xf32> to vector<1x1x1x1xf32>
    %89 = vector.extract %88[0, 0, 0, 0] : f32 from vector<1x1x1x1xf32>
    %90 = tpu.iota {dimensions = array<i32: 0>} : vector<8x128xi32>
    %91 = tpu.iota {dimensions = array<i32: 1>} : vector<8x128xi32>
    %c0_i32 = arith.constant 0 : i32
    %92 = vector.broadcast %c0_i32 : i32 to vector<8x128xi32>
    %93 = arith.cmpi eq, %90, %92 : vector<8x128xi32>
    %c0_i32_32 = arith.constant 0 : i32
    %94 = vector.broadcast %c0_i32_32 : i32 to vector<8x128xi32>
    %95 = arith.cmpi eq, %91, %94 : vector<8x128xi32>
    %96 = arith.andi %93, %95 : vector<8x128xi1>
    %cst_33 = arith.constant 0.000000e+00 : f32
    %97 = vector.broadcast %62 : f32 to vector<8x128xf32>
    %98 = vector.broadcast %cst_33 : f32 to vector<8x128xf32>
    %99 = arith.select %96, %97, %98 : vector<8x128xi1>, vector<8x128xf32>
    %c1_i32 = arith.constant 1 : i32
    %100 = vector.broadcast %c1_i32 : i32 to vector<8x128xi32>
    %101 = arith.cmpi eq, %91, %100 : vector<8x128xi32>
    %102 = arith.andi %93, %101 : vector<8x128xi1>
    %cst_34 = arith.constant 0.000000e+00 : f32
    %103 = vector.broadcast %69 : f32 to vector<8x128xf32>
    %104 = vector.broadcast %cst_34 : f32 to vector<8x128xf32>
    %105 = arith.select %102, %103, %104 : vector<8x128xi1>, vector<8x128xf32>
    %106 = arith.addf %99, %105 : vector<8x128xf32>
    %c2_i32 = arith.constant 2 : i32
    %107 = vector.broadcast %c2_i32 : i32 to vector<8x128xi32>
    %108 = arith.cmpi eq, %91, %107 : vector<8x128xi32>
    %109 = arith.andi %93, %108 : vector<8x128xi1>
    %cst_35 = arith.constant 0.000000e+00 : f32
    %110 = vector.broadcast %85 : f32 to vector<8x128xf32>
    %111 = vector.broadcast %cst_35 : f32 to vector<8x128xf32>
    %112 = arith.select %109, %110, %111 : vector<8x128xi1>, vector<8x128xf32>
    %113 = arith.addf %106, %112 : vector<8x128xf32>
    %c3_i32 = arith.constant 3 : i32
    %114 = vector.broadcast %c3_i32 : i32 to vector<8x128xi32>
    %115 = arith.cmpi eq, %91, %114 : vector<8x128xi32>
    %116 = arith.andi %93, %115 : vector<8x128xi1>
    %cst_36 = arith.constant 0.000000e+00 : f32
    %117 = vector.broadcast %89 : f32 to vector<8x128xf32>
    %118 = vector.broadcast %cst_36 : f32 to vector<8x128xf32>
    %119 = arith.select %116, %117, %118 : vector<8x128xi1>, vector<8x128xf32>
    %120 = arith.addf %113, %119 : vector<8x128xf32>
    %c0_37 = arith.constant 0 : index
    %c0_38 = arith.constant 0 : index
    %c0_39 = arith.constant 0 : index
    %121 = vector.load %arg8[%c0_37, %c0_38, %c0_39] : memref<1x8x128xf32, #tpu.memory_space<vmem>>, vector<1x8x128xf32>
    %122 = vector.shape_cast %121 : vector<1x8x128xf32> to vector<8x128xf32>
    %123 = vector.shape_cast %120 : vector<8x128xf32> to vector<1x8x128xf32>
    tpu.vector_store %arg8[%c0_37, %c0_38, %c0_39], %123 {strides = array<i32>} : memref<1x8x128xf32, #tpu.memory_space<vmem>>, vector<1x8x128xf32>,
    return
  }
  func.func @transform_0(%arg0: i32) -> i32 {
    %c0_i32 = arith.constant 0 : i32
    %c0_i32_0 = arith.constant 0 : i32
    return %c0_i32 : i32
  }
  func.func @transform_1(%arg0: i32) -> (i32, i32) {
    %c0_i32 = arith.constant 0 : i32
    %c0_i32_0 = arith.constant 0 : i32
    %c0_i32_1 = arith.constant 0 : i32
    return %c0_i32, %c0_i32_0 : i32, i32
  }
  func.func @transform_2(%arg0: i32) -> (i32, i32) {
    %c0_i32 = arith.constant 0 : i32
    %c0_i32_0 = arith.constant 0 : i32
    %c0_i32_1 = arith.constant 0 : i32
    return %c0_i32, %c0_i32_0 : i32, i32
  }
  func.func @transform_3(%arg0: i32) -> (i32, i32) {
    %c0_i32 = arith.constant 0 : i32
    %c0_i32_0 = arith.constant 0 : i32
    %c0_i32_1 = arith.constant 0 : i32
    return %c0_i32, %c0_i32_0 : i32, i32
  }
  func.func @transform_4(%arg0: i32) -> (i32, i32) {
    %c0_i32 = arith.constant 0 : i32
    %c0_i32_0 = arith.constant 0 : i32
    %c0_i32_1 = arith.constant 0 : i32
    return %c0_i32, %c0_i32_0 : i32, i32
  }
  func.func @transform_5(%arg0: i32) -> (i32, i32, i32) {
    %c0_i32 = arith.constant 0 : i32
    %c0_i32_0 = arith.constant 0 : i32
    %c0_i32_1 = arith.constant 0 : i32
    return %arg0, %c0_i32, %c0_i32_0 : i32, i32, i32
  }
  func.func @transform_6(%arg0: i32) -> (i32, i32, i32) {
    %c0_i32 = arith.constant 0 : i32
    %c0_i32_0 = arith.constant 0 : i32
    %c0_i32_1 = arith.constant 0 : i32
    return %arg0, %c0_i32, %c0_i32_0 : i32, i32, i32
  }
  func.func @transform_7(%arg0: i32) -> (i32, i32, i32) {
    %c0_i32 = arith.constant 0 : i32
    %c0_i32_0 = arith.constant 0 : i32
    %c0_i32_1 = arith.constant 0 : i32
    return %arg0, %c0_i32, %c0_i32_0 : i32, i32, i32
  }
  func.func @transform_8(%arg0: i32) -> (i32, i32, i32) {
    %c0_i32 = arith.constant 0 : i32
    %c0_i32_0 = arith.constant 0 : i32
    %c0_i32_1 = arith.constant 0 : i32
    return %arg0, %c0_i32, %c0_i32_0 : i32, i32, i32
  }
  func.func @transform_9(%arg0: i32) -> (i32, i32, i32) {
    %c0_i32 = arith.constant 0 : i32
    %c0_i32_0 = arith.constant 0 : i32
    %c0_i32_1 = arith.constant 0 : i32
    return %arg0, %c0_i32, %c0_i32_0 : i32, i32, i32
  }
}

module attributes {stable_mosaic.version = 11 : i64} {
  func.func @_level_kernel(%arg0: i32, %arg1: memref<2xf32, #tpu.memory_space<smem>>, %arg2: memref<8x8xf32, #tpu.memory_space<vmem>>, %arg3: memref<8x128xf32, #tpu.memory_space<vmem>>, %arg4: memref<4x8xf32, #tpu.memory_space<vmem>>, %arg5: memref<8x4xf32, #tpu.memory_space<vmem>>, %arg6: memref<3x8x8xf32, #tpu.memory_space<vmem>>, %arg7: memref<3x8x8xf32, #tpu.memory_space<vmem>>, %arg8: memref<1x8x128xf32, #tpu.memory_space<vmem>>, %arg9: memref<3x4x4xf32, #tpu.memory_space<vmem>>, %arg10: memref<3x4x4xf32, #tpu.memory_space<vmem>>) attributes {dimension_semantics = [#tpu.dimension_semantics<parallel>], iteration_bounds = array<i64: 2>, scalar_prefetch = 0 : i64, scratch_operands = 0 : i64, tpu.core_type = #tpu.core_type<tc>, window_params = [{transform_indices = @transform_0, window_bounds = array<i64: 2>}, {pipeline_mode = #tpu.pipeline_mode<synchronous>, transform_indices = @transform_1, window_bounds = array<i64: 8, 8>}, {pipeline_mode = #tpu.pipeline_mode<synchronous>, transform_indices = @transform_2, window_bounds = array<i64: 8, 128>}, {pipeline_mode = #tpu.pipeline_mode<synchronous>, transform_indices = @transform_3, window_bounds = array<i64: 4, 8>}, {pipeline_mode = #tpu.pipeline_mode<synchronous>, transform_indices = @transform_4, window_bounds = array<i64: 8, 4>}, {transform_indices = @transform_5, window_bounds = array<i64: 3, 8, 8>}, {transform_indices = @transform_6, window_bounds = array<i64: 3, 8, 8>}, {transform_indices = @transform_7, window_bounds = array<i64: 1, 8, 128>}, {transform_indices = @transform_8, window_bounds = array<i64: 3, 4, 4>}, {transform_indices = @transform_9, window_bounds = array<i64: 3, 4, 4>}]} {
    %c0 = arith.constant 0 : index
    %c0_0 = arith.constant 0 : index
    %c0_1 = arith.constant 0 : index
    %0 = vector.load %arg6[%c0, %c0_0, %c0_1] : memref<3x8x8xf32, #tpu.memory_space<vmem>>, vector<3x8x8xf32>
    %c0_2 = arith.constant 0 : index
    %c0_3 = arith.constant 0 : index
    %c0_4 = arith.constant 0 : index
    %1 = vector.load %arg7[%c0_2, %c0_3, %c0_4] : memref<3x8x8xf32, #tpu.memory_space<vmem>>, vector<3x8x8xf32>
    %c0_5 = arith.constant 0 : index
    %2 = memref.load %arg1[%c0_5] : memref<2xf32, #tpu.memory_space<smem>>
    %c1 = arith.constant 1 : index
    %3 = memref.load %arg1[%c1] : memref<2xf32, #tpu.memory_space<smem>>
    %4 = arith.mulf %0, %0 : vector<3x8x8xf32>
    %5 = arith.mulf %1, %1 : vector<3x8x8xf32>
    %6 = arith.mulf %0, %1 : vector<3x8x8xf32>
    %7 = tpu.concatenate %0, %1, %4, %5, %6 in 0 : vector<3x8x8xf32>, vector<3x8x8xf32>, vector<3x8x8xf32>, vector<3x8x8xf32>, vector<3x8x8xf32> -> vector<15x8x8xf32>
    %c0_6 = arith.constant 0 : index
    %c0_7 = arith.constant 0 : index
    %8 = vector.load %arg3[%c0_6, %c0_7] : memref<8x128xf32, #tpu.memory_space<vmem>>, vector<8x128xf32>
    %c0_8 = arith.constant 0 : index
    %c0_9 = arith.constant 0 : index
    %9 = vector.load %arg2[%c0_8, %c0_9] : memref<8x8xf32, #tpu.memory_space<vmem>>, vector<8x8xf32>
    %10 = vector.shape_cast %8 : vector<8x128xf32> to vector<1x8x128xf32>
    %11 = vector.broadcast %10 : vector<1x8x128xf32> to vector<15x8x128xf32>
    %12 = vector.shape_cast %9 : vector<8x8xf32> to vector<1x8x8xf32>
    %13 = vector.broadcast %12 : vector<1x8x8xf32> to vector<15x8x8xf32>
    "tpu.trace_start"() <{level = 10 : i32, message = "nhw,nwv->nhv"}> : () -> ()
    %cst = arith.constant dense<0.000000e+00> : vector<15x8x128xf32>
    %14 = tpu.matmul %7, %11, %cst {dimension_numbers = #tpu.dot_dimension_numbers<[2], [1], [1], [2], [0, 0, 0, 1, 1, 2], [0], [0]>} : vector<15x8x8xf32>, vector<15x8x128xf32>, vector<15x8x128xf32> -> vector<15x8x128xf32>
    "tpu.trace_stop"() : () -> ()
    "tpu.trace_start"() <{level = 10 : i32, message = "noh,nhv->nov"}> : () -> ()
    %cst_10 = arith.constant dense<0.000000e+00> : vector<15x8x128xf32>
    %15 = tpu.matmul %13, %14, %cst_10 {dimension_numbers = #tpu.dot_dimension_numbers<[2], [1], [1], [2], [0, 0, 0, 1, 1, 2], [0], [0]>} : vector<15x8x8xf32>, vector<15x8x128xf32>, vector<15x8x128xf32> -> vector<15x8x128xf32>
    "tpu.trace_stop"() : () -> ()
    %16 = vector.extract_strided_slice %15 {offsets = [0, 0, 0], sizes = [3, 8, 128], strides = [1, 1, 1]} : vector<15x8x128xf32> to vector<3x8x128xf32>
    %17 = vector.extract_strided_slice %15 {offsets = [3, 0, 0], sizes = [3, 8, 128], strides = [1, 1, 1]} : vector<15x8x128xf32> to vector<3x8x128xf32>
    %18 = vector.extract_strided_slice %15 {offsets = [6, 0, 0], sizes = [3, 8, 128], strides = [1, 1, 1]} : vector<15x8x128xf32> to vector<3x8x128xf32>
    %19 = vector.extract_strided_slice %15 {offsets = [9, 0, 0], sizes = [3, 8, 128], strides = [1, 1, 1]} : vector<15x8x128xf32> to vector<3x8x128xf32>
    %20 = vector.extract_strided_slice %15 {offsets = [12, 0, 0], sizes = [3, 8, 128], strides = [1, 1, 1]} : vector<15x8x128xf32> to vector<3x8x128xf32>
    %21 = arith.mulf %16, %16 : vector<3x8x128xf32>
    %22 = arith.mulf %17, %17 : vector<3x8x128xf32>
    %23 = arith.mulf %16, %17 : vector<3x8x128xf32>
    %24 = arith.subf %18, %21 : vector<3x8x128xf32>
    %25 = arith.subf %19, %22 : vector<3x8x128xf32>
    %26 = arith.subf %20, %23 : vector<3x8x128xf32>
    %cst_11 = arith.constant 2.000000e+00 : f32
    %27 = vector.broadcast %cst_11 : f32 to vector<3x8x128xf32>
    %28 = arith.mulf %27, %26 : vector<3x8x128xf32>
    %29 = vector.broadcast %3 : f32 to vector<3x8x128xf32>
    %30 = arith.addf %28, %29 : vector<3x8x128xf32>
    %31 = arith.addf %24, %25 : vector<3x8x128xf32>
    %32 = vector.broadcast %3 : f32 to vector<3x8x128xf32>
    %33 = arith.addf %31, %32 : vector<3x8x128xf32>
    %34 = tpu.reciprocal %33 {approx = true} : vector<3x8x128xf32> -> vector<3x8x128xf32>
    %35 = arith.mulf %30, %34 : vector<3x8x128xf32>
    %cst_12 = arith.constant 2.000000e+00 : f32
    %36 = vector.broadcast %cst_12 : f32 to vector<3x8x128xf32>
    %37 = arith.mulf %36, %23 : vector<3x8x128xf32>
    %38 = vector.broadcast %2 : f32 to vector<3x8x128xf32>
    %39 = arith.addf %37, %38 : vector<3x8x128xf32>
    %40 = arith.mulf %39, %30 : vector<3x8x128xf32>
    %41 = arith.mulf %40, %34 : vector<3x8x128xf32>
    %42 = arith.addf %21, %22 : vector<3x8x128xf32>
    %43 = vector.broadcast %2 : f32 to vector<3x8x128xf32>
    %44 = arith.addf %42, %43 : vector<3x8x128xf32>
    %45 = tpu.reciprocal %44 {approx = true} : vector<3x8x128xf32> -> vector<3x8x128xf32>
    %46 = arith.mulf %41, %45 : vector<3x8x128xf32>
    %47 = tpu.iota {dimensions = array<i32: 0>} : vector<8x128xi32>
    %48 = tpu.iota {dimensions = array<i32: 1>} : vector<8x128xi32>
    %c1_i32 = arith.constant 1 : i32
    %49 = vector.broadcast %c1_i32 : i32 to vector<8x128xi32>
    %50 = arith.cmpi slt, %47, %49 : vector<8x128xi32>
    %c1_i32_13 = arith.constant 1 : i32
    %51 = vector.broadcast %c1_i32_13 : i32 to vector<8x128xi32>
    %52 = arith.cmpi slt, %48, %51 : vector<8x128xi32>
    %53 = arith.andi %50, %52 : vector<8x128xi1>
    %54 = arith.extui %53 : vector<8x128xi1> to vector<8x128xi32>
    %55 = arith.sitofp %54 : vector<8x128xi32> to vector<8x128xf32>
    %56 = vector.shape_cast %55 : vector<8x128xf32> to vector<1x8x128xf32>
    %57 = vector.broadcast %56 : vector<1x8x128xf32> to vector<3x8x128xf32>
    %58 = arith.mulf %46, %57 : vector<3x8x128xf32>
    %59 = vector.shape_cast %58 : vector<3x8x128xf32> to vector<1x3x8x128xf32>
    %cst_14 = arith.constant dense<0.000000e+00> : vector<1xf32>
    %60 = vector.multi_reduction <add>, %59, %cst_14 [1, 2, 3] : vector<1x3x8x128xf32> to vector<1xf32>
    %61 = vector.shape_cast %60 : vector<1xf32> to vector<1x1x1x1xf32>
    %62 = vector.extract %61[0, 0, 0, 0] : f32 from vector<1x1x1x1xf32>
    %63 = vector.shape_cast %55 : vector<8x128xf32> to vector<1x8x128xf32>
    %64 = vector.broadcast %63 : vector<1x8x128xf32> to vector<3x8x128xf32>
    %65 = arith.mulf %35, %64 : vector<3x8x128xf32>
    %66 = vector.shape_cast %65 : vector<3x8x128xf32> to vector<1x3x8x128xf32>
    %cst_15 = arith.constant dense<0.000000e+00> : vector<1xf32>
    %67 = vector.multi_reduction <add>, %66, %cst_15 [1, 2, 3] : vector<1x3x8x128xf32> to vector<1xf32>
    %68 = vector.shape_cast %67 : vector<1xf32> to vector<1x1x1x1xf32>
    %69 = vector.extract %68[0, 0, 0, 0] : f32 from vector<1x1x1x1xf32>
    %c0_16 = arith.constant 0 : index
    %c0_17 = arith.constant 0 : index
    %70 = vector.load %arg4[%c0_16, %c0_17] : memref<4x8xf32, #tpu.memory_space<vmem>>, vector<4x8xf32>
    %c0_18 = arith.constant 0 : index
    %c0_19 = arith.constant 0 : index
    %71 = vector.load %arg5[%c0_18, %c0_19] : memref<8x4xf32, #tpu.memory_space<vmem>>, vector<8x4xf32>
    %72 = vector.shape_cast %70 : vector<4x8xf32> to vector<1x4x8xf32>
    %73 = vector.broadcast %72 : vector<1x4x8xf32> to vector<3x4x8xf32>
    %74 = vector.shape_cast %71 : vector<8x4xf32> to vector<1x8x4xf32>
    %75 = vector.broadcast %74 : vector<1x8x4xf32> to vector<3x8x4xf32>
    "tpu.trace_start"() <{level = 10 : i32, message = "noh,nhw->now"}> : () -> ()
    %cst_20 = arith.constant dense<0.000000e+00> : vector<3x4x8xf32>
    %76 = tpu.matmul %73, %0, %cst_20 {dimension_numbers = #tpu.dot_dimension_numbers<[2], [1], [1], [2], [0, 0, 0, 1, 1, 2], [0], [0]>} : vector<3x4x8xf32>, vector<3x8x8xf32>, vector<3x4x8xf32> -> vector<3x4x8xf32>
    "tpu.trace_stop"() : () -> ()
    "tpu.trace_start"() <{level = 10 : i32, message = "nhw,nwv->nhv"}> : () -> ()
    %cst_21 = arith.constant dense<0.000000e+00> : vector<3x4x4xf32>
    %77 = tpu.matmul %76, %75, %cst_21 {dimension_numbers = #tpu.dot_dimension_numbers<[2], [1], [1], [2], [0, 0, 0, 1, 1, 2], [0], [0]>} : vector<3x4x8xf32>, vector<3x8x4xf32>, vector<3x4x4xf32> -> vector<3x4x4xf32>
    "tpu.trace_stop"() : () -> ()
    "tpu.trace_start"() <{level = 10 : i32, message = "noh,nhw->now"}> : () -> ()
    %cst_22 = arith.constant dense<0.000000e+00> : vector<3x4x8xf32>
    %78 = tpu.matmul %73, %1, %cst_22 {dimension_numbers = #tpu.dot_dimension_numbers<[2], [1], [1], [2], [0, 0, 0, 1, 1, 2], [0], [0]>} : vector<3x4x8xf32>, vector<3x8x8xf32>, vector<3x4x8xf32> -> vector<3x4x8xf32>
    "tpu.trace_stop"() : () -> ()
    "tpu.trace_start"() <{level = 10 : i32, message = "nhw,nwv->nhv"}> : () -> ()
    %cst_23 = arith.constant dense<0.000000e+00> : vector<3x4x4xf32>
    %79 = tpu.matmul %78, %75, %cst_23 {dimension_numbers = #tpu.dot_dimension_numbers<[2], [1], [1], [2], [0, 0, 0, 1, 1, 2], [0], [0]>} : vector<3x4x8xf32>, vector<3x8x4xf32>, vector<3x4x4xf32> -> vector<3x4x4xf32>
    "tpu.trace_stop"() : () -> ()
    %c0_24 = arith.constant 0 : index
    %c0_25 = arith.constant 0 : index
    %c0_26 = arith.constant 0 : index
    %80 = vector.load %arg9[%c0_24, %c0_25, %c0_26] : memref<3x4x4xf32, #tpu.memory_space<vmem>>, vector<3x4x4xf32>
    tpu.vector_store %arg9[%c0_24, %c0_25, %c0_26], %77 {strides = array<i32>} : memref<3x4x4xf32, #tpu.memory_space<vmem>>, vector<3x4x4xf32>,
    %c0_27 = arith.constant 0 : index
    %c0_28 = arith.constant 0 : index
    %c0_29 = arith.constant 0 : index
    %81 = vector.load %arg10[%c0_27, %c0_28, %c0_29] : memref<3x4x4xf32, #tpu.memory_space<vmem>>, vector<3x4x4xf32>
    tpu.vector_store %arg10[%c0_27, %c0_28, %c0_29], %79 {strides = array<i32>} : memref<3x4x4xf32, #tpu.memory_space<vmem>>, vector<3x4x4xf32>,
    %82 = vector.shape_cast %77 : vector<3x4x4xf32> to vector<1x3x4x4xf32>
    %cst_30 = arith.constant dense<0x7F800000> : vector<1xf32>
    %83 = vector.multi_reduction <minimumf>, %82, %cst_30 [1, 2, 3] : vector<1x3x4x4xf32> to vector<1xf32>
    %84 = vector.shape_cast %83 : vector<1xf32> to vector<1x1x1x1xf32>
    %85 = vector.extract %84[0, 0, 0, 0] : f32 from vector<1x1x1x1xf32>
    %86 = vector.shape_cast %77 : vector<3x4x4xf32> to vector<1x3x4x4xf32>
    %cst_31 = arith.constant dense<0xFF800000> : vector<1xf32>
    %87 = vector.multi_reduction <maximumf>, %86, %cst_31 [1, 2, 3] : vector<1x3x4x4xf32> to vector<1xf32>
    %88 = vector.shape_cast %87 : vector<1xf32> to vector<1x1x1x1xf32>
    %89 = vector.extract %88[0, 0, 0, 0] : f32 from vector<1x1x1x1xf32>
    %90 = tpu.iota {dimensions = array<i32: 0>} : vector<8x128xi32>
    %91 = tpu.iota {dimensions = array<i32: 1>} : vector<8x128xi32>
    %c0_i32 = arith.constant 0 : i32
    %92 = vector.broadcast %c0_i32 : i32 to vector<8x128xi32>
    %93 = arith.cmpi eq, %90, %92 : vector<8x128xi32>
    %c0_i32_32 = arith.constant 0 : i32
    %94 = vector.broadcast %c0_i32_32 : i32 to vector<8x128xi32>
    %95 = arith.cmpi eq, %91, %94 : vector<8x128xi32>
    %96 = arith.andi %93, %95 : vector<8x128xi1>
    %cst_33 = arith.constant 0.000000e+00 : f32
    %97 = vector.broadcast %62 : f32 to vector<8x128xf32>
    %98 = vector.broadcast %cst_33 : f32 to vector<8x128xf32>
    %99 = arith.select %96, %97, %98 : vector<8x128xi1>, vector<8x128xf32>
    %c1_i32_34 = arith.constant 1 : i32
    %100 = vector.broadcast %c1_i32_34 : i32 to vector<8x128xi32>
    %101 = arith.cmpi eq, %91, %100 : vector<8x128xi32>
    %102 = arith.andi %93, %101 : vector<8x128xi1>
    %cst_35 = arith.constant 0.000000e+00 : f32
    %103 = vector.broadcast %69 : f32 to vector<8x128xf32>
    %104 = vector.broadcast %cst_35 : f32 to vector<8x128xf32>
    %105 = arith.select %102, %103, %104 : vector<8x128xi1>, vector<8x128xf32>
    %106 = arith.addf %99, %105 : vector<8x128xf32>
    %c2_i32 = arith.constant 2 : i32
    %107 = vector.broadcast %c2_i32 : i32 to vector<8x128xi32>
    %108 = arith.cmpi eq, %91, %107 : vector<8x128xi32>
    %109 = arith.andi %93, %108 : vector<8x128xi1>
    %cst_36 = arith.constant 0.000000e+00 : f32
    %110 = vector.broadcast %85 : f32 to vector<8x128xf32>
    %111 = vector.broadcast %cst_36 : f32 to vector<8x128xf32>
    %112 = arith.select %109, %110, %111 : vector<8x128xi1>, vector<8x128xf32>
    %113 = arith.addf %106, %112 : vector<8x128xf32>
    %c3_i32 = arith.constant 3 : i32
    %114 = vector.broadcast %c3_i32 : i32 to vector<8x128xi32>
    %115 = arith.cmpi eq, %91, %114 : vector<8x128xi32>
    %116 = arith.andi %93, %115 : vector<8x128xi1>
    %cst_37 = arith.constant 0.000000e+00 : f32
    %117 = vector.broadcast %89 : f32 to vector<8x128xf32>
    %118 = vector.broadcast %cst_37 : f32 to vector<8x128xf32>
    %119 = arith.select %116, %117, %118 : vector<8x128xi1>, vector<8x128xf32>
    %120 = arith.addf %113, %119 : vector<8x128xf32>
    %c0_38 = arith.constant 0 : index
    %c0_39 = arith.constant 0 : index
    %c0_40 = arith.constant 0 : index
    %121 = vector.load %arg8[%c0_38, %c0_39, %c0_40] : memref<1x8x128xf32, #tpu.memory_space<vmem>>, vector<1x8x128xf32>
    %122 = vector.shape_cast %121 : vector<1x8x128xf32> to vector<8x128xf32>
    %123 = vector.shape_cast %120 : vector<8x128xf32> to vector<1x8x128xf32>
    tpu.vector_store %arg8[%c0_38, %c0_39, %c0_40], %123 {strides = array<i32>} : memref<1x8x128xf32, #tpu.memory_space<vmem>>, vector<1x8x128xf32>,
    return
  }
  func.func @transform_0(%arg0: i32) -> i32 {
    %c0_i32 = arith.constant 0 : i32
    %c0_i32_0 = arith.constant 0 : i32
    return %c0_i32 : i32
  }
  func.func @transform_1(%arg0: i32) -> (i32, i32) {
    %c0_i32 = arith.constant 0 : i32
    %c0_i32_0 = arith.constant 0 : i32
    %c0_i32_1 = arith.constant 0 : i32
    return %c0_i32, %c0_i32_0 : i32, i32
  }
  func.func @transform_2(%arg0: i32) -> (i32, i32) {
    %c0_i32 = arith.constant 0 : i32
    %c0_i32_0 = arith.constant 0 : i32
    %c0_i32_1 = arith.constant 0 : i32
    return %c0_i32, %c0_i32_0 : i32, i32
  }
  func.func @transform_3(%arg0: i32) -> (i32, i32) {
    %c0_i32 = arith.constant 0 : i32
    %c0_i32_0 = arith.constant 0 : i32
    %c0_i32_1 = arith.constant 0 : i32
    return %c0_i32, %c0_i32_0 : i32, i32
  }
  func.func @transform_4(%arg0: i32) -> (i32, i32) {
    %c0_i32 = arith.constant 0 : i32
    %c0_i32_0 = arith.constant 0 : i32
    %c0_i32_1 = arith.constant 0 : i32
    return %c0_i32, %c0_i32_0 : i32, i32
  }
  func.func @transform_5(%arg0: i32) -> (i32, i32, i32) {
    %c0_i32 = arith.constant 0 : i32
    %c0_i32_0 = arith.constant 0 : i32
    %c0_i32_1 = arith.constant 0 : i32
    return %arg0, %c0_i32, %c0_i32_0 : i32, i32, i32
  }
  func.func @transform_6(%arg0: i32) -> (i32, i32, i32) {
    %c0_i32 = arith.constant 0 : i32
    %c0_i32_0 = arith.constant 0 : i32
    %c0_i32_1 = arith.constant 0 : i32
    return %arg0, %c0_i32, %c0_i32_0 : i32, i32, i32
  }
  func.func @transform_7(%arg0: i32) -> (i32, i32, i32) {
    %c0_i32 = arith.constant 0 : i32
    %c0_i32_0 = arith.constant 0 : i32
    %c0_i32_1 = arith.constant 0 : i32
    return %arg0, %c0_i32, %c0_i32_0 : i32, i32, i32
  }
  func.func @transform_8(%arg0: i32) -> (i32, i32, i32) {
    %c0_i32 = arith.constant 0 : i32
    %c0_i32_0 = arith.constant 0 : i32
    %c0_i32_1 = arith.constant 0 : i32
    return %arg0, %c0_i32, %c0_i32_0 : i32, i32, i32
  }
  func.func @transform_9(%arg0: i32) -> (i32, i32, i32) {
    %c0_i32 = arith.constant 0 : i32
    %c0_i32_0 = arith.constant 0 : i32
    %c0_i32_1 = arith.constant 0 : i32
    return %arg0, %c0_i32, %c0_i32_0 : i32, i32, i32
  }
}

module attributes {stable_mosaic.version = 11 : i64} {
  func.func @_level_kernel(%arg0: i32, %arg1: memref<2xf32, #tpu.memory_space<smem>>, %arg2: memref<8x16xf32, #tpu.memory_space<vmem>>, %arg3: memref<16x128xf32, #tpu.memory_space<vmem>>, %arg4: memref<8x16xf32, #tpu.memory_space<vmem>>, %arg5: memref<16x8xf32, #tpu.memory_space<vmem>>, %arg6: memref<3x16x16xf32, #tpu.memory_space<vmem>>, %arg7: memref<3x16x16xf32, #tpu.memory_space<vmem>>, %arg8: memref<1x8x128xf32, #tpu.memory_space<vmem>>, %arg9: memref<3x8x8xf32, #tpu.memory_space<vmem>>, %arg10: memref<3x8x8xf32, #tpu.memory_space<vmem>>) attributes {dimension_semantics = [#tpu.dimension_semantics<parallel>], iteration_bounds = array<i64: 2>, scalar_prefetch = 0 : i64, scratch_operands = 0 : i64, tpu.core_type = #tpu.core_type<tc>, window_params = [{transform_indices = @transform_0, window_bounds = array<i64: 2>}, {pipeline_mode = #tpu.pipeline_mode<synchronous>, transform_indices = @transform_1, window_bounds = array<i64: 8, 16>}, {pipeline_mode = #tpu.pipeline_mode<synchronous>, transform_indices = @transform_2, window_bounds = array<i64: 16, 128>}, {pipeline_mode = #tpu.pipeline_mode<synchronous>, transform_indices = @transform_3, window_bounds = array<i64: 8, 16>}, {pipeline_mode = #tpu.pipeline_mode<synchronous>, transform_indices = @transform_4, window_bounds = array<i64: 16, 8>}, {transform_indices = @transform_5, window_bounds = array<i64: 3, 16, 16>}, {transform_indices = @transform_6, window_bounds = array<i64: 3, 16, 16>}, {transform_indices = @transform_7, window_bounds = array<i64: 1, 8, 128>}, {transform_indices = @transform_8, window_bounds = array<i64: 3, 8, 8>}, {transform_indices = @transform_9, window_bounds = array<i64: 3, 8, 8>}]} {
    %c0 = arith.constant 0 : index
    %c0_0 = arith.constant 0 : index
    %c0_1 = arith.constant 0 : index
    %0 = vector.load %arg6[%c0, %c0_0, %c0_1] : memref<3x16x16xf32, #tpu.memory_space<vmem>>, vector<3x16x16xf32>
    %c0_2 = arith.constant 0 : index
    %c0_3 = arith.constant 0 : index
    %c0_4 = arith.constant 0 : index
    %1 = vector.load %arg7[%c0_2, %c0_3, %c0_4] : memref<3x16x16xf32, #tpu.memory_space<vmem>>, vector<3x16x16xf32>
    %c0_5 = arith.constant 0 : index
    %2 = memref.load %arg1[%c0_5] : memref<2xf32, #tpu.memory_space<smem>>
    %c1 = arith.constant 1 : index
    %3 = memref.load %arg1[%c1] : memref<2xf32, #tpu.memory_space<smem>>
    %4 = arith.mulf %0, %0 : vector<3x16x16xf32>
    %5 = arith.mulf %1, %1 : vector<3x16x16xf32>
    %6 = arith.mulf %0, %1 : vector<3x16x16xf32>
    %7 = tpu.concatenate %0, %1, %4, %5, %6 in 0 : vector<3x16x16xf32>, vector<3x16x16xf32>, vector<3x16x16xf32>, vector<3x16x16xf32>, vector<3x16x16xf32> -> vector<15x16x16xf32>
    %c0_6 = arith.constant 0 : index
    %c0_7 = arith.constant 0 : index
    %8 = vector.load %arg3[%c0_6, %c0_7] : memref<16x128xf32, #tpu.memory_space<vmem>>, vector<16x128xf32>
    %c0_8 = arith.constant 0 : index
    %c0_9 = arith.constant 0 : index
    %9 = vector.load %arg2[%c0_8, %c0_9] : memref<8x16xf32, #tpu.memory_space<vmem>>, vector<8x16xf32>
    %10 = vector.shape_cast %8 : vector<16x128xf32> to vector<1x16x128xf32>
    %11 = vector.broadcast %10 : vector<1x16x128xf32> to vector<15x16x128xf32>
    %12 = vector.shape_cast %9 : vector<8x16xf32> to vector<1x8x16xf32>
    %13 = vector.broadcast %12 : vector<1x8x16xf32> to vector<15x8x16xf32>
    "tpu.trace_start"() <{level = 10 : i32, message = "nhw,nwv->nhv"}> : () -> ()
    %cst = arith.constant dense<0.000000e+00> : vector<15x16x128xf32>
    %14 = tpu.matmul %7, %11, %cst {dimension_numbers = #tpu.dot_dimension_numbers<[2], [1], [1], [2], [0, 0, 0, 1, 1, 2], [0], [0]>} : vector<15x16x16xf32>, vector<15x16x128xf32>, vector<15x16x128xf32> -> vector<15x16x128xf32>
    "tpu.trace_stop"() : () -> ()
    "tpu.trace_start"() <{level = 10 : i32, message = "noh,nhv->nov"}> : () -> ()
    %cst_10 = arith.constant dense<0.000000e+00> : vector<15x8x128xf32>
    %15 = tpu.matmul %13, %14, %cst_10 {dimension_numbers = #tpu.dot_dimension_numbers<[2], [1], [1], [2], [0, 0, 0, 1, 1, 2], [0], [0]>} : vector<15x8x16xf32>, vector<15x16x128xf32>, vector<15x8x128xf32> -> vector<15x8x128xf32>
    "tpu.trace_stop"() : () -> ()
    %16 = vector.extract_strided_slice %15 {offsets = [0, 0, 0], sizes = [3, 8, 128], strides = [1, 1, 1]} : vector<15x8x128xf32> to vector<3x8x128xf32>
    %17 = vector.extract_strided_slice %15 {offsets = [3, 0, 0], sizes = [3, 8, 128], strides = [1, 1, 1]} : vector<15x8x128xf32> to vector<3x8x128xf32>
    %18 = vector.extract_strided_slice %15 {offsets = [6, 0, 0], sizes = [3, 8, 128], strides = [1, 1, 1]} : vector<15x8x128xf32> to vector<3x8x128xf32>
    %19 = vector.extract_strided_slice %15 {offsets = [9, 0, 0], sizes = [3, 8, 128], strides = [1, 1, 1]} : vector<15x8x128xf32> to vector<3x8x128xf32>
    %20 = vector.extract_strided_slice %15 {offsets = [12, 0, 0], sizes = [3, 8, 128], strides = [1, 1, 1]} : vector<15x8x128xf32> to vector<3x8x128xf32>
    %21 = arith.mulf %16, %16 : vector<3x8x128xf32>
    %22 = arith.mulf %17, %17 : vector<3x8x128xf32>
    %23 = arith.mulf %16, %17 : vector<3x8x128xf32>
    %24 = arith.subf %18, %21 : vector<3x8x128xf32>
    %25 = arith.subf %19, %22 : vector<3x8x128xf32>
    %26 = arith.subf %20, %23 : vector<3x8x128xf32>
    %cst_11 = arith.constant 2.000000e+00 : f32
    %27 = vector.broadcast %cst_11 : f32 to vector<3x8x128xf32>
    %28 = arith.mulf %27, %26 : vector<3x8x128xf32>
    %29 = vector.broadcast %3 : f32 to vector<3x8x128xf32>
    %30 = arith.addf %28, %29 : vector<3x8x128xf32>
    %31 = arith.addf %24, %25 : vector<3x8x128xf32>
    %32 = vector.broadcast %3 : f32 to vector<3x8x128xf32>
    %33 = arith.addf %31, %32 : vector<3x8x128xf32>
    %34 = tpu.reciprocal %33 {approx = true} : vector<3x8x128xf32> -> vector<3x8x128xf32>
    %35 = arith.mulf %30, %34 : vector<3x8x128xf32>
    %cst_12 = arith.constant 2.000000e+00 : f32
    %36 = vector.broadcast %cst_12 : f32 to vector<3x8x128xf32>
    %37 = arith.mulf %36, %23 : vector<3x8x128xf32>
    %38 = vector.broadcast %2 : f32 to vector<3x8x128xf32>
    %39 = arith.addf %37, %38 : vector<3x8x128xf32>
    %40 = arith.mulf %39, %30 : vector<3x8x128xf32>
    %41 = arith.mulf %40, %34 : vector<3x8x128xf32>
    %42 = arith.addf %21, %22 : vector<3x8x128xf32>
    %43 = vector.broadcast %2 : f32 to vector<3x8x128xf32>
    %44 = arith.addf %42, %43 : vector<3x8x128xf32>
    %45 = tpu.reciprocal %44 {approx = true} : vector<3x8x128xf32> -> vector<3x8x128xf32>
    %46 = arith.mulf %41, %45 : vector<3x8x128xf32>
    %47 = tpu.iota {dimensions = array<i32: 0>} : vector<8x128xi32>
    %48 = tpu.iota {dimensions = array<i32: 1>} : vector<8x128xi32>
    %c6_i32 = arith.constant 6 : i32
    %49 = vector.broadcast %c6_i32 : i32 to vector<8x128xi32>
    %50 = arith.cmpi slt, %47, %49 : vector<8x128xi32>
    %c6_i32_13 = arith.constant 6 : i32
    %51 = vector.broadcast %c6_i32_13 : i32 to vector<8x128xi32>
    %52 = arith.cmpi slt, %48, %51 : vector<8x128xi32>
    %53 = arith.andi %50, %52 : vector<8x128xi1>
    %54 = arith.extui %53 : vector<8x128xi1> to vector<8x128xi32>
    %55 = arith.sitofp %54 : vector<8x128xi32> to vector<8x128xf32>
    %56 = vector.shape_cast %55 : vector<8x128xf32> to vector<1x8x128xf32>
    %57 = vector.broadcast %56 : vector<1x8x128xf32> to vector<3x8x128xf32>
    %58 = arith.mulf %46, %57 : vector<3x8x128xf32>
    %59 = vector.shape_cast %58 : vector<3x8x128xf32> to vector<1x3x8x128xf32>
    %cst_14 = arith.constant dense<0.000000e+00> : vector<1xf32>
    %60 = vector.multi_reduction <add>, %59, %cst_14 [1, 2, 3] : vector<1x3x8x128xf32> to vector<1xf32>
    %61 = vector.shape_cast %60 : vector<1xf32> to vector<1x1x1x1xf32>
    %62 = vector.extract %61[0, 0, 0, 0] : f32 from vector<1x1x1x1xf32>
    %63 = vector.shape_cast %55 : vector<8x128xf32> to vector<1x8x128xf32>
    %64 = vector.broadcast %63 : vector<1x8x128xf32> to vector<3x8x128xf32>
    %65 = arith.mulf %35, %64 : vector<3x8x128xf32>
    %66 = vector.shape_cast %65 : vector<3x8x128xf32> to vector<1x3x8x128xf32>
    %cst_15 = arith.constant dense<0.000000e+00> : vector<1xf32>
    %67 = vector.multi_reduction <add>, %66, %cst_15 [1, 2, 3] : vector<1x3x8x128xf32> to vector<1xf32>
    %68 = vector.shape_cast %67 : vector<1xf32> to vector<1x1x1x1xf32>
    %69 = vector.extract %68[0, 0, 0, 0] : f32 from vector<1x1x1x1xf32>
    %c0_16 = arith.constant 0 : index
    %c0_17 = arith.constant 0 : index
    %70 = vector.load %arg4[%c0_16, %c0_17] : memref<8x16xf32, #tpu.memory_space<vmem>>, vector<8x16xf32>
    %c0_18 = arith.constant 0 : index
    %c0_19 = arith.constant 0 : index
    %71 = vector.load %arg5[%c0_18, %c0_19] : memref<16x8xf32, #tpu.memory_space<vmem>>, vector<16x8xf32>
    %72 = vector.shape_cast %70 : vector<8x16xf32> to vector<1x8x16xf32>
    %73 = vector.broadcast %72 : vector<1x8x16xf32> to vector<3x8x16xf32>
    %74 = vector.shape_cast %71 : vector<16x8xf32> to vector<1x16x8xf32>
    %75 = vector.broadcast %74 : vector<1x16x8xf32> to vector<3x16x8xf32>
    "tpu.trace_start"() <{level = 10 : i32, message = "noh,nhw->now"}> : () -> ()
    %cst_20 = arith.constant dense<0.000000e+00> : vector<3x8x16xf32>
    %76 = tpu.matmul %73, %0, %cst_20 {dimension_numbers = #tpu.dot_dimension_numbers<[2], [1], [1], [2], [0, 0, 0, 1, 1, 2], [0], [0]>} : vector<3x8x16xf32>, vector<3x16x16xf32>, vector<3x8x16xf32> -> vector<3x8x16xf32>
    "tpu.trace_stop"() : () -> ()
    "tpu.trace_start"() <{level = 10 : i32, message = "nhw,nwv->nhv"}> : () -> ()
    %cst_21 = arith.constant dense<0.000000e+00> : vector<3x8x8xf32>
    %77 = tpu.matmul %76, %75, %cst_21 {dimension_numbers = #tpu.dot_dimension_numbers<[2], [1], [1], [2], [0, 0, 0, 1, 1, 2], [0], [0]>} : vector<3x8x16xf32>, vector<3x16x8xf32>, vector<3x8x8xf32> -> vector<3x8x8xf32>
    "tpu.trace_stop"() : () -> ()
    "tpu.trace_start"() <{level = 10 : i32, message = "noh,nhw->now"}> : () -> ()
    %cst_22 = arith.constant dense<0.000000e+00> : vector<3x8x16xf32>
    %78 = tpu.matmul %73, %1, %cst_22 {dimension_numbers = #tpu.dot_dimension_numbers<[2], [1], [1], [2], [0, 0, 0, 1, 1, 2], [0], [0]>} : vector<3x8x16xf32>, vector<3x16x16xf32>, vector<3x8x16xf32> -> vector<3x8x16xf32>
    "tpu.trace_stop"() : () -> ()
    "tpu.trace_start"() <{level = 10 : i32, message = "nhw,nwv->nhv"}> : () -> ()
    %cst_23 = arith.constant dense<0.000000e+00> : vector<3x8x8xf32>
    %79 = tpu.matmul %78, %75, %cst_23 {dimension_numbers = #tpu.dot_dimension_numbers<[2], [1], [1], [2], [0, 0, 0, 1, 1, 2], [0], [0]>} : vector<3x8x16xf32>, vector<3x16x8xf32>, vector<3x8x8xf32> -> vector<3x8x8xf32>
    "tpu.trace_stop"() : () -> ()
    %c0_24 = arith.constant 0 : index
    %c0_25 = arith.constant 0 : index
    %c0_26 = arith.constant 0 : index
    %80 = vector.load %arg9[%c0_24, %c0_25, %c0_26] : memref<3x8x8xf32, #tpu.memory_space<vmem>>, vector<3x8x8xf32>
    tpu.vector_store %arg9[%c0_24, %c0_25, %c0_26], %77 {strides = array<i32>} : memref<3x8x8xf32, #tpu.memory_space<vmem>>, vector<3x8x8xf32>,
    %c0_27 = arith.constant 0 : index
    %c0_28 = arith.constant 0 : index
    %c0_29 = arith.constant 0 : index
    %81 = vector.load %arg10[%c0_27, %c0_28, %c0_29] : memref<3x8x8xf32, #tpu.memory_space<vmem>>, vector<3x8x8xf32>
    tpu.vector_store %arg10[%c0_27, %c0_28, %c0_29], %79 {strides = array<i32>} : memref<3x8x8xf32, #tpu.memory_space<vmem>>, vector<3x8x8xf32>,
    %82 = vector.shape_cast %77 : vector<3x8x8xf32> to vector<1x3x8x8xf32>
    %cst_30 = arith.constant dense<0x7F800000> : vector<1xf32>
    %83 = vector.multi_reduction <minimumf>, %82, %cst_30 [1, 2, 3] : vector<1x3x8x8xf32> to vector<1xf32>
    %84 = vector.shape_cast %83 : vector<1xf32> to vector<1x1x1x1xf32>
    %85 = vector.extract %84[0, 0, 0, 0] : f32 from vector<1x1x1x1xf32>
    %86 = vector.shape_cast %77 : vector<3x8x8xf32> to vector<1x3x8x8xf32>
    %cst_31 = arith.constant dense<0xFF800000> : vector<1xf32>
    %87 = vector.multi_reduction <maximumf>, %86, %cst_31 [1, 2, 3] : vector<1x3x8x8xf32> to vector<1xf32>
    %88 = vector.shape_cast %87 : vector<1xf32> to vector<1x1x1x1xf32>
    %89 = vector.extract %88[0, 0, 0, 0] : f32 from vector<1x1x1x1xf32>
    %90 = tpu.iota {dimensions = array<i32: 0>} : vector<8x128xi32>
    %91 = tpu.iota {dimensions = array<i32: 1>} : vector<8x128xi32>
    %c0_i32 = arith.constant 0 : i32
    %92 = vector.broadcast %c0_i32 : i32 to vector<8x128xi32>
    %93 = arith.cmpi eq, %90, %92 : vector<8x128xi32>
    %c0_i32_32 = arith.constant 0 : i32
    %94 = vector.broadcast %c0_i32_32 : i32 to vector<8x128xi32>
    %95 = arith.cmpi eq, %91, %94 : vector<8x128xi32>
    %96 = arith.andi %93, %95 : vector<8x128xi1>
    %cst_33 = arith.constant 0.000000e+00 : f32
    %97 = vector.broadcast %62 : f32 to vector<8x128xf32>
    %98 = vector.broadcast %cst_33 : f32 to vector<8x128xf32>
    %99 = arith.select %96, %97, %98 : vector<8x128xi1>, vector<8x128xf32>
    %c1_i32 = arith.constant 1 : i32
    %100 = vector.broadcast %c1_i32 : i32 to vector<8x128xi32>
    %101 = arith.cmpi eq, %91, %100 : vector<8x128xi32>
    %102 = arith.andi %93, %101 : vector<8x128xi1>
    %cst_34 = arith.constant 0.000000e+00 : f32
    %103 = vector.broadcast %69 : f32 to vector<8x128xf32>
    %104 = vector.broadcast %cst_34 : f32 to vector<8x128xf32>
    %105 = arith.select %102, %103, %104 : vector<8x128xi1>, vector<8x128xf32>
    %106 = arith.addf %99, %105 : vector<8x128xf32>
    %c2_i32 = arith.constant 2 : i32
    %107 = vector.broadcast %c2_i32 : i32 to vector<8x128xi32>
    %108 = arith.cmpi eq, %91, %107 : vector<8x128xi32>
    %109 = arith.andi %93, %108 : vector<8x128xi1>
    %cst_35 = arith.constant 0.000000e+00 : f32
    %110 = vector.broadcast %85 : f32 to vector<8x128xf32>
    %111 = vector.broadcast %cst_35 : f32 to vector<8x128xf32>
    %112 = arith.select %109, %110, %111 : vector<8x128xi1>, vector<8x128xf32>
    %113 = arith.addf %106, %112 : vector<8x128xf32>
    %c3_i32 = arith.constant 3 : i32
    %114 = vector.broadcast %c3_i32 : i32 to vector<8x128xi32>
    %115 = arith.cmpi eq, %91, %114 : vector<8x128xi32>
    %116 = arith.andi %93, %115 : vector<8x128xi1>
    %cst_36 = arith.constant 0.000000e+00 : f32
    %117 = vector.broadcast %89 : f32 to vector<8x128xf32>
    %118 = vector.broadcast %cst_36 : f32 to vector<8x128xf32>
    %119 = arith.select %116, %117, %118 : vector<8x128xi1>, vector<8x128xf32>
    %120 = arith.addf %113, %119 : vector<8x128xf32>
    %c0_37 = arith.constant 0 : index
    %c0_38 = arith.constant 0 : index
    %c0_39 = arith.constant 0 : index
    %121 = vector.load %arg8[%c0_37, %c0_38, %c0_39] : memref<1x8x128xf32, #tpu.memory_space<vmem>>, vector<1x8x128xf32>
    %122 = vector.shape_cast %121 : vector<1x8x128xf32> to vector<8x128xf32>
    %123 = vector.shape_cast %120 : vector<8x128xf32> to vector<1x8x128xf32>
    tpu.vector_store %arg8[%c0_37, %c0_38, %c0_39], %123 {strides = array<i32>} : memref<1x8x128xf32, #tpu.memory_space<vmem>>, vector<1x8x128xf32>,
    return
  }
  func.func @transform_0(%arg0: i32) -> i32 {
    %c0_i32 = arith.constant 0 : i32
    %c0_i32_0 = arith.constant 0 : i32
    return %c0_i32 : i32
  }
  func.func @transform_1(%arg0: i32) -> (i32, i32) {
    %c0_i32 = arith.constant 0 : i32
    %c0_i32_0 = arith.constant 0 : i32
    %c0_i32_1 = arith.constant 0 : i32
    return %c0_i32, %c0_i32_0 : i32, i32
  }
  func.func @transform_2(%arg0: i32) -> (i32, i32) {
    %c0_i32 = arith.constant 0 : i32
    %c0_i32_0 = arith.constant 0 : i32
    %c0_i32_1 = arith.constant 0 : i32
    return %c0_i32, %c0_i32_0 : i32, i32
  }
  func.func @transform_3(%arg0: i32) -> (i32, i32) {
    %c0_i32 = arith.constant 0 : i32
    %c0_i32_0 = arith.constant 0 : i32
    %c0_i32_1 = arith.constant 0 : i32
    return %c0_i32, %c0_i32_0 : i32, i32
  }
  func.func @transform_4(%arg0: i32) -> (i32, i32) {
    %c0_i32 = arith.constant 0 : i32
    %c0_i32_0 = arith.constant 0 : i32
    %c0_i32_1 = arith.constant 0 : i32
    return %c0_i32, %c0_i32_0 : i32, i32
  }
  func.func @transform_5(%arg0: i32) -> (i32, i32, i32) {
    %c0_i32 = arith.constant 0 : i32
    %c0_i32_0 = arith.constant 0 : i32
    %c0_i32_1 = arith.constant 0 : i32
    return %arg0, %c0_i32, %c0_i32_0 : i32, i32, i32
  }
  func.func @transform_6(%arg0: i32) -> (i32, i32, i32) {
    %c0_i32 = arith.constant 0 : i32
    %c0_i32_0 = arith.constant 0 : i32
    %c0_i32_1 = arith.constant 0 : i32
    return %arg0, %c0_i32, %c0_i32_0 : i32, i32, i32
  }
  func.func @transform_7(%arg0: i32) -> (i32, i32, i32) {
    %c0_i32 = arith.constant 0 : i32
    %c0_i32_0 = arith.constant 0 : i32
    %c0_i32_1 = arith.constant 0 : i32
    return %arg0, %c0_i32, %c0_i32_0 : i32, i32, i32
  }
  func.func @transform_8(%arg0: i32) -> (i32, i32, i32) {
    %c0_i32 = arith.constant 0 : i32
    %c0_i32_0 = arith.constant 0 : i32
    %c0_i32_1 = arith.constant 0 : i32
    return %arg0, %c0_i32, %c0_i32_0 : i32, i32, i32
  }
  func.func @transform_9(%arg0: i32) -> (i32, i32, i32) {
    %c0_i32 = arith.constant 0 : i32
    %c0_i32_0 = arith.constant 0 : i32
    %c0_i32_1 = arith.constant 0 : i32
    return %arg0, %c0_i32, %c0_i32_0 : i32, i32, i32
  }
}

module attributes {stable_mosaic.version = 11 : i64} {
  func.func @_level_kernel(%arg0: i32, %arg1: memref<2xf32, #tpu.memory_space<smem>>, %arg2: memref<8x4xf32, #tpu.memory_space<vmem>>, %arg3: memref<4x128xf32, #tpu.memory_space<vmem>>, %arg4: memref<2x4xf32, #tpu.memory_space<vmem>>, %arg5: memref<4x2xf32, #tpu.memory_space<vmem>>, %arg6: memref<3x4x4xf32, #tpu.memory_space<vmem>>, %arg7: memref<3x4x4xf32, #tpu.memory_space<vmem>>, %arg8: memref<1x8x128xf32, #tpu.memory_space<vmem>>, %arg9: memref<3x2x2xf32, #tpu.memory_space<vmem>>, %arg10: memref<3x2x2xf32, #tpu.memory_space<vmem>>) attributes {dimension_semantics = [#tpu.dimension_semantics<parallel>], iteration_bounds = array<i64: 2>, scalar_prefetch = 0 : i64, scratch_operands = 0 : i64, tpu.core_type = #tpu.core_type<tc>, window_params = [{transform_indices = @transform_0, window_bounds = array<i64: 2>}, {pipeline_mode = #tpu.pipeline_mode<synchronous>, transform_indices = @transform_1, window_bounds = array<i64: 8, 4>}, {pipeline_mode = #tpu.pipeline_mode<synchronous>, transform_indices = @transform_2, window_bounds = array<i64: 4, 128>}, {pipeline_mode = #tpu.pipeline_mode<synchronous>, transform_indices = @transform_3, window_bounds = array<i64: 2, 4>}, {pipeline_mode = #tpu.pipeline_mode<synchronous>, transform_indices = @transform_4, window_bounds = array<i64: 4, 2>}, {transform_indices = @transform_5, window_bounds = array<i64: 3, 4, 4>}, {transform_indices = @transform_6, window_bounds = array<i64: 3, 4, 4>}, {transform_indices = @transform_7, window_bounds = array<i64: 1, 8, 128>}, {transform_indices = @transform_8, window_bounds = array<i64: 3, 2, 2>}, {transform_indices = @transform_9, window_bounds = array<i64: 3, 2, 2>}]} {
    %c0 = arith.constant 0 : index
    %c0_0 = arith.constant 0 : index
    %c0_1 = arith.constant 0 : index
    %0 = vector.load %arg6[%c0, %c0_0, %c0_1] : memref<3x4x4xf32, #tpu.memory_space<vmem>>, vector<3x4x4xf32>
    %c0_2 = arith.constant 0 : index
    %c0_3 = arith.constant 0 : index
    %c0_4 = arith.constant 0 : index
    %1 = vector.load %arg7[%c0_2, %c0_3, %c0_4] : memref<3x4x4xf32, #tpu.memory_space<vmem>>, vector<3x4x4xf32>
    %c0_5 = arith.constant 0 : index
    %2 = memref.load %arg1[%c0_5] : memref<2xf32, #tpu.memory_space<smem>>
    %c1 = arith.constant 1 : index
    %3 = memref.load %arg1[%c1] : memref<2xf32, #tpu.memory_space<smem>>
    %4 = arith.mulf %0, %0 : vector<3x4x4xf32>
    %5 = arith.mulf %1, %1 : vector<3x4x4xf32>
    %6 = arith.mulf %0, %1 : vector<3x4x4xf32>
    %7 = tpu.concatenate %0, %1, %4, %5, %6 in 0 : vector<3x4x4xf32>, vector<3x4x4xf32>, vector<3x4x4xf32>, vector<3x4x4xf32>, vector<3x4x4xf32> -> vector<15x4x4xf32>
    %c0_6 = arith.constant 0 : index
    %c0_7 = arith.constant 0 : index
    %8 = vector.load %arg3[%c0_6, %c0_7] : memref<4x128xf32, #tpu.memory_space<vmem>>, vector<4x128xf32>
    %c0_8 = arith.constant 0 : index
    %c0_9 = arith.constant 0 : index
    %9 = vector.load %arg2[%c0_8, %c0_9] : memref<8x4xf32, #tpu.memory_space<vmem>>, vector<8x4xf32>
    %10 = vector.shape_cast %8 : vector<4x128xf32> to vector<1x4x128xf32>
    %11 = vector.broadcast %10 : vector<1x4x128xf32> to vector<15x4x128xf32>
    %12 = vector.shape_cast %9 : vector<8x4xf32> to vector<1x8x4xf32>
    %13 = vector.broadcast %12 : vector<1x8x4xf32> to vector<15x8x4xf32>
    "tpu.trace_start"() <{level = 10 : i32, message = "nhw,nwv->nhv"}> : () -> ()
    %cst = arith.constant dense<0.000000e+00> : vector<15x4x128xf32>
    %14 = tpu.matmul %7, %11, %cst {dimension_numbers = #tpu.dot_dimension_numbers<[2], [1], [1], [2], [0, 0, 0, 1, 1, 2], [0], [0]>} : vector<15x4x4xf32>, vector<15x4x128xf32>, vector<15x4x128xf32> -> vector<15x4x128xf32>
    "tpu.trace_stop"() : () -> ()
    "tpu.trace_start"() <{level = 10 : i32, message = "noh,nhv->nov"}> : () -> ()
    %cst_10 = arith.constant dense<0.000000e+00> : vector<15x8x128xf32>
    %15 = tpu.matmul %13, %14, %cst_10 {dimension_numbers = #tpu.dot_dimension_numbers<[2], [1], [1], [2], [0, 0, 0, 1, 1, 2], [0], [0]>} : vector<15x8x4xf32>, vector<15x4x128xf32>, vector<15x8x128xf32> -> vector<15x8x128xf32>
    "tpu.trace_stop"() : () -> ()
    %16 = vector.extract_strided_slice %15 {offsets = [0, 0, 0], sizes = [3, 8, 128], strides = [1, 1, 1]} : vector<15x8x128xf32> to vector<3x8x128xf32>
    %17 = vector.extract_strided_slice %15 {offsets = [3, 0, 0], sizes = [3, 8, 128], strides = [1, 1, 1]} : vector<15x8x128xf32> to vector<3x8x128xf32>
    %18 = vector.extract_strided_slice %15 {offsets = [6, 0, 0], sizes = [3, 8, 128], strides = [1, 1, 1]} : vector<15x8x128xf32> to vector<3x8x128xf32>
    %19 = vector.extract_strided_slice %15 {offsets = [9, 0, 0], sizes = [3, 8, 128], strides = [1, 1, 1]} : vector<15x8x128xf32> to vector<3x8x128xf32>
    %20 = vector.extract_strided_slice %15 {offsets = [12, 0, 0], sizes = [3, 8, 128], strides = [1, 1, 1]} : vector<15x8x128xf32> to vector<3x8x128xf32>
    %21 = arith.mulf %16, %16 : vector<3x8x128xf32>
    %22 = arith.mulf %17, %17 : vector<3x8x128xf32>
    %23 = arith.mulf %16, %17 : vector<3x8x128xf32>
    %24 = arith.subf %18, %21 : vector<3x8x128xf32>
    %25 = arith.subf %19, %22 : vector<3x8x128xf32>
    %26 = arith.subf %20, %23 : vector<3x8x128xf32>
    %cst_11 = arith.constant 2.000000e+00 : f32
    %27 = vector.broadcast %cst_11 : f32 to vector<3x8x128xf32>
    %28 = arith.mulf %27, %26 : vector<3x8x128xf32>
    %29 = vector.broadcast %3 : f32 to vector<3x8x128xf32>
    %30 = arith.addf %28, %29 : vector<3x8x128xf32>
    %31 = arith.addf %24, %25 : vector<3x8x128xf32>
    %32 = vector.broadcast %3 : f32 to vector<3x8x128xf32>
    %33 = arith.addf %31, %32 : vector<3x8x128xf32>
    %34 = tpu.reciprocal %33 {approx = true} : vector<3x8x128xf32> -> vector<3x8x128xf32>
    %35 = arith.mulf %30, %34 : vector<3x8x128xf32>
    %cst_12 = arith.constant 2.000000e+00 : f32
    %36 = vector.broadcast %cst_12 : f32 to vector<3x8x128xf32>
    %37 = arith.mulf %36, %23 : vector<3x8x128xf32>
    %38 = vector.broadcast %2 : f32 to vector<3x8x128xf32>
    %39 = arith.addf %37, %38 : vector<3x8x128xf32>
    %40 = arith.mulf %39, %30 : vector<3x8x128xf32>
    %41 = arith.mulf %40, %34 : vector<3x8x128xf32>
    %42 = arith.addf %21, %22 : vector<3x8x128xf32>
    %43 = vector.broadcast %2 : f32 to vector<3x8x128xf32>
    %44 = arith.addf %42, %43 : vector<3x8x128xf32>
    %45 = tpu.reciprocal %44 {approx = true} : vector<3x8x128xf32> -> vector<3x8x128xf32>
    %46 = arith.mulf %41, %45 : vector<3x8x128xf32>
    %47 = tpu.iota {dimensions = array<i32: 0>} : vector<8x128xi32>
    %48 = tpu.iota {dimensions = array<i32: 1>} : vector<8x128xi32>
    %c1_i32 = arith.constant 1 : i32
    %49 = vector.broadcast %c1_i32 : i32 to vector<8x128xi32>
    %50 = arith.cmpi slt, %47, %49 : vector<8x128xi32>
    %c1_i32_13 = arith.constant 1 : i32
    %51 = vector.broadcast %c1_i32_13 : i32 to vector<8x128xi32>
    %52 = arith.cmpi slt, %48, %51 : vector<8x128xi32>
    %53 = arith.andi %50, %52 : vector<8x128xi1>
    %54 = arith.extui %53 : vector<8x128xi1> to vector<8x128xi32>
    %55 = arith.sitofp %54 : vector<8x128xi32> to vector<8x128xf32>
    %56 = vector.shape_cast %55 : vector<8x128xf32> to vector<1x8x128xf32>
    %57 = vector.broadcast %56 : vector<1x8x128xf32> to vector<3x8x128xf32>
    %58 = arith.mulf %46, %57 : vector<3x8x128xf32>
    %59 = vector.shape_cast %58 : vector<3x8x128xf32> to vector<1x3x8x128xf32>
    %cst_14 = arith.constant dense<0.000000e+00> : vector<1xf32>
    %60 = vector.multi_reduction <add>, %59, %cst_14 [1, 2, 3] : vector<1x3x8x128xf32> to vector<1xf32>
    %61 = vector.shape_cast %60 : vector<1xf32> to vector<1x1x1x1xf32>
    %62 = vector.extract %61[0, 0, 0, 0] : f32 from vector<1x1x1x1xf32>
    %63 = vector.shape_cast %55 : vector<8x128xf32> to vector<1x8x128xf32>
    %64 = vector.broadcast %63 : vector<1x8x128xf32> to vector<3x8x128xf32>
    %65 = arith.mulf %35, %64 : vector<3x8x128xf32>
    %66 = vector.shape_cast %65 : vector<3x8x128xf32> to vector<1x3x8x128xf32>
    %cst_15 = arith.constant dense<0.000000e+00> : vector<1xf32>
    %67 = vector.multi_reduction <add>, %66, %cst_15 [1, 2, 3] : vector<1x3x8x128xf32> to vector<1xf32>
    %68 = vector.shape_cast %67 : vector<1xf32> to vector<1x1x1x1xf32>
    %69 = vector.extract %68[0, 0, 0, 0] : f32 from vector<1x1x1x1xf32>
    %c0_16 = arith.constant 0 : index
    %c0_17 = arith.constant 0 : index
    %70 = vector.load %arg4[%c0_16, %c0_17] : memref<2x4xf32, #tpu.memory_space<vmem>>, vector<2x4xf32>
    %c0_18 = arith.constant 0 : index
    %c0_19 = arith.constant 0 : index
    %71 = vector.load %arg5[%c0_18, %c0_19] : memref<4x2xf32, #tpu.memory_space<vmem>>, vector<4x2xf32>
    %72 = vector.shape_cast %70 : vector<2x4xf32> to vector<1x2x4xf32>
    %73 = vector.broadcast %72 : vector<1x2x4xf32> to vector<3x2x4xf32>
    %74 = vector.shape_cast %71 : vector<4x2xf32> to vector<1x4x2xf32>
    %75 = vector.broadcast %74 : vector<1x4x2xf32> to vector<3x4x2xf32>
    "tpu.trace_start"() <{level = 10 : i32, message = "noh,nhw->now"}> : () -> ()
    %cst_20 = arith.constant dense<0.000000e+00> : vector<3x2x4xf32>
    %76 = tpu.matmul %73, %0, %cst_20 {dimension_numbers = #tpu.dot_dimension_numbers<[2], [1], [1], [2], [0, 0, 0, 1, 1, 2], [0], [0]>} : vector<3x2x4xf32>, vector<3x4x4xf32>, vector<3x2x4xf32> -> vector<3x2x4xf32>
    "tpu.trace_stop"() : () -> ()
    "tpu.trace_start"() <{level = 10 : i32, message = "nhw,nwv->nhv"}> : () -> ()
    %cst_21 = arith.constant dense<0.000000e+00> : vector<3x2x2xf32>
    %77 = tpu.matmul %76, %75, %cst_21 {dimension_numbers = #tpu.dot_dimension_numbers<[2], [1], [1], [2], [0, 0, 0, 1, 1, 2], [0], [0]>} : vector<3x2x4xf32>, vector<3x4x2xf32>, vector<3x2x2xf32> -> vector<3x2x2xf32>
    "tpu.trace_stop"() : () -> ()
    "tpu.trace_start"() <{level = 10 : i32, message = "noh,nhw->now"}> : () -> ()
    %cst_22 = arith.constant dense<0.000000e+00> : vector<3x2x4xf32>
    %78 = tpu.matmul %73, %1, %cst_22 {dimension_numbers = #tpu.dot_dimension_numbers<[2], [1], [1], [2], [0, 0, 0, 1, 1, 2], [0], [0]>} : vector<3x2x4xf32>, vector<3x4x4xf32>, vector<3x2x4xf32> -> vector<3x2x4xf32>
    "tpu.trace_stop"() : () -> ()
    "tpu.trace_start"() <{level = 10 : i32, message = "nhw,nwv->nhv"}> : () -> ()
    %cst_23 = arith.constant dense<0.000000e+00> : vector<3x2x2xf32>
    %79 = tpu.matmul %78, %75, %cst_23 {dimension_numbers = #tpu.dot_dimension_numbers<[2], [1], [1], [2], [0, 0, 0, 1, 1, 2], [0], [0]>} : vector<3x2x4xf32>, vector<3x4x2xf32>, vector<3x2x2xf32> -> vector<3x2x2xf32>
    "tpu.trace_stop"() : () -> ()
    %c0_24 = arith.constant 0 : index
    %c0_25 = arith.constant 0 : index
    %c0_26 = arith.constant 0 : index
    %80 = vector.load %arg9[%c0_24, %c0_25, %c0_26] : memref<3x2x2xf32, #tpu.memory_space<vmem>>, vector<3x2x2xf32>
    tpu.vector_store %arg9[%c0_24, %c0_25, %c0_26], %77 {strides = array<i32>} : memref<3x2x2xf32, #tpu.memory_space<vmem>>, vector<3x2x2xf32>,
    %c0_27 = arith.constant 0 : index
    %c0_28 = arith.constant 0 : index
    %c0_29 = arith.constant 0 : index
    %81 = vector.load %arg10[%c0_27, %c0_28, %c0_29] : memref<3x2x2xf32, #tpu.memory_space<vmem>>, vector<3x2x2xf32>
    tpu.vector_store %arg10[%c0_27, %c0_28, %c0_29], %79 {strides = array<i32>} : memref<3x2x2xf32, #tpu.memory_space<vmem>>, vector<3x2x2xf32>,
    %82 = vector.shape_cast %77 : vector<3x2x2xf32> to vector<1x3x2x2xf32>
    %cst_30 = arith.constant dense<0x7F800000> : vector<1xf32>
    %83 = vector.multi_reduction <minimumf>, %82, %cst_30 [1, 2, 3] : vector<1x3x2x2xf32> to vector<1xf32>
    %84 = vector.shape_cast %83 : vector<1xf32> to vector<1x1x1x1xf32>
    %85 = vector.extract %84[0, 0, 0, 0] : f32 from vector<1x1x1x1xf32>
    %86 = vector.shape_cast %77 : vector<3x2x2xf32> to vector<1x3x2x2xf32>
    %cst_31 = arith.constant dense<0xFF800000> : vector<1xf32>
    %87 = vector.multi_reduction <maximumf>, %86, %cst_31 [1, 2, 3] : vector<1x3x2x2xf32> to vector<1xf32>
    %88 = vector.shape_cast %87 : vector<1xf32> to vector<1x1x1x1xf32>
    %89 = vector.extract %88[0, 0, 0, 0] : f32 from vector<1x1x1x1xf32>
    %90 = tpu.iota {dimensions = array<i32: 0>} : vector<8x128xi32>
    %91 = tpu.iota {dimensions = array<i32: 1>} : vector<8x128xi32>
    %c0_i32 = arith.constant 0 : i32
    %92 = vector.broadcast %c0_i32 : i32 to vector<8x128xi32>
    %93 = arith.cmpi eq, %90, %92 : vector<8x128xi32>
    %c0_i32_32 = arith.constant 0 : i32
    %94 = vector.broadcast %c0_i32_32 : i32 to vector<8x128xi32>
    %95 = arith.cmpi eq, %91, %94 : vector<8x128xi32>
    %96 = arith.andi %93, %95 : vector<8x128xi1>
    %cst_33 = arith.constant 0.000000e+00 : f32
    %97 = vector.broadcast %62 : f32 to vector<8x128xf32>
    %98 = vector.broadcast %cst_33 : f32 to vector<8x128xf32>
    %99 = arith.select %96, %97, %98 : vector<8x128xi1>, vector<8x128xf32>
    %c1_i32_34 = arith.constant 1 : i32
    %100 = vector.broadcast %c1_i32_34 : i32 to vector<8x128xi32>
    %101 = arith.cmpi eq, %91, %100 : vector<8x128xi32>
    %102 = arith.andi %93, %101 : vector<8x128xi1>
    %cst_35 = arith.constant 0.000000e+00 : f32
    %103 = vector.broadcast %69 : f32 to vector<8x128xf32>
    %104 = vector.broadcast %cst_35 : f32 to vector<8x128xf32>
    %105 = arith.select %102, %103, %104 : vector<8x128xi1>, vector<8x128xf32>
    %106 = arith.addf %99, %105 : vector<8x128xf32>
    %c2_i32 = arith.constant 2 : i32
    %107 = vector.broadcast %c2_i32 : i32 to vector<8x128xi32>
    %108 = arith.cmpi eq, %91, %107 : vector<8x128xi32>
    %109 = arith.andi %93, %108 : vector<8x128xi1>
    %cst_36 = arith.constant 0.000000e+00 : f32
    %110 = vector.broadcast %85 : f32 to vector<8x128xf32>
    %111 = vector.broadcast %cst_36 : f32 to vector<8x128xf32>
    %112 = arith.select %109, %110, %111 : vector<8x128xi1>, vector<8x128xf32>
    %113 = arith.addf %106, %112 : vector<8x128xf32>
    %c3_i32 = arith.constant 3 : i32
    %114 = vector.broadcast %c3_i32 : i32 to vector<8x128xi32>
    %115 = arith.cmpi eq, %91, %114 : vector<8x128xi32>
    %116 = arith.andi %93, %115 : vector<8x128xi1>
    %cst_37 = arith.constant 0.000000e+00 : f32
    %117 = vector.broadcast %89 : f32 to vector<8x128xf32>
    %118 = vector.broadcast %cst_37 : f32 to vector<8x128xf32>
    %119 = arith.select %116, %117, %118 : vector<8x128xi1>, vector<8x128xf32>
    %120 = arith.addf %113, %119 : vector<8x128xf32>
    %c0_38 = arith.constant 0 : index
    %c0_39 = arith.constant 0 : index
    %c0_40 = arith.constant 0 : index
    %121 = vector.load %arg8[%c0_38, %c0_39, %c0_40] : memref<1x8x128xf32, #tpu.memory_space<vmem>>, vector<1x8x128xf32>
    %122 = vector.shape_cast %121 : vector<1x8x128xf32> to vector<8x128xf32>
    %123 = vector.shape_cast %120 : vector<8x128xf32> to vector<1x8x128xf32>
    tpu.vector_store %arg8[%c0_38, %c0_39, %c0_40], %123 {strides = array<i32>} : memref<1x8x128xf32, #tpu.memory_space<vmem>>, vector<1x8x128xf32>,
    return
  }
  func.func @transform_0(%arg0: i32) -> i32 {
    %c0_i32 = arith.constant 0 : i32
    %c0_i32_0 = arith.constant 0 : i32
    return %c0_i32 : i32
  }
  func.func @transform_1(%arg0: i32) -> (i32, i32) {
    %c0_i32 = arith.constant 0 : i32
    %c0_i32_0 = arith.constant 0 : i32
    %c0_i32_1 = arith.constant 0 : i32
    return %c0_i32, %c0_i32_0 : i32, i32
  }
  func.func @transform_2(%arg0: i32) -> (i32, i32) {
    %c0_i32 = arith.constant 0 : i32
    %c0_i32_0 = arith.constant 0 : i32
    %c0_i32_1 = arith.constant 0 : i32
    return %c0_i32, %c0_i32_0 : i32, i32
  }
  func.func @transform_3(%arg0: i32) -> (i32, i32) {
    %c0_i32 = arith.constant 0 : i32
    %c0_i32_0 = arith.constant 0 : i32
    %c0_i32_1 = arith.constant 0 : i32
    return %c0_i32, %c0_i32_0 : i32, i32
  }
  func.func @transform_4(%arg0: i32) -> (i32, i32) {
    %c0_i32 = arith.constant 0 : i32
    %c0_i32_0 = arith.constant 0 : i32
    %c0_i32_1 = arith.constant 0 : i32
    return %c0_i32, %c0_i32_0 : i32, i32
  }
  func.func @transform_5(%arg0: i32) -> (i32, i32, i32) {
    %c0_i32 = arith.constant 0 : i32
    %c0_i32_0 = arith.constant 0 : i32
    %c0_i32_1 = arith.constant 0 : i32
    return %arg0, %c0_i32, %c0_i32_0 : i32, i32, i32
  }
  func.func @transform_6(%arg0: i32) -> (i32, i32, i32) {
    %c0_i32 = arith.constant 0 : i32
    %c0_i32_0 = arith.constant 0 : i32
    %c0_i32_1 = arith.constant 0 : i32
    return %arg0, %c0_i32, %c0_i32_0 : i32, i32, i32
  }
  func.func @transform_7(%arg0: i32) -> (i32, i32, i32) {
    %c0_i32 = arith.constant 0 : i32
    %c0_i32_0 = arith.constant 0 : i32
    %c0_i32_1 = arith.constant 0 : i32
    return %arg0, %c0_i32, %c0_i32_0 : i32, i32, i32
  }
  func.func @transform_8(%arg0: i32) -> (i32, i32, i32) {
    %c0_i32 = arith.constant 0 : i32
    %c0_i32_0 = arith.constant 0 : i32
    %c0_i32_1 = arith.constant 0 : i32
    return %arg0, %c0_i32, %c0_i32_0 : i32, i32, i32
  }
  func.func @transform_9(%arg0: i32) -> (i32, i32, i32) {
    %c0_i32 = arith.constant 0 : i32
    %c0_i32_0 = arith.constant 0 : i32
    %c0_i32_1 = arith.constant 0 : i32
    return %arg0, %c0_i32, %c0_i32_0 : i32, i32, i32
  }
}

module attributes {stable_mosaic.version = 11 : i64} {
  func.func @_level_kernel(%arg0: i32, %arg1: memref<2xf32, #tpu.memory_space<smem>>, %arg2: memref<8x2xf32, #tpu.memory_space<vmem>>, %arg3: memref<2x128xf32, #tpu.memory_space<vmem>>, %arg4: memref<1x2xf32, #tpu.memory_space<vmem>>, %arg5: memref<2x1xf32, #tpu.memory_space<vmem>>, %arg6: memref<3x2x2xf32, #tpu.memory_space<vmem>>, %arg7: memref<3x2x2xf32, #tpu.memory_space<vmem>>, %arg8: memref<1x8x128xf32, #tpu.memory_space<vmem>>, %arg9: memref<3x1x1xf32, #tpu.memory_space<vmem>>, %arg10: memref<3x1x1xf32, #tpu.memory_space<vmem>>) attributes {dimension_semantics = [#tpu.dimension_semantics<parallel>], iteration_bounds = array<i64: 2>, scalar_prefetch = 0 : i64, scratch_operands = 0 : i64, tpu.core_type = #tpu.core_type<tc>, window_params = [{transform_indices = @transform_0, window_bounds = array<i64: 2>}, {pipeline_mode = #tpu.pipeline_mode<synchronous>, transform_indices = @transform_1, window_bounds = array<i64: 8, 2>}, {pipeline_mode = #tpu.pipeline_mode<synchronous>, transform_indices = @transform_2, window_bounds = array<i64: 2, 128>}, {pipeline_mode = #tpu.pipeline_mode<synchronous>, transform_indices = @transform_3, window_bounds = array<i64: 1, 2>}, {pipeline_mode = #tpu.pipeline_mode<synchronous>, transform_indices = @transform_4, window_bounds = array<i64: 2, 1>}, {transform_indices = @transform_5, window_bounds = array<i64: 3, 2, 2>}, {transform_indices = @transform_6, window_bounds = array<i64: 3, 2, 2>}, {transform_indices = @transform_7, window_bounds = array<i64: 1, 8, 128>}, {transform_indices = @transform_8, window_bounds = array<i64: 3, 1, 1>}, {transform_indices = @transform_9, window_bounds = array<i64: 3, 1, 1>}]} {
    %c0 = arith.constant 0 : index
    %c0_0 = arith.constant 0 : index
    %c0_1 = arith.constant 0 : index
    %0 = vector.load %arg6[%c0, %c0_0, %c0_1] : memref<3x2x2xf32, #tpu.memory_space<vmem>>, vector<3x2x2xf32>
    %c0_2 = arith.constant 0 : index
    %c0_3 = arith.constant 0 : index
    %c0_4 = arith.constant 0 : index
    %1 = vector.load %arg7[%c0_2, %c0_3, %c0_4] : memref<3x2x2xf32, #tpu.memory_space<vmem>>, vector<3x2x2xf32>
    %c0_5 = arith.constant 0 : index
    %2 = memref.load %arg1[%c0_5] : memref<2xf32, #tpu.memory_space<smem>>
    %c1 = arith.constant 1 : index
    %3 = memref.load %arg1[%c1] : memref<2xf32, #tpu.memory_space<smem>>
    %4 = arith.mulf %0, %0 : vector<3x2x2xf32>
    %5 = arith.mulf %1, %1 : vector<3x2x2xf32>
    %6 = arith.mulf %0, %1 : vector<3x2x2xf32>
    %7 = tpu.concatenate %0, %1, %4, %5, %6 in 0 : vector<3x2x2xf32>, vector<3x2x2xf32>, vector<3x2x2xf32>, vector<3x2x2xf32>, vector<3x2x2xf32> -> vector<15x2x2xf32>
    %c0_6 = arith.constant 0 : index
    %c0_7 = arith.constant 0 : index
    %8 = vector.load %arg3[%c0_6, %c0_7] : memref<2x128xf32, #tpu.memory_space<vmem>>, vector<2x128xf32>
    %c0_8 = arith.constant 0 : index
    %c0_9 = arith.constant 0 : index
    %9 = vector.load %arg2[%c0_8, %c0_9] : memref<8x2xf32, #tpu.memory_space<vmem>>, vector<8x2xf32>
    %10 = vector.shape_cast %8 : vector<2x128xf32> to vector<1x2x128xf32>
    %11 = vector.broadcast %10 : vector<1x2x128xf32> to vector<15x2x128xf32>
    %12 = vector.shape_cast %9 : vector<8x2xf32> to vector<1x8x2xf32>
    %13 = vector.broadcast %12 : vector<1x8x2xf32> to vector<15x8x2xf32>
    "tpu.trace_start"() <{level = 10 : i32, message = "nhw,nwv->nhv"}> : () -> ()
    %cst = arith.constant dense<0.000000e+00> : vector<15x2x128xf32>
    %14 = tpu.matmul %7, %11, %cst {dimension_numbers = #tpu.dot_dimension_numbers<[2], [1], [1], [2], [0, 0, 0, 1, 1, 2], [0], [0]>} : vector<15x2x2xf32>, vector<15x2x128xf32>, vector<15x2x128xf32> -> vector<15x2x128xf32>
    "tpu.trace_stop"() : () -> ()
    "tpu.trace_start"() <{level = 10 : i32, message = "noh,nhv->nov"}> : () -> ()
    %cst_10 = arith.constant dense<0.000000e+00> : vector<15x8x128xf32>
    %15 = tpu.matmul %13, %14, %cst_10 {dimension_numbers = #tpu.dot_dimension_numbers<[2], [1], [1], [2], [0, 0, 0, 1, 1, 2], [0], [0]>} : vector<15x8x2xf32>, vector<15x2x128xf32>, vector<15x8x128xf32> -> vector<15x8x128xf32>
    "tpu.trace_stop"() : () -> ()
    %16 = vector.extract_strided_slice %15 {offsets = [0, 0, 0], sizes = [3, 8, 128], strides = [1, 1, 1]} : vector<15x8x128xf32> to vector<3x8x128xf32>
    %17 = vector.extract_strided_slice %15 {offsets = [3, 0, 0], sizes = [3, 8, 128], strides = [1, 1, 1]} : vector<15x8x128xf32> to vector<3x8x128xf32>
    %18 = vector.extract_strided_slice %15 {offsets = [6, 0, 0], sizes = [3, 8, 128], strides = [1, 1, 1]} : vector<15x8x128xf32> to vector<3x8x128xf32>
    %19 = vector.extract_strided_slice %15 {offsets = [9, 0, 0], sizes = [3, 8, 128], strides = [1, 1, 1]} : vector<15x8x128xf32> to vector<3x8x128xf32>
    %20 = vector.extract_strided_slice %15 {offsets = [12, 0, 0], sizes = [3, 8, 128], strides = [1, 1, 1]} : vector<15x8x128xf32> to vector<3x8x128xf32>
    %21 = arith.mulf %16, %16 : vector<3x8x128xf32>
    %22 = arith.mulf %17, %17 : vector<3x8x128xf32>
    %23 = arith.mulf %16, %17 : vector<3x8x128xf32>
    %24 = arith.subf %18, %21 : vector<3x8x128xf32>
    %25 = arith.subf %19, %22 : vector<3x8x128xf32>
    %26 = arith.subf %20, %23 : vector<3x8x128xf32>
    %cst_11 = arith.constant 2.000000e+00 : f32
    %27 = vector.broadcast %cst_11 : f32 to vector<3x8x128xf32>
    %28 = arith.mulf %27, %26 : vector<3x8x128xf32>
    %29 = vector.broadcast %3 : f32 to vector<3x8x128xf32>
    %30 = arith.addf %28, %29 : vector<3x8x128xf32>
    %31 = arith.addf %24, %25 : vector<3x8x128xf32>
    %32 = vector.broadcast %3 : f32 to vector<3x8x128xf32>
    %33 = arith.addf %31, %32 : vector<3x8x128xf32>
    %34 = tpu.reciprocal %33 {approx = true} : vector<3x8x128xf32> -> vector<3x8x128xf32>
    %35 = arith.mulf %30, %34 : vector<3x8x128xf32>
    %cst_12 = arith.constant 2.000000e+00 : f32
    %36 = vector.broadcast %cst_12 : f32 to vector<3x8x128xf32>
    %37 = arith.mulf %36, %23 : vector<3x8x128xf32>
    %38 = vector.broadcast %2 : f32 to vector<3x8x128xf32>
    %39 = arith.addf %37, %38 : vector<3x8x128xf32>
    %40 = arith.mulf %39, %30 : vector<3x8x128xf32>
    %41 = arith.mulf %40, %34 : vector<3x8x128xf32>
    %42 = arith.addf %21, %22 : vector<3x8x128xf32>
    %43 = vector.broadcast %2 : f32 to vector<3x8x128xf32>
    %44 = arith.addf %42, %43 : vector<3x8x128xf32>
    %45 = tpu.reciprocal %44 {approx = true} : vector<3x8x128xf32> -> vector<3x8x128xf32>
    %46 = arith.mulf %41, %45 : vector<3x8x128xf32>
    %47 = tpu.iota {dimensions = array<i32: 0>} : vector<8x128xi32>
    %48 = tpu.iota {dimensions = array<i32: 1>} : vector<8x128xi32>
    %c1_i32 = arith.constant 1 : i32
    %49 = vector.broadcast %c1_i32 : i32 to vector<8x128xi32>
    %50 = arith.cmpi slt, %47, %49 : vector<8x128xi32>
    %c1_i32_13 = arith.constant 1 : i32
    %51 = vector.broadcast %c1_i32_13 : i32 to vector<8x128xi32>
    %52 = arith.cmpi slt, %48, %51 : vector<8x128xi32>
    %53 = arith.andi %50, %52 : vector<8x128xi1>
    %54 = arith.extui %53 : vector<8x128xi1> to vector<8x128xi32>
    %55 = arith.sitofp %54 : vector<8x128xi32> to vector<8x128xf32>
    %56 = vector.shape_cast %55 : vector<8x128xf32> to vector<1x8x128xf32>
    %57 = vector.broadcast %56 : vector<1x8x128xf32> to vector<3x8x128xf32>
    %58 = arith.mulf %46, %57 : vector<3x8x128xf32>
    %59 = vector.shape_cast %58 : vector<3x8x128xf32> to vector<1x3x8x128xf32>
    %cst_14 = arith.constant dense<0.000000e+00> : vector<1xf32>
    %60 = vector.multi_reduction <add>, %59, %cst_14 [1, 2, 3] : vector<1x3x8x128xf32> to vector<1xf32>
    %61 = vector.shape_cast %60 : vector<1xf32> to vector<1x1x1x1xf32>
    %62 = vector.extract %61[0, 0, 0, 0] : f32 from vector<1x1x1x1xf32>
    %63 = vector.shape_cast %55 : vector<8x128xf32> to vector<1x8x128xf32>
    %64 = vector.broadcast %63 : vector<1x8x128xf32> to vector<3x8x128xf32>
    %65 = arith.mulf %35, %64 : vector<3x8x128xf32>
    %66 = vector.shape_cast %65 : vector<3x8x128xf32> to vector<1x3x8x128xf32>
    %cst_15 = arith.constant dense<0.000000e+00> : vector<1xf32>
    %67 = vector.multi_reduction <add>, %66, %cst_15 [1, 2, 3] : vector<1x3x8x128xf32> to vector<1xf32>
    %68 = vector.shape_cast %67 : vector<1xf32> to vector<1x1x1x1xf32>
    %69 = vector.extract %68[0, 0, 0, 0] : f32 from vector<1x1x1x1xf32>
    %c0_16 = arith.constant 0 : index
    %c0_17 = arith.constant 0 : index
    %70 = vector.load %arg4[%c0_16, %c0_17] : memref<1x2xf32, #tpu.memory_space<vmem>>, vector<1x2xf32>
    %c0_18 = arith.constant 0 : index
    %c0_19 = arith.constant 0 : index
    %71 = vector.load %arg5[%c0_18, %c0_19] : memref<2x1xf32, #tpu.memory_space<vmem>>, vector<2x1xf32>
    %72 = vector.shape_cast %70 : vector<1x2xf32> to vector<1x1x2xf32>
    %73 = vector.broadcast %72 : vector<1x1x2xf32> to vector<3x1x2xf32>
    %74 = vector.shape_cast %71 : vector<2x1xf32> to vector<1x2x1xf32>
    %75 = vector.broadcast %74 : vector<1x2x1xf32> to vector<3x2x1xf32>
    "tpu.trace_start"() <{level = 10 : i32, message = "noh,nhw->now"}> : () -> ()
    %cst_20 = arith.constant dense<0.000000e+00> : vector<3x1x2xf32>
    %76 = tpu.matmul %73, %0, %cst_20 {dimension_numbers = #tpu.dot_dimension_numbers<[2], [1], [1], [2], [0, 0, 0, 1, 1, 2], [0], [0]>} : vector<3x1x2xf32>, vector<3x2x2xf32>, vector<3x1x2xf32> -> vector<3x1x2xf32>
    "tpu.trace_stop"() : () -> ()
    "tpu.trace_start"() <{level = 10 : i32, message = "nhw,nwv->nhv"}> : () -> ()
    %cst_21 = arith.constant dense<0.000000e+00> : vector<3x1x1xf32>
    %77 = tpu.matmul %76, %75, %cst_21 {dimension_numbers = #tpu.dot_dimension_numbers<[2], [1], [1], [2], [0, 0, 0, 1, 1, 2], [0], [0]>} : vector<3x1x2xf32>, vector<3x2x1xf32>, vector<3x1x1xf32> -> vector<3x1x1xf32>
    "tpu.trace_stop"() : () -> ()
    "tpu.trace_start"() <{level = 10 : i32, message = "noh,nhw->now"}> : () -> ()
    %cst_22 = arith.constant dense<0.000000e+00> : vector<3x1x2xf32>
    %78 = tpu.matmul %73, %1, %cst_22 {dimension_numbers = #tpu.dot_dimension_numbers<[2], [1], [1], [2], [0, 0, 0, 1, 1, 2], [0], [0]>} : vector<3x1x2xf32>, vector<3x2x2xf32>, vector<3x1x2xf32> -> vector<3x1x2xf32>
    "tpu.trace_stop"() : () -> ()
    "tpu.trace_start"() <{level = 10 : i32, message = "nhw,nwv->nhv"}> : () -> ()
    %cst_23 = arith.constant dense<0.000000e+00> : vector<3x1x1xf32>
    %79 = tpu.matmul %78, %75, %cst_23 {dimension_numbers = #tpu.dot_dimension_numbers<[2], [1], [1], [2], [0, 0, 0, 1, 1, 2], [0], [0]>} : vector<3x1x2xf32>, vector<3x2x1xf32>, vector<3x1x1xf32> -> vector<3x1x1xf32>
    "tpu.trace_stop"() : () -> ()
    %c0_24 = arith.constant 0 : index
    %c0_25 = arith.constant 0 : index
    %c0_26 = arith.constant 0 : index
    %80 = vector.load %arg9[%c0_24, %c0_25, %c0_26] : memref<3x1x1xf32, #tpu.memory_space<vmem>>, vector<3x1x1xf32>
    tpu.vector_store %arg9[%c0_24, %c0_25, %c0_26], %77 {strides = array<i32>} : memref<3x1x1xf32, #tpu.memory_space<vmem>>, vector<3x1x1xf32>,
    %c0_27 = arith.constant 0 : index
    %c0_28 = arith.constant 0 : index
    %c0_29 = arith.constant 0 : index
    %81 = vector.load %arg10[%c0_27, %c0_28, %c0_29] : memref<3x1x1xf32, #tpu.memory_space<vmem>>, vector<3x1x1xf32>
    tpu.vector_store %arg10[%c0_27, %c0_28, %c0_29], %79 {strides = array<i32>} : memref<3x1x1xf32, #tpu.memory_space<vmem>>, vector<3x1x1xf32>,
    %82 = vector.shape_cast %77 : vector<3x1x1xf32> to vector<1x3x1x1xf32>
    %cst_30 = arith.constant dense<0x7F800000> : vector<1xf32>
    %83 = vector.multi_reduction <minimumf>, %82, %cst_30 [1, 2, 3] : vector<1x3x1x1xf32> to vector<1xf32>
    %84 = vector.shape_cast %83 : vector<1xf32> to vector<1x1x1x1xf32>
    %85 = vector.extract %84[0, 0, 0, 0] : f32 from vector<1x1x1x1xf32>
    %86 = vector.shape_cast %77 : vector<3x1x1xf32> to vector<1x3x1x1xf32>
    %cst_31 = arith.constant dense<0xFF800000> : vector<1xf32>
    %87 = vector.multi_reduction <maximumf>, %86, %cst_31 [1, 2, 3] : vector<1x3x1x1xf32> to vector<1xf32>
    %88 = vector.shape_cast %87 : vector<1xf32> to vector<1x1x1x1xf32>
    %89 = vector.extract %88[0, 0, 0, 0] : f32 from vector<1x1x1x1xf32>
    %90 = tpu.iota {dimensions = array<i32: 0>} : vector<8x128xi32>
    %91 = tpu.iota {dimensions = array<i32: 1>} : vector<8x128xi32>
    %c0_i32 = arith.constant 0 : i32
    %92 = vector.broadcast %c0_i32 : i32 to vector<8x128xi32>
    %93 = arith.cmpi eq, %90, %92 : vector<8x128xi32>
    %c0_i32_32 = arith.constant 0 : i32
    %94 = vector.broadcast %c0_i32_32 : i32 to vector<8x128xi32>
    %95 = arith.cmpi eq, %91, %94 : vector<8x128xi32>
    %96 = arith.andi %93, %95 : vector<8x128xi1>
    %cst_33 = arith.constant 0.000000e+00 : f32
    %97 = vector.broadcast %62 : f32 to vector<8x128xf32>
    %98 = vector.broadcast %cst_33 : f32 to vector<8x128xf32>
    %99 = arith.select %96, %97, %98 : vector<8x128xi1>, vector<8x128xf32>
    %c1_i32_34 = arith.constant 1 : i32
    %100 = vector.broadcast %c1_i32_34 : i32 to vector<8x128xi32>
    %101 = arith.cmpi eq, %91, %100 : vector<8x128xi32>
    %102 = arith.andi %93, %101 : vector<8x128xi1>
    %cst_35 = arith.constant 0.000000e+00 : f32
    %103 = vector.broadcast %69 : f32 to vector<8x128xf32>
    %104 = vector.broadcast %cst_35 : f32 to vector<8x128xf32>
    %105 = arith.select %102, %103, %104 : vector<8x128xi1>, vector<8x128xf32>
    %106 = arith.addf %99, %105 : vector<8x128xf32>
    %c2_i32 = arith.constant 2 : i32
    %107 = vector.broadcast %c2_i32 : i32 to vector<8x128xi32>
    %108 = arith.cmpi eq, %91, %107 : vector<8x128xi32>
    %109 = arith.andi %93, %108 : vector<8x128xi1>
    %cst_36 = arith.constant 0.000000e+00 : f32
    %110 = vector.broadcast %85 : f32 to vector<8x128xf32>
    %111 = vector.broadcast %cst_36 : f32 to vector<8x128xf32>
    %112 = arith.select %109, %110, %111 : vector<8x128xi1>, vector<8x128xf32>
    %113 = arith.addf %106, %112 : vector<8x128xf32>
    %c3_i32 = arith.constant 3 : i32
    %114 = vector.broadcast %c3_i32 : i32 to vector<8x128xi32>
    %115 = arith.cmpi eq, %91, %114 : vector<8x128xi32>
    %116 = arith.andi %93, %115 : vector<8x128xi1>
    %cst_37 = arith.constant 0.000000e+00 : f32
    %117 = vector.broadcast %89 : f32 to vector<8x128xf32>
    %118 = vector.broadcast %cst_37 : f32 to vector<8x128xf32>
    %119 = arith.select %116, %117, %118 : vector<8x128xi1>, vector<8x128xf32>
    %120 = arith.addf %113, %119 : vector<8x128xf32>
    %c0_38 = arith.constant 0 : index
    %c0_39 = arith.constant 0 : index
    %c0_40 = arith.constant 0 : index
    %121 = vector.load %arg8[%c0_38, %c0_39, %c0_40] : memref<1x8x128xf32, #tpu.memory_space<vmem>>, vector<1x8x128xf32>
    %122 = vector.shape_cast %121 : vector<1x8x128xf32> to vector<8x128xf32>
    %123 = vector.shape_cast %120 : vector<8x128xf32> to vector<1x8x128xf32>
    tpu.vector_store %arg8[%c0_38, %c0_39, %c0_40], %123 {strides = array<i32>} : memref<1x8x128xf32, #tpu.memory_space<vmem>>, vector<1x8x128xf32>,
    return
  }
  func.func @transform_0(%arg0: i32) -> i32 {
    %c0_i32 = arith.constant 0 : i32
    %c0_i32_0 = arith.constant 0 : i32
    return %c0_i32 : i32
  }
  func.func @transform_1(%arg0: i32) -> (i32, i32) {
    %c0_i32 = arith.constant 0 : i32
    %c0_i32_0 = arith.constant 0 : i32
    %c0_i32_1 = arith.constant 0 : i32
    return %c0_i32, %c0_i32_0 : i32, i32
  }
  func.func @transform_2(%arg0: i32) -> (i32, i32) {
    %c0_i32 = arith.constant 0 : i32
    %c0_i32_0 = arith.constant 0 : i32
    %c0_i32_1 = arith.constant 0 : i32
    return %c0_i32, %c0_i32_0 : i32, i32
  }
  func.func @transform_3(%arg0: i32) -> (i32, i32) {
    %c0_i32 = arith.constant 0 : i32
    %c0_i32_0 = arith.constant 0 : i32
    %c0_i32_1 = arith.constant 0 : i32
    return %c0_i32, %c0_i32_0 : i32, i32
  }
  func.func @transform_4(%arg0: i32) -> (i32, i32) {
    %c0_i32 = arith.constant 0 : i32
    %c0_i32_0 = arith.constant 0 : i32
    %c0_i32_1 = arith.constant 0 : i32
    return %c0_i32, %c0_i32_0 : i32, i32
  }
  func.func @transform_5(%arg0: i32) -> (i32, i32, i32) {
    %c0_i32 = arith.constant 0 : i32
    %c0_i32_0 = arith.constant 0 : i32
    %c0_i32_1 = arith.constant 0 : i32
    return %arg0, %c0_i32, %c0_i32_0 : i32, i32, i32
  }
  func.func @transform_6(%arg0: i32) -> (i32, i32, i32) {
    %c0_i32 = arith.constant 0 : i32
    %c0_i32_0 = arith.constant 0 : i32
    %c0_i32_1 = arith.constant 0 : i32
    return %arg0, %c0_i32, %c0_i32_0 : i32, i32, i32
  }
  func.func @transform_7(%arg0: i32) -> (i32, i32, i32) {
    %c0_i32 = arith.constant 0 : i32
    %c0_i32_0 = arith.constant 0 : i32
    %c0_i32_1 = arith.constant 0 : i32
    return %arg0, %c0_i32, %c0_i32_0 : i32, i32, i32
  }
  func.func @transform_8(%arg0: i32) -> (i32, i32, i32) {
    %c0_i32 = arith.constant 0 : i32
    %c0_i32_0 = arith.constant 0 : i32
    %c0_i32_1 = arith.constant 0 : i32
    return %arg0, %c0_i32, %c0_i32_0 : i32, i32, i32
  }
  func.func @transform_9(%arg0: i32) -> (i32, i32, i32) {
    %c0_i32 = arith.constant 0 : i32
    %c0_i32_0 = arith.constant 0 : i32
    %c0_i32_1 = arith.constant 0 : i32
    return %arg0, %c0_i32, %c0_i32_0 : i32, i32, i32
  }
}

</mosaic_0001>

<bundles_post_ra>
// kernel: msssim_pallas.7
= control target key start
LH: loop header
LB: loop body
LE: loop exit
PB: predicated region body
PF: predicated region fallthrough
CT: control target
= control target key end

     0   :  { %15 = vsyncpa [#allocation3], 0  ;;  %s4200_s30 = smov 0   ;;  %s4579_s0 = inlined_call_operand.vmem [shape: f32[2], index: 0, kind: input, shape index: {}]   ;;  %s4580_s1 = inlined_call_operand.vmem [shape: f32[8,8], index: 1, kind: input, shape index: {}]   ;;  %s4581_s2 = inlined_call_operand.vmem [shape: f32[8,128], index: 2, kind: input, shape index: {}]   ;;  %s4582_s3 = inlined_call_operand.vmem [shape: f32[4,8], index: 3, kind: input, shape index: {}]   ;;  %s4583_s4 = inlined_call_operand.vmem [shape: f32[8,4], index: 4, kind: input, shape index: {}]   ;;  %s4584_s5 = inlined_call_operand.vmem [shape: f32[6,8,8], index: 5, kind: input, shape index: {}]   ;;  %s4585_s6 = inlined_call_operand.vmem [shape: f32[6,8,8], index: 6, kind: input, shape index: {}]   ;;  %s4586_s7 = inlined_call_operand.vmem [shape: f32[2,8,128], index: 7, kind: output, shape index: {0}]   ;;  %s4587_s8 = inlined_call_operand.vmem [shape: f32[6,4,4], index: 8, kind: output, shape index: {1}]   ;;  %s4588_s9 = inlined_call_operand.vmem [shape: f32[6,4,4], index: 9, kind: output, shape index: {2}]  }
   0x1 LB: > { %s4206_s10 = sadd.s32 4294967295, %s4145_s30   ;;  %p3729_p0 = scmp.ge.s32.totalorder %s4145_s30, 1  ;;  %s4145_s30 = sphi %s4200_s30, %s21_s30  }
   0x2   : > { %p261_p1 = scmp.lt.s32.totalorder %s4145_s30, 3  ;;  %s274_s13 = sshll.u32 %s4579_s0, 4  ;;  %s275_s13 = int_to_ptr.vmem [resolvable:$true] %s274_s13 }
   0x3   : > { %p4095_p3 = scmp.eq.s32.totalorder %s4206_s10, 0  ;;  %s4120_s15 = scalar_lea.vmem %s275_s13, 16 }
   0x4   : > { %p4213_p2 = pnand %p3729_p0, %p261_p1  ;;  %p4121_p6 = scmp.ne.s32.totalorder %s275_s13, %s4120_s15 }
   0x5   : > { %p4128_p10 = scmp.lt.s32.totalorder %s275_s13, %s275_s13  ;;  %p4129_p11 = scmp.lt.s32.totalorder %s4120_s15, %s4120_s15 }
   0x6   : > { %p4091_p4 = pneg %p4213_p2 }
   0x7   : > { %p4130_p12 = por %p4129_p11, %p4128_p10 }
   0x8   : > { %p4092_p5 = pnand %p4095_p3, %p4091_p4 }
   0xa   : > { %p4122_p7 = pneg %p4092_p5 }
   0xc   : > { %p4123_p8 = pnand %p4122_p7, %p4121_p6 }
   0xe   : > { %p4124_p9 = pneg %p4123_p8 }
  0x10   : > { %p4131_p13 = pnand %p4130_p12, %p4124_p9 }
  0x12   : > { %4134 = shalt.err (!%p4131_p13)
}
  0x13   : > { %s4147_s16 = smov [#allocation2]   ;;  %317 = sbr.rel (%p4213_p2) target bundleno = 861 (0x35d), region = 48 }
  0x14   : > { %4094 = dma.vmem_to_smem (!%p4092_p5), %s275_s13, 16, %s4147_s16, [#allocation3]  }
  0x18   : > { %4140 = dma.done.wait (%p4095_p3), [#allocation3], 16  }
  0x19   : > { %4142 = vsyncadd (%p4095_p3), [#allocation3], 4294967280 }
  0x1a   : > { %323 = sfence }
  0x1b   : > { %v4231_v0 = vld [vmem:[%s4581_s2] sm:$0xff]  ;;  %s368_s19 = smul.u32 3, %s4206_s10  ;;  %v4148_v1 = vmov 0.0   ;;  %vm4149_vm0 = vmmov 0   ;;  %vm415_vm1 = vcmask 64512   ;;  %s3739_s14 = sld [smem:[#allocation2 + $0x1]] }
  0x1c   : > { %3869 = vmatprep.subr.mxu0 %v4148_v1  ;;  %3874 = vmatprep.subr.mxu1 %v4148_v1  ;;  %v4363_v17 = vld [vmem:[%s4580_s1] sm:$0xff]  ;;  %s402_s15 = sld [smem:[#allocation2]]  ;;  %vm3526_vm5 = vcmask 27648   ;;  %p380_p1 = scmp.lt.s32.totalorder %s4206_s10, 1 }
  0x1d   : > { %3870 = vmatpush3.msra.mxu0 %v4231_v0  ;;  %3871 = vmatprep.mubr.msk.f32.mxu0 %vm4149_vm0, %v4148_v1  ;;  %p369_p0 = scmp.lt.s32.totalorder %s368_s19, 5  ;;  %v4435_v46 = vld [vmem:[%s4582_s3] sm:$0xf] }
  0x1e   : > { %3875 = vmatpush3.msra.mxu1 %v4231_v0  ;;  %3876 = vmatprep.mubr.msk.f32.mxu1 %vm4149_vm0, %v4148_v1  ;;  %v4466_v49 = vld [vmem:[%s4583_s4] sm:$0xff]  ;;  %s4593_s10 = smov (!%p380_p1, %s4206_s10), 1 }
  0x1f   : > { %s4591_s19 = smov (!%p369_p0, %s368_s19), 5  ;;  %3879 = vmatprep.subr.mxu0 %v4148_v1  ;;  %3884 = vmatprep.subr.mxu1 %v4148_v1 }
  0x20   : > { %s3734_s20 = sshll.u32 %s4591_s19, 3  ;;  %s3737_s16 = sshll.u32 %s4591_s19, 2 }
  0x21   : > { %s372_s23 = scalar_lea.vmem %s4584_s5, %s3734_s20  ;;  %s378_s26 = scalar_lea.vmem %s4585_s6, %s3734_s20 }
  0x22   : > { %v4253_v2 = vld [vmem:[%s372_s23] sm:$0xff]  ;;  %v4255_v3 = vld [vmem:[%s372_s23 + $0x8] sm:$0xff]  ;;  %v4264_v4 = vld [vmem:[%s372_s23 + $0x10] sm:$0xff]  ;;  %s388_s20 = scalar_lea.vmem %s4587_s8, %s3737_s16  ;;  %s394_s23 = scalar_lea.vmem %s4588_s9, %s3737_s16 }
  0x23   : > { %3872 = vmatmul.mubr.msk.f32.vlgmr.msra.gmra.mxu0 %vm415_vm1, %v4253_v2  ;;  %3877 = vmatmul.mubr.msk.f32.vlgmr.msra.gmra.mxu1 %vm415_vm1, %v4255_v3  ;;  %v4266_v5 = vld [vmem:[%s378_s26] sm:$0xff]  ;;  %v4280_v6 = vld [vmem:[%s378_s26 + $0x8] sm:$0xff]  ;;  %v4282_v7 = vld [vmem:[%s378_s26 + $0x10] sm:$0xff]  ;;  %v404_v8 = vmul.f32 %v4253_v2, %v4253_v2  ;;  %v405_v9 = vmul.f32 %v4255_v3, %v4255_v3  ;;  %v406_v10 = vmul.f32 %v4264_v4, %v4264_v4  ;;  %s3736_s26 = sshll.u32 %s4593_s10, 3 }
  0x24   : > { %3880 = vmatpush3.msra.mxu0 %v4231_v0  ;;  %3881 = vmatprep.mubr.msk.f32.mxu0 %vm4149_vm0, %v4148_v1  ;;  %v407_v11 = vmul.f32 %v4266_v5, %v4266_v5  ;;  %v408_v12 = vmul.f32 %v4280_v6, %v4280_v6  ;;  %v409_v13 = vmul.f32 %v4282_v7, %v4282_v7  ;;  %s383_s11 = scalar_lea.vmem %s4586_s7, %s3736_s26 }
  0x25   : > { %3885 = vmatpush3.msra.mxu1 %v4231_v0  ;;  %3886 = vmatprep.mubr.msk.f32.mxu1 %vm4149_vm0, %v4148_v1  ;;  %v410_v14 = vmul.f32 %v4266_v5, %v4253_v2  ;;  %v411_v15 = vmul.f32 %v4280_v6, %v4255_v3  ;;  %v412_v16 = vmul.f32 %v4282_v7, %v4264_v4 }
  0x26   : > { %3889 = vmatprep.subr.mxu0 %v4148_v1  ;;  %3894 = vmatprep.subr.mxu1 %v4148_v1 }
  0x27   : > { %3882 = vmatmul.mubr.msk.f32.vlgmr.msra.gmra.mxu0 %vm415_vm1, %v4264_v4  ;;  %3887 = vmatmul.mubr.msk.f32.vlgmr.msra.gmra.mxu1 %vm415_vm1, %v4266_v5 }
  0x28   : > { %3890 = vmatpush3.msra.mxu0 %v4231_v0  ;;  %3891 = vmatprep.mubr.msk.f32.mxu0 %vm4149_vm0, %v4148_v1 }
  0x29   : > { %3895 = vmatpush3.msra.mxu1 %v4231_v0  ;;  %3896 = vmatprep.mubr.msk.f32.mxu1 %vm4149_vm0, %v4148_v1 }
  0x2a   : > { %3899 = vmatprep.subr.mxu0 %v4148_v1  ;;  %3904 = vmatprep.subr.mxu1 %v4148_v1 }
  0x2b   : > { %3892 = vmatmul.mubr.msk.f32.vlgmr.msra.gmra.mxu0 %vm415_vm1, %v4280_v6  ;;  %3897 = vmatmul.mubr.msk.f32.vlgmr.msra.gmra.mxu1 %vm415_vm1, %v4282_v7 }
  0x2c   : > { %3900 = vmatpush3.msra.mxu0 %v4231_v0  ;;  %3901 = vmatprep.mubr.msk.f32.mxu0 %vm4149_vm0, %v4148_v1 }
  0x2d   : > { %3905 = vmatpush3.msra.mxu1 %v4231_v0  ;;  %3906 = vmatprep.mubr.msk.f32.mxu1 %vm4149_vm0, %v4148_v1 }
  0x2e   : > { %3909 = vmatprep.subr.mxu0 %v4148_v1  ;;  %3914 = vmatprep.subr.mxu1 %v4148_v1 }
  0x2f   : > { %3902 = vmatmul.mubr.msk.f32.vlgmr.msra.gmra.mxu0 %vm415_vm1, %v404_v8  ;;  %3907 = vmatmul.mubr.msk.f32.vlgmr.msra.gmra.mxu1 %vm415_vm1, %v405_v9 }
  0x30   : > { %3910 = vmatpush3.msra.mxu0 %v4231_v0  ;;  %3911 = vmatprep.mubr.msk.f32.mxu0 %vm4149_vm0, %v4148_v1 }
  0x31   : > { %3915 = vmatpush3.msra.mxu1 %v4231_v0  ;;  %3916 = vmatprep.mubr.msk.f32.mxu1 %vm4149_vm0, %v4148_v1 }
  0x32   : > { %3919 = vmatprep.subr.mxu0 %v4148_v1  ;;  %3924 = vmatprep.subr.mxu1 %v4148_v1 }
  0x33   : > { %3912 = vmatmul.mubr.msk.f32.vlgmr.msra.gmra.mxu0 %vm415_vm1, %v406_v10  ;;  %3917 = vmatmul.mubr.msk.f32.vlgmr.msra.gmra.mxu1 %vm415_vm1, %v407_v11 }
  0x34   : > { %3920 = vmatpush3.msra.mxu0 %v4231_v0  ;;  %3921 = vmatprep.mubr.msk.f32.mxu0 %vm4149_vm0, %v4148_v1 }
  0x35   : > { %3925 = vmatpush3.msra.mxu1 %v4231_v0  ;;  %3926 = vmatprep.mubr.msk.f32.mxu1 %vm4149_vm0, %v4148_v1 }
  0x36   : > { %3929 = vmatprep.subr.mxu0 %v4148_v1  ;;  %3934 = vmatprep.subr.mxu1 %v4148_v1 }
  0x37   : > { %3922 = vmatmul.mubr.msk.f32.vlgmr.msra.gmra.mxu0 %vm415_vm1, %v408_v12  ;;  %3927 = vmatmul.mubr.msk.f32.vlgmr.msra.gmra.mxu1 %vm415_vm1, %v409_v13 }
  0x38   : > { %3930 = vmatpush3.msra.mxu0 %v4231_v0  ;;  %3931 = vmatprep.mubr.msk.f32.mxu0 %vm4149_vm0, %v4148_v1 }
  0x39   : > { %3935 = vmatpush3.msra.mxu1 %v4231_v0  ;;  %3936 = vmatprep.mubr.msk.f32.mxu1 %vm4149_vm0, %v4148_v1 }
  0x3a   : > { %3939 = vmatprep.subr.mxu0 %v4148_v1  ;;  %3944 = vmatprep.subr.mxu1 %v4148_v1 }
  0x3b   : > { %3932 = vmatmul.mubr.msk.f32.vlgmr.msra.gmra.mxu0 %vm415_vm1, %v410_v14  ;;  %3937 = vmatmul.mubr.msk.f32.vlgmr.msra.gmra.mxu1 %vm415_vm1, %v411_v15 }
  0x3c   : > { %3940 = vmatpush3.msra.mxu0 %v4231_v0  ;;  %3941 = vmatprep.mubr.msk.f32.mxu0 %vm4149_vm0, %v4148_v1 }
  0x3d   : > { %3949 = vmatprep.subr.mxu0 %v4148_v1  ;;  %3946 = vmatprep.mubr.msk.f32.mxu1 %vm4149_vm0, %v4148_v1 }
  0x3f   : > { %3942 = vmatmul.mubr.msk.f32.vlgmr.msra.gmra.mxu0 %vm415_vm1, %v412_v16  ;;  %v4472_v16 = vstv %s3739_s14 }
  0x40   : > { %3951 = vmatprep.mubr.msk.f32.mxu0 %vm4149_vm0, %v4148_v1 }
  0xe3   : > { %v485_v18 = vpop.f32.mrf.mxu0  ;;  %v558_v19 = vpop.f32.mrf.mxu1 }
  0xe4   : > { %3945 = vmatpush3.msra.mxu1 %v485_v18  ;;  %3950 = vmatpush3.msra.mxu0 %v558_v19 }
  0xe5   : > { %v3873_v20 = vpop.f32.mrf.mxu0  ;;  %v3878_v21 = vpop.f32.mrf.mxu1  ;;  %3947 = vmatmul.mubr.msk.f32.vlgmr.msra.gmra.mxu1 %vm415_vm1, %v4363_v17  ;;  %3952 = vmatmul.mubr.msk.f32.vlgmr.msra.gmra.mxu0 %vm415_vm1, %v4363_v17 }
  0xe6   : > { %3954 = vmatprep.subr.mxu1 %v4148_v1  ;;  %3959 = vmatprep.subr.mxu0 %v4148_v1  ;;  %v4474_v20 = vstv %s402_s15 }
  0xe7   : > { %v631_v22 = vpop.f32.mrf.mxu0  ;;  %v704_v23 = vpop.f32.mrf.mxu1  ;;  %3956 = vmatprep.mubr.msk.f32.mxu1 %vm4149_vm0, %v4148_v1  ;;  %3961 = vmatprep.mubr.msk.f32.mxu0 %vm4149_vm0, %v4148_v1 }
  0xe8   : > { %3955 = vmatpush3.msra.mxu1 %v631_v22  ;;  %3960 = vmatpush3.msra.mxu0 %v704_v23 }
  0xe9   : > { %v3883_v24 = vpop.f32.mrf.mxu0  ;;  %v3888_v25 = vpop.f32.mrf.mxu1  ;;  %3957 = vmatmul.mubr.msk.f32.vlgmr.msra.gmra.mxu1 %vm415_vm1, %v4363_v17  ;;  %3962 = vmatmul.mubr.msk.f32.vlgmr.msra.gmra.mxu0 %vm415_vm1, %v4363_v17 }
  0xea   : > { %3964 = vmatprep.subr.mxu1 %v4148_v1  ;;  %3969 = vmatprep.subr.mxu0 %v4148_v1 }
  0xeb   : > { %v777_v26 = vpop.f32.mrf.mxu0  ;;  %v850_v27 = vpop.f32.mrf.mxu1  ;;  %3966 = vmatprep.mubr.msk.f32.mxu1 %vm4149_vm0, %v4148_v1  ;;  %3971 = vmatprep.mubr.msk.f32.mxu0 %vm4149_vm0, %v4148_v1 }
  0xec   : > { %3965 = vmatpush3.msra.mxu1 %v777_v26  ;;  %3970 = vmatpush3.msra.mxu0 %v850_v27 }
  0xed   : > { %v3893_v28 = vpop.f32.mrf.mxu0  ;;  %v3898_v29 = vpop.f32.mrf.mxu1  ;;  %3967 = vmatmul.mubr.msk.f32.vlgmr.msra.gmra.mxu1 %vm415_vm1, %v4363_v17  ;;  %3972 = vmatmul.mubr.msk.f32.vlgmr.msra.gmra.mxu0 %vm415_vm1, %v4363_v17 }
  0xee   : > { %3974 = vmatprep.subr.mxu1 %v4148_v1  ;;  %3979 = vmatprep.subr.mxu0 %v4148_v1 }
  0xef   : > { %v923_v30 = vpop.f32.mrf.mxu0  ;;  %v996_v31 = vpop.f32.mrf.mxu1  ;;  %3976 = vmatprep.mubr.msk.f32.mxu1 %vm4149_vm0, %v4148_v1  ;;  %3981 = vmatprep.mubr.msk.f32.mxu0 %vm4149_vm0, %v4148_v1 }
  0xf0   : > { %3975 = vmatpush3.msra.mxu1 %v923_v30  ;;  %3980 = vmatpush3.msra.mxu0 %v996_v31 }
  0xf1   : > { %v3903_v32 = vpop.f32.mrf.mxu0  ;;  %v3908_v33 = vpop.f32.mrf.mxu1  ;;  %3977 = vmatmul.mubr.msk.f32.vlgmr.msra.gmra.mxu1 %vm415_vm1, %v4363_v17  ;;  %3982 = vmatmul.mubr.msk.f32.vlgmr.msra.gmra.mxu0 %vm415_vm1, %v4363_v17 }
  0xf2   : > { %3984 = vmatprep.subr.mxu1 %v4148_v1  ;;  %3989 = vmatprep.subr.mxu0 %v4148_v1 }
  0xf3   : > { %v1069_v34 = vpop.f32.mrf.mxu0  ;;  %v1142_v35 = vpop.f32.mrf.mxu1  ;;  %3986 = vmatprep.mubr.msk.f32.mxu1 %vm4149_vm0, %v4148_v1  ;;  %3991 = vmatprep.mubr.msk.f32.mxu0 %vm4149_vm0, %v4148_v1 }
  0xf4   : > { %3985 = vmatpush3.msra.mxu1 %v1069_v34  ;;  %3990 = vmatpush3.msra.mxu0 %v1142_v35 }
  0xf5   : > { %v3913_v36 = vpop.f32.mrf.mxu0  ;;  %v3918_v37 = vpop.f32.mrf.mxu1  ;;  %3987 = vmatmul.mubr.msk.f32.vlgmr.msra.gmra.mxu1 %vm415_vm1, %v4363_v17  ;;  %3992 = vmatmul.mubr.msk.f32.vlgmr.msra.gmra.mxu0 %vm415_vm1, %v4363_v17 }
  0xf6   : > { %3994 = vmatprep.subr.mxu1 %v4148_v1  ;;  %3999 = vmatprep.subr.mxu0 %v4148_v1 }
  0xf7   : > { %v1215_v38 = vpop.f32.mrf.mxu0  ;;  %v1288_v39 = vpop.f32.mrf.mxu1  ;;  %3996 = vmatprep.mubr.msk.f32.mxu1 %vm4149_vm0, %v4148_v1  ;;  %4001 = vmatprep.mubr.msk.f32.mxu0 %vm4149_vm0, %v4148_v1 }
  0xf8   : > { %3995 = vmatpush3.msra.mxu1 %v1215_v38  ;;  %4000 = vmatpush3.msra.mxu0 %v1288_v39 }
  0xf9   : > { %v3923_v40 = vpop.f32.mrf.mxu0  ;;  %v3928_v41 = vpop.f32.mrf.mxu1  ;;  %3997 = vmatmul.mubr.msk.f32.vlgmr.msra.gmra.mxu1 %vm415_vm1, %v4363_v17  ;;  %4002 = vmatmul.mubr.msk.f32.vlgmr.msra.gmra.mxu0 %vm415_vm1, %v4363_v17 }
  0xfa   : > { %4004 = vmatprep.subr.mxu1 %v4148_v1  ;;  %4009 = vmatprep.subr.mxu0 %v4148_v1 }
  0xfb   : > { %v1361_v42 = vpop.f32.mrf.mxu0  ;;  %v1434_v43 = vpop.f32.mrf.mxu1  ;;  %4006 = vmatprep.mubr.msk.f32.mxu1 %vm4149_vm0, %v4148_v1  ;;  %4011 = vmatprep.mubr.msk.f32.mxu0 %vm4149_vm0, %v4148_v1 }
  0xfc   : > { %4005 = vmatpush3.msra.mxu1 %v1361_v42  ;;  %4010 = vmatpush3.msra.mxu0 %v1434_v43 }
  0xfd   : > { %v3933_v44 = vpop.f32.mrf.mxu0  ;;  %v3938_v45 = vpop.f32.mrf.mxu1  ;;  %4007 = vmatmul.mubr.msk.f32.vlgmr.msra.gmra.mxu1 %vm415_vm1, %v4363_v17  ;;  %4012 = vmatmul.mubr.msk.f32.vlgmr.msra.gmra.mxu0 %vm415_vm1, %v4363_v17 }
  0xfe   : > { %4014 = vmatprep.subr.mxu1 %v4148_v1  ;;  %4016 = vmatprep.mubr.msk.f32.mxu1 %vm4149_vm0, %v4148_v1 }
  0xff   : > { %v1507_v47 = vpop.f32.mrf.mxu0  ;;  %4019 = vmatprep.subr.mxu0 %v4148_v1  ;;  %4021 = vmatprep.mubr.msk.f32.mxu0 %vm4149_vm0, %v4148_v1 }
 0x100   : > { %4015 = vmatpush3.msra.mxu1 %v1507_v47  ;;  %4020 = vmatpush3.msra.mxu0 %v4253_v2 }
 0x101   : > { %v3943_v48 = vpop.f32.mrf.mxu0  ;;  %4017 = vmatmul.mubr.msk.f32.vlgmr.msra.gmra.mxu1 %vm415_vm1, %v4363_v17  ;;  %4022 = vmatmul.mubr.msk.f32.vlgmr.msra.gmra.mxu0 %vm415_vm1, %v4435_v46 }
 0x102   : > { %4024 = vmatprep.subr.mxu1 %v4148_v1  ;;  %4026 = vmatprep.mubr.msk.f32.mxu1 %vm4149_vm0, %v4148_v1 }
 0x103   : > { %4025 = vmatpush3.msra.mxu1 %v4255_v3  ;;  %4029 = vmatprep.subr.mxu0 %v4148_v1 }
 0x104   : > { %4030 = vmatpush3.msra.mxu0 %v4264_v4  ;;  %4031 = vmatprep.mubr.msk.f32.mxu0 %vm4149_vm0, %v4148_v1 }
 0x105   : > { %4027 = vmatmul.mubr.msk.f32.vlgmr.msra.gmra.mxu1 %vm415_vm1, %v4435_v46  ;;  %4032 = vmatmul.mubr.msk.f32.vlgmr.msra.gmra.mxu0 %vm415_vm1, %v4435_v46 }
 0x106   : > { %4034 = vmatprep.subr.mxu1 %v4148_v1  ;;  %4036 = vmatprep.mubr.msk.f32.mxu1 %vm4149_vm0, %v4148_v1 }
 0x107   : > { %4039 = vmatprep.subr.mxu0 %v4148_v1  ;;  %4041 = vmatprep.mubr.msk.f32.mxu0 %vm4149_vm0, %v4148_v1 }
 0x108   : > { %4035 = vmatpush3.msra.mxu1 %v4466_v49  ;;  %4040 = vmatpush3.msra.mxu0 %v4466_v49 }
 0x109   : > { %4044 = vmatprep.subr.mxu1 %v4148_v1  ;;  %4049 = vmatprep.subr.mxu0 %v4148_v1 }
 0x1a5   : > { %v1580_v50 = vpop.f32.mrf.mxu1  ;;  %v1650_v51 = vpop.f32.mrf.mxu0 }
 0x1a6   : > { %v2564_v4 = vmul.f32 %v1580_v50, %v1580_v50  ;;  %v2565_v13 = vmul.f32 %v1650_v51, %v1650_v51 }
 0x1a7   : > { %v3948_v52 = vpop.f32.mrf.mxu1  ;;  %v3953_v53 = vpop.f32.mrf.mxu0 }
 0x1a9   : > { %v1720_v54 = vpop.f32.mrf.mxu1  ;;  %v1790_v55 = vpop.f32.mrf.mxu0 }
 0x1aa   : > { %v2567_v0 = vmul.f32 %v1790_v55, %v1790_v55  ;;  %v2566_v19 = vmul.f32 %v1720_v54, %v1720_v54  ;;  %v2570_v34 = vmul.f32 %v1790_v55, %v1580_v50 }
 0x1ab   : > { %v3958_v56 = vpop.f32.mrf.mxu1  ;;  %v3963_v57 = vpop.f32.mrf.mxu0 }
 0x1ac   : > { %v2614_v14 = vadd.f32 %v2567_v0, %v2564_v4  ;;  %v2601_v55 = vmul.f32 2.0, %v2570_v34 }
 0x1ad   : > { %v1860_v58 = vpop.f32.mrf.mxu1  ;;  %v1930_v59 = vpop.f32.mrf.mxu0 }
 0x1ae   : > { %v2568_v8 = vmul.f32 %v1860_v58, %v1860_v58  ;;  %v2569_v15 = vmul.f32 %v1930_v59, %v1930_v59  ;;  %v2617_v30 = vadd.f32 %v2614_v14, %v4474_v20  ;;  %v2571_v37 = vmul.f32 %v1860_v58, %v1650_v51 }
 0x1af   : > { %v3968_v60 = vpop.f32.mrf.mxu1  ;;  %v3973_v61 = vpop.f32.mrf.mxu0  ;;  %v2572_v48 = vmul.f32 %v1930_v59, %v1720_v54  ;;  %v2626_v54 = vlaneseq }
 0x1b0   : > { %v2615_v22 = vadd.f32 %v2568_v8, %v2565_v13  ;;  %v2616_v31 = vadd.f32 %v2569_v15, %v2566_v19 }
 0x1b1   : > { %v2000_v62 = vpop.f32.mrf.mxu1  ;;  %v2070_v63 = vpop.f32.mrf.mxu0 }
 0x1b2   : > { %v2573_v11 = vsub.f32 %v2000_v62, %v2564_v4  ;;  %v2574_v23 = vsub.f32 %v2070_v63, %v2565_v13  ;;  %v2618_v40 = vadd.f32 %v2615_v22, %v4474_v20  ;;  %v2619_v44 = vadd.f32 %v2616_v31, %v4474_v20 }
 0x1b3   : > { %v3978_v2 = vpop.f32.mrf.mxu1  ;;  %v3983_v3 = vpop.f32.mrf.mxu0 }
 0x1b4   : > { %v2602_v2 = vmul.f32 2.0, %v2571_v37  ;;  %v2603_v3 = vmul.f32 2.0, %v2572_v48 }
 0x1b5   : > { %v2140_v9 = vpop.f32.mrf.mxu1  ;;  %v2210_v10 = vpop.f32.mrf.mxu0 }
 0x1b6   : > { %v2576_v12 = vsub.f32 %v2210_v10, %v2567_v0  ;;  %v2575_v26 = vsub.f32 %v2140_v9, %v2566_v19  ;;  %v2605_v0 = vadd.f32 %v4474_v20, %v2601_v55  ;;  %v4494_v9 = vshrl.u32 %v2626_v54, 7 }
 0x1b7   : > { %v3988_v17 = vpop.f32.mrf.mxu1  ;;  %v3993_v18 = vpop.f32.mrf.mxu0  ;;  %v4496_v10 = vand.u32 127, %v2626_v54 }
 0x1b8   : > { %v2589_v21 = vadd.f32 %v2576_v12, %v2573_v11  ;;  %v2607_v17 = vadd.f32 %v4474_v20, %v2603_v3  ;;  %vm2630_vm2 = vcmp.lt.s32.totalorder %v4494_v9, 1  ;;  %vm3561_vm7 = vcmp.eq.s32.totalorder %v4494_v9, 0 }
 0x1b9   : > { %v2280_v24 = vpop.f32.mrf.mxu1  ;;  %v2350_v25 = vpop.f32.mrf.mxu0  ;;  %vm2631_vm3 = vcmp.lt.s32.totalorder %v4496_v10, 1  ;;  %vm3566_vm6 = vcmp.eq.s32.totalorder %v4496_v10, 1  ;;  %vm3562_vm8 = vcmp.eq.s32.totalorder %v4496_v10, 0  ;;  %vm3571_vm9 = vcmp.eq.s32.totalorder %v4496_v10, 2 }
 0x1ba   : > { %v2592_v27 = vadd.f32 %v2589_v21, %v4472_v16  ;;  %v2577_v28 = vsub.f32 %v2280_v24, %v2568_v8  ;;  %v2578_v29 = vsub.f32 %v2350_v25, %v2569_v15  ;;  %vm2632_vm4 = vmand %vm2630_vm2, %vm2631_vm3  ;;  %vm3576_vm13 = vcmp.eq.s32.totalorder %v4496_v10, 3 }
 0x1bb   : > { %v3998_v32 = vpop.f32.mrf.mxu1  ;;  %v4003_v33 = vpop.f32.mrf.mxu0  ;;  %vm3567_vm10 = vmand %vm3561_vm7, %vm3566_vm6 }
 0x1bc   : > { %4108 = vrcp.f32 %v2592_v27  ;;  %v2590_v35 = vadd.f32 %v2577_v28, %v2574_v23  ;;  %v2591_v36 = vadd.f32 %v2578_v29, %v2575_v26  ;;  %v3770_v29 = vsel %vm2632_vm4, 1.0, %v4148_v1  ;;  %vm3563_vm11 = vmand %vm3561_vm7, %vm3562_vm8 }
 0x1bd   : > { %v2420_v38 = vpop.f32.mrf.mxu1  ;;  %v2490_v39 = vpop.f32.mrf.mxu0  ;;  %4110 = vrcp.f32 %v2617_v30  ;;  %vm3572_vm12 = vmand %vm3561_vm7, %vm3571_vm9 }
 0x1be   : > { %v2593_v41 = vadd.f32 %v2590_v35, %v4472_v16  ;;  %v2594_v42 = vadd.f32 %v2591_v36, %v4472_v16  ;;  %v2579_v43 = vsub.f32 %v2420_v38, %v2570_v34  ;;  %v2580_v52 = vsub.f32 %v2490_v39, %v2571_v37  ;;  %vm3577_vm14 = vmand %vm3561_vm7, %vm3576_vm13 }
 0x1bf   : > { %v4008_v45 = vpop.f32.mrf.mxu1  ;;  %v4013_v47 = vpop.f32.mrf.mxu0 }
 0x1c0   : > { %4112 = vrcp.f32 %v2593_v41  ;;  %v2582_v50 = vmul.f32 2.0, %v2579_v43  ;;  %v2583_v60 = vmul.f32 2.0, %v2580_v52 }
 0x1c1   : > { %4114 = vrcp.f32 %v2594_v42  ;;  %v2560_v51 = vpop.f32.mrf.mxu1  ;;  %v2734_v53 = vpop.f32.mrf.mxu0 }
 0x1c2   : > { %4116 = vrcp.f32 %v2618_v40  ;;  %v2581_v56 = vsub.f32 %v2560_v51, %v2572_v48  ;;  %4037 = vmatmul.mubr.msk.f32.vlgmr.msra.gmra.mxu1 %vm415_vm1, %v2734_v53  ;;  %v2586_v59 = vadd.f32 %v4472_v16, %v2582_v50  ;;  %v2587_v12 = vadd.f32 %v4472_v16, %v2583_v60 }
 0x1c3   : > { %4118 = vrcp.f32 %v2619_v44  ;;  %v4018_v57 = vpop.f32.mrf.mxu1  ;;  %v4023_v58 = vpop.f32.mrf.mxu0  ;;  %4045 = vmatpush3.msra.mxu1 %v4466_v49  ;;  %4046 = vmatprep.mubr.msk.f32.mxu1 %vm4149_vm0, %v4148_v1 }
 0x1c4   : > { %4054 = vmatprep.subr.mxu1 %v4148_v1  ;;  %v2584_v61 = vmul.f32 2.0, %v2581_v56  ;;  %v2608_v11 = vmul.f32 %v2605_v0, %v2586_v59 }
 0x1c5   : > { %v2804_v62 = vpop.f32.mrf.mxu1  ;;  %v2874_v63 = vpop.f32.mrf.mxu0 }
 0x1c6   : > { %4042 = vmatmul.mubr.msk.f32.vlgmr.msra.gmra.mxu0 %vm415_vm1, %v2804_v62  ;;  %4047 = vmatmul.mubr.msk.f32.vlgmr.msra.gmra.mxu1 %vm415_vm1, %v2874_v63  ;;  %v2588_v14 = vadd.f32 %v4472_v16, %v2584_v61 }
 0x1c7   : > { %v4028_v4 = vpop.f32.mrf.mxu1  ;;  %v4033_v8 = vpop.f32.mrf.mxu0  ;;  %4050 = vmatpush3.msra.mxu0 %v4266_v5  ;;  %4051 = vmatprep.mubr.msk.f32.mxu0 %vm4149_vm0, %v4148_v1  ;;  %v2606_v5 = vadd.f32 %v4474_v20, %v2602_v2 }
 0x1c8   : > { %4059 = vmatprep.subr.mxu0 %v4148_v1  ;;  %4055 = vmatpush3.msra.mxu1 %v4280_v6  ;;  %v2610_v19 = vmul.f32 %v2607_v17, %v2588_v14 }
 0x1c9   : > { %v4109_v13 = vpop.eup %4108  ;;  %4056 = vmatprep.mubr.msk.f32.mxu1 %vm4149_vm0, %v4148_v1  ;;  %4064 = vmatprep.subr.mxu1 %v4148_v1  ;;  %v2609_v16 = vmul.f32 %v2606_v5, %v2587_v12 }
 0x1ca   : > { %v2611_v15 = vmul.f32 %v4109_v13, %v2608_v11  ;;  %4052 = vmatmul.mubr.msk.f32.vlgmr.msra.gmra.mxu0 %vm415_vm1, %v4435_v46  ;;  %4057 = vmatmul.mubr.msk.f32.vlgmr.msra.gmra.mxu1 %vm415_vm1, %v4435_v46  ;;  %v4111_v6 = vpop.eup %4110  ;;  %v2598_v26 = vmul.f32 %v4109_v13, %v2586_v59 }
 0x1cb   : > { %4060 = vmatpush3.msra.mxu0 %v4282_v7  ;;  %4061 = vmatprep.mubr.msk.f32.mxu0 %vm4149_vm0, %v4148_v1 }
 0x1cc   : > { %4065 = vmatpush3.msra.mxu1 %v4466_v49  ;;  %4066 = vmatprep.mubr.msk.f32.mxu1 %vm4149_vm0, %v4148_v1  ;;  %v2623_v22 = vmul.f32 %v4111_v6, %v2611_v15 }
 0x1cd   : > { %v4113_v18 = vpop.eup %4112  ;;  %4069 = vmatprep.subr.mxu0 %v4148_v1  ;;  %4074 = vmatprep.subr.mxu1 %v4148_v1 }
 0x1ce   : > { %v4115_v7 = vpop.eup %4114  ;;  %v2599_v20 = vmul.f32 %v4113_v18, %v2587_v12  ;;  %v2612_v21 = vmul.f32 %v4113_v18, %v2609_v16  ;;  %4062 = vmatmul.mubr.msk.f32.vlgmr.msra.gmra.mxu0 %vm415_vm1, %v4435_v46  ;;  %v2635_v30 = vmul.f32 %v3770_v29, %v2623_v22  ;;  %v2649_v46 = vmul.f32 %v3770_v29, %v2598_v26 }
 0x1cf   : > { %v4117_v23 = vpop.eup %4116  ;;  %v2613_v24 = vmul.f32 %v4115_v7, %v2610_v19  ;;  %4070 = vmatpush3.msra.mxu0 %v4466_v49  ;;  %4071 = vmatprep.mubr.msk.f32.mxu0 %vm4149_vm0, %v4148_v1  ;;  %v2600_v33 = vmul.f32 %v4115_v7, %v2588_v14 }
 0x1d0   : > { %v4119_v25 = vpop.eup %4118  ;;  %v2624_v27 = vmul.f32 %v4117_v23, %v2612_v21  ;;  %v2650_v32 = vmul.f32 %v3770_v29, %v2599_v20 }
 0x1d1   : > { %v2625_v28 = vmul.f32 %v4119_v25, %v2613_v24  ;;  %v2651_v38 = vmul.f32 %v3770_v29, %v2600_v33 }
 0x1d2   : > { %v2636_v31 = vmul.f32 %v3770_v29, %v2624_v27  ;;  %v2652_v37 = vadd.f32 %v2650_v32, %v2649_v46 }
 0x1d3   : > { %v2637_v34 = vmul.f32 %v3770_v29, %v2625_v28 }
 0x1d4   : > { %v2638_v35 = vadd.f32 %v2636_v31, %v2635_v30  ;;  %v2653_v39 = vadd.f32 %v2652_v37, %v2651_v38 }
 0x1d6   : > { %v2639_v36 = vadd.f32 %v2638_v35, %v2637_v34 }
 0x1d8   : > { %2640 = vadd.xlane.f32.xlu0 %v2639_v36 }
 0x1dc   : > { %2654 = vadd.xlane.f32.xlu0 %v2653_v39 }
 0x261   : > { %v2641_v40 = vpop.xlane.xlu0 %2640 }
 0x262   : > { %v2642_v41 = vrot.slane %v2641_v40, 4 }
 0x264   : > { %v2643_v42 = vadd.f32 %v2642_v41, %v2641_v40 }
 0x265   : > { %v2655_v43 = vpop.xlane.xlu0 %2654 }
 0x266   : > { %v2644_v44 = vrot.slane %v2643_v42, 2  ;;  %v2656_v45 = vrot.slane %v2655_v43, 4 }
 0x268   : > { %v2657_v47 = vadd.f32 %v2656_v45, %v2655_v43  ;;  %v2645_v48 = vadd.f32 %v2644_v44, %v2643_v42 }
 0x26a   : > { %v2658_v50 = vrot.slane %v2657_v47, 2  ;;  %v2646_v52 = vrot.slane %v2645_v48, 1 }
 0x26c   : > { %v2659_v51 = vadd.f32 %v2658_v50, %v2657_v47  ;;  %v2647_v53 = vadd.f32 %v2646_v52, %v2645_v48 }
 0x26e   : > { %4079 = vpush %v2647_v53  ;;  %v2660_v55 = vrot.slane %v2659_v51, 1 }
 0x270   : > { %v2661_v56 = vadd.f32 %v2660_v55, %v2659_v51 }
 0x272   : > { %4081 = vpush %v2661_v56 }
 0x282   : > { %v2947_v57 = vpop.f32.mrf.mxu1 }
 0x283   : > { %3527 = vst.msk [vmem:[%s388_s20] sm:$0xf] %vm3526_vm5, %v2947_v57  ;;  %v3533_v61 = vsel %vm3526_vm5, %v2947_v57, inf  ;;  %v3547_v4 = vsel %vm3526_vm5, %v2947_v57, -inf }
 0x284   : > { %v4038_v58 = vpop.f32.mrf.mxu1 }
 0x286   : > { %v3020_v54 = vpop.f32.mrf.mxu0  ;;  %v3093_v59 = vpop.f32.mrf.mxu1 }
 0x287   : > { %3528 = vst.msk [vmem:[%s388_s20 + $0x4] sm:$0xf] %vm3526_vm5, %v3020_v54  ;;  %v3548_v60 = vsel %vm3526_vm5, %v3020_v54, -inf  ;;  %3529 = vst.msk [vmem:[%s388_s20 + $0x8] sm:$0xf] %vm3526_vm5, %v3093_v59  ;;  %v3534_v62 = vsel %vm3526_vm5, %v3020_v54, inf }
 0x288   : > { %v3535_v63 = vsel %vm3526_vm5, %v3093_v59, inf  ;;  %v4043_v0 = vpop.f32.mrf.mxu0  ;;  %v4048_v2 = vpop.f32.mrf.mxu1  ;;  %v3536_v3 = vmin.f32 %v3533_v61, %v3534_v62  ;;  %v3550_v11 = vmax.f32 %v3547_v4, %v3548_v60  ;;  %v3549_v14 = vsel %vm3526_vm5, %v3093_v59, -inf }
 0x28a   : > { %v3537_v8 = vmin.f32 %v3536_v3, %v3535_v63  ;;  %v3163_v12 = vpop.f32.mrf.mxu0  ;;  %v3233_v13 = vpop.f32.mrf.mxu1  ;;  %v3551_v17 = vmax.f32 %v3550_v11, %v3549_v14 }
 0x28b   : > { %4067 = vmatmul.mubr.msk.f32.vlgmr.msra.gmra.mxu1 %vm415_vm1, %v3163_v12  ;;  %4072 = vmatmul.mubr.msk.f32.vlgmr.msra.gmra.mxu0 %vm415_vm1, %v3233_v13 }
 0x28c   : > { %3538 = vmin.xlane.f32.xlu1 %v3537_v8  ;;  %v4053_v5 = vpop.f32.mrf.mxu0  ;;  %4075 = vmatpush3.msra.mxu1 %v4466_v49  ;;  %v4058_v15 = vpop.f32.mrf.mxu1 }
 0x28d   : > { %4076 = vmatprep.mubr.msk.f32.mxu1 %vm4149_vm0, %v4148_v1 }
 0x28e   : > { %v3303_v6 = vpop.f32.mrf.mxu0 }
 0x28f   : > { %4077 = vmatmul.mubr.msk.f32.vlgmr.msra.gmra.mxu1 %vm415_vm1, %v3303_v6 }
 0x290   : > { %3552 = vmax.xlane.f32.xlu1 %v3551_v17  ;;  %v4063_v16 = vpop.f32.mrf.mxu0 }
 0x29f   : > { %s4080_s24 = spop %4079 }
 0x2a0   : > { %v3564_v46 = vstv %s4080_s24 }
 0x2a1   : > { %v3565_v38 = vsel %vm3563_vm11, %v3564_v46, 0.0 }
 0x2a3   : > { %s4082_s25 = spop %4081 }
 0x2a4   : > { %v3568_v34 = vstv %s4082_s25 }
 0x2a5   : > { %v3569_v36 = vsel %vm3567_vm10, %v3568_v34, 0.0 }
 0x2a6   : > { %v3570_v40 = vadd.f32 %v3569_v36, %v3565_v38 }
 0x315   : > { %v3539_v18 = vpop.xlane.xlu1 %3538 }
 0x316   : > { %v3540_v19 = vrot.slane %v3539_v18, 4 }
 0x318   : > { %v3541_v7 = vmin.f32 %v3539_v18, %v3540_v19 }
 0x319   : > { %v3553_v20 = vpop.xlane.xlu1 %3552 }
 0x31a   : > { %v3542_v21 = vrot.slane %v3541_v7, 2  ;;  %v3554_v22 = vrot.slane %v3553_v20, 4 }
 0x31c   : > { %v3555_v23 = vmax.f32 %v3553_v20, %v3554_v22  ;;  %v3543_v24 = vmin.f32 %v3541_v7, %v3542_v21 }
 0x31e   : > { %v3556_v49 = vrot.slane %v3555_v23, 2  ;;  %v3544_v25 = vrot.slane %v3543_v24, 1 }
 0x320   : > { %v3557_v26 = vmax.f32 %v3555_v23, %v3556_v49  ;;  %v3545_v27 = vmin.f32 %v3543_v24, %v3544_v25 }
 0x322   : > { %4083 = vpush %v3545_v27  ;;  %v3558_v1 = vrot.slane %v3557_v26, 1 }
 0x324   : > { %v3559_v28 = vmax.f32 %v3557_v26, %v3558_v1 }
 0x326   : > { %4085 = vpush %v3559_v28 }
 0x34b   : > { %v3376_v29 = vpop.f32.mrf.mxu1  ;;  %v3449_v30 = vpop.f32.mrf.mxu0 }
 0x34c   : > { %3530 = vst.msk [vmem:[%s394_s23] sm:$0xf] %vm3526_vm5, %v3376_v29  ;;  %3531 = vst.msk [vmem:[%s394_s23 + $0x4] sm:$0xf] %vm3526_vm5, %v3449_v30 }
 0x34d   : > { %v4068_v31 = vpop.f32.mrf.mxu1  ;;  %v4073_v32 = vpop.f32.mrf.mxu0 }
 0x34f   : > { %v3522_v33 = vpop.f32.mrf.mxu1 }
 0x350   : > { %3532 = vst.msk [vmem:[%s394_s23 + $0x8] sm:$0xf] %vm3526_vm5, %v3522_v33 }
 0x351   : > { %v4078_v35 = vpop.f32.mrf.mxu1 }
 0x353   : > { %s4084_s19 = spop %4083 }
 0x354   : > { %v3573_v37 = vstv %s4084_s19 }
 0x355   : > { %v3574_v39 = vsel %vm3572_vm12, %v3573_v37, 0.0 }
 0x356   : > { %v3575_v41 = vadd.f32 %v3574_v39, %v3570_v40 }
 0x357   : > { %s4086_s27 = spop %4085 }
 0x358   : > { %v3578_v42 = vstv %s4086_s27 }
 0x359   : > { %v3579_v43 = vsel %vm3577_vm14, %v3578_v42, 0.0 }
 0x35a   : > { %v3580_v44 = vadd.f32 %v3579_v43, %v3575_v41 }
 0x35c   : > { %3581 = vst [vmem:[%s383_s11] sm:$0xff] %v3580_v44 }
 0x35d PF: > { %s21_s30 = sadd.s32 1, %s4145_s30  }
 0x35e   : > { %p18_p2 = scmp.ge.s32.totalorder %s21_s30, 4  }
 0x360   :  { %20 = sbr.rel (!%p18_p2) target bundleno = 1 (0x1), region = 110 }
 0x365   :  { %3635 = vsyncpa [#allocation3], 1 }
 0x366   :  { %3637 = vsyncpa [#allocation3 + $0x1], 1 }

// kernel: msssim_pallas.6
= control target key start
LH: loop header
LB: loop body
LE: loop exit
PB: predicated region body
PF: predicated region fallthrough
CT: control target
= control target key end

     0   :  { %15 = vsyncpa [#allocation3], 0  ;;  %s4503_s30 = smov 0   ;;  %s4993_s0 = inlined_call_operand.vmem [shape: f32[2], index: 0, kind: input, shape index: {}]   ;;  %s4994_s1 = inlined_call_operand.vmem [shape: f32[8,16], index: 1, kind: input, shape index: {}]   ;;  %s4995_s2 = inlined_call_operand.vmem [shape: f32[16,128], index: 2, kind: input, shape index: {}]   ;;  %s4996_s3 = inlined_call_operand.vmem [shape: f32[8,16], index: 3, kind: input, shape index: {}]   ;;  %s4997_s4 = inlined_call_operand.vmem [shape: f32[16,8], index: 4, kind: input, shape index: {}]   ;;  %s4998_s5 = inlined_call_operand.vmem [shape: f32[6,16,16], index: 5, kind: input, shape index: {}]   ;;  %s4999_s6 = inlined_call_operand.vmem [shape: f32[6,16,16], index: 6, kind: input, shape index: {}]   ;;  %s5000_s7 = inlined_call_operand.vmem [shape: f32[2,8,128], index: 7, kind: output, shape index: {0}]   ;;  %s5001_s8 = inlined_call_operand.vmem [shape: f32[6,8,8], index: 8, kind: output, shape index: {1}]   ;;  %s5002_s9 = inlined_call_operand.vmem [shape: f32[6,8,8], index: 9, kind: output, shape index: {2}]  }
   0x1 LB: > { %s4509_s10 = sadd.s32 4294967295, %s4448_s30   ;;  %p3872_p0 = scmp.ge.s32.totalorder %s4448_s30, 1  ;;  %s4448_s30 = sphi %s4503_s30, %s21_s30  }
   0x2   : > { %p261_p1 = scmp.lt.s32.totalorder %s4448_s30, 3  ;;  %s274_s13 = sshll.u32 %s4993_s0, 4  ;;  %s275_s13 = int_to_ptr.vmem [resolvable:$true] %s274_s13 }
   0x3   : > { %p4398_p3 = scmp.eq.s32.totalorder %s4509_s10, 0  ;;  %s4423_s15 = scalar_lea.vmem %s275_s13, 16 }
   0x4   : > { %p4516_p2 = pnand %p3872_p0, %p261_p1  ;;  %p4424_p6 = scmp.ne.s32.totalorder %s275_s13, %s4423_s15 }
   0x5   : > { %p4431_p10 = scmp.lt.s32.totalorder %s275_s13, %s275_s13  ;;  %p4432_p11 = scmp.lt.s32.totalorder %s4423_s15, %s4423_s15 }
   0x6   : > { %p4394_p4 = pneg %p4516_p2 }
   0x7   : > { %p4433_p12 = por %p4432_p11, %p4431_p10 }
   0x8   : > { %p4395_p5 = pnand %p4398_p3, %p4394_p4 }
   0xa   : > { %p4425_p7 = pneg %p4395_p5 }
   0xc   : > { %p4426_p8 = pnand %p4425_p7, %p4424_p6 }
   0xe   : > { %p4427_p9 = pneg %p4426_p8 }
  0x10   : > { %p4434_p13 = pnand %p4433_p12, %p4427_p9 }
  0x12   : > { %4437 = shalt.err (!%p4434_p13)
}
  0x13   : > { %s4450_s16 = smov [#allocation2]   ;;  %319 = sbr.rel (%p4516_p2) target bundleno = 879 (0x36f), region = 48 }
  0x14   : > { %4397 = dma.vmem_to_smem (!%p4395_p5), %s275_s13, 16, %s4450_s16, [#allocation3]  }
  0x18   : > { %4443 = dma.done.wait (%p4398_p3), [#allocation3], 16  }
  0x19   : > { %4445 = vsyncadd (%p4398_p3), [#allocation3], 4294967280 }
  0x1a   : > { %325 = sfence }
  0x1b   : > { %v4534_v0 = vld [vmem:[%s4995_s2 + $0x8] sm:$0xff]  ;;  %v4539_v1 = vld [vmem:[%s4995_s2] sm:$0xff]  ;;  %s372_s21 = smul.u32 3, %s4509_s10  ;;  %vm437_vm0 = vcmask 130048   ;;  %v4451_v32 = vmov 0.0   ;;  %vm4452_vm1 = vmmov 0  }
  0x1c   : > { %4088 = vmatprep.subr.mxu0 %v4534_v0  ;;  %4095 = vmatprep.subr.mxu1 %v4534_v0  ;;  %v4722_v35 = vld [vmem:[%s4994_s1] sm:$0xff]  ;;  %s3884_s18 = sld [smem:[#allocation2 + $0x1]]  ;;  %vm3669_vm5 = vcmask 64512   ;;  %p386_p1 = scmp.lt.s32.totalorder %s4509_s10, 1 }
  0x1d   : > { %4089 = vmatpush3.msra.mxu0 %v4534_v0  ;;  %4096 = vmatpush3.msra.mxu1 %v4534_v0  ;;  %p373_p0 = scmp.lt.s32.totalorder %s372_s21, 5  ;;  %s414_s19 = sld [smem:[#allocation2]] }
  0x1e   : > { %4090 = vmatprep.subr.mxu0 %v4539_v1  ;;  %4097 = vmatprep.subr.mxu1 %v4539_v1  ;;  %s5009_s10 = smov (!%p386_p1, %s4509_s10), 1 }
  0x1f   : > { %4091 = vmatpush3.msra.mxu0 %v4539_v1  ;;  %s5007_s21 = smov (!%p373_p0, %s372_s21), 5  ;;  %4098 = vmatpush3.msra.mxu1 %v4539_v1  ;;  %s3881_s11 = sshll.u32 %s5009_s10, 3 }
  0x20   : > { %4102 = vmatprep.subr.mxu0 %v4534_v0  ;;  %4109 = vmatprep.subr.mxu1 %v4534_v0  ;;  %s3945_s22 = sshll.u32 %s5007_s21, 4  ;;  %s3882_s20 = sshll.u32 %s5007_s21, 3 }
  0x21   : > { %s377_s25 = scalar_lea.vmem %s4998_s5, %s3945_s22  ;;  %s384_s28 = scalar_lea.vmem %s4999_s6, %s3945_s22 }
  0x22   : > { %v4558_v2 = vld [vmem:[%s377_s25] sm:$0xff]  ;;  %v4560_v3 = vld [vmem:[%s377_s25 + $0x10] sm:$0xff]  ;;  %v4562_v4 = vld [vmem:[%s377_s25 + $0x8] sm:$0xff]  ;;  %s394_s24 = scalar_lea.vmem %s5001_s8, %s3882_s20  ;;  %s400_s27 = scalar_lea.vmem %s5002_s9, %s3882_s20 }
  0x23   : > { %4092 = vmatprep.mubr.msk.f32.mxu0 %vm437_vm0, %v4558_v2  ;;  %4099 = vmatprep.mubr.msk.f32.mxu1 %vm437_vm0, %v4560_v3  ;;  %v4571_v5 = vld [vmem:[%s377_s25 + $0x18] sm:$0xff]  ;;  %v4577_v6 = vld [vmem:[%s377_s25 + $0x20] sm:$0xff]  ;;  %v4585_v8 = vld [vmem:[%s377_s25 + $0x28] sm:$0xff]  ;;  %v416_v14 = vmul.f32 %v4558_v2, %v4558_v2  ;;  %v418_v15 = vmul.f32 %v4560_v3, %v4560_v3  ;;  %v417_v16 = vmul.f32 %v4562_v4, %v4562_v4  ;;  %s389_s15 = scalar_lea.vmem %s5000_s7, %s3881_s11 }
  0x24   : > { %4093 = vmatmul.mubr.msk.f32.vlgmr.msra.gmra.mxu0 %vm437_vm0, %v4562_v4  ;;  %4100 = vmatmul.mubr.msk.f32.vlgmr.msra.gmra.mxu1 %vm437_vm0, %v4571_v5  ;;  %v4581_v7 = vld [vmem:[%s384_s28] sm:$0xff]  ;;  %v4587_v9 = vld [vmem:[%s384_s28 + $0x8] sm:$0xff]  ;;  %v4601_v10 = vld [vmem:[%s384_s28 + $0x10] sm:$0xff]  ;;  %v419_v17 = vmul.f32 %v4571_v5, %v4571_v5  ;;  %v420_v18 = vmul.f32 %v4577_v6, %v4577_v6  ;;  %v421_v20 = vmul.f32 %v4585_v8, %v4585_v8 }
  0x25   : > { %4103 = vmatpush3.msra.mxu0 %v4534_v0  ;;  %4110 = vmatpush3.msra.mxu1 %v4534_v0  ;;  %v4605_v11 = vld [vmem:[%s384_s28 + $0x20] sm:$0xff]  ;;  %v4609_v12 = vld [vmem:[%s384_s28 + $0x18] sm:$0xff]  ;;  %v4611_v13 = vld [vmem:[%s384_s28 + $0x28] sm:$0xff]  ;;  %v422_v19 = vmul.f32 %v4581_v7, %v4581_v7  ;;  %v423_v21 = vmul.f32 %v4587_v9, %v4587_v9  ;;  %v424_v22 = vmul.f32 %v4601_v10, %v4601_v10 }
  0x26   : > { %4104 = vmatprep.subr.mxu0 %v4539_v1  ;;  %4111 = vmatprep.subr.mxu1 %v4539_v1  ;;  %v426_v23 = vmul.f32 %v4605_v11, %v4605_v11  ;;  %v425_v24 = vmul.f32 %v4609_v12, %v4609_v12  ;;  %v427_v25 = vmul.f32 %v4611_v13, %v4611_v13 }
  0x27   : > { %4105 = vmatpush3.msra.mxu0 %v4539_v1  ;;  %4106 = vmatprep.mubr.msk.f32.mxu0 %vm437_vm0, %v4577_v6  ;;  %v428_v26 = vmul.f32 %v4581_v7, %v4558_v2  ;;  %v430_v27 = vmul.f32 %v4601_v10, %v4560_v3  ;;  %v429_v28 = vmul.f32 %v4587_v9, %v4562_v4 }
  0x28   : > { %4112 = vmatpush3.msra.mxu1 %v4539_v1  ;;  %4113 = vmatprep.mubr.msk.f32.mxu1 %vm437_vm0, %v4581_v7  ;;  %v431_v29 = vmul.f32 %v4609_v12, %v4571_v5  ;;  %v432_v30 = vmul.f32 %v4605_v11, %v4577_v6  ;;  %v433_v31 = vmul.f32 %v4611_v13, %v4585_v8 }
  0x29   : > { %4107 = vmatmul.mubr.msk.f32.vlgmr.msra.gmra.mxu0 %vm437_vm0, %v4585_v8  ;;  %4114 = vmatmul.mubr.msk.f32.vlgmr.msra.gmra.mxu1 %vm437_vm0, %v4587_v9 }
  0x2a   : > { %4116 = vmatprep.subr.mxu0 %v4534_v0  ;;  %4123 = vmatprep.subr.mxu1 %v4534_v0 }
  0x2b   : > { %4117 = vmatpush3.msra.mxu0 %v4534_v0  ;;  %4124 = vmatpush3.msra.mxu1 %v4534_v0 }
  0x2c   : > { %4118 = vmatprep.subr.mxu0 %v4539_v1  ;;  %4125 = vmatprep.subr.mxu1 %v4539_v1 }
  0x2d   : > { %4119 = vmatpush3.msra.mxu0 %v4539_v1  ;;  %4120 = vmatprep.mubr.msk.f32.mxu0 %vm437_vm0, %v4601_v10 }
  0x2e   : > { %4126 = vmatpush3.msra.mxu1 %v4539_v1  ;;  %4127 = vmatprep.mubr.msk.f32.mxu1 %vm437_vm0, %v4605_v11 }
  0x2f   : > { %4121 = vmatmul.mubr.msk.f32.vlgmr.msra.gmra.mxu0 %vm437_vm0, %v4609_v12  ;;  %4128 = vmatmul.mubr.msk.f32.vlgmr.msra.gmra.mxu1 %vm437_vm0, %v4611_v13 }
  0x30   : > { %4130 = vmatprep.subr.mxu0 %v4534_v0  ;;  %4137 = vmatprep.subr.mxu1 %v4534_v0 }
  0x31   : > { %4131 = vmatpush3.msra.mxu0 %v4534_v0  ;;  %4138 = vmatpush3.msra.mxu1 %v4534_v0 }
  0x32   : > { %4132 = vmatprep.subr.mxu0 %v4539_v1  ;;  %4139 = vmatprep.subr.mxu1 %v4539_v1 }
  0x33   : > { %4133 = vmatpush3.msra.mxu0 %v4539_v1  ;;  %4134 = vmatprep.mubr.msk.f32.mxu0 %vm437_vm0, %v416_v14 }
  0x34   : > { %4140 = vmatpush3.msra.mxu1 %v4539_v1  ;;  %4141 = vmatprep.mubr.msk.f32.mxu1 %vm437_vm0, %v418_v15 }
  0x35   : > { %4135 = vmatmul.mubr.msk.f32.vlgmr.msra.gmra.mxu0 %vm437_vm0, %v417_v16  ;;  %4142 = vmatmul.mubr.msk.f32.vlgmr.msra.gmra.mxu1 %vm437_vm0, %v419_v17 }
  0x36   : > { %4144 = vmatprep.subr.mxu0 %v4534_v0  ;;  %4151 = vmatprep.subr.mxu1 %v4534_v0 }
  0x37   : > { %4145 = vmatpush3.msra.mxu0 %v4534_v0  ;;  %4152 = vmatpush3.msra.mxu1 %v4534_v0 }
  0x38   : > { %4146 = vmatprep.subr.mxu0 %v4539_v1  ;;  %4153 = vmatprep.subr.mxu1 %v4539_v1 }
  0x39   : > { %4147 = vmatpush3.msra.mxu0 %v4539_v1  ;;  %4148 = vmatprep.mubr.msk.f32.mxu0 %vm437_vm0, %v420_v18 }
  0x3a   : > { %4154 = vmatpush3.msra.mxu1 %v4539_v1  ;;  %4155 = vmatprep.mubr.msk.f32.mxu1 %vm437_vm0, %v422_v19 }
  0x3b   : > { %4149 = vmatmul.mubr.msk.f32.vlgmr.msra.gmra.mxu0 %vm437_vm0, %v421_v20  ;;  %4156 = vmatmul.mubr.msk.f32.vlgmr.msra.gmra.mxu1 %vm437_vm0, %v423_v21 }
  0x3c   : > { %4158 = vmatprep.subr.mxu0 %v4534_v0  ;;  %4165 = vmatprep.subr.mxu1 %v4534_v0 }
  0x3d   : > { %4159 = vmatpush3.msra.mxu0 %v4534_v0  ;;  %4166 = vmatpush3.msra.mxu1 %v4534_v0 }
  0x3e   : > { %4160 = vmatprep.subr.mxu0 %v4539_v1  ;;  %4167 = vmatprep.subr.mxu1 %v4539_v1 }
  0x3f   : > { %4161 = vmatpush3.msra.mxu0 %v4539_v1  ;;  %4162 = vmatprep.mubr.msk.f32.mxu0 %vm437_vm0, %v424_v22 }
  0x40   : > { %4168 = vmatpush3.msra.mxu1 %v4539_v1  ;;  %4169 = vmatprep.mubr.msk.f32.mxu1 %vm437_vm0, %v426_v23 }
  0x41   : > { %4163 = vmatmul.mubr.msk.f32.vlgmr.msra.gmra.mxu0 %vm437_vm0, %v425_v24  ;;  %4170 = vmatmul.mubr.msk.f32.vlgmr.msra.gmra.mxu1 %vm437_vm0, %v427_v25 }
  0x42   : > { %4172 = vmatprep.subr.mxu0 %v4534_v0  ;;  %4179 = vmatprep.subr.mxu1 %v4534_v0 }
  0x43   : > { %4173 = vmatpush3.msra.mxu0 %v4534_v0  ;;  %4180 = vmatpush3.msra.mxu1 %v4534_v0 }
  0x44   : > { %4174 = vmatprep.subr.mxu0 %v4539_v1  ;;  %4181 = vmatprep.subr.mxu1 %v4539_v1 }
  0x45   : > { %4175 = vmatpush3.msra.mxu0 %v4539_v1  ;;  %4176 = vmatprep.mubr.msk.f32.mxu0 %vm437_vm0, %v428_v26 }
  0x46   : > { %4182 = vmatpush3.msra.mxu1 %v4539_v1  ;;  %4183 = vmatprep.mubr.msk.f32.mxu1 %vm437_vm0, %v430_v27 }
  0x47   : > { %4177 = vmatmul.mubr.msk.f32.vlgmr.msra.gmra.mxu0 %vm437_vm0, %v429_v28  ;;  %4184 = vmatmul.mubr.msk.f32.vlgmr.msra.gmra.mxu1 %vm437_vm0, %v431_v29 }
  0x48   : > { %4186 = vmatprep.subr.mxu0 %v4534_v0  ;;  %4190 = vmatprep.mubr.msk.f32.mxu0 %vm437_vm0, %v432_v30 }
  0x49   : > { %4187 = vmatpush3.msra.mxu0 %v4534_v0  ;;  %4193 = vmatprep.subr.mxu1 %v4451_v32  ;;  %v4812_v0 = vld [vmem:[%s4996_s3] sm:$0xff] }
  0x4a   : > { %4188 = vmatprep.subr.mxu0 %v4539_v1  ;;  %4197 = vmatprep.mubr.msk.f32.mxu1 %vm4452_vm1, %v4451_v32 }
  0x4b   : > { %4189 = vmatpush3.msra.mxu0 %v4539_v1  ;;  %v4846_v1 = vld [vmem:[%s4997_s4 + $0x8] sm:$0xff] }
  0x4c   : > { %4191 = vmatmul.mubr.msk.f32.vlgmr.msra.gmra.mxu0 %vm437_vm0, %v433_v31  ;;  %4200 = vmatprep.subr.mxu0 %v4451_v32 }
  0x4d   : > { %4204 = vmatprep.mubr.msk.f32.mxu0 %vm4452_vm1, %v4451_v32 }
  0xe4   : > { %v4094_v33 = vpop.f32.mrf.mxu0  ;;  %v4101_v34 = vpop.f32.mrf.mxu1 }
  0xe5   : > { %4194 = vmatpush3.msra.mxu1 %v4094_v33  ;;  %4201 = vmatpush3.msra.mxu0 %v4101_v34  ;;  %v4863_v33 = vstv %s3884_s18 }
  0xe6   : > { %v510_v36 = vpop.f32.mrf.mxu0  ;;  %v591_v37 = vpop.f32.mrf.mxu1  ;;  %4195 = vmatprep.subr.mxu1 %v4451_v32  ;;  %4202 = vmatprep.subr.mxu0 %v4451_v32 }
  0xe7   : > { %4196 = vmatpush3.msra.mxu1 %v510_v36  ;;  %4203 = vmatpush3.msra.mxu0 %v591_v37 }
  0xe8   : > { %4198 = vmatmul.mubr.msk.f32.vlgmr.msra.gmra.mxu1 %vm437_vm0, %v4722_v35  ;;  %4205 = vmatmul.mubr.msk.f32.vlgmr.msra.gmra.mxu0 %vm437_vm0, %v4722_v35 }
  0xe9   : > { %v4108_v38 = vpop.f32.mrf.mxu0  ;;  %v4115_v39 = vpop.f32.mrf.mxu1  ;;  %4207 = vmatprep.subr.mxu1 %v4451_v32  ;;  %4214 = vmatprep.subr.mxu0 %v4451_v32 }
  0xea   : > { %4208 = vmatpush3.msra.mxu1 %v4108_v38  ;;  %4215 = vmatpush3.msra.mxu0 %v4115_v39 }
  0xeb   : > { %v672_v40 = vpop.f32.mrf.mxu0  ;;  %v753_v41 = vpop.f32.mrf.mxu1  ;;  %4209 = vmatprep.subr.mxu1 %v4451_v32  ;;  %4216 = vmatprep.subr.mxu0 %v4451_v32 }
  0xec   : > { %4210 = vmatpush3.msra.mxu1 %v672_v40  ;;  %4211 = vmatprep.mubr.msk.f32.mxu1 %vm4452_vm1, %v4451_v32 }
  0xed   : > { %4217 = vmatpush3.msra.mxu0 %v753_v41  ;;  %4218 = vmatprep.mubr.msk.f32.mxu0 %vm4452_vm1, %v4451_v32  ;;  %v4867_v41 = vstv %s414_s19 }
  0xee   : > { %4212 = vmatmul.mubr.msk.f32.vlgmr.msra.gmra.mxu1 %vm437_vm0, %v4722_v35  ;;  %4219 = vmatmul.mubr.msk.f32.vlgmr.msra.gmra.mxu0 %vm437_vm0, %v4722_v35 }
  0xef   : > { %v4122_v42 = vpop.f32.mrf.mxu0  ;;  %v4129_v43 = vpop.f32.mrf.mxu1  ;;  %4221 = vmatprep.subr.mxu1 %v4451_v32  ;;  %4228 = vmatprep.subr.mxu0 %v4451_v32 }
  0xf0   : > { %4222 = vmatpush3.msra.mxu1 %v4122_v42  ;;  %4229 = vmatpush3.msra.mxu0 %v4129_v43 }
  0xf1   : > { %v834_v44 = vpop.f32.mrf.mxu0  ;;  %v915_v45 = vpop.f32.mrf.mxu1  ;;  %4223 = vmatprep.subr.mxu1 %v4451_v32  ;;  %4230 = vmatprep.subr.mxu0 %v4451_v32 }
  0xf2   : > { %4224 = vmatpush3.msra.mxu1 %v834_v44  ;;  %4225 = vmatprep.mubr.msk.f32.mxu1 %vm4452_vm1, %v4451_v32 }
  0xf3   : > { %4231 = vmatpush3.msra.mxu0 %v915_v45  ;;  %4232 = vmatprep.mubr.msk.f32.mxu0 %vm4452_vm1, %v4451_v32 }
  0xf4   : > { %4226 = vmatmul.mubr.msk.f32.vlgmr.msra.gmra.mxu1 %vm437_vm0, %v4722_v35  ;;  %4233 = vmatmul.mubr.msk.f32.vlgmr.msra.gmra.mxu0 %vm437_vm0, %v4722_v35 }
  0xf5   : > { %v4136_v46 = vpop.f32.mrf.mxu0  ;;  %v4143_v47 = vpop.f32.mrf.mxu1  ;;  %4235 = vmatprep.subr.mxu1 %v4451_v32  ;;  %4242 = vmatprep.subr.mxu0 %v4451_v32 }
  0xf6   : > { %4236 = vmatpush3.msra.mxu1 %v4136_v46  ;;  %4243 = vmatpush3.msra.mxu0 %v4143_v47 }
  0xf7   : > { %v996_v48 = vpop.f32.mrf.mxu0  ;;  %v1077_v49 = vpop.f32.mrf.mxu1  ;;  %4237 = vmatprep.subr.mxu1 %v4451_v32  ;;  %4244 = vmatprep.subr.mxu0 %v4451_v32 }
  0xf8   : > { %4238 = vmatpush3.msra.mxu1 %v996_v48  ;;  %4239 = vmatprep.mubr.msk.f32.mxu1 %vm4452_vm1, %v4451_v32 }
  0xf9   : > { %4245 = vmatpush3.msra.mxu0 %v1077_v49  ;;  %4246 = vmatprep.mubr.msk.f32.mxu0 %vm4452_vm1, %v4451_v32 }
  0xfa   : > { %4240 = vmatmul.mubr.msk.f32.vlgmr.msra.gmra.mxu1 %vm437_vm0, %v4722_v35  ;;  %4247 = vmatmul.mubr.msk.f32.vlgmr.msra.gmra.mxu0 %vm437_vm0, %v4722_v35 }
  0xfb   : > { %v4150_v50 = vpop.f32.mrf.mxu0  ;;  %v4157_v51 = vpop.f32.mrf.mxu1  ;;  %4249 = vmatprep.subr.mxu1 %v4451_v32  ;;  %4256 = vmatprep.subr.mxu0 %v4451_v32 }
  0xfc   : > { %4250 = vmatpush3.msra.mxu1 %v4150_v50  ;;  %4257 = vmatpush3.msra.mxu0 %v4157_v51 }
  0xfd   : > { %v1158_v52 = vpop.f32.mrf.mxu0  ;;  %v1239_v53 = vpop.f32.mrf.mxu1  ;;  %4251 = vmatprep.subr.mxu1 %v4451_v32  ;;  %4258 = vmatprep.subr.mxu0 %v4451_v32 }
  0xfe   : > { %4252 = vmatpush3.msra.mxu1 %v1158_v52  ;;  %4253 = vmatprep.mubr.msk.f32.mxu1 %vm4452_vm1, %v4451_v32 }
  0xff   : > { %4259 = vmatpush3.msra.mxu0 %v1239_v53  ;;  %4260 = vmatprep.mubr.msk.f32.mxu0 %vm4452_vm1, %v4451_v32 }
 0x100   : > { %4254 = vmatmul.mubr.msk.f32.vlgmr.msra.gmra.mxu1 %vm437_vm0, %v4722_v35  ;;  %4261 = vmatmul.mubr.msk.f32.vlgmr.msra.gmra.mxu0 %vm437_vm0, %v4722_v35 }
 0x101   : > { %v4164_v54 = vpop.f32.mrf.mxu0  ;;  %v4171_v55 = vpop.f32.mrf.mxu1  ;;  %4263 = vmatprep.subr.mxu1 %v4451_v32  ;;  %4270 = vmatprep.subr.mxu0 %v4451_v32 }
 0x102   : > { %4264 = vmatpush3.msra.mxu1 %v4164_v54  ;;  %4271 = vmatpush3.msra.mxu0 %v4171_v55 }
 0x103   : > { %v1320_v56 = vpop.f32.mrf.mxu0  ;;  %v1401_v57 = vpop.f32.mrf.mxu1  ;;  %4265 = vmatprep.subr.mxu1 %v4451_v32  ;;  %4272 = vmatprep.subr.mxu0 %v4451_v32 }
 0x104   : > { %4266 = vmatpush3.msra.mxu1 %v1320_v56  ;;  %4267 = vmatprep.mubr.msk.f32.mxu1 %vm4452_vm1, %v4451_v32 }
 0x105   : > { %4273 = vmatpush3.msra.mxu0 %v1401_v57  ;;  %4274 = vmatprep.mubr.msk.f32.mxu0 %vm4452_vm1, %v4451_v32 }
 0x106   : > { %4268 = vmatmul.mubr.msk.f32.vlgmr.msra.gmra.mxu1 %vm437_vm0, %v4722_v35  ;;  %4275 = vmatmul.mubr.msk.f32.vlgmr.msra.gmra.mxu0 %vm437_vm0, %v4722_v35 }
 0x107   : > { %v4178_v58 = vpop.f32.mrf.mxu0  ;;  %v4185_v59 = vpop.f32.mrf.mxu1  ;;  %4277 = vmatprep.subr.mxu1 %v4451_v32  ;;  %4284 = vmatprep.subr.mxu0 %v4451_v32 }
 0x108   : > { %4278 = vmatpush3.msra.mxu1 %v4178_v58  ;;  %4285 = vmatpush3.msra.mxu0 %v4185_v59 }
 0x109   : > { %v1482_v60 = vpop.f32.mrf.mxu0  ;;  %v1563_v61 = vpop.f32.mrf.mxu1  ;;  %4279 = vmatprep.subr.mxu1 %v4451_v32  ;;  %4286 = vmatprep.subr.mxu0 %v4451_v32 }
 0x10a   : > { %4280 = vmatpush3.msra.mxu1 %v1482_v60  ;;  %4281 = vmatprep.mubr.msk.f32.mxu1 %vm4452_vm1, %v4451_v32 }
 0x10b   : > { %4287 = vmatpush3.msra.mxu0 %v1563_v61  ;;  %4288 = vmatprep.mubr.msk.f32.mxu0 %vm4452_vm1, %v4451_v32 }
 0x10c   : > { %v4192_v62 = vpop.f32.mrf.mxu0  ;;  %4282 = vmatmul.mubr.msk.f32.vlgmr.msra.gmra.mxu1 %vm437_vm0, %v4722_v35  ;;  %4289 = vmatmul.mubr.msk.f32.vlgmr.msra.gmra.mxu0 %vm437_vm0, %v4722_v35 }
 0x10d   : > { %4291 = vmatprep.subr.mxu1 %v4451_v32  ;;  %4298 = vmatprep.subr.mxu0 %v4451_v32 }
 0x10e   : > { %4292 = vmatpush3.msra.mxu1 %v4192_v62  ;;  %v1644_v63 = vpop.f32.mrf.mxu0  ;;  %4299 = vmatpush3.msra.mxu0 %v4562_v4 }
 0x10f   : > { %4293 = vmatprep.subr.mxu1 %v4451_v32  ;;  %4295 = vmatprep.mubr.msk.f32.mxu1 %vm4452_vm1, %v4451_v32 }
 0x110   : > { %4294 = vmatpush3.msra.mxu1 %v1644_v63  ;;  %4300 = vmatprep.subr.mxu0 %v4451_v32 }
 0x111   : > { %4296 = vmatmul.mubr.msk.f32.vlgmr.msra.gmra.mxu1 %vm437_vm0, %v4722_v35  ;;  %4301 = vmatpush3.msra.mxu0 %v4558_v2  ;;  %v4854_v2 = vld [vmem:[%s4997_s4] sm:$0xff] }
 0x112   : > { %4302 = vmatprep.mubr.msk.f32.mxu0 %vm4452_vm1, %v4451_v32  ;;  %4305 = vmatprep.subr.mxu1 %v4451_v32 }
 0x113   : > { %4303 = vmatmul.mubr.msk.f32.vlgmr.msra.gmra.mxu0 %vm437_vm0, %v4812_v0  ;;  %4306 = vmatpush3.msra.mxu1 %v4571_v5 }
 0x114   : > { %4312 = vmatprep.subr.mxu0 %v4451_v32  ;;  %4307 = vmatprep.subr.mxu1 %v4451_v32 }
 0x115   : > { %4313 = vmatpush3.msra.mxu0 %v4585_v8  ;;  %4308 = vmatpush3.msra.mxu1 %v4560_v3 }
 0x116   : > { %4309 = vmatprep.mubr.msk.f32.mxu1 %vm4452_vm1, %v4451_v32  ;;  %4314 = vmatprep.subr.mxu0 %v4451_v32 }
 0x117   : > { %4310 = vmatmul.mubr.msk.f32.vlgmr.msra.gmra.mxu1 %vm437_vm0, %v4812_v0  ;;  %4315 = vmatpush3.msra.mxu0 %v4577_v6 }
 0x118   : > { %4316 = vmatprep.mubr.msk.f32.mxu0 %vm4452_vm1, %v4451_v32  ;;  %4319 = vmatprep.subr.mxu1 %v4451_v32 }
 0x119   : > { %4317 = vmatmul.mubr.msk.f32.vlgmr.msra.gmra.mxu0 %vm437_vm0, %v4812_v0  ;;  %4323 = vmatprep.mubr.msk.f32.mxu1 %vm4452_vm1, %v4451_v32 }
 0x11a   : > { %4326 = vmatprep.subr.mxu0 %v4451_v32  ;;  %4330 = vmatprep.mubr.msk.f32.mxu0 %vm4452_vm1, %v4451_v32 }
 0x11b   : > { %4320 = vmatpush3.msra.mxu1 %v4846_v1  ;;  %4327 = vmatpush3.msra.mxu0 %v4846_v1 }
 0x11c   : > { %4321 = vmatprep.subr.mxu1 %v4451_v32  ;;  %4328 = vmatprep.subr.mxu0 %v4451_v32 }
 0x11d   : > { %4322 = vmatpush3.msra.mxu1 %v4854_v2  ;;  %4329 = vmatpush3.msra.mxu0 %v4854_v2 }
 0x11e   : > { %4333 = vmatprep.subr.mxu1 %v4451_v32  ;;  %4340 = vmatprep.subr.mxu0 %v4451_v32 }
 0x1a8   : > { %v1722_v3 = vpop.f32.mrf.mxu1  ;;  %v1792_v4 = vpop.f32.mrf.mxu0 }
 0x1a9   : > { %v2706_v25 = vmul.f32 %v1722_v3, %v1722_v3  ;;  %v2707_v37 = vmul.f32 %v1792_v4, %v1792_v4 }
 0x1aa   : > { %v4199_v5 = vpop.f32.mrf.mxu1  ;;  %v4206_v6 = vpop.f32.mrf.mxu0 }
 0x1ae   : > { %v4861_v8 = vpop.f32.mrf.mxu1  ;;  %v1932_v14 = vpop.f32.mrf.mxu0 }
 0x1af   : > { %v2709_v26 = vmul.f32 %v1932_v14, %v1932_v14  ;;  %v2708_v40 = vmul.f32 %v4861_v8, %v4861_v8  ;;  %v2712_v56 = vmul.f32 %v1932_v14, %v1722_v3 }
 0x1b0   : > { %v4213_v15 = vpop.f32.mrf.mxu1  ;;  %v4220_v16 = vpop.f32.mrf.mxu0 }
 0x1b1   : > { %v2756_v38 = vadd.f32 %v2709_v26, %v2706_v25 }
 0x1b3   : > { %v2759_v50 = vadd.f32 %v2756_v38, %v4867_v41 }
 0x1b4   : > { %v2002_v17 = vpop.f32.mrf.mxu1  ;;  %v2072_v18 = vpop.f32.mrf.mxu0 }
 0x1b5   : > { %v2710_v31 = vmul.f32 %v2002_v17, %v2002_v17  ;;  %v2711_v39 = vmul.f32 %v2072_v18, %v2072_v18  ;;  %v2713_v57 = vmul.f32 %v2002_v17, %v1792_v4  ;;  %v2768_v4 = vlaneseq }
 0x1b6   : > { %v4227_v19 = vpop.f32.mrf.mxu1  ;;  %v4234_v20 = vpop.f32.mrf.mxu0  ;;  %v2714_v14 = vmul.f32 %v2072_v18, %v4861_v8 }
 0x1b7   : > { %v2757_v43 = vadd.f32 %v2710_v31, %v2707_v37  ;;  %v2758_v51 = vadd.f32 %v2711_v39, %v2708_v40  ;;  %v2743_v19 = vmul.f32 2.0, %v2712_v56 }
 0x1b9   : > { %v2760_v58 = vadd.f32 %v2757_v43, %v4867_v41  ;;  %v2761_v61 = vadd.f32 %v2758_v51, %v4867_v41 }
 0x1ba   : > { %v2142_v21 = vpop.f32.mrf.mxu1  ;;  %v2212_v22 = vpop.f32.mrf.mxu0 }
 0x1bb   : > { %v2715_v29 = vsub.f32 %v2142_v21, %v2706_v25  ;;  %v2716_v44 = vsub.f32 %v2212_v22, %v2707_v37 }
 0x1bc   : > { %v4241_v23 = vpop.f32.mrf.mxu1  ;;  %v4248_v24 = vpop.f32.mrf.mxu0 }
 0x1bd   : > { %v2747_v23 = vadd.f32 %v4867_v41, %v2743_v19  ;;  %v2744_v24 = vmul.f32 2.0, %v2713_v57 }
 0x1c0   : > { %v2282_v27 = vpop.f32.mrf.mxu1  ;;  %v2352_v28 = vpop.f32.mrf.mxu0 }
 0x1c1   : > { %v2718_v30 = vsub.f32 %v2352_v28, %v2709_v26  ;;  %v2717_v47 = vsub.f32 %v2282_v27, %v2708_v40  ;;  %v4878_v27 = vshrl.u32 %v2768_v4, 7  ;;  %v4880_v28 = vand.u32 127, %v2768_v4 }
 0x1c2   : > { %v4255_v34 = vpop.f32.mrf.mxu1  ;;  %v4262_v35 = vpop.f32.mrf.mxu0 }
 0x1c3   : > { %v2731_v36 = vadd.f32 %v2718_v30, %v2715_v29  ;;  %v2745_v30 = vmul.f32 2.0, %v2714_v14  ;;  %vm2772_vm2 = vcmp.lt.s32.totalorder %v4878_v27, 6  ;;  %vm2773_vm3 = vcmp.lt.s32.totalorder %v4880_v28, 6 }
 0x1c4   : > { %vm4903_vm4 = vmand %vm2772_vm2, %vm2773_vm3  ;;  %vm3709_vm6 = vcmp.eq.s32.totalorder %v4880_v28, 1  ;;  %vm3704_vm7 = vcmp.eq.s32.totalorder %v4878_v27, 0  ;;  %vm3705_vm8 = vcmp.eq.s32.totalorder %v4880_v28, 0  ;;  %vm3714_vm9 = vcmp.eq.s32.totalorder %v4880_v28, 2 }
 0x1c5   : > { %v2734_v42 = vadd.f32 %v2731_v36, %v4863_v33  ;;  %v2748_v36 = vadd.f32 %v4867_v41, %v2744_v24  ;;  %vm3710_vm10 = vmand %vm3704_vm7, %vm3709_vm6  ;;  %vm3719_vm13 = vcmp.eq.s32.totalorder %v4880_v28, 3 }
 0x1c6   : > { %v2422_v45 = vpop.f32.mrf.mxu1  ;;  %v2492_v46 = vpop.f32.mrf.mxu0  ;;  %vm3706_vm11 = vmand %vm3704_vm7, %vm3705_vm8 }
 0x1c7   : > { %4411 = vrcp.f32 %v2734_v42  ;;  %v2719_v48 = vsub.f32 %v2422_v45, %v2710_v31  ;;  %v2720_v49 = vsub.f32 %v2492_v46, %v2711_v39  ;;  %v2749_v39 = vadd.f32 %v4867_v41, %v2745_v30  ;;  %vm3715_vm12 = vmand %vm3704_vm7, %vm3714_vm9 }
 0x1c8   : > { %v4269_v52 = vpop.f32.mrf.mxu1  ;;  %v4276_v53 = vpop.f32.mrf.mxu0  ;;  %4413 = vrcp.f32 %v2759_v50  ;;  %vm3720_vm14 = vmand %vm3704_vm7, %vm3719_vm13 }
 0x1c9   : > { %v2732_v54 = vadd.f32 %v2719_v48, %v2716_v44  ;;  %v2733_v55 = vadd.f32 %v2720_v49, %v2717_v47 }
 0x1cb   : > { %v2735_v59 = vadd.f32 %v2732_v54, %v4863_v33  ;;  %v2736_v60 = vadd.f32 %v2733_v55, %v4863_v33 }
 0x1cc   : > { %v2562_v62 = vpop.f32.mrf.mxu1  ;;  %v2632_v63 = vpop.f32.mrf.mxu0 }
 0x1cd   : > { %4415 = vrcp.f32 %v2735_v59  ;;  %v2721_v5 = vsub.f32 %v2562_v62, %v2712_v56  ;;  %v2722_v6 = vsub.f32 %v2632_v63, %v2713_v57 }
 0x1ce   : > { %4417 = vrcp.f32 %v2736_v60  ;;  %v4283_v15 = vpop.f32.mrf.mxu1  ;;  %v4290_v16 = vpop.f32.mrf.mxu0 }
 0x1cf   : > { %4419 = vrcp.f32 %v2760_v58  ;;  %v2724_v3 = vmul.f32 2.0, %v2721_v5  ;;  %v2725_v20 = vmul.f32 2.0, %v2722_v6 }
 0x1d0   : > { %4421 = vrcp.f32 %v2761_v61 }
 0x1d1   : > { %v2728_v17 = vadd.f32 %v4863_v33, %v2724_v3  ;;  %v2702_v21 = vpop.f32.mrf.mxu1  ;;  %v2729_v18 = vadd.f32 %v4863_v33, %v2725_v20 }
 0x1d2   : > { %v2723_v22 = vsub.f32 %v2702_v21, %v2714_v14 }
 0x1d3   : > { %v2877_v25 = vpop.f32.mrf.mxu0  ;;  %v4297_v26 = vpop.f32.mrf.mxu1  ;;  %v2750_v8 = vmul.f32 %v2747_v23, %v2728_v17 }
 0x1d4   : > { %v4412_v29 = vpop.eup %4411  ;;  %v2726_v31 = vmul.f32 2.0, %v2723_v22  ;;  %4324 = vmatmul.mubr.msk.f32.vlgmr.msra.gmra.mxu1 %vm437_vm0, %v2877_v25 }
 0x1d5   : > { %v4304_v34 = vpop.f32.mrf.mxu0  ;;  %4334 = vmatpush3.msra.mxu1 %v4846_v1  ;;  %4337 = vmatprep.mubr.msk.f32.mxu1 %vm4452_vm1, %v4451_v32  ;;  %v2753_v37 = vmul.f32 %v4412_v29, %v2750_v8  ;;  %v4414_v40 = vpop.eup %4413  ;;  %v2740_v51 = vmul.f32 %v4412_v29, %v2728_v17 }
 0x1d6   : > { %v2730_v35 = vadd.f32 %v4863_v33, %v2726_v31  ;;  %4335 = vmatprep.subr.mxu1 %v4451_v32  ;;  %v2751_v33 = vmul.f32 %v2748_v36, %v2729_v18 }
 0x1d7   : > { %v2947_v38 = vpop.f32.mrf.mxu1  ;;  %4336 = vmatpush3.msra.mxu1 %v4854_v2 }
 0x1d8   : > { %4331 = vmatmul.mubr.msk.f32.vlgmr.msra.gmra.mxu0 %vm437_vm0, %v2947_v38  ;;  %4347 = vmatprep.subr.mxu1 %v4451_v32  ;;  %v2752_v45 = vmul.f32 %v2749_v39, %v2730_v35 }
 0x1d9   : > { %v3017_v42 = vpop.f32.mrf.mxu0  ;;  %v4311_v43 = vpop.f32.mrf.mxu1  ;;  %4341 = vmatpush3.msra.mxu0 %v4587_v9  ;;  %4344 = vmatprep.mubr.msk.f32.mxu0 %vm4452_vm1, %v4451_v32  ;;  %v2765_v9 = vmul.f32 %v4414_v40, %v2753_v37 }
 0x1da   : > { %v4416_v44 = vpop.eup %4415  ;;  %4338 = vmatmul.mubr.msk.f32.vlgmr.msra.gmra.mxu1 %vm437_vm0, %v3017_v42  ;;  %4342 = vmatprep.subr.mxu0 %v4451_v32 }
 0x1db   : > { %v4418_v46 = vpop.eup %4417  ;;  %v2741_v47 = vmul.f32 %v4416_v44, %v2729_v18  ;;  %v2754_v48 = vmul.f32 %v4416_v44, %v2751_v33  ;;  %v4318_v49 = vpop.f32.mrf.mxu0  ;;  %4343 = vmatpush3.msra.mxu0 %v4581_v7  ;;  %4348 = vmatpush3.msra.mxu1 %v4609_v12  ;;  %v3930_v7 = vsel %vm4903_vm4, 1.0, %v4451_v32 }
 0x1dc   : > { %v4420_v50 = vpop.eup %4419  ;;  %4345 = vmatmul.mubr.msk.f32.vlgmr.msra.gmra.mxu0 %vm437_vm0, %v4812_v0  ;;  %4354 = vmatprep.subr.mxu0 %v4451_v32  ;;  %v2755_v52 = vmul.f32 %v4418_v46, %v2752_v45  ;;  %v2777_v55 = vmul.f32 %v3930_v7, %v2765_v9  ;;  %v2791_v57 = vmul.f32 %v3930_v7, %v2740_v51 }
 0x1dd   : > { %v4422_v53 = vpop.eup %4421  ;;  %4355 = vmatpush3.msra.mxu0 %v4611_v13  ;;  %4349 = vmatprep.subr.mxu1 %v4451_v32  ;;  %v2766_v54 = vmul.f32 %v4420_v50, %v2754_v48  ;;  %v2792_v13 = vmul.f32 %v3930_v7, %v2741_v47  ;;  %v2742_v58 = vmul.f32 %v4418_v46, %v2730_v35 }
 0x1de   : > { %4356 = vmatprep.subr.mxu0 %v4451_v32  ;;  %4350 = vmatpush3.msra.mxu1 %v4601_v10  ;;  %v2767_v12 = vmul.f32 %v4422_v53, %v2755_v52 }
 0x1df   : > { %4351 = vmatprep.mubr.msk.f32.mxu1 %vm4452_vm1, %v4451_v32  ;;  %4357 = vmatpush3.msra.mxu0 %v4605_v11  ;;  %v2778_v56 = vmul.f32 %v3930_v7, %v2766_v54  ;;  %v2794_v60 = vadd.f32 %v2792_v13, %v2791_v57 }
 0x1e0   : > { %4358 = vmatprep.mubr.msk.f32.mxu0 %vm4452_vm1, %v4451_v32  ;;  %4352 = vmatmul.mubr.msk.f32.vlgmr.msra.gmra.mxu1 %vm437_vm0, %v4812_v0  ;;  %v2779_v10 = vmul.f32 %v3930_v7, %v2767_v12 }
 0x1e1   : > { %4359 = vmatmul.mubr.msk.f32.vlgmr.msra.gmra.mxu0 %vm437_vm0, %v4812_v0  ;;  %v2780_v59 = vadd.f32 %v2778_v56, %v2777_v55  ;;  %4361 = vmatprep.subr.mxu1 %v4451_v32  ;;  %v2793_v0 = vmul.f32 %v3930_v7, %v2742_v58 }
 0x1e2   : > { %4362 = vmatpush3.msra.mxu1 %v4846_v1  ;;  %4365 = vmatprep.mubr.msk.f32.mxu1 %vm4452_vm1, %v4451_v32 }
 0x1e3   : > { %v2781_v11 = vadd.f32 %v2780_v59, %v2779_v10  ;;  %4363 = vmatprep.subr.mxu1 %v4451_v32  ;;  %4368 = vmatprep.subr.mxu0 %v4451_v32  ;;  %v2795_v61 = vadd.f32 %v2794_v60, %v2793_v0 }
 0x1e4   : > { %4364 = vmatpush3.msra.mxu1 %v4854_v2  ;;  %4369 = vmatpush3.msra.mxu0 %v4846_v1 }
 0x1e5   : > { %2782 = vadd.xlane.f32.xlu0 %v2781_v11  ;;  %4375 = vmatprep.subr.mxu1 %v4451_v32 }
 0x1e6   : > { %4370 = vmatprep.subr.mxu0 %v4451_v32  ;;  %4372 = vmatprep.mubr.msk.f32.mxu0 %vm4452_vm1, %v4451_v32 }
 0x1e7   : > { %4371 = vmatpush3.msra.mxu0 %v4854_v2 }
 0x1e9   : > { %2796 = vadd.xlane.f32.xlu0 %v2795_v61 }
 0x26e   : > { %v2783_v62 = vpop.xlane.xlu0 %2782 }
 0x26f   : > { %v2784_v63 = vrot.slane %v2783_v62, 4 }
 0x271   : > { %v2785_v5 = vadd.f32 %v2784_v63, %v2783_v62 }
 0x272   : > { %v2797_v6 = vpop.xlane.xlu0 %2796 }
 0x273   : > { %v2786_v15 = vrot.slane %v2785_v5, 2  ;;  %v2798_v16 = vrot.slane %v2797_v6, 4 }
 0x275   : > { %v2799_v19 = vadd.f32 %v2798_v16, %v2797_v6  ;;  %v2787_v3 = vadd.f32 %v2786_v15, %v2785_v5 }
 0x277   : > { %v2800_v4 = vrot.slane %v2799_v19, 2  ;;  %v2788_v14 = vrot.slane %v2787_v3, 1 }
 0x279   : > { %v2801_v17 = vadd.f32 %v2800_v4, %v2799_v19  ;;  %v2789_v20 = vadd.f32 %v2788_v14, %v2787_v3 }
 0x27b   : > { %4382 = vpush %v2789_v20  ;;  %v2802_v21 = vrot.slane %v2801_v17, 1 }
 0x27d   : > { %v2803_v22 = vadd.f32 %v2802_v21, %v2801_v17 }
 0x27f   : > { %4384 = vpush %v2803_v22 }
 0x294   : > { %v3090_v23 = vpop.f32.mrf.mxu1 }
 0x295   : > { %3670 = vst.msk [vmem:[%s394_s24] sm:$0xff] %vm3669_vm5, %v3090_v23  ;;  %v3676_v29 = vsel %vm3669_vm5, %v3090_v23, inf  ;;  %v3690_v34 = vsel %vm3669_vm5, %v3090_v23, -inf }
 0x296   : > { %v4325_v24 = vpop.f32.mrf.mxu1 }
 0x298   : > { %v3163_v25 = vpop.f32.mrf.mxu0 }
 0x299   : > { %3671 = vst.msk [vmem:[%s394_s24 + $0x8] sm:$0xff] %vm3669_vm5, %v3163_v25  ;;  %v3691_v26 = vsel %vm3669_vm5, %v3163_v25, -inf  ;;  %v3677_v30 = vsel %vm3669_vm5, %v3163_v25, inf }
 0x29a   : > { %v3236_v31 = vpop.f32.mrf.mxu1  ;;  %v4332_v8 = vpop.f32.mrf.mxu0  ;;  %v3679_v18 = vmin.f32 %v3676_v29, %v3677_v30  ;;  %v3693_v38 = vmax.f32 %v3690_v34, %v3691_v26 }
 0x29b   : > { %3672 = vst.msk [vmem:[%s394_s24 + $0x10] sm:$0xff] %vm3669_vm5, %v3236_v31  ;;  %v3678_v35 = vsel %vm3669_vm5, %v3236_v31, inf  ;;  %v3692_v40 = vsel %vm3669_vm5, %v3236_v31, -inf }
 0x29c   : > { %v4339_v36 = vpop.f32.mrf.mxu1  ;;  %v3680_v37 = vmin.f32 %v3679_v18, %v3678_v35  ;;  %v3306_v39 = vpop.f32.mrf.mxu0  ;;  %v3694_v42 = vmax.f32 %v3693_v38, %v3692_v40 }
 0x29d   : > { %4366 = vmatmul.mubr.msk.f32.vlgmr.msra.gmra.mxu1 %vm437_vm0, %v3306_v39 }
 0x29e   : > { %3681 = vmin.xlane.f32.xlu1 %v3680_v37  ;;  %v4346_v33 = vpop.f32.mrf.mxu0  ;;  %4376 = vmatpush3.msra.mxu1 %v4846_v1 }
 0x29f   : > { %4377 = vmatprep.subr.mxu1 %v4451_v32  ;;  %4379 = vmatprep.mubr.msk.f32.mxu1 %vm4452_vm1, %v4451_v32 }
 0x2a0   : > { %v3376_v43 = vpop.f32.mrf.mxu1  ;;  %4378 = vmatpush3.msra.mxu1 %v4854_v2 }
 0x2a1   : > { %v3446_v44 = vpop.f32.mrf.mxu0  ;;  %4373 = vmatmul.mubr.msk.f32.vlgmr.msra.gmra.mxu0 %vm437_vm0, %v3376_v43 }
 0x2a2   : > { %3695 = vmax.xlane.f32.xlu1 %v3694_v42  ;;  %4380 = vmatmul.mubr.msk.f32.vlgmr.msra.gmra.mxu1 %vm437_vm0, %v3446_v44  ;;  %v4353_v45 = vpop.f32.mrf.mxu1 }
 0x2a3   : > { %v4360_v41 = vpop.f32.mrf.mxu0 }
 0x2ac   : > { %s4383_s28 = spop %4382 }
 0x2ad   : > { %v3707_v10 = vstv %s4383_s28 }
 0x2ae   : > { %v3708_v0 = vsel %vm3706_vm11, %v3707_v10, 0.0 }
 0x2b0   : > { %s4385_s29 = spop %4384 }
 0x2b1   : > { %v3711_v13 = vstv %s4385_s29 }
 0x2b2   : > { %v3712_v11 = vsel %vm3710_vm10, %v3711_v13, 0.0 }
 0x2b3   : > { %v3713_v62 = vadd.f32 %v3712_v11, %v3708_v0 }
 0x327   : > { %v3682_v46 = vpop.xlane.xlu1 %3681 }
 0x328   : > { %v3683_v1 = vrot.slane %v3682_v46, 4 }
 0x32a   : > { %v3684_v47 = vmin.f32 %v3682_v46, %v3683_v1 }
 0x32b   : > { %v3696_v48 = vpop.xlane.xlu1 %3695 }
 0x32c   : > { %v3685_v49 = vrot.slane %v3684_v47, 2  ;;  %v3697_v9 = vrot.slane %v3696_v48, 4 }
 0x32e   : > { %v3698_v32 = vmax.f32 %v3696_v48, %v3697_v9  ;;  %v3686_v50 = vmin.f32 %v3684_v47, %v3685_v49 }
 0x330   : > { %v3699_v51 = vrot.slane %v3698_v32, 2  ;;  %v3687_v52 = vrot.slane %v3686_v50, 1 }
 0x332   : > { %v3700_v2 = vmax.f32 %v3698_v32, %v3699_v51  ;;  %v3688_v53 = vmin.f32 %v3686_v50, %v3687_v52 }
 0x334   : > { %4386 = vpush %v3688_v53  ;;  %v3701_v54 = vrot.slane %v3700_v2, 1 }
 0x336   : > { %v3702_v7 = vmax.f32 %v3700_v2, %v3701_v54 }
 0x338   : > { %4388 = vpush %v3702_v7 }
 0x35d   : > { %v3519_v12 = vpop.f32.mrf.mxu1 }
 0x35e   : > { %3673 = vst.msk [vmem:[%s400_s27] sm:$0xff] %vm3669_vm5, %v3519_v12 }
 0x35f   : > { %v4367_v55 = vpop.f32.mrf.mxu1 }
 0x361   : > { %v3592_v56 = vpop.f32.mrf.mxu0 }
 0x362   : > { %3674 = vst.msk [vmem:[%s400_s27 + $0x8] sm:$0xff] %vm3669_vm5, %v3592_v56  ;;  %v3665_v57 = vpop.f32.mrf.mxu1 }
 0x363   : > { %3675 = vst.msk [vmem:[%s400_s27 + $0x10] sm:$0xff] %vm3669_vm5, %v3665_v57  ;;  %v4374_v58 = vpop.f32.mrf.mxu0 }
 0x364   : > { %v4381_v59 = vpop.f32.mrf.mxu1 }
 0x365   : > { %s4387_s21 = spop %4386 }
 0x366   : > { %v3716_v60 = vstv %s4387_s21 }
 0x367   : > { %v3717_v61 = vsel %vm3715_vm12, %v3716_v60, 0.0 }
 0x368   : > { %v3718_v63 = vadd.f32 %v3717_v61, %v3713_v62 }
 0x369   : > { %s4389_s12 = spop %4388 }
 0x36a   : > { %v3721_v5 = vstv %s4389_s12 }
 0x36b   : > { %v3722_v6 = vsel %vm3720_vm14, %v3721_v5, 0.0 }
 0x36c   : > { %v3723_v15 = vadd.f32 %v3722_v6, %v3718_v63 }
 0x36e   : > { %3724 = vst [vmem:[%s389_s15] sm:$0xff] %v3723_v15 }
 0x36f PF: > { %s21_s30 = sadd.s32 1, %s4448_s30  }
 0x370   : > { %p18_p2 = scmp.ge.s32.totalorder %s21_s30, 4  }
 0x372   :  { %20 = sbr.rel (!%p18_p2) target bundleno = 1 (0x1), region = 110 }
 0x377   :  { %3778 = vsyncpa [#allocation3], 1 }
 0x378   :  { %3780 = vsyncpa [#allocation3 + $0x1], 1 }

// kernel: msssim_pallas.8
= control target key start
LH: loop header
LB: loop body
LE: loop exit
PB: predicated region body
PF: predicated region fallthrough
CT: control target
= control target key end

     0   :  { %15 = vsyncpa [#allocation3], 0  ;;  %s4306_s30 = smov 0   ;;  %s4727_s0 = inlined_call_operand.vmem [shape: f32[2], index: 0, kind: input, shape index: {}]   ;;  %s4728_s1 = inlined_call_operand.vmem [shape: f32[8,4], index: 1, kind: input, shape index: {}]   ;;  %s4729_s2 = inlined_call_operand.vmem [shape: f32[4,128], index: 2, kind: input, shape index: {}]   ;;  %s4730_s3 = inlined_call_operand.vmem [shape: f32[2,4], index: 3, kind: input, shape index: {}]   ;;  %s4731_s4 = inlined_call_operand.vmem [shape: f32[4,2], index: 4, kind: input, shape index: {}]   ;;  %s4732_s5 = inlined_call_operand.vmem [shape: f32[6,4,4], index: 5, kind: input, shape index: {}]   ;;  %s4733_s6 = inlined_call_operand.vmem [shape: f32[6,4,4], index: 6, kind: input, shape index: {}]   ;;  %s4734_s7 = inlined_call_operand.vmem [shape: f32[2,8,128], index: 7, kind: output, shape index: {0}]   ;;  %s4735_s8 = inlined_call_operand.vmem [shape: f32[6,2,2], index: 8, kind: output, shape index: {1}]   ;;  %s4736_s9 = inlined_call_operand.vmem [shape: f32[6,2,2], index: 9, kind: output, shape index: {2}]  }
   0x1 LB: > { %s4312_s10 = sadd.s32 4294967295, %s4251_s30   ;;  %p3793_p0 = scmp.ge.s32.totalorder %s4251_s30, 1  ;;  %s4251_s30 = sphi %s4306_s30, %s21_s30  }
   0x2   : > { %p261_p1 = scmp.lt.s32.totalorder %s4251_s30, 3  ;;  %s274_s13 = sshll.u32 %s4727_s0, 4  ;;  %s275_s13 = int_to_ptr.vmem [resolvable:$true] %s274_s13 }
   0x3   : > { %p4201_p3 = scmp.eq.s32.totalorder %s4312_s10, 0  ;;  %s4226_s15 = scalar_lea.vmem %s275_s13, 16 }
   0x4   : > { %p4319_p2 = pnand %p3793_p0, %p261_p1  ;;  %p4227_p6 = scmp.ne.s32.totalorder %s275_s13, %s4226_s15 }
   0x5   : > { %p4234_p10 = scmp.lt.s32.totalorder %s275_s13, %s275_s13  ;;  %p4235_p11 = scmp.lt.s32.totalorder %s4226_s15, %s4226_s15 }
   0x6   : > { %p4197_p4 = pneg %p4319_p2 }
   0x7   : > { %p4236_p12 = por %p4235_p11, %p4234_p10 }
   0x8   : > { %p4198_p5 = pnand %p4201_p3, %p4197_p4 }
   0xa   : > { %p4228_p7 = pneg %p4198_p5 }
   0xc   : > { %p4229_p8 = pnand %p4228_p7, %p4227_p6 }
   0xe   : > { %p4230_p9 = pneg %p4229_p8 }
  0x10   : > { %p4237_p13 = pnand %p4236_p12, %p4230_p9 }
  0x12   : > { %4240 = shalt.err (!%p4237_p13)
}
  0x13   : > { %s4253_s16 = smov [#allocation2]   ;;  %317 = sbr.rel (%p4319_p2) target bundleno = 861 (0x35d), region = 48 }
  0x14   : > { %4200 = dma.vmem_to_smem (!%p4198_p5), %s275_s13, 16, %s4253_s16, [#allocation3]  }
  0x18   : > { %4246 = dma.done.wait (%p4201_p3), [#allocation3], 16  }
  0x19   : > { %4248 = vsyncadd (%p4201_p3), [#allocation3], 4294967280 }
  0x1a   : > { %323 = sfence }
  0x1b   : > { %v4337_v0 = vld [vmem:[%s4729_s2] sm:$0xf]  ;;  %vm419_vm0 = vcmask 1043456   ;;  %s368_s19 = smul.u32 3, %s4312_s10  ;;  %v4254_v1 = vmov 0.0   ;;  %vm4255_vm1 = vmmov 0  }
  0x1c   : > { %3975 = vmatprep.subr.mxu0 %v4254_v1  ;;  %3980 = vmatprep.subr.mxu1 %v4254_v1  ;;  %vm415_vm2 = vcmask 31744   ;;  %v4484_v17 = vld [vmem:[%s4728_s1] sm:$0xff]  ;;  %s3803_s14 = sld [smem:[#allocation2 + $0x1]]  ;;  %vm3590_vm6 = vcmask 9216   ;;  %p380_p1 = scmp.lt.s32.totalorder %s4312_s10, 1 }
  0x1d   : > { %3976 = vmatpush3.msk.msra.mxu0 %vm419_vm0, %v4337_v0  ;;  %3977 = vmatprep.mubr.msk.f32.mxu0 %vm4255_vm1, %v4254_v1  ;;  %p369_p0 = scmp.lt.s32.totalorder %s368_s19, 5  ;;  %v4570_v46 = vld [vmem:[%s4730_s3] sm:$0x3]  ;;  %s402_s15 = sld [smem:[#allocation2]] }
  0x1e   : > { %3981 = vmatpush3.msk.msra.mxu1 %vm419_vm0, %v4337_v0  ;;  %3982 = vmatprep.mubr.msk.f32.mxu1 %vm4255_vm1, %v4254_v1  ;;  %v4605_v49 = vld [vmem:[%s4731_s4] sm:$0xf]  ;;  %s4741_s10 = smov (!%p380_p1, %s4312_s10), 1 }
  0x1f   : > { %s4739_s19 = smov (!%p369_p0, %s368_s19), 5  ;;  %3985 = vmatprep.subr.mxu0 %v4254_v1  ;;  %3990 = vmatprep.subr.mxu1 %v4254_v1 }
  0x20   : > { %s3798_s20 = sshll.u32 %s4739_s19, 2  ;;  %s3801_s16 = sshll.u32 %s4739_s19, 1 }
  0x21   : > { %s372_s23 = scalar_lea.vmem %s4732_s5, %s3798_s20  ;;  %s378_s26 = scalar_lea.vmem %s4733_s6, %s3798_s20 }
  0x22   : > { %v4361_v2 = vld [vmem:[%s372_s23] sm:$0xf]  ;;  %v4363_v3 = vld [vmem:[%s372_s23 + $0x4] sm:$0xf]  ;;  %v4373_v4 = vld [vmem:[%s372_s23 + $0x8] sm:$0xf]  ;;  %s388_s20 = scalar_lea.vmem %s4735_s8, %s3801_s16  ;;  %s394_s23 = scalar_lea.vmem %s4736_s9, %s3801_s16 }
  0x23   : > { %3978 = vmatmul.mubr.msk.f32.vlgmr.msra.gmra.mxu0 %vm415_vm2, %v4361_v2  ;;  %3983 = vmatmul.mubr.msk.f32.vlgmr.msra.gmra.mxu1 %vm415_vm2, %v4363_v3  ;;  %v4375_v5 = vld [vmem:[%s378_s26] sm:$0xf]  ;;  %v4391_v6 = vld [vmem:[%s378_s26 + $0x4] sm:$0xf]  ;;  %v4393_v7 = vld [vmem:[%s378_s26 + $0x8] sm:$0xf]  ;;  %v404_v8 = vmul.f32 %v4361_v2, %v4361_v2  ;;  %v405_v9 = vmul.f32 %v4363_v3, %v4363_v3  ;;  %v406_v10 = vmul.f32 %v4373_v4, %v4373_v4 }
  0x24   : > { %3986 = vmatpush3.msk.msra.mxu0 %vm419_vm0, %v4337_v0  ;;  %3987 = vmatprep.mubr.msk.f32.mxu0 %vm4255_vm1, %v4254_v1  ;;  %v407_v11 = vmul.f32 %v4375_v5, %v4375_v5  ;;  %v408_v12 = vmul.f32 %v4391_v6, %v4391_v6  ;;  %v409_v13 = vmul.f32 %v4393_v7, %v4393_v7  ;;  %s3800_s26 = sshll.u32 %s4741_s10, 3 }
  0x25   : > { %3991 = vmatpush3.msk.msra.mxu1 %vm419_vm0, %v4337_v0  ;;  %3992 = vmatprep.mubr.msk.f32.mxu1 %vm4255_vm1, %v4254_v1  ;;  %v410_v14 = vmul.f32 %v4375_v5, %v4361_v2  ;;  %v411_v15 = vmul.f32 %v4391_v6, %v4363_v3  ;;  %v412_v16 = vmul.f32 %v4393_v7, %v4373_v4  ;;  %s383_s11 = scalar_lea.vmem %s4734_s7, %s3800_s26 }
  0x26   : > { %3995 = vmatprep.subr.mxu0 %v4254_v1  ;;  %4000 = vmatprep.subr.mxu1 %v4254_v1 }
  0x27   : > { %3988 = vmatmul.mubr.msk.f32.vlgmr.msra.gmra.mxu0 %vm415_vm2, %v4373_v4  ;;  %3993 = vmatmul.mubr.msk.f32.vlgmr.msra.gmra.mxu1 %vm415_vm2, %v4375_v5 }
  0x28   : > { %3996 = vmatpush3.msk.msra.mxu0 %vm419_vm0, %v4337_v0  ;;  %3997 = vmatprep.mubr.msk.f32.mxu0 %vm4255_vm1, %v4254_v1 }
  0x29   : > { %4001 = vmatpush3.msk.msra.mxu1 %vm419_vm0, %v4337_v0  ;;  %4002 = vmatprep.mubr.msk.f32.mxu1 %vm4255_vm1, %v4254_v1 }
  0x2a   : > { %4005 = vmatprep.subr.mxu0 %v4254_v1  ;;  %4010 = vmatprep.subr.mxu1 %v4254_v1 }
  0x2b   : > { %3998 = vmatmul.mubr.msk.f32.vlgmr.msra.gmra.mxu0 %vm415_vm2, %v4391_v6  ;;  %4003 = vmatmul.mubr.msk.f32.vlgmr.msra.gmra.mxu1 %vm415_vm2, %v4393_v7 }
  0x2c   : > { %4006 = vmatpush3.msk.msra.mxu0 %vm419_vm0, %v4337_v0  ;;  %4007 = vmatprep.mubr.msk.f32.mxu0 %vm4255_vm1, %v4254_v1 }
  0x2d   : > { %4011 = vmatpush3.msk.msra.mxu1 %vm419_vm0, %v4337_v0  ;;  %4012 = vmatprep.mubr.msk.f32.mxu1 %vm4255_vm1, %v4254_v1 }
  0x2e   : > { %4015 = vmatprep.subr.mxu0 %v4254_v1  ;;  %4020 = vmatprep.subr.mxu1 %v4254_v1 }
  0x2f   : > { %4008 = vmatmul.mubr.msk.f32.vlgmr.msra.gmra.mxu0 %vm415_vm2, %v404_v8  ;;  %4013 = vmatmul.mubr.msk.f32.vlgmr.msra.gmra.mxu1 %vm415_vm2, %v405_v9 }
  0x30   : > { %4016 = vmatpush3.msk.msra.mxu0 %vm419_vm0, %v4337_v0  ;;  %4017 = vmatprep.mubr.msk.f32.mxu0 %vm4255_vm1, %v4254_v1 }
  0x31   : > { %4021 = vmatpush3.msk.msra.mxu1 %vm419_vm0, %v4337_v0  ;;  %4022 = vmatprep.mubr.msk.f32.mxu1 %vm4255_vm1, %v4254_v1 }
  0x32   : > { %4025 = vmatprep.subr.mxu0 %v4254_v1  ;;  %4030 = vmatprep.subr.mxu1 %v4254_v1 }
  0x33   : > { %4018 = vmatmul.mubr.msk.f32.vlgmr.msra.gmra.mxu0 %vm415_vm2, %v406_v10  ;;  %4023 = vmatmul.mubr.msk.f32.vlgmr.msra.gmra.mxu1 %vm415_vm2, %v407_v11 }
  0x34   : > { %4026 = vmatpush3.msk.msra.mxu0 %vm419_vm0, %v4337_v0  ;;  %4027 = vmatprep.mubr.msk.f32.mxu0 %vm4255_vm1, %v4254_v1 }
  0x35   : > { %4031 = vmatpush3.msk.msra.mxu1 %vm419_vm0, %v4337_v0  ;;  %4032 = vmatprep.mubr.msk.f32.mxu1 %vm4255_vm1, %v4254_v1 }
  0x36   : > { %4035 = vmatprep.subr.mxu0 %v4254_v1  ;;  %4040 = vmatprep.subr.mxu1 %v4254_v1 }
  0x37   : > { %4028 = vmatmul.mubr.msk.f32.vlgmr.msra.gmra.mxu0 %vm415_vm2, %v408_v12  ;;  %4033 = vmatmul.mubr.msk.f32.vlgmr.msra.gmra.mxu1 %vm415_vm2, %v409_v13 }
  0x38   : > { %4036 = vmatpush3.msk.msra.mxu0 %vm419_vm0, %v4337_v0  ;;  %4037 = vmatprep.mubr.msk.f32.mxu0 %vm4255_vm1, %v4254_v1 }
  0x39   : > { %4041 = vmatpush3.msk.msra.mxu1 %vm419_vm0, %v4337_v0  ;;  %4042 = vmatprep.mubr.msk.f32.mxu1 %vm4255_vm1, %v4254_v1 }
  0x3a   : > { %4045 = vmatprep.subr.mxu0 %v4254_v1  ;;  %4050 = vmatprep.subr.mxu1 %v4254_v1 }
  0x3b   : > { %4038 = vmatmul.mubr.msk.f32.vlgmr.msra.gmra.mxu0 %vm415_vm2, %v410_v14  ;;  %4043 = vmatmul.mubr.msk.f32.vlgmr.msra.gmra.mxu1 %vm415_vm2, %v411_v15 }
  0x3c   : > { %4046 = vmatpush3.msk.msra.mxu0 %vm419_vm0, %v4337_v0  ;;  %4047 = vmatprep.mubr.msk.f32.mxu0 %vm4255_vm1, %v4254_v1 }
  0x3d   : > { %4055 = vmatprep.subr.mxu0 %v4254_v1  ;;  %4052 = vmatprep.mubr.msk.f32.mxu1 %vm4255_vm1, %v4254_v1 }
  0x3f   : > { %4048 = vmatmul.mubr.msk.f32.vlgmr.msra.gmra.mxu0 %vm415_vm2, %v412_v16  ;;  %v4613_v16 = vstv %s3803_s14 }
  0x40   : > { %4057 = vmatprep.mubr.msk.f32.mxu0 %vm4255_vm1, %v4254_v1 }
  0xe3   : > { %v489_v18 = vpop.f32.mrf.mxu0  ;;  %v562_v19 = vpop.f32.mrf.mxu1 }
  0xe4   : > { %4051 = vmatpush3.msk.msra.mxu1 %vm419_vm0, %v489_v18  ;;  %4056 = vmatpush3.msk.msra.mxu0 %vm419_vm0, %v562_v19 }
  0xe5   : > { %v3979_v20 = vpop.f32.mrf.mxu0  ;;  %v3984_v21 = vpop.f32.mrf.mxu1  ;;  %4053 = vmatmul.mubr.msk.f32.vlgmr.msra.gmra.mxu1 %vm415_vm2, %v4484_v17  ;;  %4058 = vmatmul.mubr.msk.f32.vlgmr.msra.gmra.mxu0 %vm415_vm2, %v4484_v17 }
  0xe6   : > { %4060 = vmatprep.subr.mxu1 %v4254_v1  ;;  %4065 = vmatprep.subr.mxu0 %v4254_v1  ;;  %v4615_v20 = vstv %s402_s15 }
  0xe7   : > { %v635_v22 = vpop.f32.mrf.mxu0  ;;  %v708_v23 = vpop.f32.mrf.mxu1  ;;  %4062 = vmatprep.mubr.msk.f32.mxu1 %vm4255_vm1, %v4254_v1  ;;  %4067 = vmatprep.mubr.msk.f32.mxu0 %vm4255_vm1, %v4254_v1 }
  0xe8   : > { %4061 = vmatpush3.msk.msra.mxu1 %vm419_vm0, %v635_v22  ;;  %4066 = vmatpush3.msk.msra.mxu0 %vm419_vm0, %v708_v23 }
  0xe9   : > { %v3989_v24 = vpop.f32.mrf.mxu0  ;;  %v3994_v25 = vpop.f32.mrf.mxu1  ;;  %4063 = vmatmul.mubr.msk.f32.vlgmr.msra.gmra.mxu1 %vm415_vm2, %v4484_v17  ;;  %4068 = vmatmul.mubr.msk.f32.vlgmr.msra.gmra.mxu0 %vm415_vm2, %v4484_v17 }
  0xea   : > { %4070 = vmatprep.subr.mxu1 %v4254_v1  ;;  %4075 = vmatprep.subr.mxu0 %v4254_v1 }
  0xeb   : > { %v781_v26 = vpop.f32.mrf.mxu0  ;;  %v854_v27 = vpop.f32.mrf.mxu1  ;;  %4072 = vmatprep.mubr.msk.f32.mxu1 %vm4255_vm1, %v4254_v1  ;;  %4077 = vmatprep.mubr.msk.f32.mxu0 %vm4255_vm1, %v4254_v1 }
  0xec   : > { %4071 = vmatpush3.msk.msra.mxu1 %vm419_vm0, %v781_v26  ;;  %4076 = vmatpush3.msk.msra.mxu0 %vm419_vm0, %v854_v27 }
  0xed   : > { %v3999_v28 = vpop.f32.mrf.mxu0  ;;  %v4004_v29 = vpop.f32.mrf.mxu1  ;;  %4073 = vmatmul.mubr.msk.f32.vlgmr.msra.gmra.mxu1 %vm415_vm2, %v4484_v17  ;;  %4078 = vmatmul.mubr.msk.f32.vlgmr.msra.gmra.mxu0 %vm415_vm2, %v4484_v17 }
  0xee   : > { %4080 = vmatprep.subr.mxu1 %v4254_v1  ;;  %4085 = vmatprep.subr.mxu0 %v4254_v1 }
  0xef   : > { %v927_v30 = vpop.f32.mrf.mxu0  ;;  %v1000_v31 = vpop.f32.mrf.mxu1  ;;  %4082 = vmatprep.mubr.msk.f32.mxu1 %vm4255_vm1, %v4254_v1  ;;  %4087 = vmatprep.mubr.msk.f32.mxu0 %vm4255_vm1, %v4254_v1 }
  0xf0   : > { %4081 = vmatpush3.msk.msra.mxu1 %vm419_vm0, %v927_v30  ;;  %4086 = vmatpush3.msk.msra.mxu0 %vm419_vm0, %v1000_v31 }
  0xf1   : > { %v4009_v32 = vpop.f32.mrf.mxu0  ;;  %v4014_v33 = vpop.f32.mrf.mxu1  ;;  %4083 = vmatmul.mubr.msk.f32.vlgmr.msra.gmra.mxu1 %vm415_vm2, %v4484_v17  ;;  %4088 = vmatmul.mubr.msk.f32.vlgmr.msra.gmra.mxu0 %vm415_vm2, %v4484_v17 }
  0xf2   : > { %4090 = vmatprep.subr.mxu1 %v4254_v1  ;;  %4095 = vmatprep.subr.mxu0 %v4254_v1 }
  0xf3   : > { %v1073_v34 = vpop.f32.mrf.mxu0  ;;  %v1146_v35 = vpop.f32.mrf.mxu1  ;;  %4092 = vmatprep.mubr.msk.f32.mxu1 %vm4255_vm1, %v4254_v1  ;;  %4097 = vmatprep.mubr.msk.f32.mxu0 %vm4255_vm1, %v4254_v1 }
  0xf4   : > { %4091 = vmatpush3.msk.msra.mxu1 %vm419_vm0, %v1073_v34  ;;  %4096 = vmatpush3.msk.msra.mxu0 %vm419_vm0, %v1146_v35 }
  0xf5   : > { %v4019_v36 = vpop.f32.mrf.mxu0  ;;  %v4024_v37 = vpop.f32.mrf.mxu1  ;;  %4093 = vmatmul.mubr.msk.f32.vlgmr.msra.gmra.mxu1 %vm415_vm2, %v4484_v17  ;;  %4098 = vmatmul.mubr.msk.f32.vlgmr.msra.gmra.mxu0 %vm415_vm2, %v4484_v17 }
  0xf6   : > { %4100 = vmatprep.subr.mxu1 %v4254_v1  ;;  %4105 = vmatprep.subr.mxu0 %v4254_v1 }
  0xf7   : > { %v1219_v38 = vpop.f32.mrf.mxu0  ;;  %v1292_v39 = vpop.f32.mrf.mxu1  ;;  %4102 = vmatprep.mubr.msk.f32.mxu1 %vm4255_vm1, %v4254_v1  ;;  %4107 = vmatprep.mubr.msk.f32.mxu0 %vm4255_vm1, %v4254_v1 }
  0xf8   : > { %4101 = vmatpush3.msk.msra.mxu1 %vm419_vm0, %v1219_v38  ;;  %4106 = vmatpush3.msk.msra.mxu0 %vm419_vm0, %v1292_v39 }
  0xf9   : > { %v4029_v40 = vpop.f32.mrf.mxu0  ;;  %v4034_v41 = vpop.f32.mrf.mxu1  ;;  %4103 = vmatmul.mubr.msk.f32.vlgmr.msra.gmra.mxu1 %vm415_vm2, %v4484_v17  ;;  %4108 = vmatmul.mubr.msk.f32.vlgmr.msra.gmra.mxu0 %vm415_vm2, %v4484_v17 }
  0xfa   : > { %4110 = vmatprep.subr.mxu1 %v4254_v1  ;;  %4115 = vmatprep.subr.mxu0 %v4254_v1 }
  0xfb   : > { %v1365_v42 = vpop.f32.mrf.mxu0  ;;  %v1438_v43 = vpop.f32.mrf.mxu1  ;;  %4112 = vmatprep.mubr.msk.f32.mxu1 %vm4255_vm1, %v4254_v1  ;;  %4117 = vmatprep.mubr.msk.f32.mxu0 %vm4255_vm1, %v4254_v1 }
  0xfc   : > { %4111 = vmatpush3.msk.msra.mxu1 %vm419_vm0, %v1365_v42  ;;  %4116 = vmatpush3.msk.msra.mxu0 %vm419_vm0, %v1438_v43 }
  0xfd   : > { %v4039_v44 = vpop.f32.mrf.mxu0  ;;  %v4044_v45 = vpop.f32.mrf.mxu1  ;;  %4113 = vmatmul.mubr.msk.f32.vlgmr.msra.gmra.mxu1 %vm415_vm2, %v4484_v17  ;;  %4118 = vmatmul.mubr.msk.f32.vlgmr.msra.gmra.mxu0 %vm415_vm2, %v4484_v17 }
  0xfe   : > { %4120 = vmatprep.subr.mxu1 %v4254_v1  ;;  %4122 = vmatprep.mubr.msk.f32.mxu1 %vm4255_vm1, %v4254_v1 }
  0xff   : > { %v1511_v47 = vpop.f32.mrf.mxu0  ;;  %4125 = vmatprep.subr.mxu0 %v4254_v1  ;;  %4127 = vmatprep.mubr.msk.f32.mxu0 %vm4255_vm1, %v4254_v1 }
 0x100   : > { %4121 = vmatpush3.msk.msra.mxu1 %vm419_vm0, %v1511_v47  ;;  %4126 = vmatpush3.msk.msra.mxu0 %vm419_vm0, %v4361_v2 }
 0x101   : > { %v4049_v48 = vpop.f32.mrf.mxu0  ;;  %4123 = vmatmul.mubr.msk.f32.vlgmr.msra.gmra.mxu1 %vm415_vm2, %v4484_v17  ;;  %4128 = vmatmul.mubr.msk.f32.vlgmr.msra.gmra.mxu0 %vm415_vm2, %v4570_v46 }
 0x102   : > { %4130 = vmatprep.subr.mxu1 %v4254_v1  ;;  %4132 = vmatprep.mubr.msk.f32.mxu1 %vm4255_vm1, %v4254_v1 }
 0x103   : > { %4131 = vmatpush3.msk.msra.mxu1 %vm419_vm0, %v4363_v3  ;;  %4135 = vmatprep.subr.mxu0 %v4254_v1 }
 0x104   : > { %4136 = vmatpush3.msk.msra.mxu0 %vm419_vm0, %v4373_v4  ;;  %4137 = vmatprep.mubr.msk.f32.mxu0 %vm4255_vm1, %v4254_v1 }
 0x105   : > { %4133 = vmatmul.mubr.msk.f32.vlgmr.msra.gmra.mxu1 %vm415_vm2, %v4570_v46  ;;  %4138 = vmatmul.mubr.msk.f32.vlgmr.msra.gmra.mxu0 %vm415_vm2, %v4570_v46 }
 0x106   : > { %4140 = vmatprep.subr.mxu1 %v4254_v1  ;;  %4142 = vmatprep.mubr.msk.f32.mxu1 %vm4255_vm1, %v4254_v1 }
 0x107   : > { %4145 = vmatprep.subr.mxu0 %v4254_v1  ;;  %4147 = vmatprep.mubr.msk.f32.mxu0 %vm4255_vm1, %v4254_v1 }
 0x108   : > { %4141 = vmatpush3.msk.msra.mxu1 %vm419_vm0, %v4605_v49  ;;  %4146 = vmatpush3.msk.msra.mxu0 %vm419_vm0, %v4605_v49 }
 0x109   : > { %4150 = vmatprep.subr.mxu1 %v4254_v1  ;;  %4155 = vmatprep.subr.mxu0 %v4254_v1 }
 0x1a5   : > { %v1587_v50 = vpop.f32.mrf.mxu1  ;;  %v1660_v51 = vpop.f32.mrf.mxu0 }
 0x1a6   : > { %v2613_v4 = vmul.f32 %v1587_v50, %v1587_v50  ;;  %v2614_v13 = vmul.f32 %v1660_v51, %v1660_v51 }
 0x1a7   : > { %v4054_v52 = vpop.f32.mrf.mxu1  ;;  %v4059_v53 = vpop.f32.mrf.mxu0 }
 0x1a9   : > { %v1733_v54 = vpop.f32.mrf.mxu1  ;;  %v1806_v55 = vpop.f32.mrf.mxu0 }
 0x1aa   : > { %v2616_v0 = vmul.f32 %v1806_v55, %v1806_v55  ;;  %v2615_v19 = vmul.f32 %v1733_v54, %v1733_v54  ;;  %v2619_v34 = vmul.f32 %v1806_v55, %v1587_v50 }
 0x1ab   : > { %v4064_v56 = vpop.f32.mrf.mxu1  ;;  %v4069_v57 = vpop.f32.mrf.mxu0 }
 0x1ac   : > { %v2663_v14 = vadd.f32 %v2616_v0, %v2613_v4  ;;  %v2650_v55 = vmul.f32 2.0, %v2619_v34 }
 0x1ad   : > { %v1879_v58 = vpop.f32.mrf.mxu1  ;;  %v1952_v59 = vpop.f32.mrf.mxu0 }
 0x1ae   : > { %v2617_v8 = vmul.f32 %v1879_v58, %v1879_v58  ;;  %v2618_v15 = vmul.f32 %v1952_v59, %v1952_v59  ;;  %v2666_v30 = vadd.f32 %v2663_v14, %v4615_v20  ;;  %v2620_v37 = vmul.f32 %v1879_v58, %v1660_v51 }
 0x1af   : > { %v4074_v60 = vpop.f32.mrf.mxu1  ;;  %v4079_v61 = vpop.f32.mrf.mxu0  ;;  %v2621_v48 = vmul.f32 %v1952_v59, %v1733_v54  ;;  %v2675_v54 = vlaneseq }
 0x1b0   : > { %v2664_v22 = vadd.f32 %v2617_v8, %v2614_v13  ;;  %v2665_v31 = vadd.f32 %v2618_v15, %v2615_v19 }
 0x1b1   : > { %v2025_v62 = vpop.f32.mrf.mxu1  ;;  %v2098_v63 = vpop.f32.mrf.mxu0 }
 0x1b2   : > { %v2622_v11 = vsub.f32 %v2025_v62, %v2613_v4  ;;  %v2623_v23 = vsub.f32 %v2098_v63, %v2614_v13  ;;  %v2667_v40 = vadd.f32 %v2664_v22, %v4615_v20  ;;  %v2668_v44 = vadd.f32 %v2665_v31, %v4615_v20 }
 0x1b3   : > { %v4084_v2 = vpop.f32.mrf.mxu1  ;;  %v4089_v3 = vpop.f32.mrf.mxu0 }
 0x1b4   : > { %v2651_v2 = vmul.f32 2.0, %v2620_v37  ;;  %v2652_v3 = vmul.f32 2.0, %v2621_v48 }
 0x1b5   : > { %v2171_v9 = vpop.f32.mrf.mxu1  ;;  %v2244_v10 = vpop.f32.mrf.mxu0 }
 0x1b6   : > { %v2625_v12 = vsub.f32 %v2244_v10, %v2616_v0  ;;  %v2624_v26 = vsub.f32 %v2171_v9, %v2615_v19  ;;  %v2654_v0 = vadd.f32 %v4615_v20, %v2650_v55  ;;  %v4637_v9 = vshrl.u32 %v2675_v54, 7 }
 0x1b7   : > { %v4094_v17 = vpop.f32.mrf.mxu1  ;;  %v4099_v18 = vpop.f32.mrf.mxu0  ;;  %v4639_v10 = vand.u32 127, %v2675_v54 }
 0x1b8   : > { %v2638_v21 = vadd.f32 %v2625_v12, %v2622_v11  ;;  %v2656_v17 = vadd.f32 %v4615_v20, %v2652_v3  ;;  %vm2679_vm3 = vcmp.lt.s32.totalorder %v4637_v9, 1  ;;  %vm3625_vm8 = vcmp.eq.s32.totalorder %v4637_v9, 0 }
 0x1b9   : > { %v2317_v24 = vpop.f32.mrf.mxu1  ;;  %v2390_v25 = vpop.f32.mrf.mxu0  ;;  %vm2680_vm4 = vcmp.lt.s32.totalorder %v4639_v10, 1  ;;  %vm3630_vm7 = vcmp.eq.s32.totalorder %v4639_v10, 1  ;;  %vm3626_vm9 = vcmp.eq.s32.totalorder %v4639_v10, 0  ;;  %vm3635_vm10 = vcmp.eq.s32.totalorder %v4639_v10, 2 }
 0x1ba   : > { %v2641_v27 = vadd.f32 %v2638_v21, %v4613_v16  ;;  %v2626_v28 = vsub.f32 %v2317_v24, %v2617_v8  ;;  %v2627_v29 = vsub.f32 %v2390_v25, %v2618_v15  ;;  %vm2681_vm5 = vmand %vm2679_vm3, %vm2680_vm4  ;;  %vm3640_vm14 = vcmp.eq.s32.totalorder %v4639_v10, 3 }
 0x1bb   : > { %v4104_v32 = vpop.f32.mrf.mxu1  ;;  %v4109_v33 = vpop.f32.mrf.mxu0  ;;  %vm3631_vm11 = vmand %vm3625_vm8, %vm3630_vm7 }
 0x1bc   : > { %4214 = vrcp.f32 %v2641_v27  ;;  %v2639_v35 = vadd.f32 %v2626_v28, %v2623_v23  ;;  %v2640_v36 = vadd.f32 %v2627_v29, %v2624_v26  ;;  %v3864_v29 = vsel %vm2681_vm5, 1.0, %v4254_v1  ;;  %vm3627_vm12 = vmand %vm3625_vm8, %vm3626_vm9 }
 0x1bd   : > { %v2463_v38 = vpop.f32.mrf.mxu1  ;;  %v2536_v39 = vpop.f32.mrf.mxu0  ;;  %4216 = vrcp.f32 %v2666_v30  ;;  %vm3636_vm13 = vmand %vm3625_vm8, %vm3635_vm10 }
 0x1be   : > { %v2642_v41 = vadd.f32 %v2639_v35, %v4613_v16  ;;  %v2643_v42 = vadd.f32 %v2640_v36, %v4613_v16  ;;  %v2628_v43 = vsub.f32 %v2463_v38, %v2619_v34  ;;  %v2629_v52 = vsub.f32 %v2536_v39, %v2620_v37  ;;  %vm3641_vm15 = vmand %vm3625_vm8, %vm3640_vm14 }
 0x1bf   : > { %v4114_v45 = vpop.f32.mrf.mxu1  ;;  %v4119_v47 = vpop.f32.mrf.mxu0 }
 0x1c0   : > { %4218 = vrcp.f32 %v2642_v41  ;;  %v2631_v50 = vmul.f32 2.0, %v2628_v43  ;;  %v2632_v60 = vmul.f32 2.0, %v2629_v52 }
 0x1c1   : > { %4220 = vrcp.f32 %v2643_v42  ;;  %v2609_v51 = vpop.f32.mrf.mxu1  ;;  %v2785_v53 = vpop.f32.mrf.mxu0 }
 0x1c2   : > { %4222 = vrcp.f32 %v2667_v40  ;;  %v2630_v56 = vsub.f32 %v2609_v51, %v2621_v48  ;;  %4143 = vmatmul.mubr.msk.f32.vlgmr.msra.gmra.mxu1 %vm415_vm2, %v2785_v53  ;;  %v2635_v59 = vadd.f32 %v4613_v16, %v2631_v50  ;;  %v2636_v12 = vadd.f32 %v4613_v16, %v2632_v60 }
 0x1c3   : > { %4224 = vrcp.f32 %v2668_v44  ;;  %v4124_v57 = vpop.f32.mrf.mxu1  ;;  %v4129_v58 = vpop.f32.mrf.mxu0  ;;  %4151 = vmatpush3.msk.msra.mxu1 %vm419_vm0, %v4605_v49  ;;  %4152 = vmatprep.mubr.msk.f32.mxu1 %vm4255_vm1, %v4254_v1 }
 0x1c4   : > { %4160 = vmatprep.subr.mxu1 %v4254_v1  ;;  %v2633_v61 = vmul.f32 2.0, %v2630_v56  ;;  %v2657_v11 = vmul.f32 %v2654_v0, %v2635_v59 }
 0x1c5   : > { %v2857_v62 = vpop.f32.mrf.mxu1  ;;  %v2929_v63 = vpop.f32.mrf.mxu0 }
 0x1c6   : > { %4148 = vmatmul.mubr.msk.f32.vlgmr.msra.gmra.mxu0 %vm415_vm2, %v2857_v62  ;;  %4153 = vmatmul.mubr.msk.f32.vlgmr.msra.gmra.mxu1 %vm415_vm2, %v2929_v63  ;;  %v2637_v14 = vadd.f32 %v4613_v16, %v2633_v61 }
 0x1c7   : > { %v4134_v4 = vpop.f32.mrf.mxu1  ;;  %v4139_v8 = vpop.f32.mrf.mxu0  ;;  %4156 = vmatpush3.msk.msra.mxu0 %vm419_vm0, %v4375_v5  ;;  %4157 = vmatprep.mubr.msk.f32.mxu0 %vm4255_vm1, %v4254_v1  ;;  %v2655_v5 = vadd.f32 %v4615_v20, %v2651_v2 }
 0x1c8   : > { %4165 = vmatprep.subr.mxu0 %v4254_v1  ;;  %4161 = vmatpush3.msk.msra.mxu1 %vm419_vm0, %v4391_v6  ;;  %v2659_v19 = vmul.f32 %v2656_v17, %v2637_v14 }
 0x1c9   : > { %v4215_v13 = vpop.eup %4214  ;;  %4162 = vmatprep.mubr.msk.f32.mxu1 %vm4255_vm1, %v4254_v1  ;;  %4170 = vmatprep.subr.mxu1 %v4254_v1  ;;  %v2658_v16 = vmul.f32 %v2655_v5, %v2636_v12 }
 0x1ca   : > { %v2660_v15 = vmul.f32 %v4215_v13, %v2657_v11  ;;  %4158 = vmatmul.mubr.msk.f32.vlgmr.msra.gmra.mxu0 %vm415_vm2, %v4570_v46  ;;  %4163 = vmatmul.mubr.msk.f32.vlgmr.msra.gmra.mxu1 %vm415_vm2, %v4570_v46  ;;  %v4217_v6 = vpop.eup %4216  ;;  %v2647_v26 = vmul.f32 %v4215_v13, %v2635_v59 }
 0x1cb   : > { %4166 = vmatpush3.msk.msra.mxu0 %vm419_vm0, %v4393_v7  ;;  %4167 = vmatprep.mubr.msk.f32.mxu0 %vm4255_vm1, %v4254_v1 }
 0x1cc   : > { %4171 = vmatpush3.msk.msra.mxu1 %vm419_vm0, %v4605_v49  ;;  %4172 = vmatprep.mubr.msk.f32.mxu1 %vm4255_vm1, %v4254_v1  ;;  %v2672_v22 = vmul.f32 %v4217_v6, %v2660_v15  ;;  %v2698_v35 = vmul.f32 %v3864_v29, %v2647_v26 }
 0x1cd   : > { %v4219_v18 = vpop.eup %4218  ;;  %4175 = vmatprep.subr.mxu0 %v4254_v1  ;;  %4180 = vmatprep.subr.mxu1 %v4254_v1 }
 0x1ce   : > { %v4221_v7 = vpop.eup %4220  ;;  %v2648_v20 = vmul.f32 %v4219_v18, %v2636_v12  ;;  %v2661_v21 = vmul.f32 %v4219_v18, %v2658_v16  ;;  %4168 = vmatmul.mubr.msk.f32.vlgmr.msra.gmra.mxu0 %vm415_vm2, %v4570_v46  ;;  %v2684_v30 = vmul.f32 %v3864_v29, %v2672_v22 }
 0x1cf   : > { %v4223_v23 = vpop.eup %4222  ;;  %v2662_v24 = vmul.f32 %v4221_v7, %v2659_v19  ;;  %4176 = vmatpush3.msk.msra.mxu0 %vm419_vm0, %v4605_v49  ;;  %4177 = vmatprep.mubr.msk.f32.mxu0 %vm4255_vm1, %v4254_v1  ;;  %v2649_v33 = vmul.f32 %v4221_v7, %v2637_v14 }
 0x1d0   : > { %v4225_v25 = vpop.eup %4224  ;;  %v2673_v27 = vmul.f32 %v4223_v23, %v2661_v21  ;;  %v2699_v32 = vmul.f32 %v3864_v29, %v2648_v20 }
 0x1d1   : > { %v2674_v28 = vmul.f32 %v4225_v25, %v2662_v24  ;;  %v2700_v38 = vmul.f32 %v3864_v29, %v2649_v33 }
 0x1d2   : > { %v2685_v31 = vmul.f32 %v3864_v29, %v2673_v27  ;;  %v2701_v37 = vadd.f32 %v2699_v32, %v2698_v35 }
 0x1d3   : > { %v2686_v34 = vmul.f32 %v3864_v29, %v2674_v28 }
 0x1d4   : > { %v2687_v46 = vadd.f32 %v2685_v31, %v2684_v30  ;;  %v2702_v39 = vadd.f32 %v2701_v37, %v2700_v38 }
 0x1d6   : > { %v2688_v36 = vadd.f32 %v2687_v46, %v2686_v34 }
 0x1d8   : > { %2689 = vadd.xlane.f32.xlu0 %v2688_v36 }
 0x1dc   : > { %2703 = vadd.xlane.f32.xlu0 %v2702_v39 }
 0x261   : > { %v2690_v40 = vpop.xlane.xlu0 %2689 }
 0x262   : > { %v2691_v41 = vrot.slane %v2690_v40, 4 }
 0x264   : > { %v2692_v42 = vadd.f32 %v2691_v41, %v2690_v40 }
 0x265   : > { %v2704_v43 = vpop.xlane.xlu0 %2703 }
 0x266   : > { %v2693_v44 = vrot.slane %v2692_v42, 2  ;;  %v2705_v45 = vrot.slane %v2704_v43, 4 }
 0x268   : > { %v2706_v47 = vadd.f32 %v2705_v45, %v2704_v43  ;;  %v2694_v48 = vadd.f32 %v2693_v44, %v2692_v42 }
 0x26a   : > { %v2707_v50 = vrot.slane %v2706_v47, 2  ;;  %v2695_v52 = vrot.slane %v2694_v48, 1 }
 0x26c   : > { %v2708_v51 = vadd.f32 %v2707_v50, %v2706_v47  ;;  %v2696_v53 = vadd.f32 %v2695_v52, %v2694_v48 }
 0x26e   : > { %4185 = vpush %v2696_v53  ;;  %v2709_v55 = vrot.slane %v2708_v51, 1 }
 0x270   : > { %v2710_v56 = vadd.f32 %v2709_v55, %v2708_v51 }
 0x272   : > { %4187 = vpush %v2710_v56 }
 0x282   : > { %v3005_v57 = vpop.f32.mrf.mxu1 }
 0x283   : > { %3591 = vst.msk [vmem:[%s388_s20] sm:$0x3] %vm3590_vm6, %v3005_v57  ;;  %v3597_v61 = vsel %vm3590_vm6, %v3005_v57, inf  ;;  %v3611_v4 = vsel %vm3590_vm6, %v3005_v57, -inf }
 0x284   : > { %v4144_v58 = vpop.f32.mrf.mxu1 }
 0x286   : > { %v3078_v54 = vpop.f32.mrf.mxu0  ;;  %v3151_v59 = vpop.f32.mrf.mxu1 }
 0x287   : > { %3592 = vst.msk [vmem:[%s388_s20 + $0x2] sm:$0x3] %vm3590_vm6, %v3078_v54  ;;  %v3612_v60 = vsel %vm3590_vm6, %v3078_v54, -inf  ;;  %3593 = vst.msk [vmem:[%s388_s20 + $0x4] sm:$0x3] %vm3590_vm6, %v3151_v59  ;;  %v3598_v62 = vsel %vm3590_vm6, %v3078_v54, inf }
 0x288   : > { %v3599_v63 = vsel %vm3590_vm6, %v3151_v59, inf  ;;  %v4149_v0 = vpop.f32.mrf.mxu0  ;;  %v4154_v2 = vpop.f32.mrf.mxu1  ;;  %v3600_v3 = vmin.f32 %v3597_v61, %v3598_v62  ;;  %v3614_v11 = vmax.f32 %v3611_v4, %v3612_v60  ;;  %v3613_v14 = vsel %vm3590_vm6, %v3151_v59, -inf }
 0x28a   : > { %v3601_v8 = vmin.f32 %v3600_v3, %v3599_v63  ;;  %v3223_v12 = vpop.f32.mrf.mxu0  ;;  %v3295_v13 = vpop.f32.mrf.mxu1  ;;  %v3615_v17 = vmax.f32 %v3614_v11, %v3613_v14 }
 0x28b   : > { %4173 = vmatmul.mubr.msk.f32.vlgmr.msra.gmra.mxu1 %vm415_vm2, %v3223_v12  ;;  %4178 = vmatmul.mubr.msk.f32.vlgmr.msra.gmra.mxu0 %vm415_vm2, %v3295_v13 }
 0x28c   : > { %3602 = vmin.xlane.f32.xlu1 %v3601_v8  ;;  %v4159_v5 = vpop.f32.mrf.mxu0  ;;  %4181 = vmatpush3.msk.msra.mxu1 %vm419_vm0, %v4605_v49  ;;  %v4164_v15 = vpop.f32.mrf.mxu1 }
 0x28d   : > { %4182 = vmatprep.mubr.msk.f32.mxu1 %vm4255_vm1, %v4254_v1 }
 0x28e   : > { %v3367_v6 = vpop.f32.mrf.mxu0 }
 0x28f   : > { %4183 = vmatmul.mubr.msk.f32.vlgmr.msra.gmra.mxu1 %vm415_vm2, %v3367_v6 }
 0x290   : > { %3616 = vmax.xlane.f32.xlu1 %v3615_v17  ;;  %v4169_v16 = vpop.f32.mrf.mxu0 }
 0x29f   : > { %s4186_s24 = spop %4185 }
 0x2a0   : > { %v3628_v35 = vstv %s4186_s24 }
 0x2a1   : > { %v3629_v38 = vsel %vm3627_vm12, %v3628_v35, 0.0 }
 0x2a3   : > { %s4188_s25 = spop %4187 }
 0x2a4   : > { %v3632_v34 = vstv %s4188_s25 }
 0x2a5   : > { %v3633_v36 = vsel %vm3631_vm11, %v3632_v34, 0.0 }
 0x2a6   : > { %v3634_v40 = vadd.f32 %v3633_v36, %v3629_v38 }
 0x315   : > { %v3603_v18 = vpop.xlane.xlu1 %3602 }
 0x316   : > { %v3604_v19 = vrot.slane %v3603_v18, 4 }
 0x318   : > { %v3605_v7 = vmin.f32 %v3603_v18, %v3604_v19 }
 0x319   : > { %v3617_v20 = vpop.xlane.xlu1 %3616 }
 0x31a   : > { %v3606_v21 = vrot.slane %v3605_v7, 2  ;;  %v3618_v22 = vrot.slane %v3617_v20, 4 }
 0x31c   : > { %v3619_v23 = vmax.f32 %v3617_v20, %v3618_v22  ;;  %v3607_v24 = vmin.f32 %v3605_v7, %v3606_v21 }
 0x31e   : > { %v3620_v49 = vrot.slane %v3619_v23, 2  ;;  %v3608_v25 = vrot.slane %v3607_v24, 1 }
 0x320   : > { %v3621_v26 = vmax.f32 %v3619_v23, %v3620_v49  ;;  %v3609_v27 = vmin.f32 %v3607_v24, %v3608_v25 }
 0x322   : > { %4189 = vpush %v3609_v27  ;;  %v3622_v1 = vrot.slane %v3621_v26, 1 }
 0x324   : > { %v3623_v28 = vmax.f32 %v3621_v26, %v3622_v1 }
 0x326   : > { %4191 = vpush %v3623_v28 }
 0x34b   : > { %v3440_v29 = vpop.f32.mrf.mxu1  ;;  %v3513_v30 = vpop.f32.mrf.mxu0 }
 0x34c   : > { %3594 = vst.msk [vmem:[%s394_s23] sm:$0x3] %vm3590_vm6, %v3440_v29  ;;  %3595 = vst.msk [vmem:[%s394_s23 + $0x2] sm:$0x3] %vm3590_vm6, %v3513_v30 }
 0x34d   : > { %v4174_v31 = vpop.f32.mrf.mxu1  ;;  %v4179_v32 = vpop.f32.mrf.mxu0 }
 0x34f   : > { %v3586_v33 = vpop.f32.mrf.mxu1 }
 0x350   : > { %3596 = vst.msk [vmem:[%s394_s23 + $0x4] sm:$0x3] %vm3590_vm6, %v3586_v33 }
 0x351   : > { %v4184_v46 = vpop.f32.mrf.mxu1 }
 0x353   : > { %s4190_s19 = spop %4189 }
 0x354   : > { %v3637_v37 = vstv %s4190_s19 }
 0x355   : > { %v3638_v39 = vsel %vm3636_vm13, %v3637_v37, 0.0 }
 0x356   : > { %v3639_v41 = vadd.f32 %v3638_v39, %v3634_v40 }
 0x357   : > { %s4192_s27 = spop %4191 }
 0x358   : > { %v3642_v42 = vstv %s4192_s27 }
 0x359   : > { %v3643_v43 = vsel %vm3641_vm15, %v3642_v42, 0.0 }
 0x35a   : > { %v3644_v44 = vadd.f32 %v3643_v43, %v3639_v41 }
 0x35c   : > { %3645 = vst [vmem:[%s383_s11] sm:$0xff] %v3644_v44 }
 0x35d PF: > { %s21_s30 = sadd.s32 1, %s4251_s30  }
 0x35e   : > { %p18_p2 = scmp.ge.s32.totalorder %s21_s30, 4  }
 0x360   :  { %20 = sbr.rel (!%p18_p2) target bundleno = 1 (0x1), region = 110 }
 0x365   :  { %3699 = vsyncpa [#allocation3], 1 }
 0x366   :  { %3701 = vsyncpa [#allocation3 + $0x1], 1 }

// kernel: msssim_pallas.5
= control target key start
LH: loop header
LB: loop body
LE: loop exit
PB: predicated region body
PF: predicated region fallthrough
CT: control target
= control target key end

     0   :  { %s7168_s0 = inlined_call_operand.vmem [shape: f32[2], index: 0, kind: input, shape index: {}]   ;;  %s7169_s1 = inlined_call_operand.hbm [shape: f32[24,32], index: 1, kind: input, shape index: {}]   ;;  %s7170_s2 = inlined_call_operand.vmem [shape: f32[32,128], index: 2, kind: input, shape index: {}]   ;;  %s7171_s3 = inlined_call_operand.vmem [shape: f32[16,32], index: 3, kind: input, shape index: {}]   ;;  %s7172_s4 = inlined_call_operand.vmem [shape: f32[32,16], index: 4, kind: input, shape index: {}]   ;;  %s7173_s5 = inlined_call_operand.vmem [shape: f32[6,32,32], index: 5, kind: input, shape index: {}]   ;;  %s7174_s6 = inlined_call_operand.hbm [shape: f32[6,32,32], index: 6, kind: input, shape index: {}]   ;;  %s7175_s7 = inlined_call_operand.vmem [shape: f32[2,8,128], index: 7, kind: output, shape index: {0}]   ;;  %s7176_s8 = inlined_call_operand.vmem [shape: f32[6,16,16], index: 8, kind: output, shape index: {1}]   ;;  %s7177_s9 = inlined_call_operand.vmem [shape: f32[6,16,16], index: 9, kind: output, shape index: {2}]  }
   0x1   :  { %7184 = sst [smem:[#allocation13_spill]] %s7168_s0 }
   0x2   :  { %15 = vsyncpa [#allocation4], 0 }
   0x3   :  { %16 = vsyncpa [#allocation3], 0 }
   0x4   :  { %17 = vsyncpa [#allocation7], 0 }
   0x5   :  { %19 = vsyncpa [#allocation7 + $0x1], 0  ;;  %s5966_s30 = smov 0   ;;  %s5968_s10 = smov 0  }
   0x6   :  { %s5970_s11 = smov 0   ;;  %s5972_s12 = smov 0  }
   0x7 LB: > { %s5985_s13 = sadd.s32 4294967295, %s5907_s12   ;;  %s5988_s14 = sadd.s32 1, %s5907_s12   ;;  %s5907_s12 = sphi %s5972_s12, %s7200_s12   ;;  %s5903_s11 = sphi %s5970_s11, %s7204_s11   ;;  %s5899_s10 = sphi %s5968_s10, %s7203_s10   ;;  %s5895_s30 = sphi %s5966_s30, %s7202_s30  }
   0x8   : > { %7185 = sst [smem:[#allocation11_spill]] %s5988_s14  ;;  %s160_s15 = ssub.s32 %s5907_s12, %s5988_s14 }
   0x9   : > { %s163_s16 = sadd.s32 1, %s5903_s11  ;;  %p161_p0 = scmp.eq.s32.totalorder %s160_s15, 0 }
   0xa   : > { %p170_p1 = scmp.ne.s32.totalorder %s5903_s11, %s5899_s10  ;;  %p171_p2 = scmp.eq.s32.totalorder %s5907_s12, 0 }
   0xb   : > { %p176_p3 = scmp.ne.s32.totalorder %s5899_s10, %s5895_s30  ;;  %p7178_p5 = scmp.eq.s32.totalorder %s5985_s13, 0 }
   0xc   : > { %s5998_s17 = scalar_select %p161_p0, %s5903_s11, %s163_s16  }
   0xd   : > { %p6000_p4 = por %p171_p2, %p170_p1  ;;  %p4621_p6 = scmp.ge.s32.totalorder %s5907_s12, 1 }
   0xe   : > { %7186 = sst [smem:[#allocation12_spill]] %s5998_s17  ;;  %p265_p7 = scmp.lt.s32.totalorder %s5907_s12, 3 }
   0xf   : > { %p6009_p8 = por %p7178_p5, %p176_p3  ;;  %s7190_s0 = sld [smem:[#allocation13_spill]] }
  0x10   : > { %p6013_p9 = pnand %p4621_p6, %p265_p7  ;;  %p5705_p11 = scmp.lt.s32.totalorder %s5907_s12, 2 }
  0x11   : > { %s7188_s19 = scalar_select %p6009_p8, 1, 0 }
  0x12   : > { %s7189_s20 = scalar_select %p6013_p9, 1, 0 }
  0x13   : > { %p5692_p10 = pneg %p6013_p9  ;;  %s5909_s25 = smov [#allocation5]  }
  0x14   : > { %s288_s26 = sshll.u32 %s5909_s25, 4  ;;  %p6031_p13 = pnand %p5705_p11, %p6000_p4  ;;  %s289_s26 = int_to_ptr.vmem [resolvable:$true] %s288_s26 }
  0x15   : > { %s278_s23 = sshll.u32 %s7190_s0, 4  ;;  %p6025_p12 = pnand %p5692_p10, %p7178_p5  ;;  %s279_s23 = int_to_ptr.vmem [resolvable:$true] %s278_s23 }
  0x16   : > { %s7192_s27 = scalar_select %p6031_p13, 1, 0 }
  0x17   : > { %s5796_s28 = scalar_lea.vmem %s279_s23, 16  ;;  %p5798_p1 = pneg %p6025_p12 }
  0x18   : > { %p5797_p0 = scmp.ne.s32.totalorder %s279_s23, %s5796_s28  ;;  %p5804_p6 = scmp.lt.s32.totalorder %s279_s23, %s279_s23 }
  0x19   : > { %p5805_p7 = scmp.lt.s32.totalorder %s5796_s28, %s5796_s28 }
  0x1a   : > { %p5799_p2 = pnand %p5798_p1, %p5797_p0 }
  0x1b   : > { %p5806_p10 = por %p5805_p7, %p5804_p6 }
  0x1c   : > { %p5800_p3 = pneg %p5799_p2 }
  0x1e   : > { %p5807_p5 = pnand %p5806_p10, %p5800_p3 }
  0x20   : > { %5810 = shalt.err (!%p5807_p5)
}
  0x21   : > { %s5910_s29 = smov [#allocation2]   ;;  %s5822_s30 = scalar_lea.vmem %s289_s26, 384 }
  0x22   : > { %5695 = dma.vmem_to_smem (!%p6025_p12), %s279_s23, 16, %s5910_s29, [#allocation4]  }
  0x23   : > { %p5823_p4 = scmp.ne.s32.totalorder %s289_s26, %s5822_s30  ;;  %p5830_p9 = scmp.lt.s32.totalorder %s289_s26, %s289_s26 }
  0x24   : > { %p5831_p13 = scmp.lt.s32.totalorder %s5822_s30, %s5822_s30 }
  0x25   : > { %p5825_p11 = pnand %p5823_p4, %p5798_p1 }
  0x26   : > { %p5832_p0 = por %p5831_p13, %p5830_p9 }
  0x27   : > { %p5826_p8 = pneg %p5825_p11 }
  0x29   : > { %p5833_p2 = pnand %p5832_p0, %p5826_p8 }
  0x2b   : > { %5836 = shalt.err (!%p5833_p2)
}
  0x2c   : > { %s5911_s15 = smov 128   ;;  %s5912_s16 = smov 8  }
  0x2d   : > { %5698 = dma.hbm_to_vmem [thread:$0]  (!%p6025_p12), %s7169_s1, 384, %s289_s26, [#allocation3], %s5911_s15, %s5911_s15, %s5912_s16  }
  0x2e   : > { %s321_s22 = sand.u32 1, %s5903_s11   ;;  %s4777_s23 = smul.u32 1536, %s5907_s12 }
  0x2f   : > { %s5672_s25 = smul.u32 96, %s321_s22  ;;  %s6056_s17 = scalar_lea.sflag [#allocation7], %s321_s22 }
  0x30   : > { %s6052_s30 = scalar_lea.hbm %s7174_s6, %s4777_s23  ;;  %p7193_p8 = scmp.ne.s32.totalorder %s7192_s27, 0 }
  0x31   : > { %s325_s0 = scalar_lea.vmem [#allocation6], %s5672_s25  ;;  %s5837_s14 = scalar_lea.hbm %s6052_s30, 1536 }
  0x32   : > { %s333_s24 = sshll.u32 %s325_s0, 4  ;;  %p5838_p5 = scmp.ne.s32.totalorder %s6052_s30, %s5837_s14  ;;  %s6054_s24 = int_to_ptr.vmem [resolvable:$true] %s333_s24 }
  0x33   : > { %p5839_p9 = pneg %p7193_p8  ;;  %s5842_s18 = scalar_lea.hbm %s7174_s6, 3072 }
  0x34   : > { %p5843_p1 = scmp.lt.s32.totalorder %s6052_s30, %s7174_s6  ;;  %p5844_p3 = scmp.lt.s32.totalorder %s5842_s18, %s5837_s14 }
  0x35   : > { %p5840_p12 = pnand %p5839_p9, %p5838_p5 }
  0x36   : > { %p5845_p6 = por %p5844_p3, %p5843_p1 }
  0x37   : > { %p5841_p13 = pneg %p5840_p12 }
  0x39   : > { %p5846_p7 = pnand %p5845_p6, %p5841_p13 }
  0x3b   : > { %5849 = shalt.err (!%p5846_p7)
}
  0x3c   : > { %s5850_s0 = scalar_lea.vmem %s6054_s24, 1536  ;;  %s5913_s22 = smov [#allocation6]  }
  0x3d   : > { %p5851_p10 = scmp.ne.s32.totalorder %s6054_s24, %s5850_s0  ;;  %s5855_s25 = sshll.u32 %s5913_s22, 4  ;;  %s5856_s25 = int_to_ptr.vmem [resolvable:$false] %s5855_s25 }
  0x3e   : > { %s5857_s28 = scalar_lea.vmem %s5856_s25, 3072  ;;  %p5858_p0 = scmp.lt.s32.totalorder %s6054_s24, %s5856_s25 }
  0x3f   : > { %p5853_p4 = pnand %p5851_p10, %p5839_p9  ;;  %p5859_p2 = scmp.lt.s32.totalorder %s5857_s28, %s5850_s0 }
  0x41   : > { %p5854_p11 = pneg %p5853_p4  ;;  %p5860_p5 = por %p5859_p2, %p5858_p0 }
  0x43   : > { %p5861_p12 = pnand %p5860_p5, %p5854_p11 }
  0x45   : > { %5864 = shalt.err (!%p5861_p12)
}
  0x46   : > { %5702 = dma.hbm_to_vmem [thread:$0]  (!%p7193_p8), %s6052_s30, 1536, %s6054_s24, %s6056_s17, %s5911_s15, %s5911_s15, %s5912_s16  }
  0x47   : > { %p7194_p9 = scmp.ne.s32.totalorder %s7189_s20, 0 }
  0x48   : > { %p7195_p13 = scmp.eq.s32.totalorder (!%p7194_p9), %s5985_s13, 0 }
  0x49   : > { %345 = sbr.rel (%p7194_p9) target bundleno = 1029 (0x405), region = 48 }
  0x4e   : > { %5882 = dma.done.wait (%p7195_p13), [#allocation4], 16   ;;  %p7196_p1 = pmov %p7195_p13 }
  0x50   : > { %5884 = vsyncadd (%p7196_p1), [#allocation4], 4294967280  ;;  %p7197_p3 = pmov %p7196_p1 }
  0x51   : > { %p7198_p6 = pmov %p7196_p1 }
  0x52   : > { %5886 = dma.done.wait (%p7197_p3), [#allocation3], 384  }
  0x53   : > { %5888 = vsyncadd (%p7198_p6), [#allocation3], 4294966912  ;;  %s355_s14 = sand.u32 1, %s5899_s10   ;;  %p7199_p8 = scmp.ne.s32.totalorder %s7188_s19, 0 }
  0x54   : > { %s5673_s27 = smul.u32 96, %s355_s14  ;;  %s356_s17 = scalar_lea.sflag [#allocation7], %s355_s14 }
  0x56   : > { %s6091_s15 = scalar_lea.vmem [#allocation6], %s5673_s27 }
  0x57   : > { %5890 = dma.done.wait (%p7199_p8), %s356_s17, 1536  }
  0x58   : > { %5892 = vsyncadd (%p7199_p8), %s356_s17, 4294965760 }
  0x59   : > { %364 = sfence }
  0x5a   : > { %v6100_v0 = vld [vmem:[%s7170_s2 + $0x18] sm:$0xff]  ;;  %v6105_v1 = vld [vmem:[%s7170_s2 + $0x10] sm:$0xff]  ;;  %s412_s24 = smul.u32 3, %s5985_s13  ;;  %v6115_v2 = vld [vmem:[%s7170_s2 + $0x8] sm:$0xff]  ;;  %vm507_vm0 = vcmask 261120   ;;  %v5914_v63 = vmov 0.0  }
  0x5b   : > { %5075 = vmatprep.subr.mxu0 %v6100_v0  ;;  %5089 = vmatprep.subr.mxu1 %v6100_v0  ;;  %v6124_v3 = vld [vmem:[%s7170_s2] sm:$0xff]  ;;  %v6198_v13 = vld [vmem:[%s6091_s15] sm:$0xff]  ;;  %v6218_v17 = vld [vmem:[%s6091_s15 + $0x10] sm:$0xff]  ;;  %vm5915_vm1 = vmmov 0   ;;  %s462_s18 = sld [smem:[#allocation2]]  ;;  %vm4373_vm5 = vcmask 130048  }
  0x5c   : > { %5076 = vmatpush3.msra.mxu0 %v6100_v0  ;;  %5090 = vmatpush3.msra.mxu1 %v6100_v0  ;;  %p413_p7 = scmp.lt.s32.totalorder %s412_s24, 5  ;;  %v6206_v15 = vld [vmem:[%s6091_s15 + $0x8] sm:$0xff]  ;;  %v6231_v19 = vld [vmem:[%s6091_s15 + $0x18] sm:$0xff]  ;;  %v6249_v20 = vld [vmem:[%s6091_s15 + $0x20] sm:$0xff]  ;;  %v476_v38 = vmul.f32 %v6198_v13, %v6198_v13  ;;  %v478_v41 = vmul.f32 %v6218_v17, %v6218_v17  ;;  %p420_p10 = scmp.lt.s32.totalorder %s5985_s13, 1 }
  0x5d   : > { %5077 = vmatprep.subr.mxu0 %v6105_v1  ;;  %5091 = vmatprep.subr.mxu1 %v6105_v1  ;;  %v6254_v21 = vld [vmem:[%s6091_s15 + $0x28] sm:$0xff]  ;;  %v6259_v22 = vld [vmem:[%s6091_s15 + $0x40] sm:$0xff]  ;;  %v6262_v23 = vld [vmem:[%s6091_s15 + $0x30] sm:$0xff]  ;;  %v477_v40 = vmul.f32 %v6206_v15, %v6206_v15  ;;  %v479_v43 = vmul.f32 %v6231_v19, %v6231_v19  ;;  %v480_v44 = vmul.f32 %v6249_v20, %v6249_v20 }
  0x5e   : > { %5078 = vmatpush3.msra.mxu0 %v6105_v1  ;;  %5092 = vmatpush3.msra.mxu1 %v6105_v1  ;;  %s7206_s24 = smov (!%p413_p7, %s412_s24), 5  ;;  %v6268_v24 = vld [vmem:[%s6091_s15 + $0x48] sm:$0xff]  ;;  %v6274_v25 = vld [vmem:[%s6091_s15 + $0x50] sm:$0xff]  ;;  %v6281_v26 = vld [vmem:[%s6091_s15 + $0x38] sm:$0xff]  ;;  %v481_v45 = vmul.f32 %v6254_v21, %v6254_v21  ;;  %v484_v46 = vmul.f32 %v6259_v22, %v6259_v22  ;;  %v482_v47 = vmul.f32 %v6262_v23, %v6262_v23  ;;  %s7208_s13 = smov (!%p420_p10, %s5985_s13), 1 }
  0x5f   : > { %5079 = vmatprep.subr.mxu0 %v6115_v2  ;;  %5093 = vmatprep.subr.mxu1 %v6115_v2  ;;  %s4774_s21 = sshll.u32 %s7206_s24, 5  ;;  %v6289_v27 = vld [vmem:[%s6091_s15 + $0x58] sm:$0xff]  ;;  %v485_v48 = vmul.f32 %v6268_v24, %v6268_v24  ;;  %v486_v49 = vmul.f32 %v6274_v25, %v6274_v25  ;;  %v483_v50 = vmul.f32 %v6281_v26, %v6281_v26  ;;  %s4632_s20 = sshll.u32 %s7208_s13, 3 }
  0x60   : > { %5080 = vmatpush3.msra.mxu0 %v6115_v2  ;;  %5094 = vmatpush3.msra.mxu1 %v6115_v2  ;;  %s6138_s22 = scalar_lea.vmem %s7173_s5, %s4774_s21  ;;  %v487_v51 = vmul.f32 %v6289_v27, %v6289_v27  ;;  %s4637_s21 = sld [smem:[#allocation2 + $0x1]] }
  0x61   : > { %5081 = vmatprep.subr.mxu0 %v6124_v3  ;;  %5095 = vmatprep.subr.mxu1 %v6124_v3  ;;  %v6142_v4 = vld [vmem:[%s6138_s22] sm:$0xff]  ;;  %v6149_v6 = vld [vmem:[%s6138_s22 + $0x8] sm:$0xff]  ;;  %v6165_v8 = vld [vmem:[%s6138_s22 + $0x10] sm:$0xff]  ;;  %s423_s19 = scalar_lea.vmem %s7175_s7, %s4632_s20 }
  0x62   : > { %5082 = vmatpush3.msra.mxu0 %v6124_v3  ;;  %5096 = vmatpush3.msra.mxu1 %v6124_v3  ;;  %v6146_v5 = vld [vmem:[%s6138_s22 + $0x20] sm:$0xff]  ;;  %v6156_v7 = vld [vmem:[%s6138_s22 + $0x28] sm:$0xff]  ;;  %v6168_v9 = vld [vmem:[%s6138_s22 + $0x30] sm:$0xff]  ;;  %v464_v28 = vmul.f32 %v6142_v4, %v6142_v4  ;;  %v465_v29 = vmul.f32 %v6149_v6, %v6149_v6  ;;  %v466_v31 = vmul.f32 %v6165_v8, %v6165_v8 }
  0x63   : > { %5083 = vmatprep.mubr.msk.f32.mxu0 %vm507_vm0, %v6142_v4  ;;  %5097 = vmatprep.mubr.msk.f32.mxu1 %vm507_vm0, %v6146_v5  ;;  %v6175_v10 = vld [vmem:[%s6138_s22 + $0x18] sm:$0xff]  ;;  %v6193_v12 = vld [vmem:[%s6138_s22 + $0x40] sm:$0xff]  ;;  %v6203_v14 = vld [vmem:[%s6138_s22 + $0x48] sm:$0xff]  ;;  %v468_v30 = vmul.f32 %v6146_v5, %v6146_v5  ;;  %v469_v32 = vmul.f32 %v6156_v7, %v6156_v7  ;;  %v470_v33 = vmul.f32 %v6168_v9, %v6168_v9 }
  0x64   : > { %5084 = vmatmul.mubr.msk.f32.vlgmr.msra.gmra.mxu0 %vm507_vm0, %v6149_v6  ;;  %5098 = vmatmul.mubr.msk.f32.vlgmr.msra.gmra.mxu1 %vm507_vm0, %v6156_v7  ;;  %v6178_v11 = vld [vmem:[%s6138_s22 + $0x38] sm:$0xff]  ;;  %v6212_v16 = vld [vmem:[%s6138_s22 + $0x50] sm:$0xff]  ;;  %v467_v34 = vmul.f32 %v6175_v10, %v6175_v10  ;;  %v472_v36 = vmul.f32 %v6193_v12, %v6193_v12  ;;  %v473_v37 = vmul.f32 %v6203_v14, %v6203_v14 }
  0x65   : > { %5103 = vmatprep.subr.mxu0 %v6100_v0  ;;  %5117 = vmatprep.subr.mxu1 %v6100_v0  ;;  %v6228_v18 = vld [vmem:[%s6138_s22 + $0x58] sm:$0xff]  ;;  %v471_v35 = vmul.f32 %v6178_v11, %v6178_v11  ;;  %v474_v39 = vmul.f32 %v6212_v16, %v6212_v16  ;;  %v488_v52 = vmul.f32 %v6198_v13, %v6142_v4 }
  0x66   : > { %5104 = vmatpush3.msra.mxu0 %v6100_v0  ;;  %5118 = vmatpush3.msra.mxu1 %v6100_v0  ;;  %v475_v42 = vmul.f32 %v6228_v18, %v6228_v18  ;;  %v489_v53 = vmul.f32 %v6206_v15, %v6149_v6  ;;  %v492_v54 = vmul.f32 %v6249_v20, %v6146_v5 }
  0x67   : > { %5105 = vmatprep.subr.mxu0 %v6105_v1  ;;  %5119 = vmatprep.subr.mxu1 %v6105_v1  ;;  %v490_v55 = vmul.f32 %v6218_v17, %v6165_v8  ;;  %v493_v56 = vmul.f32 %v6254_v21, %v6156_v7  ;;  %v494_v57 = vmul.f32 %v6262_v23, %v6168_v9 }
  0x68   : > { %5086 = vmatprep.mubr.msk.f32.mxu0 %vm507_vm0, %v6165_v8  ;;  %5100 = vmatprep.mubr.msk.f32.mxu1 %vm507_vm0, %v6168_v9  ;;  %v491_v58 = vmul.f32 %v6231_v19, %v6175_v10  ;;  %v496_v59 = vmul.f32 %v6259_v22, %v6193_v12  ;;  %v495_v60 = vmul.f32 %v6281_v26, %v6178_v11 }
  0x69   : > { %5106 = vmatpush3.msra.mxu0 %v6105_v1  ;;  %5120 = vmatpush3.msra.mxu1 %v6105_v1  ;;  %v497_v61 = vmul.f32 %v6268_v24, %v6203_v14  ;;  %v498_v62 = vmul.f32 %v6274_v25, %v6212_v16 }
  0x6a   : > { %5087 = vmatmul.mubr.msk.f32.gmra.mxu0 %vm507_vm0, %v6175_v10  ;;  %5101 = vmatmul.mubr.msk.f32.gmra.mxu1 %vm507_vm0, %v6178_v11 }
  0x6b   : > { %5107 = vmatprep.subr.mxu0 %v6115_v2  ;;  %5121 = vmatprep.subr.mxu1 %v6115_v2 }
  0x6c   : > { %5108 = vmatpush3.msra.mxu0 %v6115_v2  ;;  %5122 = vmatpush3.msra.mxu1 %v6115_v2 }
  0x6d   : > { %5109 = vmatprep.subr.mxu0 %v6124_v3  ;;  %5123 = vmatprep.subr.mxu1 %v6124_v3 }
  0x6e   : > { %5110 = vmatpush3.msra.mxu0 %v6124_v3  ;;  %5111 = vmatprep.mubr.msk.f32.mxu0 %vm507_vm0, %v6193_v12 }
  0x6f   : > { %5124 = vmatpush3.msra.mxu1 %v6124_v3  ;;  %5125 = vmatprep.mubr.msk.f32.mxu1 %vm507_vm0, %v6198_v13 }
  0x70   : > { %5112 = vmatmul.mubr.msk.f32.vlgmr.msra.gmra.mxu0 %vm507_vm0, %v6203_v14  ;;  %5126 = vmatmul.mubr.msk.f32.vlgmr.msra.gmra.mxu1 %vm507_vm0, %v6206_v15 }
  0x71   : > { %5131 = vmatprep.subr.mxu0 %v6100_v0  ;;  %5114 = vmatprep.mubr.msk.f32.mxu0 %vm507_vm0, %v6212_v16 }
  0x72   : > { %5128 = vmatprep.mubr.msk.f32.mxu1 %vm507_vm0, %v6218_v17  ;;  %5132 = vmatpush3.msra.mxu0 %v6100_v0 }
  0x73   : > { %5145 = vmatprep.subr.mxu1 %v6100_v0  ;;  %5133 = vmatprep.subr.mxu0 %v6105_v1 }
  0x74   : > { %5115 = vmatmul.mubr.msk.f32.gmra.mxu0 %vm507_vm0, %v6228_v18  ;;  %5129 = vmatmul.mubr.msk.f32.gmra.mxu1 %vm507_vm0, %v6231_v19 }
  0x75   : > { %5146 = vmatpush3.msra.mxu1 %v6100_v0  ;;  %5134 = vmatpush3.msra.mxu0 %v6105_v1 }
  0x76   : > { %5147 = vmatprep.subr.mxu1 %v6105_v1  ;;  %5135 = vmatprep.subr.mxu0 %v6115_v2 }
  0x77   : > { %5148 = vmatpush3.msra.mxu1 %v6105_v1  ;;  %5136 = vmatpush3.msra.mxu0 %v6115_v2 }
  0x78   : > { %5149 = vmatprep.subr.mxu1 %v6115_v2  ;;  %5137 = vmatprep.subr.mxu0 %v6124_v3 }
  0x79   : > { %5150 = vmatpush3.msra.mxu1 %v6115_v2  ;;  %5138 = vmatpush3.msra.mxu0 %v6124_v3 }
  0x7a   : > { %5139 = vmatprep.mubr.msk.f32.mxu0 %vm507_vm0, %v6249_v20  ;;  %5151 = vmatprep.subr.mxu1 %v6124_v3  ;;  %v6484_v20 = vld [vmem:[#allocation5] sm:$0xff] }
  0x7b   : > { %5140 = vmatmul.mubr.msk.f32.vlgmr.msra.gmra.mxu0 %vm507_vm0, %v6254_v21  ;;  %5152 = vmatpush3.msra.mxu1 %v6124_v3 }
  0x7c   : > { %5153 = vmatprep.mubr.msk.f32.mxu1 %vm507_vm0, %v6259_v22  ;;  %5142 = vmatprep.mubr.msk.f32.mxu0 %vm507_vm0, %v6262_v23 }
  0x7d   : > { %5154 = vmatmul.mubr.msk.f32.vlgmr.msra.gmra.mxu1 %vm507_vm0, %v6268_v24  ;;  %5159 = vmatprep.subr.mxu0 %v6100_v0 }
  0x7e   : > { %5156 = vmatprep.mubr.msk.f32.mxu1 %vm507_vm0, %v6274_v25  ;;  %5160 = vmatpush3.msra.mxu0 %v6100_v0 }
  0x7f   : > { %5143 = vmatmul.mubr.msk.f32.gmra.mxu0 %vm507_vm0, %v6281_v26  ;;  %5173 = vmatprep.subr.mxu1 %v6100_v0 }
  0x80   : > { %5161 = vmatprep.subr.mxu0 %v6105_v1  ;;  %5174 = vmatpush3.msra.mxu1 %v6100_v0 }
  0x81   : > { %5157 = vmatmul.mubr.msk.f32.gmra.mxu1 %vm507_vm0, %v6289_v27  ;;  %5162 = vmatpush3.msra.mxu0 %v6105_v1 }
  0x82   : > { %5175 = vmatprep.subr.mxu1 %v6105_v1  ;;  %5163 = vmatprep.subr.mxu0 %v6115_v2 }
  0x83   : > { %5176 = vmatpush3.msra.mxu1 %v6105_v1  ;;  %5164 = vmatpush3.msra.mxu0 %v6115_v2 }
  0x84   : > { %5177 = vmatprep.subr.mxu1 %v6115_v2  ;;  %5165 = vmatprep.subr.mxu0 %v6124_v3 }
  0x85   : > { %5178 = vmatpush3.msra.mxu1 %v6115_v2  ;;  %5166 = vmatpush3.msra.mxu0 %v6124_v3 }
  0x86   : > { %5167 = vmatprep.mubr.msk.f32.mxu0 %vm507_vm0, %v464_v28  ;;  %5179 = vmatprep.subr.mxu1 %v6124_v3 }
  0x87   : > { %5168 = vmatmul.mubr.msk.f32.vlgmr.msra.gmra.mxu0 %vm507_vm0, %v465_v29  ;;  %5180 = vmatpush3.msra.mxu1 %v6124_v3 }
  0x88   : > { %5181 = vmatprep.mubr.msk.f32.mxu1 %vm507_vm0, %v468_v30  ;;  %5170 = vmatprep.mubr.msk.f32.mxu0 %vm507_vm0, %v466_v31  ;;  %v6510_v31 = vld [vmem:[#allocation5 + $0x10] sm:$0xff] }
  0x89   : > { %5182 = vmatmul.mubr.msk.f32.vlgmr.msra.gmra.mxu1 %vm507_vm0, %v469_v32  ;;  %5187 = vmatprep.subr.mxu0 %v6100_v0 }
  0x8a   : > { %5184 = vmatprep.mubr.msk.f32.mxu1 %vm507_vm0, %v470_v33  ;;  %5188 = vmatpush3.msra.mxu0 %v6100_v0 }
  0x8b   : > { %5171 = vmatmul.mubr.msk.f32.gmra.mxu0 %vm507_vm0, %v467_v34  ;;  %5201 = vmatprep.subr.mxu1 %v6100_v0 }
  0x8c   : > { %5189 = vmatprep.subr.mxu0 %v6105_v1  ;;  %5202 = vmatpush3.msra.mxu1 %v6100_v0 }
  0x8d   : > { %5185 = vmatmul.mubr.msk.f32.gmra.mxu1 %vm507_vm0, %v471_v35  ;;  %5190 = vmatpush3.msra.mxu0 %v6105_v1 }
  0x8e   : > { %5203 = vmatprep.subr.mxu1 %v6105_v1  ;;  %5191 = vmatprep.subr.mxu0 %v6115_v2 }
  0x8f   : > { %5204 = vmatpush3.msra.mxu1 %v6105_v1  ;;  %5192 = vmatpush3.msra.mxu0 %v6115_v2 }
  0x90   : > { %5205 = vmatprep.subr.mxu1 %v6115_v2  ;;  %5193 = vmatprep.subr.mxu0 %v6124_v3 }
  0x91   : > { %5206 = vmatpush3.msra.mxu1 %v6115_v2  ;;  %5194 = vmatpush3.msra.mxu0 %v6124_v3 }
  0x92   : > { %5195 = vmatprep.mubr.msk.f32.mxu0 %vm507_vm0, %v472_v36  ;;  %5207 = vmatprep.subr.mxu1 %v6124_v3 }
  0x93   : > { %5196 = vmatmul.mubr.msk.f32.vlgmr.msra.gmra.mxu0 %vm507_vm0, %v473_v37  ;;  %5208 = vmatpush3.msra.mxu1 %v6124_v3 }
  0x94   : > { %5209 = vmatprep.mubr.msk.f32.mxu1 %vm507_vm0, %v476_v38  ;;  %5198 = vmatprep.mubr.msk.f32.mxu0 %vm507_vm0, %v474_v39 }
  0x95   : > { %5210 = vmatmul.mubr.msk.f32.vlgmr.msra.gmra.mxu1 %vm507_vm0, %v477_v40  ;;  %5215 = vmatprep.subr.mxu0 %v6100_v0 }
  0x96   : > { %5212 = vmatprep.mubr.msk.f32.mxu1 %vm507_vm0, %v478_v41  ;;  %5216 = vmatpush3.msra.mxu0 %v6100_v0 }
  0x97   : > { %5199 = vmatmul.mubr.msk.f32.gmra.mxu0 %vm507_vm0, %v475_v42  ;;  %5229 = vmatprep.subr.mxu1 %v6100_v0 }
  0x98   : > { %5217 = vmatprep.subr.mxu0 %v6105_v1  ;;  %5230 = vmatpush3.msra.mxu1 %v6100_v0 }
  0x99   : > { %5213 = vmatmul.mubr.msk.f32.gmra.mxu1 %vm507_vm0, %v479_v43  ;;  %5218 = vmatpush3.msra.mxu0 %v6105_v1 }
  0x9a   : > { %5231 = vmatprep.subr.mxu1 %v6105_v1  ;;  %5219 = vmatprep.subr.mxu0 %v6115_v2 }
  0x9b   : > { %5232 = vmatpush3.msra.mxu1 %v6105_v1  ;;  %5220 = vmatpush3.msra.mxu0 %v6115_v2 }
  0x9c   : > { %5233 = vmatprep.subr.mxu1 %v6115_v2  ;;  %5221 = vmatprep.subr.mxu0 %v6124_v3 }
  0x9d   : > { %5234 = vmatpush3.msra.mxu1 %v6115_v2  ;;  %5222 = vmatpush3.msra.mxu0 %v6124_v3 }
  0x9e   : > { %5223 = vmatprep.mubr.msk.f32.mxu0 %vm507_vm0, %v480_v44  ;;  %5235 = vmatprep.subr.mxu1 %v6124_v3 }
  0x9f   : > { %5224 = vmatmul.mubr.msk.f32.vlgmr.msra.gmra.mxu0 %vm507_vm0, %v481_v45  ;;  %5236 = vmatpush3.msra.mxu1 %v6124_v3 }
  0xa0   : > { %5237 = vmatprep.mubr.msk.f32.mxu1 %vm507_vm0, %v484_v46  ;;  %5226 = vmatprep.mubr.msk.f32.mxu0 %vm507_vm0, %v482_v47 }
  0xa1   : > { %5238 = vmatmul.mubr.msk.f32.vlgmr.msra.gmra.mxu1 %vm507_vm0, %v485_v48  ;;  %5243 = vmatprep.subr.mxu0 %v6100_v0 }
  0xa2   : > { %5240 = vmatprep.mubr.msk.f32.mxu1 %vm507_vm0, %v486_v49  ;;  %5244 = vmatpush3.msra.mxu0 %v6100_v0 }
  0xa3   : > { %5227 = vmatmul.mubr.msk.f32.gmra.mxu0 %vm507_vm0, %v483_v50  ;;  %5257 = vmatprep.subr.mxu1 %v6100_v0 }
  0xa4   : > { %5245 = vmatprep.subr.mxu0 %v6105_v1  ;;  %5258 = vmatpush3.msra.mxu1 %v6100_v0 }
  0xa5   : > { %5241 = vmatmul.mubr.msk.f32.gmra.mxu1 %vm507_vm0, %v487_v51  ;;  %5246 = vmatpush3.msra.mxu0 %v6105_v1 }
  0xa6   : > { %5259 = vmatprep.subr.mxu1 %v6105_v1  ;;  %5247 = vmatprep.subr.mxu0 %v6115_v2 }
  0xa7   : > { %5260 = vmatpush3.msra.mxu1 %v6105_v1  ;;  %5248 = vmatpush3.msra.mxu0 %v6115_v2 }
  0xa8   : > { %5261 = vmatprep.subr.mxu1 %v6115_v2  ;;  %5249 = vmatprep.subr.mxu0 %v6124_v3 }
  0xa9   : > { %5262 = vmatpush3.msra.mxu1 %v6115_v2  ;;  %5250 = vmatpush3.msra.mxu0 %v6124_v3 }
  0xaa   : > { %5251 = vmatprep.mubr.msk.f32.mxu0 %vm507_vm0, %v488_v52  ;;  %5263 = vmatprep.subr.mxu1 %v6124_v3 }
  0xab   : > { %5252 = vmatmul.mubr.msk.f32.vlgmr.msra.gmra.mxu0 %vm507_vm0, %v489_v53  ;;  %5264 = vmatpush3.msra.mxu1 %v6124_v3 }
  0xac   : > { %5265 = vmatprep.mubr.msk.f32.mxu1 %vm507_vm0, %v492_v54  ;;  %5254 = vmatprep.mubr.msk.f32.mxu0 %vm507_vm0, %v490_v55 }
  0xad   : > { %5266 = vmatmul.mubr.msk.f32.vlgmr.msra.gmra.mxu1 %vm507_vm0, %v493_v56  ;;  %5271 = vmatprep.subr.mxu0 %v6100_v0 }
  0xae   : > { %5268 = vmatprep.mubr.msk.f32.mxu1 %vm507_vm0, %v494_v57  ;;  %5272 = vmatpush3.msra.mxu0 %v6100_v0  ;;  %v499_v0 = vmul.f32 %v6289_v27, %v6228_v18  ;;  %v6498_v27 = vld [vmem:[#allocation5 + $0x8] sm:$0xff] }
  0xaf   : > { %5255 = vmatmul.mubr.msk.f32.gmra.mxu0 %vm507_vm0, %v491_v58  ;;  %5273 = vmatprep.subr.mxu0 %v6105_v1 }
  0xb0   : > { %5274 = vmatpush3.msra.mxu0 %v6105_v1  ;;  %5279 = vmatprep.mubr.msk.f32.mxu0 %vm507_vm0, %v496_v59 }
  0xb1   : > { %5269 = vmatmul.mubr.msk.f32.gmra.mxu1 %vm507_vm0, %v495_v60  ;;  %5275 = vmatprep.subr.mxu0 %v6115_v2 }
  0xb2   : > { %5276 = vmatpush3.msra.mxu0 %v6115_v2  ;;  %5285 = vmatprep.subr.mxu1 %v5914_v63 }
  0xb3   : > { %5277 = vmatprep.subr.mxu0 %v6124_v3  ;;  %5293 = vmatprep.mubr.msk.f32.mxu1 %vm5915_vm1, %v5914_v63 }
  0xb4   : > { %5278 = vmatpush3.msra.mxu0 %v6124_v3 }
  0xb5   : > { %5280 = vmatmul.mubr.msk.f32.vlgmr.msra.gmra.mxu0 %vm507_vm0, %v497_v61  ;;  %5302 = vmatprep.subr.mxu0 %v5914_v63 }
  0xb6   : > { %5282 = vmatprep.mubr.msk.f32.mxu0 %vm507_vm0, %v498_v62 }
  0xb9   : > { %5283 = vmatmul.mubr.msk.f32.gmra.mxu0 %vm507_vm0, %v499_v0 }
  0xba   : > { %5310 = vmatprep.mubr.msk.f32.mxu0 %vm5915_vm1, %v5914_v63 }
 0x124   : > { %v5085_v1 = vpop.f32.mrf.mxu0  ;;  %v5099_v2 = vpop.f32.mrf.mxu1 }
 0x126   : > { %v586_v5 = vpop.f32.mrf.mxu0  ;;  %v683_v7 = vpop.f32.mrf.mxu1 }
 0x12a   : > { %v5088_v13 = vpop.f32.mrf.mxu0  ;;  %v5102_v3 = vpop.f32.mrf.mxu1 }
 0x12b   : > { %5286 = vmatpush3.msra.mxu1 %v5088_v13  ;;  %5303 = vmatpush3.msra.mxu0 %v5102_v3 }
 0x12c   : > { %v596_v15 = vpop.f32.mrf.mxu0  ;;  %v693_v17 = vpop.f32.mrf.mxu1  ;;  %5287 = vmatprep.subr.mxu1 %v5914_v63  ;;  %5304 = vmatprep.subr.mxu0 %v5914_v63 }
 0x12d   : > { %5288 = vmatpush3.msra.mxu1 %v596_v15  ;;  %5305 = vmatpush3.msra.mxu0 %v693_v17 }
 0x12e   : > { %5289 = vmatprep.subr.mxu1 %v5914_v63  ;;  %5306 = vmatprep.subr.mxu0 %v5914_v63 }
 0x12f   : > { %5290 = vmatpush3.msra.mxu1 %v5085_v1  ;;  %5307 = vmatpush3.msra.mxu0 %v5099_v2 }
 0x130   : > { %v5113_v21 = vpop.f32.mrf.mxu0  ;;  %v5127_v22 = vpop.f32.mrf.mxu1  ;;  %5291 = vmatprep.subr.mxu1 %v5914_v63  ;;  %5308 = vmatprep.subr.mxu0 %v5914_v63 }
 0x131   : > { %5292 = vmatpush3.msra.mxu1 %v586_v5  ;;  %5309 = vmatpush3.msra.mxu0 %v683_v7 }
 0x132   : > { %v780_v23 = vpop.f32.mrf.mxu0  ;;  %v877_v24 = vpop.f32.mrf.mxu1  ;;  %5294 = vmatmul.mubr.msk.f32.vlgmr.msra.gmra.mxu1 %vm507_vm0, %v6484_v20  ;;  %5311 = vmatmul.mubr.msk.f32.vlgmr.msra.gmra.mxu0 %vm507_vm0, %v6484_v20 }
 0x133   : > { %5319 = vmatprep.subr.mxu1 %v5914_v63  ;;  %5336 = vmatprep.subr.mxu0 %v5914_v63 }
 0x134   : > { %v5116_v25 = vpop.f32.mrf.mxu0  ;;  %v5130_v26 = vpop.f32.mrf.mxu1  ;;  %5296 = vmatprep.mubr.msk.f32.mxu1 %vm5915_vm1, %v5914_v63  ;;  %5313 = vmatprep.mubr.msk.f32.mxu0 %vm5915_vm1, %v5914_v63 }
 0x135   : > { %5320 = vmatpush3.msra.mxu1 %v5116_v25  ;;  %5337 = vmatpush3.msra.mxu0 %v5130_v26 }
 0x136   : > { %v790_v28 = vpop.f32.mrf.mxu0  ;;  %v887_v29 = vpop.f32.mrf.mxu1  ;;  %5321 = vmatprep.subr.mxu1 %v5914_v63  ;;  %5338 = vmatprep.subr.mxu0 %v5914_v63 }
 0x137   : > { %5322 = vmatpush3.msra.mxu1 %v790_v28  ;;  %5339 = vmatpush3.msra.mxu0 %v887_v29 }
 0x138   : > { %5297 = vmatmul.mubr.msk.f32.gmra.mxu1 %vm507_vm0, %v6498_v27  ;;  %5314 = vmatmul.mubr.msk.f32.gmra.mxu0 %vm507_vm0, %v6498_v27 }
 0x139   : > { %5323 = vmatprep.subr.mxu1 %v5914_v63  ;;  %5340 = vmatprep.subr.mxu0 %v5914_v63 }
 0x13a   : > { %5324 = vmatpush3.msra.mxu1 %v5113_v21  ;;  %5341 = vmatpush3.msra.mxu0 %v5127_v22 }
 0x13b   : > { %v5141_v30 = vpop.f32.mrf.mxu0  ;;  %5325 = vmatprep.subr.mxu1 %v5914_v63  ;;  %5342 = vmatprep.subr.mxu0 %v5914_v63 }
 0x13c   : > { %5299 = vmatprep.mubr.msk.f32.mxu1 %vm5915_vm1, %v5914_v63  ;;  %5316 = vmatprep.mubr.msk.f32.mxu0 %vm5915_vm1, %v5914_v63 }
 0x13d   : > { %v5155_v32 = vpop.f32.mrf.mxu1  ;;  %5326 = vmatpush3.msra.mxu1 %v780_v23  ;;  %5343 = vmatpush3.msra.mxu0 %v877_v24  ;;  %v974_v33 = vpop.f32.mrf.mxu0 }
 0x13e   : > { %5300 = vmatmul.mubr.msk.f32.gmra.mxu1 %vm507_vm0, %v6510_v31  ;;  %5317 = vmatmul.mubr.msk.f32.gmra.mxu0 %vm507_vm0, %v6510_v31 }
 0x13f   : > { %v1071_v34 = vpop.f32.mrf.mxu1  ;;  %v5144_v35 = vpop.f32.mrf.mxu0  ;;  %5327 = vmatprep.mubr.msk.f32.mxu1 %vm5915_vm1, %v5914_v63  ;;  %5344 = vmatprep.mubr.msk.f32.mxu0 %vm5915_vm1, %v5914_v63 }
 0x140   : > { %5353 = vmatprep.subr.mxu1 %v5914_v63  ;;  %5370 = vmatprep.subr.mxu0 %v5914_v63 }
 0x141   : > { %v5158_v36 = vpop.f32.mrf.mxu1  ;;  %v984_v37 = vpop.f32.mrf.mxu0 }
 0x142   : > { %5328 = vmatmul.mubr.msk.f32.vlgmr.msra.gmra.mxu1 %vm507_vm0, %v6484_v20  ;;  %5345 = vmatmul.mubr.msk.f32.vlgmr.msra.gmra.mxu0 %vm507_vm0, %v6484_v20 }
 0x143   : > { %5354 = vmatpush3.msra.mxu1 %v5144_v35  ;;  %5371 = vmatpush3.msra.mxu0 %v5158_v36  ;;  %v1081_v38 = vpop.f32.mrf.mxu1 }
 0x144   : > { %5355 = vmatprep.subr.mxu1 %v5914_v63  ;;  %5372 = vmatprep.subr.mxu0 %v5914_v63 }
 0x145   : > { %5356 = vmatpush3.msra.mxu1 %v984_v37  ;;  %5373 = vmatpush3.msra.mxu0 %v1081_v38 }
 0x146   : > { %5330 = vmatprep.mubr.msk.f32.mxu1 %vm5915_vm1, %v5914_v63  ;;  %5347 = vmatprep.mubr.msk.f32.mxu0 %vm5915_vm1, %v5914_v63 }
 0x147   : > { %5357 = vmatprep.subr.mxu1 %v5914_v63  ;;  %5374 = vmatprep.subr.mxu0 %v5914_v63  ;;  %v5169_v39 = vpop.f32.mrf.mxu0 }
 0x148   : > { %5331 = vmatmul.mubr.msk.f32.gmra.mxu1 %vm507_vm0, %v6498_v27  ;;  %5348 = vmatmul.mubr.msk.f32.gmra.mxu0 %vm507_vm0, %v6498_v27 }
 0x149   : > { %5358 = vmatpush3.msra.mxu1 %v5141_v30  ;;  %5375 = vmatpush3.msra.mxu0 %v5155_v32  ;;  %v5183_v40 = vpop.f32.mrf.mxu1  ;;  %v1168_v41 = vpop.f32.mrf.mxu0 }
 0x14a   : > { %5359 = vmatprep.subr.mxu1 %v5914_v63  ;;  %5376 = vmatprep.subr.mxu0 %v5914_v63 }
 0x14b   : > { %5360 = vmatpush3.msra.mxu1 %v974_v33  ;;  %5377 = vmatpush3.msra.mxu0 %v1071_v34  ;;  %v1265_v42 = vpop.f32.mrf.mxu1  ;;  %v5172_v43 = vpop.f32.mrf.mxu0 }
 0x14c   : > { %5333 = vmatprep.mubr.msk.f32.mxu1 %vm5915_vm1, %v5914_v63  ;;  %5350 = vmatprep.mubr.msk.f32.mxu0 %vm5915_vm1, %v5914_v63 }
 0x14d   : > { %5334 = vmatmul.mubr.msk.f32.gmra.mxu1 %vm507_vm0, %v6510_v31  ;;  %5351 = vmatmul.mubr.msk.f32.gmra.mxu0 %vm507_vm0, %v6510_v31  ;;  %v5186_v44 = vpop.f32.mrf.mxu1  ;;  %v1178_v45 = vpop.f32.mrf.mxu0 }
 0x14e   : > { %5361 = vmatprep.mubr.msk.f32.mxu1 %vm5915_vm1, %v5914_v63  ;;  %5378 = vmatprep.mubr.msk.f32.mxu0 %vm5915_vm1, %v5914_v63 }
 0x14f   : > { %5387 = vmatprep.subr.mxu1 %v5914_v63  ;;  %5404 = vmatprep.subr.mxu0 %v5914_v63  ;;  %v1275_v46 = vpop.f32.mrf.mxu1 }
 0x151   : > { %5362 = vmatmul.mubr.msk.f32.vlgmr.msra.gmra.mxu1 %vm507_vm0, %v6484_v20  ;;  %5379 = vmatmul.mubr.msk.f32.vlgmr.msra.gmra.mxu0 %vm507_vm0, %v6484_v20 }
 0x152   : > { %5388 = vmatpush3.msra.mxu1 %v5172_v43  ;;  %5405 = vmatpush3.msra.mxu0 %v5186_v44 }
 0x153   : > { %5389 = vmatprep.subr.mxu1 %v5914_v63  ;;  %5406 = vmatprep.subr.mxu0 %v5914_v63  ;;  %v5197_v47 = vpop.f32.mrf.mxu0 }
 0x154   : > { %5390 = vmatpush3.msra.mxu1 %v1178_v45  ;;  %5407 = vmatpush3.msra.mxu0 %v1275_v46 }
 0x155   : > { %5364 = vmatprep.mubr.msk.f32.mxu1 %vm5915_vm1, %v5914_v63  ;;  %5381 = vmatprep.mubr.msk.f32.mxu0 %vm5915_vm1, %v5914_v63  ;;  %v5211_v48 = vpop.f32.mrf.mxu1  ;;  %v1362_v49 = vpop.f32.mrf.mxu0 }
 0x156   : > { %5391 = vmatprep.subr.mxu1 %v5914_v63  ;;  %5408 = vmatprep.subr.mxu0 %v5914_v63 }
 0x157   : > { %5365 = vmatmul.mubr.msk.f32.gmra.mxu1 %vm507_vm0, %v6498_v27  ;;  %5382 = vmatmul.mubr.msk.f32.gmra.mxu0 %vm507_vm0, %v6498_v27  ;;  %v1459_v50 = vpop.f32.mrf.mxu1  ;;  %v5200_v51 = vpop.f32.mrf.mxu0 }
 0x158   : > { %5392 = vmatpush3.msra.mxu1 %v5169_v39  ;;  %5409 = vmatpush3.msra.mxu0 %v5183_v40 }
 0x159   : > { %5393 = vmatprep.subr.mxu1 %v5914_v63  ;;  %5410 = vmatprep.subr.mxu0 %v5914_v63  ;;  %v5214_v52 = vpop.f32.mrf.mxu1  ;;  %v1372_v53 = vpop.f32.mrf.mxu0 }
 0x15a   : > { %5394 = vmatpush3.msra.mxu1 %v1168_v41  ;;  %5411 = vmatpush3.msra.mxu0 %v1265_v42 }
 0x15b   : > { %5367 = vmatprep.mubr.msk.f32.mxu1 %vm5915_vm1, %v5914_v63  ;;  %5384 = vmatprep.mubr.msk.f32.mxu0 %vm5915_vm1, %v5914_v63  ;;  %v1469_v54 = vpop.f32.mrf.mxu1 }
 0x15c   : > { %5368 = vmatmul.mubr.msk.f32.gmra.mxu1 %vm507_vm0, %v6510_v31  ;;  %5385 = vmatmul.mubr.msk.f32.gmra.mxu0 %vm507_vm0, %v6510_v31 }
 0x15d   : > { %5395 = vmatprep.mubr.msk.f32.mxu1 %vm5915_vm1, %v5914_v63  ;;  %5412 = vmatprep.mubr.msk.f32.mxu0 %vm5915_vm1, %v5914_v63 }
 0x15e   : > { %5421 = vmatprep.subr.mxu1 %v5914_v63  ;;  %5438 = vmatprep.subr.mxu0 %v5914_v63 }
 0x15f   : > { %v5225_v55 = vpop.f32.mrf.mxu0 }
 0x160   : > { %5396 = vmatmul.mubr.msk.f32.vlgmr.msra.gmra.mxu1 %vm507_vm0, %v6484_v20  ;;  %5413 = vmatmul.mubr.msk.f32.vlgmr.msra.gmra.mxu0 %vm507_vm0, %v6484_v20 }
 0x161   : > { %5422 = vmatpush3.msra.mxu1 %v5200_v51  ;;  %5439 = vmatpush3.msra.mxu0 %v5214_v52  ;;  %v5239_v56 = vpop.f32.mrf.mxu1  ;;  %v1556_v57 = vpop.f32.mrf.mxu0 }
 0x162   : > { %5423 = vmatprep.subr.mxu1 %v5914_v63  ;;  %5440 = vmatprep.subr.mxu0 %v5914_v63 }
 0x163   : > { %5424 = vmatpush3.msra.mxu1 %v1372_v53  ;;  %5441 = vmatpush3.msra.mxu0 %v1469_v54  ;;  %v1653_v58 = vpop.f32.mrf.mxu1  ;;  %v5228_v59 = vpop.f32.mrf.mxu0 }
 0x164   : > { %5398 = vmatprep.mubr.msk.f32.mxu1 %vm5915_vm1, %v5914_v63  ;;  %5415 = vmatprep.mubr.msk.f32.mxu0 %vm5915_vm1, %v5914_v63 }
 0x165   : > { %5425 = vmatprep.subr.mxu1 %v5914_v63  ;;  %5442 = vmatprep.subr.mxu0 %v5914_v63  ;;  %v5242_v60 = vpop.f32.mrf.mxu1  ;;  %v1566_v61 = vpop.f32.mrf.mxu0 }
 0x166   : > { %5399 = vmatmul.mubr.msk.f32.gmra.mxu1 %vm507_vm0, %v6498_v27  ;;  %5416 = vmatmul.mubr.msk.f32.gmra.mxu0 %vm507_vm0, %v6498_v27 }
 0x167   : > { %5426 = vmatpush3.msra.mxu1 %v5197_v47  ;;  %5443 = vmatpush3.msra.mxu0 %v5211_v48  ;;  %v1663_v62 = vpop.f32.mrf.mxu1 }
 0x168   : > { %5427 = vmatprep.subr.mxu1 %v5914_v63  ;;  %5444 = vmatprep.subr.mxu0 %v5914_v63 }
 0x169   : > { %5428 = vmatpush3.msra.mxu1 %v1362_v49  ;;  %5445 = vmatpush3.msra.mxu0 %v1459_v50 }
 0x16a   : > { %5401 = vmatprep.mubr.msk.f32.mxu1 %vm5915_vm1, %v5914_v63  ;;  %5418 = vmatprep.mubr.msk.f32.mxu0 %vm5915_vm1, %v5914_v63 }
 0x16b   : > { %5402 = vmatmul.mubr.msk.f32.gmra.mxu1 %vm507_vm0, %v6510_v31  ;;  %5419 = vmatmul.mubr.msk.f32.gmra.mxu0 %vm507_vm0, %v6510_v31  ;;  %v5253_v0 = vpop.f32.mrf.mxu0 }
 0x16c   : > { %5429 = vmatprep.mubr.msk.f32.mxu1 %vm5915_vm1, %v5914_v63  ;;  %5446 = vmatprep.mubr.msk.f32.mxu0 %vm5915_vm1, %v5914_v63 }
 0x16d   : > { %5455 = vmatprep.subr.mxu1 %v5914_v63  ;;  %5472 = vmatprep.subr.mxu0 %v5914_v63  ;;  %v5267_v1 = vpop.f32.mrf.mxu1  ;;  %v1750_v2 = vpop.f32.mrf.mxu0 }
 0x16f   : > { %5430 = vmatmul.mubr.msk.f32.vlgmr.msra.gmra.mxu1 %vm507_vm0, %v6484_v20  ;;  %5447 = vmatmul.mubr.msk.f32.vlgmr.msra.gmra.mxu0 %vm507_vm0, %v6484_v20  ;;  %v1847_v5 = vpop.f32.mrf.mxu1  ;;  %v5256_v7 = vpop.f32.mrf.mxu0 }
 0x170   : > { %5456 = vmatpush3.msra.mxu1 %v5228_v59  ;;  %5473 = vmatpush3.msra.mxu0 %v5242_v60 }
 0x171   : > { %5457 = vmatprep.subr.mxu1 %v5914_v63  ;;  %5474 = vmatprep.subr.mxu0 %v5914_v63  ;;  %v5270_v13 = vpop.f32.mrf.mxu1  ;;  %v1760_v3 = vpop.f32.mrf.mxu0 }
 0x172   : > { %5458 = vmatpush3.msra.mxu1 %v1566_v61  ;;  %5475 = vmatpush3.msra.mxu0 %v1663_v62 }
 0x173   : > { %5432 = vmatprep.mubr.msk.f32.mxu1 %vm5915_vm1, %v5914_v63  ;;  %5449 = vmatprep.mubr.msk.f32.mxu0 %vm5915_vm1, %v5914_v63  ;;  %v1857_v15 = vpop.f32.mrf.mxu1 }
 0x174   : > { %5459 = vmatprep.subr.mxu1 %v5914_v63  ;;  %5476 = vmatprep.subr.mxu0 %v5914_v63 }
 0x175   : > { %5433 = vmatmul.mubr.msk.f32.gmra.mxu1 %vm507_vm0, %v6498_v27  ;;  %5450 = vmatmul.mubr.msk.f32.gmra.mxu0 %vm507_vm0, %v6498_v27  ;;  %v5281_v17 = vpop.f32.mrf.mxu0 }
 0x176   : > { %5460 = vmatpush3.msra.mxu1 %v5225_v55  ;;  %5477 = vmatpush3.msra.mxu0 %v5239_v56 }
 0x177   : > { %5461 = vmatprep.subr.mxu1 %v5914_v63  ;;  %5478 = vmatprep.subr.mxu0 %v5914_v63  ;;  %v1944_v21 = vpop.f32.mrf.mxu0 }
 0x178   : > { %5462 = vmatpush3.msra.mxu1 %v1556_v57  ;;  %5479 = vmatpush3.msra.mxu0 %v1653_v58 }
 0x179   : > { %5435 = vmatprep.mubr.msk.f32.mxu1 %vm5915_vm1, %v5914_v63  ;;  %5452 = vmatprep.mubr.msk.f32.mxu0 %vm5915_vm1, %v5914_v63  ;;  %v5284_v22 = vpop.f32.mrf.mxu0 }
 0x17a   : > { %5436 = vmatmul.mubr.msk.f32.gmra.mxu1 %vm507_vm0, %v6510_v31  ;;  %5453 = vmatmul.mubr.msk.f32.gmra.mxu0 %vm507_vm0, %v6510_v31 }
 0x17b   : > { %5463 = vmatprep.mubr.msk.f32.mxu1 %vm5915_vm1, %v5914_v63  ;;  %5480 = vmatprep.mubr.msk.f32.mxu0 %vm5915_vm1, %v5914_v63  ;;  %v1954_v23 = vpop.f32.mrf.mxu0 }
 0x17c   : > { %5489 = vmatprep.subr.mxu1 %v5914_v63  ;;  %5506 = vmatprep.subr.mxu0 %v5914_v63 }
 0x17e   : > { %5464 = vmatmul.mubr.msk.f32.vlgmr.msra.gmra.mxu1 %vm507_vm0, %v6484_v20  ;;  %5481 = vmatmul.mubr.msk.f32.vlgmr.msra.gmra.mxu0 %vm507_vm0, %v6484_v20 }
 0x17f   : > { %5490 = vmatpush3.msra.mxu1 %v5256_v7  ;;  %5507 = vmatpush3.msra.mxu0 %v5270_v13 }
 0x180   : > { %5491 = vmatprep.subr.mxu1 %v5914_v63  ;;  %5508 = vmatprep.subr.mxu0 %v5914_v63 }
 0x181   : > { %5492 = vmatpush3.msra.mxu1 %v1760_v3  ;;  %5509 = vmatpush3.msra.mxu0 %v1857_v15 }
 0x182   : > { %5466 = vmatprep.mubr.msk.f32.mxu1 %vm5915_vm1, %v5914_v63  ;;  %5483 = vmatprep.mubr.msk.f32.mxu0 %vm5915_vm1, %v5914_v63 }
 0x183   : > { %5493 = vmatprep.subr.mxu1 %v5914_v63  ;;  %5510 = vmatprep.subr.mxu0 %v5914_v63 }
 0x184   : > { %5467 = vmatmul.mubr.msk.f32.gmra.mxu1 %vm507_vm0, %v6498_v27  ;;  %5484 = vmatmul.mubr.msk.f32.gmra.mxu0 %vm507_vm0, %v6498_v27 }
 0x185   : > { %5494 = vmatpush3.msra.mxu1 %v5253_v0  ;;  %5511 = vmatpush3.msra.mxu0 %v5267_v1 }
 0x186   : > { %5495 = vmatprep.subr.mxu1 %v5914_v63  ;;  %5512 = vmatprep.subr.mxu0 %v5914_v63 }
 0x187   : > { %5496 = vmatpush3.msra.mxu1 %v1750_v2  ;;  %5513 = vmatpush3.msra.mxu0 %v1847_v5 }
 0x188   : > { %5469 = vmatprep.mubr.msk.f32.mxu1 %vm5915_vm1, %v5914_v63  ;;  %5486 = vmatprep.mubr.msk.f32.mxu0 %vm5915_vm1, %v5914_v63 }
 0x189   : > { %5470 = vmatmul.mubr.msk.f32.gmra.mxu1 %vm507_vm0, %v6510_v31  ;;  %5487 = vmatmul.mubr.msk.f32.gmra.mxu0 %vm507_vm0, %v6510_v31 }
 0x18a   : > { %5497 = vmatprep.mubr.msk.f32.mxu1 %vm5915_vm1, %v5914_v63  ;;  %5514 = vmatprep.mubr.msk.f32.mxu0 %vm5915_vm1, %v5914_v63 }
 0x18b   : > { %5523 = vmatprep.subr.mxu1 %v5914_v63  ;;  %5540 = vmatprep.subr.mxu0 %v6175_v10 }
 0x18d   : > { %5498 = vmatmul.mubr.msk.f32.vlgmr.msra.gmra.mxu1 %vm507_vm0, %v6484_v20  ;;  %5515 = vmatmul.mubr.msk.f32.vlgmr.msra.gmra.mxu0 %vm507_vm0, %v6484_v20 }
 0x18e   : > { %5524 = vmatpush3.msra.mxu1 %v5284_v22  ;;  %5500 = vmatprep.mubr.msk.f32.mxu1 %vm5915_vm1, %v5914_v63 }
 0x18f   : > { %5525 = vmatprep.subr.mxu1 %v5914_v63  ;;  %5517 = vmatprep.mubr.msk.f32.mxu0 %vm5915_vm1, %v5914_v63 }
 0x190   : > { %5526 = vmatpush3.msra.mxu1 %v1954_v23  ;;  %5541 = vmatpush3.msra.mxu0 %v6175_v10  ;;  %v6711_v10 = vld [vmem:[%s7171_s3] sm:$0xff] }
 0x191   : > { %5527 = vmatprep.subr.mxu1 %v5914_v63  ;;  %5501 = vmatmul.mubr.msk.f32.gmra.mxu1 %vm507_vm0, %v6498_v27 }
 0x192   : > { %5518 = vmatmul.mubr.msk.f32.gmra.mxu0 %vm507_vm0, %v6498_v27  ;;  %5528 = vmatpush3.msra.mxu1 %v5281_v17 }
 0x193   : > { %5529 = vmatprep.subr.mxu1 %v5914_v63  ;;  %5542 = vmatprep.subr.mxu0 %v6165_v8 }
 0x194   : > { %5530 = vmatpush3.msra.mxu1 %v1944_v21  ;;  %5543 = vmatpush3.msra.mxu0 %v6165_v8  ;;  %v6726_v8 = vld [vmem:[%s7171_s3 + $0x8] sm:$0xff] }
 0x195   : > { %5503 = vmatprep.mubr.msk.f32.mxu1 %vm5915_vm1, %v5914_v63  ;;  %5520 = vmatprep.mubr.msk.f32.mxu0 %vm5915_vm1, %v5914_v63 }
 0x196   : > { %5544 = vmatprep.subr.mxu0 %v6149_v6  ;;  %5504 = vmatmul.mubr.msk.f32.gmra.mxu1 %vm507_vm0, %v6510_v31 }
 0x197   : > { %5521 = vmatmul.mubr.msk.f32.gmra.mxu0 %vm507_vm0, %v6510_v31  ;;  %5531 = vmatprep.mubr.msk.f32.mxu1 %vm5915_vm1, %v5914_v63 }
 0x198   : > { %5545 = vmatpush3.msra.mxu0 %v6149_v6  ;;  %5548 = vmatprep.mubr.msk.f32.mxu0 %vm507_vm0, %v6711_v10  ;;  %v5783_v6 = vld [vmem:[%s6138_s22 + $0x20] sm:$0xff] }
 0x199   : > { %5546 = vmatprep.subr.mxu0 %v6142_v4  ;;  %5551 = vmatprep.subr.mxu1 %v6178_v11 }
 0x19a   : > { %5547 = vmatpush3.msra.mxu0 %v6142_v4  ;;  %5532 = vmatmul.mubr.msk.f32.vlgmr.msra.gmra.mxu1 %vm507_vm0, %v6484_v20  ;;  %v5782_v4 = vld [vmem:[%s6138_s22 + $0x28] sm:$0xff] }
 0x19b   : > { %5562 = vmatprep.subr.mxu0 %v6228_v18  ;;  %5549 = vmatmul.mubr.msk.f32.vlgmr.msra.gmra.mxu0 %vm507_vm0, %v6726_v8 }
 0x19c   : > { %5563 = vmatpush3.msra.mxu0 %v6228_v18  ;;  %5552 = vmatpush3.msra.mxu1 %v6178_v11  ;;  %v6775_v11 = vld [vmem:[%s7172_s4 + $0x10] sm:$0xff] }
 0x19d   : > { %5564 = vmatprep.subr.mxu0 %v6212_v16  ;;  %5534 = vmatprep.mubr.msk.f32.mxu1 %vm5915_vm1, %v5914_v63 }
 0x19e   : > { %5565 = vmatpush3.msra.mxu0 %v6212_v16  ;;  %5553 = vmatprep.subr.mxu1 %v6168_v9 }
 0x19f   : > { %5566 = vmatprep.subr.mxu0 %v6203_v14  ;;  %5535 = vmatmul.mubr.msk.f32.gmra.mxu1 %vm507_vm0, %v6498_v27 }
 0x1a0   : > { %5554 = vmatpush3.msra.mxu1 %v6168_v9  ;;  %5567 = vmatpush3.msra.mxu0 %v6203_v14  ;;  %v6767_v9 = vld [vmem:[%s7172_s4 + $0x18] sm:$0xff]  ;;  %v6793_v14 = vld [vmem:[%s7172_s4] sm:$0xff] }
 0x1a1   : > { %5568 = vmatprep.subr.mxu0 %v6193_v12  ;;  %5555 = vmatprep.subr.mxu1 %v5782_v4 }
 0x1a2   : > { %5569 = vmatpush3.msra.mxu0 %v6193_v12  ;;  %5570 = vmatprep.mubr.msk.f32.mxu0 %vm507_vm0, %v6711_v10  ;;  %v6784_v12 = vld [vmem:[%s7172_s4 + $0x8] sm:$0xff] }
 0x1a3   : > { %5537 = vmatprep.mubr.msk.f32.mxu1 %vm5915_vm1, %v5914_v63  ;;  %5556 = vmatpush3.msra.mxu1 %v5782_v4 }
 0x1a4   : > { %5571 = vmatmul.mubr.msk.f32.vlgmr.msra.gmra.mxu0 %vm507_vm0, %v6726_v8  ;;  %5538 = vmatmul.mubr.msk.f32.gmra.mxu1 %vm507_vm0, %v6510_v31 }
 0x1a5   : > { %5557 = vmatprep.subr.mxu1 %v5783_v6  ;;  %5559 = vmatprep.mubr.msk.f32.mxu1 %vm507_vm0, %v6711_v10 }
 0x1a6   : > { %5558 = vmatpush3.msra.mxu1 %v5783_v6  ;;  %5584 = vmatprep.subr.mxu0 %v6767_v9 }
 0x1a7   : > { %5573 = vmatprep.subr.mxu1 %v6767_v9  ;;  %5585 = vmatpush3.msra.mxu0 %v6767_v9 }
 0x1a8   : > { %5560 = vmatmul.mubr.msk.f32.vlgmr.msra.gmra.mxu1 %vm507_vm0, %v6726_v8  ;;  %5586 = vmatprep.subr.mxu0 %v6775_v11 }
 0x1a9   : > { %5574 = vmatpush3.msra.mxu1 %v6767_v9  ;;  %5587 = vmatpush3.msra.mxu0 %v6775_v11 }
 0x1aa   : > { %5575 = vmatprep.subr.mxu1 %v6775_v11  ;;  %5588 = vmatprep.subr.mxu0 %v6784_v12 }
 0x1ab   : > { %5576 = vmatpush3.msra.mxu1 %v6775_v11  ;;  %5589 = vmatpush3.msra.mxu0 %v6784_v12 }
 0x1ac   : > { %5577 = vmatprep.subr.mxu1 %v6784_v12  ;;  %5590 = vmatprep.subr.mxu0 %v6793_v14 }
 0x1ad   : > { %5578 = vmatpush3.msra.mxu1 %v6784_v12  ;;  %5591 = vmatpush3.msra.mxu0 %v6793_v14 }
 0x1ae   : > { %5579 = vmatprep.subr.mxu1 %v6793_v14  ;;  %5606 = vmatprep.subr.mxu0 %v6231_v19 }
 0x1af   : > { %5580 = vmatpush3.msra.mxu1 %v6793_v14 }
 0x1b0   : > { %5595 = vmatprep.subr.mxu1 %v6767_v9 }
 0x1f2   : > { %v2038_v16 = vpop.f32.mrf.mxu1  ;;  %v6802_v18 = vpop.f32.mrf.mxu0 }
 0x1f3   : > { %v3172_v35 = vmul.f32 %v2038_v16, %v2038_v16 }
 0x1f4   : > { %v5295_v20 = vpop.f32.mrf.mxu1  ;;  %v5312_v24 = vpop.f32.mrf.mxu0 }
 0x1f8   : > { %v2043_v25 = vpop.f32.mrf.mxu1  ;;  %v6804_v26 = vpop.f32.mrf.mxu0 }
 0x1f9   : > { %v6816_v42 = vmul.f32 %v2043_v25, %v2043_v25 }
 0x1fa   : > { %v5298_v27 = vpop.f32.mrf.mxu1  ;;  %v5315_v28 = vpop.f32.mrf.mxu0 }
 0x1fe   : > { %v6806_v29 = vpop.f32.mrf.mxu1  ;;  %v6808_v30 = vpop.f32.mrf.mxu0 }
 0x200   : > { %v5301_v31 = vpop.f32.mrf.mxu1  ;;  %v5318_v32 = vpop.f32.mrf.mxu0 }
 0x202   : > { %v2198_v33 = vpop.f32.mrf.mxu1  ;;  %v2278_v34 = vpop.f32.mrf.mxu0 }
 0x203   : > { %v3181_v19 = vmul.f32 %v2278_v34, %v2278_v34  ;;  %v6810_v36 = vmul.f32 %v2278_v34, %v2038_v16  ;;  %v6834_v56 = vmul.f32 %v2198_v33, %v2198_v33 }
 0x204   : > { %v5329_v37 = vpop.f32.mrf.mxu1  ;;  %v5346_v38 = vpop.f32.mrf.mxu0 }
 0x205   : > { %v6812_v39 = vadd.f32 %v3181_v19, %v3172_v35 }
 0x208   : > { %v6814_v40 = vpop.f32.mrf.mxu1  ;;  %v2283_v41 = vpop.f32.mrf.mxu0 }
 0x209   : > { %v3182_v43 = vmul.f32 %v2283_v41, %v2283_v41  ;;  %v6818_v44 = vmul.f32 %v2283_v41, %v2043_v25 }
 0x20a   : > { %v5332_v45 = vpop.f32.mrf.mxu1  ;;  %v5349_v46 = vpop.f32.mrf.mxu0 }
 0x20b   : > { %v6821_v47 = vadd.f32 %v3182_v43, %v6816_v42  ;;  %v3354_v45 = vlaneseq }
 0x20d   : > { %v6823_v48 = vpop.f32.mrf.mxu1  ;;  %v6825_v49 = vpop.f32.mrf.mxu0 }
 0x20e   : > { %v6829_v50 = vmul.f32 %v6825_v49, %v6806_v29 }
 0x20f   : > { %v5335_v51 = vpop.f32.mrf.mxu1  ;;  %v5352_v52 = vpop.f32.mrf.mxu0 }
 0x211   : > { %v2358_v53 = vpop.f32.mrf.mxu1  ;;  %v2438_v54 = vpop.f32.mrf.mxu0 }
 0x212   : > { %v6832_v55 = vmul.f32 %v2358_v53, %v6802_v18  ;;  %v6836_v57 = vmul.f32 %v2438_v54, %v2438_v54  ;;  %v6838_v58 = vmul.f32 %v2438_v54, %v2198_v33  ;;  %v6874_v54 = vshrl.u32 %v3354_v45, 7 }
 0x213   : > { %v5363_v59 = vpop.f32.mrf.mxu1  ;;  %v5380_v60 = vpop.f32.mrf.mxu0 }
 0x214   : > { %v6842_v61 = vadd.f32 %v6836_v57, %v6834_v56  ;;  %vm4426_vm7 = vcmp.eq.s32.totalorder %v6874_v54, 0 }
 0x217   : > { %v6844_v62 = vpop.f32.mrf.mxu1  ;;  %v6846_v0 = vpop.f32.mrf.mxu0 }
 0x218   : > { %v6850_v1 = vmul.f32 %v6844_v62, %v6804_v26  ;;  %v6854_v2 = vmul.f32 %v6846_v0, %v6814_v40 }
 0x219   : > { %v5366_v5 = vpop.f32.mrf.mxu1  ;;  %v5383_v7 = vpop.f32.mrf.mxu0 }
 0x21c   : > { %v6856_v13 = vpop.f32.mrf.mxu1  ;;  %v6858_v3 = vpop.f32.mrf.mxu0 }
 0x21d   : > { %v6862_v15 = vmul.f32 %v6856_v13, %v6808_v30  ;;  %v6866_v17 = vmul.f32 %v6858_v3, %v6823_v48 }
 0x21e   : > { %v5369_v21 = vpop.f32.mrf.mxu1  ;;  %v5386_v22 = vpop.f32.mrf.mxu0 }
 0x21f   : > { %v3357_v21 = vadd.s32 16, %v6874_v54 }
 0x220   : > { %v2518_v23 = vpop.f32.mrf.mxu1  ;;  %v2598_v4 = vpop.f32.mrf.mxu0 }
 0x221   : > { %v3199_v38 = vsub.f32 %v2518_v23, %v3172_v35  ;;  %vm3362_vm2 = vcmp.lt.s32.totalorder %v3357_v21, 22  ;;  %v3281_v21 = vmul.f32 2.0, %v6810_v36 }
 0x222   : > { %v5397_v6 = vpop.f32.mrf.mxu1  ;;  %v5414_v16 = vpop.f32.mrf.mxu0 }
 0x226   : > { %v2523_v20 = vpop.f32.mrf.mxu1  ;;  %v6868_v24 = vpop.f32.mrf.mxu0 }
 0x227   : > { %v3200_v5 = vsub.f32 %v2523_v20, %v6816_v42  ;;  %v3175_v42 = vmul.f32 %v6802_v18, %v6802_v18  ;;  %v6891_v20 = vstv %s4637_s21 }
 0x228   : > { %v5400_v25 = vpop.f32.mrf.mxu1  ;;  %v5417_v27 = vpop.f32.mrf.mxu0 }
 0x229   : > { %v6884_v25 = vstv %s462_s18  ;;  %v3184_v27 = vmul.f32 %v2358_v53, %v2358_v53 }
 0x22b   : > { %v6870_v28 = vpop.f32.mrf.mxu1  ;;  %v6872_v31 = vpop.f32.mrf.mxu0 }
 0x22d   : > { %v5403_v32 = vpop.f32.mrf.mxu1  ;;  %v5420_v33 = vpop.f32.mrf.mxu0 }
 0x22f   : > { %v2678_v34 = vpop.f32.mrf.mxu1  ;;  %v2758_v37 = vpop.f32.mrf.mxu0 }
 0x230   : > { %v3208_v41 = vsub.f32 %v2758_v37, %v3181_v19  ;;  %v6880_v19 = vand.u32 127, %v3354_v45  ;;  %v3205_v45 = vsub.f32 %v2678_v34, %v6834_v56  ;;  %v3174_v56 = vmul.f32 %v6806_v29, %v6806_v29 }
 0x231   : > { %v5431_v46 = vpop.f32.mrf.mxu1  ;;  %v5448_v51 = vpop.f32.mrf.mxu0  ;;  %v3328_v29 = vadd.f32 %v6821_v47, %v6884_v25 }
 0x232   : > { %v3245_v52 = vadd.f32 %v3208_v41, %v3199_v38  ;;  %vm3363_vm3 = vcmp.lt.s32.totalorder %v6880_v19, 22  ;;  %v3202_v41 = vsub.f32 %v2598_v4, %v3175_v42  ;;  %v3183_v51 = vmul.f32 %v6825_v49, %v6825_v49 }
 0x233   : > { %vm3366_vm4 = vmand %vm3362_vm2, %vm3363_vm3  ;;  %v3176_v4 = vmul.f32 %v6804_v26, %v6804_v26  ;;  %v3177_v49 = vmul.f32 %v6808_v30, %v6808_v30  ;;  %vm4431_vm6 = vcmp.eq.s32.totalorder %v6880_v19, 1  ;;  %vm4427_vm8 = vcmp.eq.s32.totalorder %v6880_v19, 0 }
 0x234   : > { %vm4436_vm9 = vcmp.eq.s32.totalorder %v6880_v19, 2  ;;  %vm4432_vm10 = vmand %vm4426_vm7, %vm4431_vm6  ;;  %vm4441_vm13 = vcmp.eq.s32.totalorder %v6880_v19, 3 }
 0x235   : > { %v6876_v59 = vpop.f32.mrf.mxu1  ;;  %v2763_v60 = vpop.f32.mrf.mxu0  ;;  %vm4428_vm11 = vmand %vm4426_vm7, %vm4427_vm8 }
 0x236   : > { %v3209_v7 = vsub.f32 %v2763_v60, %v3182_v43  ;;  %v3327_v43 = vadd.f32 %v6812_v39, %v6884_v25  ;;  %v3321_v60 = vadd.f32 %v3184_v27, %v3175_v42  ;;  %v6901_v39 = vsel %vm3366_vm4, 1.0, %v5914_v63  ;;  %vm4437_vm12 = vmand %vm4426_vm7, %vm4436_vm9 }
 0x237   : > { %v5434_v22 = vpop.f32.mrf.mxu1  ;;  %v5451_v6 = vpop.f32.mrf.mxu0  ;;  %vm4442_vm14 = vmand %vm4426_vm7, %vm4441_vm13 }
 0x238   : > { %v3246_v35 = vadd.f32 %v3209_v7, %v3200_v5  ;;  %v6898_v7 = vsel %vm3363_vm3, 1.0, %v5914_v63  ;;  %v3185_v22 = vmul.f32 %v6844_v62, %v6844_v62  ;;  %v3254_v63 = vadd.f32 %v3245_v52, %v6891_v20 }
 0x239   : > { %5746 = vrcp.f32 %v3327_v43  ;;  %v3282_v6 = vmul.f32 2.0, %v6818_v44  ;;  %v3330_v30 = vadd.f32 %v3321_v60, %v6884_v25  ;;  %v3203_v62 = vsub.f32 %v6868_v24, %v3176_v4 }
 0x23a   : > { %v6882_v23 = vpop.f32.mrf.mxu1  ;;  %v2768_v16 = vpop.f32.mrf.mxu0  ;;  %v3201_v52 = vsub.f32 %v6870_v28, %v3174_v56  ;;  %v3255_v47 = vadd.f32 %v3246_v35, %v6891_v20  ;;  %v6936_v60 = vmul.f32 %v6823_v48, %v6823_v48 }
 0x23b   : > { %v3210_v26 = vsub.f32 %v2768_v16, %v3183_v51  ;;  %v6924_v16 = vadd.f32 %v6884_v25, %v3281_v21  ;;  %v6932_v28 = vadd.f32 %v6884_v25, %v3282_v6 }
 0x23c   : > { %v5437_v32 = vpop.f32.mrf.mxu1  ;;  %v5454_v33 = vpop.f32.mrf.mxu0 }
 0x23d   : > { %v3283_v32 = vmul.f32 2.0, %v6829_v50  ;;  %v3320_v33 = vadd.f32 %v3183_v51, %v3174_v56  ;;  %v3247_v24 = vadd.f32 %v3210_v26, %v3201_v52 }
 0x23e   : > { %v2838_v37 = vpop.f32.mrf.mxu1  ;;  %v2918_v38 = vpop.f32.mrf.mxu0 }
 0x23f   : > { %v3211_v46 = vsub.f32 %v2838_v37, %v3184_v27  ;;  %v3214_v53 = vsub.f32 %v2918_v38, %v6836_v57  ;;  %v3322_v38 = vadd.f32 %v3185_v22, %v3176_v4  ;;  %v3329_v35 = vadd.f32 %v3320_v33, %v6884_v25 }
 0x240   : > { %v5465_v5 = vpop.f32.mrf.mxu1  ;;  %v5482_v18 = vpop.f32.mrf.mxu0 }
 0x241   : > { %v3248_v34 = vadd.f32 %v3211_v46, %v3202_v41  ;;  %v6907_v57 = vadd.f32 %v3214_v53, %v3205_v45  ;;  %v3179_v46 = vmul.f32 %v6814_v40, %v6814_v40  ;;  %v3186_v53 = vmul.f32 %v6856_v13, %v6856_v13 }
 0x242   : > { %v6940_v5 = vadd.f32 %v6884_v25, %v3283_v32  ;;  %v3188_v40 = vmul.f32 %v6846_v0, %v6846_v0  ;;  %v3331_v56 = vadd.f32 %v3322_v38, %v6884_v25  ;;  %v3284_v0 = vmul.f32 2.0, %v6832_v55 }
 0x243   : > { %v3257_v27 = vadd.f32 %v3248_v34, %v6891_v20  ;;  %v3204_v34 = vsub.f32 %v6872_v31, %v3177_v49  ;;  %v3323_v21 = vadd.f32 %v3186_v53, %v3177_v49  ;;  %v3333_v32 = vadd.f32 %v6842_v61, %v6884_v25 }
 0x244   : > { %v2843_v42 = vpop.f32.mrf.mxu1  ;;  %v2923_v37 = vpop.f32.mrf.mxu0  ;;  %v3285_v31 = vmul.f32 2.0, %v6850_v1  ;;  %v3189_v49 = vmul.f32 %v6858_v3, %v6858_v3  ;;  %v3206_v33 = vsub.f32 %v6876_v59, %v3179_v46  ;;  %v3294_v3 = vadd.f32 %v6884_v25, %v3284_v0 }
 0x245   : > { %5748 = vrcp.f32 %v3257_v27  ;;  %v3212_v43 = vsub.f32 %v2843_v42, %v3185_v22  ;;  %v3256_v22 = vadd.f32 %v3247_v24, %v6891_v20  ;;  %v6950_v27 = vmul.f32 2.0, %v6838_v58 }
 0x246   : > { %5750 = vrcp.f32 %v3254_v63  ;;  %v5468_v41 = vpop.f32.mrf.mxu1  ;;  %v5485_v45 = vpop.f32.mrf.mxu0  ;;  %v3215_v63 = vsub.f32 %v2923_v37, %v3188_v40  ;;  %v3325_v24 = vadd.f32 %v3188_v40, %v3179_v46 }
 0x247   : > { %v3249_v51 = vadd.f32 %v3212_v43, %v3203_v62  ;;  %5752 = vrcp.f32 %v3328_v29  ;;  %v3332_v43 = vadd.f32 %v3323_v21, %v6884_v25  ;;  %v5747_v45 = vpop.eup %5746 }
 0x248   : > { %5754 = vrcp.f32 %v3330_v30  ;;  %v3252_v61 = vadd.f32 %v3215_v63, %v3206_v33  ;;  %v3286_v33 = vmul.f32 2.0, %v6862_v15 }
 0x249   : > { %v3258_v13 = vadd.f32 %v3249_v51, %v6891_v20  ;;  %v2848_v18 = vpop.f32.mrf.mxu1  ;;  %v2928_v4 = vpop.f32.mrf.mxu0  ;;  %5756 = vrcp.f32 %v3255_v47 }
 0x24a   : > { %v3213_v48 = vsub.f32 %v2848_v18, %v3186_v53  ;;  %v3216_v38 = vsub.f32 %v2928_v4, %v3189_v49  ;;  %v3261_v46 = vadd.f32 %v3252_v61, %v6891_v20 }
 0x24b   : > { %5758 = vrcp.f32 %v3258_v13  ;;  %v5471_v6 = vpop.f32.mrf.mxu1  ;;  %v5488_v26 = vpop.f32.mrf.mxu0  ;;  %v3295_v13 = vadd.f32 %v6884_v25, %v3285_v31 }
 0x24c   : > { %5760 = vrcp.f32 %v3329_v35  ;;  %v3250_v29 = vadd.f32 %v3213_v48, %v3204_v34 }
 0x24d   : > { %v2998_v30 = vpop.f32.mrf.mxu1  ;;  %v3078_v42 = vpop.f32.mrf.mxu0  ;;  %5762 = vrcp.f32 %v3331_v56 }
 0x24e   : > { %v3259_v37 = vadd.f32 %v3250_v29, %v6891_v20  ;;  %v3217_v62 = vsub.f32 %v2998_v30, %v6810_v36  ;;  %v3220_v52 = vsub.f32 %v3078_v42, %v6832_v55  ;;  %5764 = vrcp.f32 %v3256_v22 }
 0x24f   : > { %v5499_v47 = vpop.f32.mrf.mxu1  ;;  %v5516_v41 = vpop.f32.mrf.mxu0  ;;  %v3207_v36 = vsub.f32 %v6882_v23, %v6936_v60  ;;  %v3260_v55 = vadd.f32 %v6907_v57, %v6891_v20  ;;  %v3334_v29 = vadd.f32 %v3325_v24, %v6884_v25  ;;  %v3326_v30 = vadd.f32 %v3189_v49, %v6936_v60 }
 0x250   : > { %5766 = vrcp.f32 %v3259_v37  ;;  %v3226_v59 = vmul.f32 2.0, %v3217_v62  ;;  %v3229_v53 = vmul.f32 2.0, %v3220_v52 }
 0x251   : > { %5768 = vrcp.f32 %v3333_v32  ;;  %v3003_v51 = vpop.f32.mrf.mxu1  ;;  %v3253_v40 = vadd.f32 %v3216_v38, %v3207_v36 }
 0x252   : > { %v5749_v35 = vpop.eup %5748  ;;  %v3236_v18 = vadd.f32 %v6891_v20, %v3226_v59  ;;  %v3239_v4 = vadd.f32 %v6891_v20, %v3229_v53  ;;  %v3218_v56 = vsub.f32 %v3003_v51, %v6818_v44  ;;  %v3083_v34 = vpop.f32.mrf.mxu0  ;;  %5770 = vrcp.f32 %v3332_v43 }
 0x253   : > { %v5751_v48 = vpop.eup %5750  ;;  %v3221_v23 = vsub.f32 %v3083_v34, %v6850_v1  ;;  %v5502_v21 = vpop.f32.mrf.mxu1  ;;  %5772 = vrcp.f32 %v3260_v55  ;;  %v3262_v47 = vadd.f32 %v3253_v40, %v6891_v20 }
 0x254   : > { %v3272_v57 = vmul.f32 %v5751_v48, %v3236_v18  ;;  %v3300_v22 = vmul.f32 %v6924_v16, %v3236_v18  ;;  %v6974_v63 = vmul.f32 %v5749_v35, %v3239_v4  ;;  %v3303_v6 = vmul.f32 %v3294_v3, %v3239_v4  ;;  %v5519_v26 = vpop.f32.mrf.mxu0  ;;  %v5753_v0 = vpop.eup %5752 }
 0x255   : > { %v3227_v44 = vmul.f32 2.0, %v3218_v56  ;;  %v3230_v32 = vmul.f32 2.0, %v3221_v23  ;;  %v5755_v31 = vpop.eup %5754  ;;  %5774 = vrcp.f32 %v3261_v46 }
 0x256   : > { %v3309_v1 = vmul.f32 %v5751_v48, %v3300_v22  ;;  %v3312_v42 = vmul.f32 %v5749_v35, %v3303_v6  ;;  %v3008_v37 = vpop.f32.mrf.mxu1  ;;  %v5757_v62 = vpop.eup %5756  ;;  %5776 = vrcp.f32 %v3334_v29 }
 0x257   : > { %v3237_v16 = vadd.f32 %v6891_v20, %v3227_v44  ;;  %v3240_v52 = vadd.f32 %v6891_v20, %v3230_v32  ;;  %v3219_v43 = vsub.f32 %v3008_v37, %v6829_v50  ;;  %v3088_v61 = vpop.f32.mrf.mxu0  ;;  %v3296_v50 = vadd.f32 %v6884_v25, %v3286_v33 }
 0x258   : > { %v5759_v38 = vpop.eup %5758  ;;  %v3345_v41 = vmul.f32 %v5747_v45, %v3309_v1  ;;  %v6983_v3 = vmul.f32 %v5755_v31, %v3312_v42  ;;  %v3222_v60 = vsub.f32 %v3088_v61, %v6862_v15  ;;  %v5505_v49 = vpop.f32.mrf.mxu1  ;;  %v3399_v45 = vmul.f32 %v6898_v7, %v3272_v57 }
 0x259   : > { %v5761_v59 = vpop.eup %5760  ;;  %v3273_v53 = vmul.f32 %v5757_v62, %v3237_v16  ;;  %v3301_v24 = vmul.f32 %v6932_v28, %v3237_v16  ;;  %v3276_v36 = vmul.f32 %v5759_v38, %v3240_v52  ;;  %v3304_v55 = vmul.f32 %v3295_v13, %v3240_v52  ;;  %v5522_v51 = vpop.f32.mrf.mxu0 }
 0x25a   : > { %v3228_v35 = vmul.f32 2.0, %v3219_v43  ;;  %v3231_v18 = vmul.f32 2.0, %v3222_v60  ;;  %v3158_v4 = vpop.f32.mrf.mxu1  ;;  %v5763_v56 = vpop.eup %5762  ;;  %v3335_v28 = vadd.f32 %v3326_v30, %v6884_v25  ;;  %5778 = vrcp.f32 %v3262_v47 }
 0x25b   : > { %v3310_v34 = vmul.f32 %v5757_v62, %v3301_v24  ;;  %v3400_v15 = vmul.f32 %v6898_v7, %v3273_v53  ;;  %v3313_v48 = vmul.f32 %v5759_v38, %v3304_v55  ;;  %v5550_v46 = vpop.f32.mrf.mxu0  ;;  %v5765_v40 = vpop.eup %5764  ;;  %v3223_v21 = vsub.f32 %v3158_v4, %v6838_v58 }
 0x25c   : > { %v3238_v13 = vadd.f32 %v6891_v20, %v3228_v35  ;;  %v3241_v23 = vadd.f32 %v6891_v20, %v3231_v18  ;;  %v5533_v22 = vpop.f32.mrf.mxu1  ;;  %v3297_v42 = vadd.f32 %v6884_v25, %v6950_v27  ;;  %v3373_v58 = vmul.f32 %v6898_v7, %v3345_v41 }
 0x25d   : > { %v5767_v6 = vpop.eup %5766  ;;  %v3346_v26 = vmul.f32 %v5753_v0, %v3310_v34  ;;  %v3408_v29 = vadd.f32 %v3400_v15, %v3399_v45  ;;  %v6994_v57 = vmul.f32 %v5763_v56, %v3313_v48  ;;  %v3503_v44 = vpop.f32.mrf.mxu0  ;;  %v3232_v0 = vmul.f32 2.0, %v3223_v21 }
 0x25e   : > { %v5769_v32 = vpop.eup %5768  ;;  %v3274_v31 = vmul.f32 %v5765_v40, %v3238_v13  ;;  %v3302_v33 = vmul.f32 %v6940_v5, %v3238_v13  ;;  %v3277_v1 = vmul.f32 %v5767_v6, %v3241_v23  ;;  %v3305_v30 = vmul.f32 %v3296_v50, %v3241_v23  ;;  %5581 = vmatprep.mubr.msk.f32.mxu1 %vm507_vm0, %v3503_v44 }
 0x25f   : > { %v3374_v37 = vmul.f32 %v6898_v7, %v3346_v26  ;;  %v3163_v62 = vpop.f32.mrf.mxu1  ;;  %5582 = vmatmul.mubr.msk.f32.vlgmr.msra.gmra.mxu1 %vm507_vm0, %v5550_v46  ;;  %v5771_v16 = vpop.eup %5770  ;;  %v3288_v52 = vmul.f32 2.0, %v6854_v2  ;;  %5780 = vrcp.f32 %v3335_v28  ;;  %v3242_v27 = vadd.f32 %v6891_v20, %v3232_v0 }
 0x260   : > { %v3311_v43 = vmul.f32 %v5765_v40, %v3302_v33  ;;  %v3401_v5 = vmul.f32 %v6901_v39, %v3274_v31  ;;  %v3314_v61 = vmul.f32 %v5767_v6, %v3305_v30  ;;  %5596 = vmatpush3.msra.mxu1 %v6767_v9  ;;  %v3224_v47 = vsub.f32 %v3163_v62, %v6854_v2  ;;  %v5773_v60 = vpop.eup %5772  ;;  %v5785_v62 = vld [vmem:[%s6091_s15 + $0x30] sm:$0xff] }
 0x261   : > { %v3382_v38 = vadd.f32 %v3374_v37, %v3373_v58  ;;  %5597 = vmatprep.subr.mxu1 %v6775_v11  ;;  %v5536_v41 = vpop.f32.mrf.mxu1  ;;  %v3402_v49 = vmul.f32 %v6898_v7, %v6974_v63  ;;  %v3278_v51 = vmul.f32 %v5773_v60, %v3242_v27  ;;  %v3306_v50 = vmul.f32 %v3297_v42, %v3242_v27  ;;  %v5786_v27 = vld [vmem:[%s6091_s15 + $0x28] sm:$0xff] }
 0x262   : > { %v3347_v53 = vmul.f32 %v5761_v59, %v3311_v43  ;;  %v3409_v24 = vadd.f32 %v3408_v29, %v3401_v5  ;;  %v3350_v55 = vmul.f32 %v5771_v16, %v3314_v61  ;;  %5598 = vmatpush3.msra.mxu1 %v6775_v11  ;;  %v3233_v35 = vmul.f32 2.0, %v3224_v47  ;;  %v5775_v18 = vpop.eup %5774  ;;  %v5787_v41 = vld [vmem:[%s6091_s15 + $0x18] sm:$0xff] }
 0x263   : > { %5599 = vmatprep.subr.mxu1 %v6784_v12  ;;  %v3298_v2 = vadd.f32 %v6884_v25, %v3288_v52  ;;  %v3403_v4 = vmul.f32 %v6898_v7, %v3276_v36  ;;  %v3289_v59 = vmul.f32 2.0, %v6866_v17  ;;  %v3315_v15 = vmul.f32 %v5773_v60, %v3306_v50  ;;  %v5777_v22 = vpop.eup %5776 }
 0x264   : > { %v3375_v56 = vmul.f32 %v6901_v39, %v3347_v53  ;;  %v3410_v45 = vadd.f32 %v3409_v24, %v3402_v49  ;;  %v5572_v34 = vpop.f32.mrf.mxu0  ;;  %v3168_v63 = vpop.f32.mrf.mxu1  ;;  %5600 = vmatpush3.msra.mxu1 %v6784_v12  ;;  %v3243_v48 = vadd.f32 %v6891_v20, %v3233_v35  ;;  %v3376_v36 = vmul.f32 %v6898_v7, %v6983_v3  ;;  %v5788_v24 = vld [vmem:[%s6091_s15 + $0x10] sm:$0xff]  ;;  %v5789_v35 = vld [vmem:[%s6091_s15 + $0x20] sm:$0xff] }
 0x265   : > { %v3225_v46 = vsub.f32 %v3168_v63, %v6866_v17  ;;  %5601 = vmatprep.subr.mxu1 %v6793_v14  ;;  %v3404_v40 = vmul.f32 %v6901_v39, %v3277_v1  ;;  %v5784_v17 = vld [vmem:[%s6091_s15 + $0x38] sm:$0xff]  ;;  %v3351_v44 = vmul.f32 %v5769_v32, %v3315_v15  ;;  %v3405_v3 = vmul.f32 %v6898_v7, %v3278_v51  ;;  %v5794_v63 = vld [vmem:[%s6091_s15 + $0x48] sm:$0xff] }
 0x266   : > { %v3653_v28 = vpop.f32.mrf.mxu0  ;;  %v5539_v13 = vpop.f32.mrf.mxu1  ;;  %5602 = vmatpush3.msra.mxu1 %v6793_v14  ;;  %v3383_v23 = vadd.f32 %v3382_v38, %v3375_v56  ;;  %v3411_v21 = vadd.f32 %v3410_v45, %v3403_v4  ;;  %v3279_v6 = vmul.f32 %v5775_v18, %v3243_v48  ;;  %v3307_v26 = vmul.f32 %v3298_v2, %v3243_v48  ;;  %v5790_v2 = vld [vmem:[%s6091_s15 + $0x8] sm:$0xff] }
 0x267   : > { %v3234_v29 = vmul.f32 2.0, %v3225_v46  ;;  %5603 = vmatprep.mubr.msk.f32.mxu1 %vm507_vm0, %v3653_v28  ;;  %5617 = vmatprep.subr.mxu1 %v5784_v17  ;;  %v3377_v33 = vmul.f32 %v6898_v7, %v6994_v57  ;;  %v3299_v42 = vadd.f32 %v6884_v25, %v3289_v59  ;;  %v5779_v32 = vpop.eup %5778  ;;  %v3378_v16 = vmul.f32 %v6901_v39, %v3350_v55  ;;  %v5795_v59 = vld [vmem:[%s6091_s15 + $0x40] sm:$0xff] }
 0x268   : > { %5604 = vmatmul.mubr.msk.f32.vlgmr.msra.gmra.mxu1 %vm507_vm0, %v5572_v34  ;;  %v5561_v31 = vpop.f32.mrf.mxu1  ;;  %v3384_v1 = vadd.f32 %v3383_v23, %v3376_v36  ;;  %v3412_v30 = vadd.f32 %v3411_v21, %v3404_v40  ;;  %v3316_v58 = vmul.f32 %v5775_v18, %v3307_v26  ;;  %v3406_v52 = vmul.f32 %v6898_v7, %v3279_v6  ;;  %v5792_v34 = vld [vmem:[%s6091_s15 + $0x58] sm:$0xff] }
 0x269   : > { %v3244_v37 = vadd.f32 %v6891_v20, %v3234_v29  ;;  %5618 = vmatpush3.msra.mxu1 %v5784_v17  ;;  %5625 = vmatprep.mubr.msk.f32.mxu1 %vm507_vm0, %v6711_v10  ;;  %v3379_v61 = vmul.f32 %v6898_v7, %v3351_v44 }
 0x26a   : > { %v3578_v0 = vpop.f32.mrf.mxu1  ;;  %5619 = vmatprep.subr.mxu1 %v5785_v62  ;;  %v3385_v57 = vadd.f32 %v3384_v1, %v3377_v33  ;;  %v3413_v43 = vadd.f32 %v3412_v30, %v3405_v3  ;;  %v3352_v20 = vmul.f32 %v5777_v22, %v3316_v58 }
 0x26b   : > { %v3280_v25 = vmul.f32 %v5779_v32, %v3244_v37  ;;  %v3308_v5 = vmul.f32 %v3299_v42, %v3244_v37  ;;  %5592 = vmatprep.mubr.msk.f32.mxu0 %vm507_vm0, %v3578_v0  ;;  %5620 = vmatpush3.msra.mxu1 %v5785_v62 }
 0x26c   : > { %5593 = vmatmul.mubr.msk.f32.vlgmr.msra.gmra.mxu0 %vm507_vm0, %v5561_v31  ;;  %v3386_v38 = vadd.f32 %v3385_v57, %v3378_v16  ;;  %5621 = vmatprep.subr.mxu1 %v5786_v27  ;;  %v3414_v47 = vadd.f32 %v3413_v43, %v3406_v52  ;;  %v5781_v53 = vpop.eup %5780  ;;  %v3380_v55 = vmul.f32 %v6898_v7, %v3352_v20  ;;  %v5791_v7 = vld [vmem:[%s6091_s15] sm:$0xff] }
 0x26d   : > { %5607 = vmatpush3.msra.mxu0 %v5787_v41  ;;  %5614 = vmatprep.mubr.msk.f32.mxu0 %vm507_vm0, %v6711_v10  ;;  %v3317_v60 = vmul.f32 %v5779_v32, %v3308_v5  ;;  %v3407_v49 = vmul.f32 %v6901_v39, %v3280_v25 }
 0x26e   : > { %5608 = vmatprep.subr.mxu0 %v5788_v24  ;;  %v3387_v51 = vadd.f32 %v3386_v38, %v3379_v61  ;;  %5622 = vmatpush3.msra.mxu1 %v5786_v27 }
 0x26f   : > { %5609 = vmatpush3.msra.mxu0 %v5788_v24  ;;  %v3353_v50 = vmul.f32 %v5781_v53, %v3317_v60  ;;  %5623 = vmatprep.subr.mxu1 %v5789_v35  ;;  %v3415_v18 = vadd.f32 %v3414_v47, %v3407_v49 }
 0x270   : > { %5610 = vmatprep.subr.mxu0 %v5790_v2  ;;  %v3388_v4 = vadd.f32 %v3387_v51, %v3380_v55  ;;  %5624 = vmatpush3.msra.mxu1 %v5789_v35 }
 0x271   : > { %5611 = vmatpush3.msra.mxu0 %v5790_v2  ;;  %v3381_v56 = vmul.f32 %v6901_v39, %v3353_v50  ;;  %5626 = vmatmul.mubr.msk.f32.vlgmr.msra.gmra.mxu1 %vm507_vm0, %v6726_v8  ;;  %v5793_v39 = vld [vmem:[%s6091_s15 + $0x50] sm:$0xff]  ;;  %s4775_s15 = sshll.u32 %s7206_s24, 4 }
 0x272   : > { %5612 = vmatprep.subr.mxu0 %v5791_v7  ;;  %5639 = vmatprep.subr.mxu1 %v6767_v9  ;;  %s429_s22 = scalar_lea.vmem %s7176_s8, %s4775_s15  ;;  %s7124_s17 = scalar_lea.vmem %s7177_s9, %s4775_s15 }
 0x273   : > { %5613 = vmatpush3.msra.mxu0 %v5791_v7  ;;  %v3389_v45 = vadd.f32 %v3388_v4, %v3381_v56  ;;  %5640 = vmatpush3.msra.mxu1 %v6767_v9 }
 0x274   : > { %5615 = vmatmul.mubr.msk.f32.vlgmr.msra.gmra.mxu0 %vm507_vm0, %v6726_v8  ;;  %5628 = vmatprep.subr.mxu0 %v5792_v34 }
 0x275   : > { %5629 = vmatpush3.msra.mxu0 %v5792_v34  ;;  %3390 = vadd.xlane.f32.xlu0 %v3389_v45 }
 0x276   : > { %5630 = vmatprep.subr.mxu0 %v5793_v39  ;;  %5636 = vmatprep.mubr.msk.f32.mxu0 %vm507_vm0, %v6711_v10 }
 0x277   : > { %5631 = vmatpush3.msra.mxu0 %v5793_v39  ;;  %5641 = vmatprep.subr.mxu1 %v6775_v11 }
 0x278   : > { %5632 = vmatprep.subr.mxu0 %v5794_v63  ;;  %5642 = vmatpush3.msra.mxu1 %v6775_v11 }
 0x279   : > { %5633 = vmatpush3.msra.mxu0 %v5794_v63  ;;  %3416 = vadd.xlane.f32.xlu0 %v3415_v18 }
 0x27a   : > { %5634 = vmatprep.subr.mxu0 %v5795_v59  ;;  %5643 = vmatprep.subr.mxu1 %v6784_v12 }
 0x27b   : > { %5635 = vmatpush3.msra.mxu0 %v5795_v59  ;;  %5644 = vmatpush3.msra.mxu1 %v6784_v12 }
 0x27c   : > { %5637 = vmatmul.mubr.msk.f32.vlgmr.msra.gmra.mxu0 %vm507_vm0, %v6726_v8  ;;  %5645 = vmatprep.subr.mxu1 %v6793_v14 }
 0x27d   : > { %5650 = vmatprep.subr.mxu0 %v6767_v9  ;;  %5646 = vmatpush3.msra.mxu1 %v6793_v14 }
 0x27e   : > { %5651 = vmatpush3.msra.mxu0 %v6767_v9  ;;  %5661 = vmatprep.subr.mxu1 %v6767_v9 }
 0x27f   : > { %5652 = vmatprep.subr.mxu0 %v6775_v11 }
 0x280   : > { %5653 = vmatpush3.msra.mxu0 %v6775_v11 }
 0x281   : > { %5654 = vmatprep.subr.mxu0 %v6784_v12 }
 0x282   : > { %5655 = vmatpush3.msra.mxu0 %v6784_v12 }
 0x283   : > { %5656 = vmatprep.subr.mxu0 %v6793_v14 }
 0x284   : > { %5657 = vmatpush3.msra.mxu0 %v6793_v14 }
 0x2fe   : > { %v3391_v10 = vpop.xlane.xlu0 %3390 }
 0x2ff   : > { %v3392_v8 = vrot.slane %v3391_v10, 4 }
 0x301   : > { %v3393_v15 = vadd.f32 %v3392_v8, %v3391_v10 }
 0x302   : > { %v3417_v48 = vpop.xlane.xlu0 %3416 }
 0x303   : > { %v3394_v46 = vrot.slane %v3393_v15, 2  ;;  %v3418_v36 = vrot.slane %v3417_v48, 4 }
 0x305   : > { %v3419_v40 = vadd.f32 %v3418_v36, %v3417_v48  ;;  %v3395_v28 = vadd.f32 %v3394_v46, %v3393_v15 }
 0x307   : > { %v3420_v13 = vrot.slane %v3419_v40, 2  ;;  %v3396_v23 = vrot.slane %v3395_v28, 1 }
 0x309   : > { %v3421_v21 = vadd.f32 %v3420_v13, %v3419_v40  ;;  %v3397_v22 = vadd.f32 %v3396_v23, %v3395_v28 }
 0x30b   : > { %5674 = vpush %v3397_v22  ;;  %v3422_v6 = vrot.slane %v3421_v21, 1 }
 0x30d   : > { %v3423_v26 = vadd.f32 %v3422_v6, %v3421_v21 }
 0x30f   : > { %5676 = vpush %v3423_v26 }
 0x31f   : > { %v5583_v29 = vpop.f32.mrf.mxu1 }
 0x320   : > { %4375 = vst.msk [vmem:[%s429_s22 + $0x8] sm:$0xff] %vm4373_vm5, %v5583_v29  ;;  %v4387_v58 = vsel %vm4373_vm5, %v5583_v29, inf  ;;  %v4407_v61 = vsel %vm4373_vm5, %v5583_v29, -inf }
 0x321   : > { %v3734_v17 = vpop.f32.mrf.mxu1 }
 0x322   : > { %4374 = vst.msk [vmem:[%s429_s22] sm:$0xff] %vm4373_vm5, %v3734_v17  ;;  %v4386_v31 = vsel %vm4373_vm5, %v3734_v17, inf  ;;  %v4406_v32 = vsel %vm4373_vm5, %v3734_v17, -inf }
 0x328   : > { %v5605_v44 = vpop.f32.mrf.mxu1 }
 0x329   : > { %4379 = vst.msk [vmem:[%s429_s22 + $0x28] sm:$0xff] %vm4373_vm5, %v5605_v44  ;;  %v4392_v33 = vsel %vm4373_vm5, %v5605_v44, inf  ;;  %v4412_v16 = vsel %vm4373_vm5, %v5605_v44, -inf }
 0x32a   : > { %v3896_v3 = vpop.f32.mrf.mxu1  ;;  %v4393_v62 = vmin.f32 %v4387_v58, %v4392_v33  ;;  %v4413_v47 = vmax.f32 %v4407_v61, %v4412_v16 }
 0x32b   : > { %4378 = vst.msk [vmem:[%s429_s22 + $0x20] sm:$0xff] %vm4373_vm5, %v3896_v3  ;;  %v4390_v1 = vsel %vm4373_vm5, %v3896_v3, inf  ;;  %v4410_v37 = vsel %vm4373_vm5, %v3896_v3, -inf }
 0x32c   : > { %v5594_v30 = vpop.f32.mrf.mxu0  ;;  %v4391_v42 = vmin.f32 %v4386_v31, %v4390_v1  ;;  %v4411_v25 = vmax.f32 %v4406_v32, %v4410_v37 }
 0x32d   : > { %4377 = vst.msk [vmem:[%s429_s22 + $0x18] sm:$0xff] %vm4373_vm5, %v5594_v30  ;;  %v4389_v43 = vsel %vm4373_vm5, %v5594_v30, inf  ;;  %v4409_v38 = vsel %vm4373_vm5, %v5594_v30, -inf }
 0x32e   : > { %v3815_v0 = vpop.f32.mrf.mxu0  ;;  %v4394_v5 = vmin.f32 %v4391_v42, %v4393_v62  ;;  %v4414_v24 = vmax.f32 %v4411_v25, %v4413_v47 }
 0x32f   : > { %4376 = vst.msk [vmem:[%s429_s22 + $0x10] sm:$0xff] %vm4373_vm5, %v3815_v0  ;;  %v4408_v57 = vsel %vm4373_vm5, %v3815_v0, -inf  ;;  %v4388_v52 = vsel %vm4373_vm5, %v3815_v0, inf }
 0x330   : > { %v4395_v20 = vmin.f32 %v4388_v52, %v4389_v43  ;;  %v4415_v60 = vmax.f32 %v4408_v57, %v4409_v38 }
 0x331   : > { %v5627_v27 = vpop.f32.mrf.mxu1 }
 0x332   : > { %v4396_v41 = vmin.f32 %v4394_v5, %v4395_v20  ;;  %v4416_v51 = vmax.f32 %v4414_v24, %v4415_v60 }
 0x333   : > { %v4046_v49 = vpop.f32.mrf.mxu1 }
 0x334   : > { %v5616_v53 = vpop.f32.mrf.mxu0  ;;  %4397 = vmin.xlane.f32.xlu1 %v4396_v41  ;;  %5658 = vmatprep.mubr.msk.f32.mxu0 %vm507_vm0, %v4046_v49 }
 0x335   : > { %5659 = vmatmul.mubr.msk.f32.vlgmr.msra.gmra.mxu0 %vm507_vm0, %v5627_v27 }
 0x336   : > { %v3971_v55 = vpop.f32.mrf.mxu0 }
 0x337   : > { %5647 = vmatprep.mubr.msk.f32.mxu1 %vm507_vm0, %v3971_v55 }
 0x338   : > { %5648 = vmatmul.mubr.msk.f32.vlgmr.msra.gmra.mxu1 %vm507_vm0, %v5616_v53  ;;  %4417 = vmax.xlane.f32.xlu1 %v4416_v51 }
 0x339   : > { %5662 = vmatpush3.msra.mxu1 %v6767_v9 }
 0x33a   : > { %5663 = vmatprep.subr.mxu1 %v6775_v11 }
 0x33b   : > { %5664 = vmatpush3.msra.mxu1 %v6775_v11 }
 0x33c   : > { %v5638_v50 = vpop.f32.mrf.mxu0  ;;  %5665 = vmatprep.subr.mxu1 %v6784_v12  ;;  %s5675_s25 = spop %5674 }
 0x33d   : > { %5666 = vmatpush3.msra.mxu1 %v6784_v12  ;;  %v4429_v46 = vstv %s5675_s25 }
 0x33e   : > { %v4121_v35 = vpop.f32.mrf.mxu0  ;;  %5667 = vmatprep.subr.mxu1 %v6793_v14  ;;  %v4430_v13 = vsel %vm4428_vm11, %v4429_v46, 0.0 }
 0x33f   : > { %5668 = vmatpush3.msra.mxu1 %v6793_v14  ;;  %5669 = vmatprep.mubr.msk.f32.mxu1 %vm507_vm0, %v4121_v35 }
 0x340   : > { %5670 = vmatmul.mubr.msk.f32.vlgmr.msra.gmra.mxu1 %vm507_vm0, %v5638_v50  ;;  %s5677_s28 = spop %5676 }
 0x341   : > { %v4433_v15 = vstv %s5677_s28 }
 0x342   : > { %v4434_v40 = vsel %vm4432_vm10, %v4433_v15, 0.0 }
 0x343   : > { %v4435_v21 = vadd.f32 %v4434_v40, %v4430_v13 }
 0x3bd   : > { %v4398_v18 = vpop.xlane.xlu1 %4397 }
 0x3be   : > { %v4399_v9 = vrot.slane %v4398_v18, 4 }
 0x3c0   : > { %v4400_v2 = vmin.f32 %v4398_v18, %v4399_v9 }
 0x3c1   : > { %v4418_v4 = vpop.xlane.xlu1 %4417 }
 0x3c2   : > { %v4401_v11 = vrot.slane %v4400_v2, 2  ;;  %v4419_v56 = vrot.slane %v4418_v4, 4 }
 0x3c4   : > { %v4420_v7 = vmax.f32 %v4418_v4, %v4419_v56  ;;  %v4402_v45 = vmin.f32 %v4400_v2, %v4401_v11 }
 0x3c6   : > { %v4421_v34 = vrot.slane %v4420_v7, 2  ;;  %v4403_v12 = vrot.slane %v4402_v45, 1 }
 0x3c8   : > { %v4422_v39 = vmax.f32 %v4420_v7, %v4421_v34  ;;  %v4404_v63 = vmin.f32 %v4402_v45, %v4403_v12 }
 0x3ca   : > { %5678 = vpush %v4404_v63  ;;  %v4423_v14 = vrot.slane %v4422_v39, 1 }
 0x3cc   : > { %v4424_v59 = vmax.f32 %v4422_v39, %v4423_v14 }
 0x3ce   : > { %5680 = vpush %v4424_v59 }
 0x3f5   : > { %v5660_v10 = vpop.f32.mrf.mxu0 }
 0x3f6   : > { %4383 = vst.msk [vmem:[%s7124_s17 + $0x18] sm:$0xff] %vm4373_vm5, %v5660_v10 }
 0x3f7   : > { %v4283_v8 = vpop.f32.mrf.mxu0 }
 0x3f8   : > { %v5649_v48 = vpop.f32.mrf.mxu1  ;;  %4382 = vst.msk [vmem:[%s7124_s17 + $0x10] sm:$0xff] %vm4373_vm5, %v4283_v8 }
 0x3f9   : > { %4381 = vst.msk [vmem:[%s7124_s17 + $0x8] sm:$0xff] %vm4373_vm5, %v5649_v48 }
 0x3fa   : > { %v4202_v36 = vpop.f32.mrf.mxu1 }
 0x3fb   : > { %4380 = vst.msk [vmem:[%s7124_s17] sm:$0xff] %vm4373_vm5, %v4202_v36  ;;  %s5679_s24 = spop %5678 }
 0x3fc   : > { %v4438_v28 = vstv %s5679_s24 }
 0x3fd   : > { %v4439_v23 = vsel %vm4437_vm12, %v4438_v28, 0.0 }
 0x3fe   : > { %v4440_v22 = vadd.f32 %v4439_v23, %v4435_v21 }
 0x3ff   : > { %s5681_s16 = spop %5680 }
 0x400   : > { %v5671_v6 = vpop.f32.mrf.mxu1  ;;  %v4443_v26 = vstv %s5681_s16 }
 0x401   : > { %4385 = vst.msk [vmem:[%s7124_s17 + $0x28] sm:$0xff] %vm4373_vm5, %v5671_v6  ;;  %v4444_v19 = vsel %vm4442_vm14, %v4443_v26, 0.0 }
 0x402   : > { %v4445_v29 = vadd.f32 %v4444_v19, %v4440_v22  ;;  %v4364_v17 = vpop.f32.mrf.mxu1 }
 0x403   : > { %4384 = vst.msk [vmem:[%s7124_s17 + $0x20] sm:$0xff] %vm4373_vm5, %v4364_v17 }
 0x404   : > { %4446 = vst [vmem:[%s423_s19] sm:$0xff] %v4445_v29 }
 0x405 PF: > { %s7200_s12 = sld [smem:[#allocation11_spill]]  ;;  %s7202_s30 = smov %s5899_s10 }
 0x406   : > { %s7201_s13 = sld [smem:[#allocation12_spill]]  ;;  %s7203_s10 = smov %s5903_s11 }
 0x40b   : > { %p22_p4 = scmp.ge.s32.totalorder %s7200_s12, 4  }
 0x40c   : > { %s7204_s11 = smov %s7201_s13 }
 0x40d   :  { %24 = sbr.rel (!%p22_p4) target bundleno = 7 (0x7), region = 125 }
 0x412   :  { %4504 = vsyncpa [#allocation3], 1 }
 0x413   :  { %4506 = vsyncpa [#allocation3 + $0x1], 1 }
 0x414   :  { %4507 = vsyncpa [#allocation7], 1 }
 0x415   :  { %4509 = vsyncpa [#allocation7 + $0x1], 1 }
 0x416   :  { %4510 = vsyncpa [#allocation4], 1 }
 0x417   :  { %4512 = vsyncpa [#allocation4 + $0x1], 1 }

// kernel: msssim_pallas.9
= control target key start
LH: loop header
LB: loop body
LE: loop exit
PB: predicated region body
PF: predicated region fallthrough
CT: control target
= control target key end

     0   :  { %s5033_s0 = inlined_call_operand.vmem [shape: f32[2], index: 0, kind: input, shape index: {}]   ;;  %s5034_s1 = inlined_call_operand.vmem [shape: f32[8,2], index: 1, kind: input, shape index: {}]   ;;  %s5035_s2 = inlined_call_operand.vmem [shape: f32[2,128], index: 2, kind: input, shape index: {}]   ;;  %s5036_s3 = inlined_call_operand.vmem [shape: f32[1,2], index: 3, kind: input, shape index: {}]   ;;  %s5037_s4 = inlined_call_operand.vmem [shape: f32[2,1], index: 4, kind: input, shape index: {}]   ;;  %s5038_s5 = inlined_call_operand.vmem [shape: f32[6,2,2], index: 5, kind: input, shape index: {}]   ;;  %s5039_s6 = inlined_call_operand.vmem [shape: f32[6,2,2], index: 6, kind: input, shape index: {}]   ;;  %s5040_s7 = inlined_call_operand.vmem [shape: f32[2,8,128], index: 7, kind: output, shape index: {0}]   ;;  %s5041_s8 = inlined_call_operand.hbm [shape: f32[6,1,1], index: 8, kind: output, shape index: {1}]   ;;  %s5042_s9 = inlined_call_operand.hbm [shape: f32[6,1,1], index: 9, kind: output, shape index: {2}]  }
   0x1   :  { %5047 = sst [smem:[#allocation11_spill]] %s5033_s0 }
   0x2   :  { %15 = vsyncpa [#allocation4], 0 }
   0x3   :  { %16 = vsyncpa [#allocation3], 0 }
   0x4   :  { %18 = vsyncpa [#allocation3 + $0x1], 0 }
   0x5   :  { %19 = vsyncpa [#allocation7], 0 }
   0x6   :  { %21 = vsyncpa [#allocation7 + $0x1], 0  ;;  %s4469_s30 = smov 0   ;;  %s4471_s10 = smov 0  }
   0x7   :  { %s4473_s11 = smov 0   ;;  %s4475_s12 = smov 0  }
   0x8 LB: > { %s4490_s13 = sadd.s32 4294967295, %s4410_s12   ;;  %s3826_s14 = sadd.s32 4294967294, %s4410_s12   ;;  %s4410_s12 = sphi %s4475_s12, %s5064_s12   ;;  %s4406_s11 = sphi %s4473_s11, %s5063_s11   ;;  %s4402_s10 = sphi %s4471_s10, %s5062_s10   ;;  %s4398_s30 = sphi %s4469_s30, %s5061_s30  }
   0x9   : > { %s4494_s15 = sadd.s32 1, %s4410_s12   ;;  %s217_s16 = sadd.s32 1, %s4406_s11 }
   0xa   : > { %s214_s17 = ssub.s32 %s4410_s12, %s4494_s15  ;;  %p227_p0 = scmp.ne.s32.totalorder %s4406_s11, %s4402_s10 }
   0xb   : > { %p215_p1 = scmp.eq.s32.totalorder %s214_s17, 0  ;;  %p228_p2 = scmp.eq.s32.totalorder %s4490_s13, 1 }
   0xc   : > { %p233_p3 = scmp.ne.s32.totalorder %s4402_s10, %s4398_s30  ;;  %p234_p4 = scmp.eq.s32.totalorder %s3826_s14, 1 }
   0xd   : > { %s4505_s18 = scalar_select %p215_p1, %s4406_s11, %s217_s16  }
   0xe   : > { %p4507_p5 = por %p228_p2, %p227_p0  ;;  %p4511_p6 = por %p234_p4, %p233_p3 }
   0xf   : > { %p3827_p7 = scmp.ge.s32.totalorder %s4410_s12, 1  ;;  %p267_p8 = scmp.lt.s32.totalorder %s4410_s12, 3 }
  0x10   : > { %p4249_p9 = scmp.eq.s32.totalorder %s4490_s13, 0  ;;  %s5051_s0 = sld [smem:[#allocation11_spill]] }
  0x11   : > { %p4518_p10 = pnand %p3827_p7, %p267_p8 }
  0x13   : > { %p4238_p11 = pneg %p4518_p10 }
  0x15   : > { %p4239_p12 = pnand %p4249_p9, %p4238_p11 }
  0x16   : > { %s280_s24 = sshll.u32 %s5051_s0, 4  ;;  %s281_s24 = int_to_ptr.vmem [resolvable:$true] %s280_s24 }
  0x17   : > { %s4301_s25 = scalar_lea.vmem %s281_s24, 16  ;;  %p4303_p0 = pneg %p4239_p12 }
  0x18   : > { %p4302_p13 = scmp.ne.s32.totalorder %s281_s24, %s4301_s25  ;;  %p4309_p3 = scmp.lt.s32.totalorder %s281_s24, %s281_s24 }
  0x19   : > { %p4310_p4 = scmp.lt.s32.totalorder %s4301_s25, %s4301_s25 }
  0x1a   : > { %p4304_p1 = pnand %p4303_p0, %p4302_p13 }
  0x1b   : > { %p4311_p7 = por %p4310_p4, %p4309_p3 }
  0x1c   : > { %p4305_p2 = pneg %p4304_p1 }
  0x1e   : > { %p4312_p8 = pnand %p4311_p7, %p4305_p2 }
  0x20   : > { %4315 = shalt.err (!%p4312_p8)
}
  0x21   : > { %s4412_s26 = smov [#allocation2]   ;;  %323 = sbr.rel (%p4518_p10) target bundleno = 885 (0x375), region = 48 }
  0x22   : > { %4241 = dma.vmem_to_smem (!%p4239_p12), %s281_s24, 16, %s4412_s26, [#allocation4]  }
  0x26   : > { %4385 = dma.done.wait (%p4249_p9), [#allocation4], 16  }
  0x27   : > { %4387 = vsyncadd (%p4249_p9), [#allocation4], 4294967280 }
  0x28   : > { %329 = sfence }
  0x29   : > { %v4538_v0 = vld [vmem:[%s5035_s2] sm:$0x3]  ;;  %vm415_vm0 = vcmask 1041408   ;;  %s374_s29 = smul.u32 3, %s4490_s13  ;;  %v4413_v1 = vmov 0.0   ;;  %vm4414_vm1 = vmmov 0  }
  0x2a   : > { %4011 = vmatprep.subr.mxu0 %v4413_v1  ;;  %4016 = vmatprep.subr.mxu1 %v4413_v1  ;;  %vm411_vm2 = vcmask 15360   ;;  %v4682_v17 = vld [vmem:[%s5034_s1] sm:$0xff]  ;;  %s3835_s16 = sld [smem:[#allocation2 + $0x1]]  ;;  %vm3586_vm6 = vcmask 0   ;;  %s5043_s25 = smul.u32 48, %s4490_s13 }
  0x2b   : > { %4012 = vmatpush3.msk.msra.mxu0 %vm415_vm0, %v4538_v0  ;;  %4013 = vmatprep.mubr.msk.f32.mxu0 %vm4414_vm1, %v4413_v1  ;;  %p375_p9 = scmp.lt.s32.totalorder %s374_s29, 5  ;;  %v4768_v46 = vld [vmem:[%s5036_s3] sm:$0x1]  ;;  %s398_s17 = sld [smem:[#allocation2]] }
  0x2c   : > { %4017 = vmatpush3.msk.msra.mxu1 %vm415_vm0, %v4538_v0  ;;  %4018 = vmatprep.mubr.msk.f32.mxu1 %vm4414_vm1, %v4413_v1  ;;  %v4803_v49 = vld [vmem:[%s5037_s4] sm:$0x3]  ;;  %s4910_s28 = scalar_lea.hbm %s5041_s8, %s5043_s25 }
  0x2d   : > { %s5066_s29 = smov (!%p375_p9, %s374_s29), 5  ;;  %4021 = vmatprep.subr.mxu0 %v4413_v1  ;;  %4026 = vmatprep.subr.mxu1 %v4413_v1 }
  0x2e   : > { %s3832_s14 = sshll.u32 %s5066_s29, 1 }
  0x2f   : > { %s378_s21 = scalar_lea.vmem %s5038_s5, %s3832_s14  ;;  %s384_s24 = scalar_lea.vmem %s5039_s6, %s3832_s14 }
  0x30   : > { %v4559_v2 = vld [vmem:[%s378_s21] sm:$0x3]  ;;  %v4561_v3 = vld [vmem:[%s378_s21 + $0x2] sm:$0x3]  ;;  %v4571_v4 = vld [vmem:[%s378_s21 + $0x4] sm:$0x3] }
  0x31   : > { %4014 = vmatmul.mubr.msk.f32.vlgmr.msra.gmra.mxu0 %vm411_vm2, %v4559_v2  ;;  %4019 = vmatmul.mubr.msk.f32.vlgmr.msra.gmra.mxu1 %vm411_vm2, %v4561_v3  ;;  %v4573_v5 = vld [vmem:[%s384_s24] sm:$0x3]  ;;  %v4589_v6 = vld [vmem:[%s384_s24 + $0x2] sm:$0x3]  ;;  %v4591_v7 = vld [vmem:[%s384_s24 + $0x4] sm:$0x3]  ;;  %v400_v8 = vmul.f32 %v4559_v2, %v4559_v2  ;;  %v401_v9 = vmul.f32 %v4561_v3, %v4561_v3  ;;  %v402_v10 = vmul.f32 %v4571_v4, %v4571_v4 }
  0x32   : > { %4022 = vmatpush3.msk.msra.mxu0 %vm415_vm0, %v4538_v0  ;;  %4023 = vmatprep.mubr.msk.f32.mxu0 %vm4414_vm1, %v4413_v1  ;;  %v403_v11 = vmul.f32 %v4573_v5, %v4573_v5  ;;  %v404_v12 = vmul.f32 %v4589_v6, %v4589_v6  ;;  %v405_v13 = vmul.f32 %v4591_v7, %v4591_v7  ;;  %s4875_s21 = sand.u32 1, %s4402_s10  }
  0x33   : > { %4027 = vmatpush3.msk.msra.mxu1 %vm415_vm0, %v4538_v0  ;;  %4028 = vmatprep.mubr.msk.f32.mxu1 %vm4414_vm1, %v4413_v1  ;;  %v406_v14 = vmul.f32 %v4573_v5, %v4559_v2  ;;  %v407_v15 = vmul.f32 %v4589_v6, %v4561_v3  ;;  %v408_v16 = vmul.f32 %v4591_v7, %v4571_v4  ;;  %s5044_s22 = smul.u32 3, %s4875_s21 }
  0x34   : > { %4031 = vmatprep.subr.mxu0 %v4413_v1  ;;  %4036 = vmatprep.subr.mxu1 %v4413_v1 }
  0x35   : > { %4024 = vmatmul.mubr.msk.f32.vlgmr.msra.gmra.mxu0 %vm411_vm2, %v4571_v4  ;;  %4029 = vmatmul.mubr.msk.f32.vlgmr.msra.gmra.mxu1 %vm411_vm2, %v4573_v5  ;;  %s4880_s23 = scalar_lea.vmem [#allocation5], %s5044_s22 }
  0x36   : > { %4032 = vmatpush3.msk.msra.mxu0 %vm415_vm0, %v4538_v0  ;;  %4033 = vmatprep.mubr.msk.f32.mxu0 %vm4414_vm1, %v4413_v1  ;;  %s3668_s24 = sshll.u32 %s4880_s23, 4  ;;  %s4903_s24 = int_to_ptr.vmem [resolvable:$true] %s3668_s24 }
  0x37   : > { %4037 = vmatpush3.msk.msra.mxu1 %vm415_vm0, %v4538_v0  ;;  %4038 = vmatprep.mubr.msk.f32.mxu1 %vm4414_vm1, %v4413_v1  ;;  %s4316_s14 = scalar_lea.vmem %s4903_s24, 48 }
  0x38   : > { %4041 = vmatprep.subr.mxu0 %v4413_v1  ;;  %4046 = vmatprep.subr.mxu1 %v4413_v1  ;;  %p4317_p10 = scmp.ne.s32.totalorder %s4903_s24, %s4316_s14 }
  0x39   : > { %4034 = vmatmul.mubr.msk.f32.vlgmr.msra.gmra.mxu0 %vm411_vm2, %v4589_v6  ;;  %4039 = vmatmul.mubr.msk.f32.vlgmr.msra.gmra.mxu1 %vm411_vm2, %v4591_v7 }
  0x3a   : > { %4042 = vmatpush3.msk.msra.mxu0 %vm415_vm0, %v4538_v0  ;;  %4043 = vmatprep.mubr.msk.f32.mxu0 %vm4414_vm1, %v4413_v1  ;;  %p4318_p11 = pnand %p4317_p10, %p4507_p5 }
  0x3b   : > { %4047 = vmatpush3.msk.msra.mxu1 %vm415_vm0, %v4538_v0  ;;  %4048 = vmatprep.mubr.msk.f32.mxu1 %vm4414_vm1, %v4413_v1 }
  0x3c   : > { %4051 = vmatprep.subr.mxu0 %v4413_v1  ;;  %4056 = vmatprep.subr.mxu1 %v4413_v1  ;;  %p4319_p12 = pneg %p4318_p11 }
  0x3d   : > { %4044 = vmatmul.mubr.msk.f32.vlgmr.msra.gmra.mxu0 %vm411_vm2, %v400_v8  ;;  %4049 = vmatmul.mubr.msk.f32.vlgmr.msra.gmra.mxu1 %vm411_vm2, %v401_v9 }
  0x3e   : > { %4052 = vmatpush3.msk.msra.mxu0 %vm415_vm0, %v4538_v0  ;;  %4053 = vmatprep.mubr.msk.f32.mxu0 %vm4414_vm1, %v4413_v1 }
  0x3f   : > { %4057 = vmatpush3.msk.msra.mxu1 %vm415_vm0, %v4538_v0  ;;  %4058 = vmatprep.mubr.msk.f32.mxu1 %vm4414_vm1, %v4413_v1 }
  0x40   : > { %4061 = vmatprep.subr.mxu0 %v4413_v1  ;;  %4066 = vmatprep.subr.mxu1 %v4413_v1 }
  0x41   : > { %4054 = vmatmul.mubr.msk.f32.vlgmr.msra.gmra.mxu0 %vm411_vm2, %v402_v10  ;;  %4059 = vmatmul.mubr.msk.f32.vlgmr.msra.gmra.mxu1 %vm411_vm2, %v403_v11 }
  0x42   : > { %4062 = vmatpush3.msk.msra.mxu0 %vm415_vm0, %v4538_v0  ;;  %4063 = vmatprep.mubr.msk.f32.mxu0 %vm4414_vm1, %v4413_v1 }
  0x43   : > { %4067 = vmatpush3.msk.msra.mxu1 %vm415_vm0, %v4538_v0  ;;  %4068 = vmatprep.mubr.msk.f32.mxu1 %vm4414_vm1, %v4413_v1 }
  0x44   : > { %4071 = vmatprep.subr.mxu0 %v4413_v1  ;;  %4076 = vmatprep.subr.mxu1 %v4413_v1 }
  0x45   : > { %4064 = vmatmul.mubr.msk.f32.vlgmr.msra.gmra.mxu0 %vm411_vm2, %v404_v12  ;;  %4069 = vmatmul.mubr.msk.f32.vlgmr.msra.gmra.mxu1 %vm411_vm2, %v405_v13 }
  0x46   : > { %4072 = vmatpush3.msk.msra.mxu0 %vm415_vm0, %v4538_v0  ;;  %4073 = vmatprep.mubr.msk.f32.mxu0 %vm4414_vm1, %v4413_v1 }
  0x47   : > { %4077 = vmatpush3.msk.msra.mxu1 %vm415_vm0, %v4538_v0  ;;  %4078 = vmatprep.mubr.msk.f32.mxu1 %vm4414_vm1, %v4413_v1 }
  0x48   : > { %4081 = vmatprep.subr.mxu0 %v4413_v1  ;;  %4086 = vmatprep.subr.mxu1 %v4413_v1 }
  0x49   : > { %4074 = vmatmul.mubr.msk.f32.vlgmr.msra.gmra.mxu0 %vm411_vm2, %v406_v14  ;;  %4079 = vmatmul.mubr.msk.f32.vlgmr.msra.gmra.mxu1 %vm411_vm2, %v407_v15 }
  0x4a   : > { %4082 = vmatpush3.msk.msra.mxu0 %vm415_vm0, %v4538_v0  ;;  %4083 = vmatprep.mubr.msk.f32.mxu0 %vm4414_vm1, %v4413_v1 }
  0x4b   : > { %4091 = vmatprep.subr.mxu0 %v4413_v1  ;;  %4088 = vmatprep.mubr.msk.f32.mxu1 %vm4414_vm1, %v4413_v1 }
  0x4d   : > { %4084 = vmatmul.mubr.msk.f32.vlgmr.msra.gmra.mxu0 %vm411_vm2, %v408_v16  ;;  %v4811_v16 = vstv %s3835_s16  ;;  %s4415_s16 = smov [#allocation5]  }
  0x4e   : > { %4093 = vmatprep.mubr.msk.f32.mxu0 %vm4414_vm1, %v4413_v1 }
  0xf1   : > { %v485_v18 = vpop.f32.mrf.mxu0  ;;  %v558_v19 = vpop.f32.mrf.mxu1 }
  0xf2   : > { %4087 = vmatpush3.msk.msra.mxu1 %vm415_vm0, %v485_v18  ;;  %4092 = vmatpush3.msk.msra.mxu0 %vm415_vm0, %v558_v19 }
  0xf3   : > { %v4015_v20 = vpop.f32.mrf.mxu0  ;;  %v4020_v21 = vpop.f32.mrf.mxu1  ;;  %4089 = vmatmul.mubr.msk.f32.vlgmr.msra.gmra.mxu1 %vm411_vm2, %v4682_v17  ;;  %4094 = vmatmul.mubr.msk.f32.vlgmr.msra.gmra.mxu0 %vm411_vm2, %v4682_v17 }
  0xf4   : > { %4096 = vmatprep.subr.mxu1 %v4413_v1  ;;  %4101 = vmatprep.subr.mxu0 %v4413_v1  ;;  %v4813_v20 = vstv %s398_s17  ;;  %s4320_s17 = sshll.u32 %s4415_s16, 4  ;;  %s4321_s17 = int_to_ptr.vmem [resolvable:$false] %s4320_s17 }
  0xf5   : > { %v631_v22 = vpop.f32.mrf.mxu0  ;;  %v704_v23 = vpop.f32.mrf.mxu1  ;;  %4098 = vmatprep.mubr.msk.f32.mxu1 %vm4414_vm1, %v4413_v1  ;;  %4103 = vmatprep.mubr.msk.f32.mxu0 %vm4414_vm1, %v4413_v1  ;;  %p4323_p13 = scmp.lt.s32.totalorder %s4903_s24, %s4321_s17 }
  0xf6   : > { %4097 = vmatpush3.msk.msra.mxu1 %vm415_vm0, %v631_v22  ;;  %4102 = vmatpush3.msk.msra.mxu0 %vm415_vm0, %v704_v23 }
  0xf7   : > { %v4025_v24 = vpop.f32.mrf.mxu0  ;;  %v4030_v25 = vpop.f32.mrf.mxu1  ;;  %4099 = vmatmul.mubr.msk.f32.vlgmr.msra.gmra.mxu1 %vm411_vm2, %v4682_v17  ;;  %4104 = vmatmul.mubr.msk.f32.vlgmr.msra.gmra.mxu0 %vm411_vm2, %v4682_v17 }
  0xf8   : > { %4106 = vmatprep.subr.mxu1 %v4413_v1  ;;  %4111 = vmatprep.subr.mxu0 %v4413_v1 }
  0xf9   : > { %v777_v26 = vpop.f32.mrf.mxu0  ;;  %v850_v27 = vpop.f32.mrf.mxu1  ;;  %4108 = vmatprep.mubr.msk.f32.mxu1 %vm4414_vm1, %v4413_v1  ;;  %4113 = vmatprep.mubr.msk.f32.mxu0 %vm4414_vm1, %v4413_v1 }
  0xfa   : > { %4107 = vmatpush3.msk.msra.mxu1 %vm415_vm0, %v777_v26  ;;  %4112 = vmatpush3.msk.msra.mxu0 %vm415_vm0, %v850_v27 }
  0xfb   : > { %v4035_v28 = vpop.f32.mrf.mxu0  ;;  %v4040_v29 = vpop.f32.mrf.mxu1  ;;  %4109 = vmatmul.mubr.msk.f32.vlgmr.msra.gmra.mxu1 %vm411_vm2, %v4682_v17  ;;  %4114 = vmatmul.mubr.msk.f32.vlgmr.msra.gmra.mxu0 %vm411_vm2, %v4682_v17 }
  0xfc   : > { %4116 = vmatprep.subr.mxu1 %v4413_v1  ;;  %4121 = vmatprep.subr.mxu0 %v4413_v1 }
  0xfd   : > { %v923_v30 = vpop.f32.mrf.mxu0  ;;  %v996_v31 = vpop.f32.mrf.mxu1  ;;  %4118 = vmatprep.mubr.msk.f32.mxu1 %vm4414_vm1, %v4413_v1  ;;  %4123 = vmatprep.mubr.msk.f32.mxu0 %vm4414_vm1, %v4413_v1 }
  0xfe   : > { %4117 = vmatpush3.msk.msra.mxu1 %vm415_vm0, %v923_v30  ;;  %4122 = vmatpush3.msk.msra.mxu0 %vm415_vm0, %v996_v31 }
  0xff   : > { %v4045_v32 = vpop.f32.mrf.mxu0  ;;  %v4050_v33 = vpop.f32.mrf.mxu1  ;;  %4119 = vmatmul.mubr.msk.f32.vlgmr.msra.gmra.mxu1 %vm411_vm2, %v4682_v17  ;;  %4124 = vmatmul.mubr.msk.f32.vlgmr.msra.gmra.mxu0 %vm411_vm2, %v4682_v17 }
 0x100   : > { %4126 = vmatprep.subr.mxu1 %v4413_v1  ;;  %4131 = vmatprep.subr.mxu0 %v4413_v1 }
 0x101   : > { %v1069_v34 = vpop.f32.mrf.mxu0  ;;  %v1142_v35 = vpop.f32.mrf.mxu1  ;;  %4128 = vmatprep.mubr.msk.f32.mxu1 %vm4414_vm1, %v4413_v1  ;;  %4133 = vmatprep.mubr.msk.f32.mxu0 %vm4414_vm1, %v4413_v1 }
 0x102   : > { %4127 = vmatpush3.msk.msra.mxu1 %vm415_vm0, %v1069_v34  ;;  %4132 = vmatpush3.msk.msra.mxu0 %vm415_vm0, %v1142_v35 }
 0x103   : > { %v4055_v36 = vpop.f32.mrf.mxu0  ;;  %v4060_v37 = vpop.f32.mrf.mxu1  ;;  %4129 = vmatmul.mubr.msk.f32.vlgmr.msra.gmra.mxu1 %vm411_vm2, %v4682_v17  ;;  %4134 = vmatmul.mubr.msk.f32.vlgmr.msra.gmra.mxu0 %vm411_vm2, %v4682_v17 }
 0x104   : > { %4136 = vmatprep.subr.mxu1 %v4413_v1  ;;  %4141 = vmatprep.subr.mxu0 %v4413_v1 }
 0x105   : > { %v1215_v38 = vpop.f32.mrf.mxu0  ;;  %v1288_v39 = vpop.f32.mrf.mxu1  ;;  %4138 = vmatprep.mubr.msk.f32.mxu1 %vm4414_vm1, %v4413_v1  ;;  %4143 = vmatprep.mubr.msk.f32.mxu0 %vm4414_vm1, %v4413_v1 }
 0x106   : > { %4137 = vmatpush3.msk.msra.mxu1 %vm415_vm0, %v1215_v38  ;;  %4142 = vmatpush3.msk.msra.mxu0 %vm415_vm0, %v1288_v39 }
 0x107   : > { %v4065_v40 = vpop.f32.mrf.mxu0  ;;  %v4070_v41 = vpop.f32.mrf.mxu1  ;;  %4139 = vmatmul.mubr.msk.f32.vlgmr.msra.gmra.mxu1 %vm411_vm2, %v4682_v17  ;;  %4144 = vmatmul.mubr.msk.f32.vlgmr.msra.gmra.mxu0 %vm411_vm2, %v4682_v17 }
 0x108   : > { %4146 = vmatprep.subr.mxu1 %v4413_v1  ;;  %4151 = vmatprep.subr.mxu0 %v4413_v1 }
 0x109   : > { %v1361_v42 = vpop.f32.mrf.mxu0  ;;  %v1434_v43 = vpop.f32.mrf.mxu1  ;;  %4148 = vmatprep.mubr.msk.f32.mxu1 %vm4414_vm1, %v4413_v1  ;;  %4153 = vmatprep.mubr.msk.f32.mxu0 %vm4414_vm1, %v4413_v1 }
 0x10a   : > { %4147 = vmatpush3.msk.msra.mxu1 %vm415_vm0, %v1361_v42  ;;  %4152 = vmatpush3.msk.msra.mxu0 %vm415_vm0, %v1434_v43 }
 0x10b   : > { %v4075_v44 = vpop.f32.mrf.mxu0  ;;  %v4080_v45 = vpop.f32.mrf.mxu1  ;;  %4149 = vmatmul.mubr.msk.f32.vlgmr.msra.gmra.mxu1 %vm411_vm2, %v4682_v17  ;;  %4154 = vmatmul.mubr.msk.f32.vlgmr.msra.gmra.mxu0 %vm411_vm2, %v4682_v17 }
 0x10c   : > { %4156 = vmatprep.subr.mxu1 %v4413_v1  ;;  %4158 = vmatprep.mubr.msk.f32.mxu1 %vm4414_vm1, %v4413_v1 }
 0x10d   : > { %v1507_v47 = vpop.f32.mrf.mxu0  ;;  %4161 = vmatprep.subr.mxu0 %v4413_v1  ;;  %4163 = vmatprep.mubr.msk.f32.mxu0 %vm4414_vm1, %v4413_v1 }
 0x10e   : > { %4157 = vmatpush3.msk.msra.mxu1 %vm415_vm0, %v1507_v47  ;;  %4162 = vmatpush3.msk.msra.mxu0 %vm415_vm0, %v4559_v2 }
 0x10f   : > { %v4085_v48 = vpop.f32.mrf.mxu0  ;;  %4159 = vmatmul.mubr.msk.f32.vlgmr.msra.gmra.mxu1 %vm411_vm2, %v4682_v17  ;;  %4164 = vmatmul.mubr.msk.f32.vlgmr.msra.gmra.mxu0 %vm411_vm2, %v4768_v46 }
 0x110   : > { %4166 = vmatprep.subr.mxu1 %v4413_v1  ;;  %4168 = vmatprep.mubr.msk.f32.mxu1 %vm4414_vm1, %v4413_v1 }
 0x111   : > { %4167 = vmatpush3.msk.msra.mxu1 %vm415_vm0, %v4561_v3  ;;  %4171 = vmatprep.subr.mxu0 %v4413_v1 }
 0x112   : > { %4172 = vmatpush3.msk.msra.mxu0 %vm415_vm0, %v4571_v4  ;;  %4173 = vmatprep.mubr.msk.f32.mxu0 %vm4414_vm1, %v4413_v1 }
 0x113   : > { %4169 = vmatmul.mubr.msk.f32.vlgmr.msra.gmra.mxu1 %vm411_vm2, %v4768_v46  ;;  %4174 = vmatmul.mubr.msk.f32.vlgmr.msra.gmra.mxu0 %vm411_vm2, %v4768_v46 }
 0x114   : > { %4176 = vmatprep.subr.mxu1 %v4413_v1  ;;  %4178 = vmatprep.mubr.msk.f32.mxu1 %vm4414_vm1, %v4413_v1 }
 0x115   : > { %4181 = vmatprep.subr.mxu0 %v4413_v1  ;;  %4183 = vmatprep.mubr.msk.f32.mxu0 %vm4414_vm1, %v4413_v1 }
 0x116   : > { %4177 = vmatpush3.msk.msra.mxu1 %vm415_vm0, %v4803_v49  ;;  %4182 = vmatpush3.msk.msra.mxu0 %vm415_vm0, %v4803_v49 }
 0x117   : > { %4186 = vmatprep.subr.mxu1 %v4413_v1  ;;  %4191 = vmatprep.subr.mxu0 %v4413_v1 }
 0x1b3   : > { %v1583_v50 = vpop.f32.mrf.mxu1  ;;  %v1656_v51 = vpop.f32.mrf.mxu0 }
 0x1b4   : > { %v2609_v4 = vmul.f32 %v1583_v50, %v1583_v50  ;;  %v2610_v13 = vmul.f32 %v1656_v51, %v1656_v51 }
 0x1b5   : > { %v4090_v52 = vpop.f32.mrf.mxu1  ;;  %v4095_v53 = vpop.f32.mrf.mxu0 }
 0x1b7   : > { %v1729_v54 = vpop.f32.mrf.mxu1  ;;  %v1802_v55 = vpop.f32.mrf.mxu0 }
 0x1b8   : > { %v2612_v0 = vmul.f32 %v1802_v55, %v1802_v55  ;;  %v2611_v19 = vmul.f32 %v1729_v54, %v1729_v54  ;;  %v2615_v34 = vmul.f32 %v1802_v55, %v1583_v50 }
 0x1b9   : > { %v4100_v56 = vpop.f32.mrf.mxu1  ;;  %v4105_v57 = vpop.f32.mrf.mxu0 }
 0x1ba   : > { %v2659_v14 = vadd.f32 %v2612_v0, %v2609_v4  ;;  %v2646_v55 = vmul.f32 2.0, %v2615_v34 }
 0x1bb   : > { %v1875_v58 = vpop.f32.mrf.mxu1  ;;  %v1948_v59 = vpop.f32.mrf.mxu0 }
 0x1bc   : > { %v2613_v8 = vmul.f32 %v1875_v58, %v1875_v58  ;;  %v2614_v15 = vmul.f32 %v1948_v59, %v1948_v59  ;;  %v2662_v30 = vadd.f32 %v2659_v14, %v4813_v20  ;;  %v2616_v37 = vmul.f32 %v1875_v58, %v1656_v51 }
 0x1bd   : > { %v4110_v60 = vpop.f32.mrf.mxu1  ;;  %v4115_v61 = vpop.f32.mrf.mxu0  ;;  %v2617_v48 = vmul.f32 %v1948_v59, %v1729_v54  ;;  %v2671_v54 = vlaneseq }
 0x1be   : > { %v2660_v22 = vadd.f32 %v2613_v8, %v2610_v13  ;;  %v2661_v31 = vadd.f32 %v2614_v15, %v2611_v19 }
 0x1bf   : > { %v2021_v62 = vpop.f32.mrf.mxu1  ;;  %v2094_v63 = vpop.f32.mrf.mxu0 }
 0x1c0   : > { %v2618_v11 = vsub.f32 %v2021_v62, %v2609_v4  ;;  %v2619_v23 = vsub.f32 %v2094_v63, %v2610_v13  ;;  %v2663_v40 = vadd.f32 %v2660_v22, %v4813_v20  ;;  %v2664_v44 = vadd.f32 %v2661_v31, %v4813_v20 }
 0x1c1   : > { %v4120_v2 = vpop.f32.mrf.mxu1  ;;  %v4125_v3 = vpop.f32.mrf.mxu0 }
 0x1c2   : > { %v2647_v2 = vmul.f32 2.0, %v2616_v37  ;;  %v2648_v3 = vmul.f32 2.0, %v2617_v48 }
 0x1c3   : > { %v2167_v9 = vpop.f32.mrf.mxu1  ;;  %v2240_v10 = vpop.f32.mrf.mxu0 }
 0x1c4   : > { %v2621_v12 = vsub.f32 %v2240_v10, %v2612_v0  ;;  %v2620_v26 = vsub.f32 %v2167_v9, %v2611_v19  ;;  %v2650_v0 = vadd.f32 %v4813_v20, %v2646_v55  ;;  %v4835_v9 = vshrl.u32 %v2671_v54, 7 }
 0x1c5   : > { %v4130_v17 = vpop.f32.mrf.mxu1  ;;  %v4135_v18 = vpop.f32.mrf.mxu0  ;;  %v4837_v10 = vand.u32 127, %v2671_v54 }
 0x1c6   : > { %v2634_v21 = vadd.f32 %v2621_v12, %v2618_v11  ;;  %v2652_v17 = vadd.f32 %v4813_v20, %v2648_v3  ;;  %vm2675_vm3 = vcmp.lt.s32.totalorder %v4835_v9, 1 }
 0x1c7   : > { %v2313_v24 = vpop.f32.mrf.mxu1  ;;  %v2386_v25 = vpop.f32.mrf.mxu0  ;;  %vm2676_vm4 = vcmp.lt.s32.totalorder %v4837_v10, 1 }
 0x1c8   : > { %v2637_v27 = vadd.f32 %v2634_v21, %v4811_v16  ;;  %v2622_v28 = vsub.f32 %v2313_v24, %v2613_v8  ;;  %v2623_v29 = vsub.f32 %v2386_v25, %v2614_v15  ;;  %vm2677_vm5 = vmand %vm2675_vm3, %vm2676_vm4 }
 0x1c9   : > { %v4140_v32 = vpop.f32.mrf.mxu1  ;;  %v4145_v33 = vpop.f32.mrf.mxu0 }
 0x1ca   : > { %4289 = vrcp.f32 %v2637_v27  ;;  %v2635_v35 = vadd.f32 %v2622_v28, %v2619_v23  ;;  %v2636_v36 = vadd.f32 %v2623_v29, %v2620_v26  ;;  %v3896_v29 = vsel %vm2677_vm5, 1.0, %v4413_v1 }
 0x1cb   : > { %v2459_v38 = vpop.f32.mrf.mxu1  ;;  %v2532_v39 = vpop.f32.mrf.mxu0  ;;  %4291 = vrcp.f32 %v2662_v30 }
 0x1cc   : > { %v2638_v41 = vadd.f32 %v2635_v35, %v4811_v16  ;;  %v2639_v42 = vadd.f32 %v2636_v36, %v4811_v16  ;;  %v2624_v43 = vsub.f32 %v2459_v38, %v2615_v34  ;;  %v2625_v52 = vsub.f32 %v2532_v39, %v2616_v37 }
 0x1cd   : > { %v4150_v45 = vpop.f32.mrf.mxu1  ;;  %v4155_v47 = vpop.f32.mrf.mxu0 }
 0x1ce   : > { %4293 = vrcp.f32 %v2638_v41  ;;  %v2627_v50 = vmul.f32 2.0, %v2624_v43  ;;  %v2628_v60 = vmul.f32 2.0, %v2625_v52 }
 0x1cf   : > { %4295 = vrcp.f32 %v2639_v42  ;;  %v2605_v51 = vpop.f32.mrf.mxu1  ;;  %v2781_v53 = vpop.f32.mrf.mxu0 }
 0x1d0   : > { %4297 = vrcp.f32 %v2663_v40  ;;  %v2626_v56 = vsub.f32 %v2605_v51, %v2617_v48  ;;  %4179 = vmatmul.mubr.msk.f32.vlgmr.msra.gmra.mxu1 %vm411_vm2, %v2781_v53  ;;  %v2631_v59 = vadd.f32 %v4811_v16, %v2627_v50  ;;  %v2632_v12 = vadd.f32 %v4811_v16, %v2628_v60 }
 0x1d1   : > { %4299 = vrcp.f32 %v2664_v44  ;;  %v4160_v57 = vpop.f32.mrf.mxu1  ;;  %v4165_v58 = vpop.f32.mrf.mxu0  ;;  %4187 = vmatpush3.msk.msra.mxu1 %vm415_vm0, %v4803_v49  ;;  %4188 = vmatprep.mubr.msk.f32.mxu1 %vm4414_vm1, %v4413_v1 }
 0x1d2   : > { %4196 = vmatprep.subr.mxu1 %v4413_v1  ;;  %v2629_v61 = vmul.f32 2.0, %v2626_v56  ;;  %v2653_v11 = vmul.f32 %v2650_v0, %v2631_v59 }
 0x1d3   : > { %v2853_v62 = vpop.f32.mrf.mxu1  ;;  %v2925_v63 = vpop.f32.mrf.mxu0 }
 0x1d4   : > { %4184 = vmatmul.mubr.msk.f32.vlgmr.msra.gmra.mxu0 %vm411_vm2, %v2853_v62  ;;  %4189 = vmatmul.mubr.msk.f32.vlgmr.msra.gmra.mxu1 %vm411_vm2, %v2925_v63  ;;  %v2633_v14 = vadd.f32 %v4811_v16, %v2629_v61 }
 0x1d5   : > { %v4170_v4 = vpop.f32.mrf.mxu1  ;;  %v4175_v8 = vpop.f32.mrf.mxu0  ;;  %4192 = vmatpush3.msk.msra.mxu0 %vm415_vm0, %v4573_v5  ;;  %4193 = vmatprep.mubr.msk.f32.mxu0 %vm4414_vm1, %v4413_v1  ;;  %v2651_v5 = vadd.f32 %v4813_v20, %v2647_v2 }
 0x1d6   : > { %4201 = vmatprep.subr.mxu0 %v4413_v1  ;;  %4197 = vmatpush3.msk.msra.mxu1 %vm415_vm0, %v4589_v6  ;;  %v2655_v19 = vmul.f32 %v2652_v17, %v2633_v14 }
 0x1d7   : > { %v4290_v13 = vpop.eup %4289  ;;  %4198 = vmatprep.mubr.msk.f32.mxu1 %vm4414_vm1, %v4413_v1  ;;  %4206 = vmatprep.subr.mxu1 %v4413_v1  ;;  %v2654_v16 = vmul.f32 %v2651_v5, %v2632_v12 }
 0x1d8   : > { %v2656_v15 = vmul.f32 %v4290_v13, %v2653_v11  ;;  %4194 = vmatmul.mubr.msk.f32.vlgmr.msra.gmra.mxu0 %vm411_vm2, %v4768_v46  ;;  %4199 = vmatmul.mubr.msk.f32.vlgmr.msra.gmra.mxu1 %vm411_vm2, %v4768_v46  ;;  %v4292_v6 = vpop.eup %4291  ;;  %v2643_v26 = vmul.f32 %v4290_v13, %v2631_v59 }
 0x1d9   : > { %4202 = vmatpush3.msk.msra.mxu0 %vm415_vm0, %v4591_v7  ;;  %4203 = vmatprep.mubr.msk.f32.mxu0 %vm4414_vm1, %v4413_v1 }
 0x1da   : > { %4207 = vmatpush3.msk.msra.mxu1 %vm415_vm0, %v4803_v49  ;;  %4208 = vmatprep.mubr.msk.f32.mxu1 %vm4414_vm1, %v4413_v1  ;;  %v2668_v22 = vmul.f32 %v4292_v6, %v2656_v15  ;;  %v2694_v35 = vmul.f32 %v3896_v29, %v2643_v26 }
 0x1db   : > { %v4294_v18 = vpop.eup %4293  ;;  %4211 = vmatprep.subr.mxu0 %v4413_v1  ;;  %4216 = vmatprep.subr.mxu1 %v4413_v1 }
 0x1dc   : > { %v4296_v7 = vpop.eup %4295  ;;  %v2644_v20 = vmul.f32 %v4294_v18, %v2632_v12  ;;  %v2657_v21 = vmul.f32 %v4294_v18, %v2654_v16  ;;  %4204 = vmatmul.mubr.msk.f32.vlgmr.msra.gmra.mxu0 %vm411_vm2, %v4768_v46  ;;  %v2680_v30 = vmul.f32 %v3896_v29, %v2668_v22 }
 0x1dd   : > { %v4298_v23 = vpop.eup %4297  ;;  %v2658_v24 = vmul.f32 %v4296_v7, %v2655_v19  ;;  %4212 = vmatpush3.msk.msra.mxu0 %vm415_vm0, %v4803_v49  ;;  %4213 = vmatprep.mubr.msk.f32.mxu0 %vm4414_vm1, %v4413_v1  ;;  %v2645_v33 = vmul.f32 %v4296_v7, %v2633_v14 }
 0x1de   : > { %v4300_v25 = vpop.eup %4299  ;;  %v2669_v27 = vmul.f32 %v4298_v23, %v2657_v21  ;;  %v2695_v32 = vmul.f32 %v3896_v29, %v2644_v20 }
 0x1df   : > { %v2670_v28 = vmul.f32 %v4300_v25, %v2658_v24  ;;  %v2696_v38 = vmul.f32 %v3896_v29, %v2645_v33 }
 0x1e0   : > { %v2681_v31 = vmul.f32 %v3896_v29, %v2669_v27  ;;  %v2697_v37 = vadd.f32 %v2695_v32, %v2694_v35 }
 0x1e1   : > { %v2682_v34 = vmul.f32 %v3896_v29, %v2670_v28 }
 0x1e2   : > { %v2683_v46 = vadd.f32 %v2681_v31, %v2680_v30  ;;  %v2698_v39 = vadd.f32 %v2697_v37, %v2696_v38 }
 0x1e4   : > { %v2684_v36 = vadd.f32 %v2683_v46, %v2682_v34 }
 0x1e6   : > { %2685 = vadd.xlane.f32.xlu0 %v2684_v36 }
 0x1ea   : > { %2699 = vadd.xlane.f32.xlu0 %v2698_v39 }
 0x26f   : > { %v2686_v40 = vpop.xlane.xlu0 %2685 }
 0x270   : > { %v2687_v41 = vrot.slane %v2686_v40, 4 }
 0x272   : > { %v2688_v42 = vadd.f32 %v2687_v41, %v2686_v40 }
 0x273   : > { %v2700_v43 = vpop.xlane.xlu0 %2699 }
 0x274   : > { %v2689_v44 = vrot.slane %v2688_v42, 2  ;;  %v2701_v45 = vrot.slane %v2700_v43, 4 }
 0x276   : > { %v2702_v47 = vadd.f32 %v2701_v45, %v2700_v43  ;;  %v2690_v48 = vadd.f32 %v2689_v44, %v2688_v42 }
 0x278   : > { %v2703_v50 = vrot.slane %v2702_v47, 2  ;;  %v2691_v52 = vrot.slane %v2690_v48, 1 }
 0x27a   : > { %v2704_v51 = vadd.f32 %v2703_v50, %v2702_v47  ;;  %v2692_v53 = vadd.f32 %v2691_v52, %v2690_v48 }
 0x27c   : > { %4222 = vpush %v2692_v53  ;;  %v2705_v55 = vrot.slane %v2704_v51, 1 }
 0x27e   : > { %v2706_v56 = vadd.f32 %v2705_v55, %v2704_v51 }
 0x280   : > { %4224 = vpush %v2706_v56 }
 0x290   : > { %v3001_v57 = vpop.f32.mrf.mxu1 }
 0x291   : > { %3587 = vst.msk [vmem:[%s4880_s23] sm:$0x1] %vm3586_vm6, %v3001_v57  ;;  %v3593_v61 = vsel %vm3586_vm6, %v3001_v57, inf  ;;  %v3607_v4 = vsel %vm3586_vm6, %v3001_v57, -inf }
 0x292   : > { %v4180_v58 = vpop.f32.mrf.mxu1 }
 0x294   : > { %v3074_v54 = vpop.f32.mrf.mxu0  ;;  %v3147_v59 = vpop.f32.mrf.mxu1 }
 0x295   : > { %3588 = vst.msk [vmem:[%s4880_s23 + $0x1] sm:$0x1] %vm3586_vm6, %v3074_v54  ;;  %v3608_v60 = vsel %vm3586_vm6, %v3074_v54, -inf  ;;  %3589 = vst.msk [vmem:[%s4880_s23 + $0x2] sm:$0x1] %vm3586_vm6, %v3147_v59  ;;  %v3594_v62 = vsel %vm3586_vm6, %v3074_v54, inf }
 0x296   : > { %v3595_v63 = vsel %vm3586_vm6, %v3147_v59, inf  ;;  %v4185_v0 = vpop.f32.mrf.mxu0  ;;  %v4190_v2 = vpop.f32.mrf.mxu1  ;;  %v3596_v3 = vmin.f32 %v3593_v61, %v3594_v62  ;;  %v3610_v11 = vmax.f32 %v3607_v4, %v3608_v60  ;;  %v3609_v14 = vsel %vm3586_vm6, %v3147_v59, -inf  ;;  %s4322_s23 = scalar_lea.vmem %s4321_s17, 96 }
 0x297   : > { %p4324_p0 = scmp.lt.s32.totalorder %s4322_s23, %s4316_s14 }
 0x298   : > { %v3597_v8 = vmin.f32 %v3596_v3, %v3595_v63  ;;  %v3219_v12 = vpop.f32.mrf.mxu0  ;;  %v3291_v13 = vpop.f32.mrf.mxu1  ;;  %v3611_v17 = vmax.f32 %v3610_v11, %v3609_v14 }
 0x299   : > { %4209 = vmatmul.mubr.msk.f32.vlgmr.msra.gmra.mxu1 %vm411_vm2, %v3219_v12  ;;  %4214 = vmatmul.mubr.msk.f32.vlgmr.msra.gmra.mxu0 %vm411_vm2, %v3291_v13  ;;  %p4325_p1 = por %p4324_p0, %p4323_p13 }
 0x29a   : > { %3598 = vmin.xlane.f32.xlu1 %v3597_v8  ;;  %v4195_v5 = vpop.f32.mrf.mxu0  ;;  %4217 = vmatpush3.msk.msra.mxu1 %vm415_vm0, %v4803_v49  ;;  %v4200_v15 = vpop.f32.mrf.mxu1 }
 0x29b   : > { %4218 = vmatprep.mubr.msk.f32.mxu1 %vm4414_vm1, %v4413_v1  ;;  %p4326_p2 = pnand %p4325_p1, %p4319_p12 }
 0x29c   : > { %v3363_v6 = vpop.f32.mrf.mxu0 }
 0x29d   : > { %4219 = vmatmul.mubr.msk.f32.vlgmr.msra.gmra.mxu1 %vm411_vm2, %v3363_v6 }
 0x29e   : > { %3612 = vmax.xlane.f32.xlu1 %v3611_v17  ;;  %v4205_v16 = vpop.f32.mrf.mxu0 }
 0x29f   : > { %4329 = shalt.err (!%p4326_p2)
}
 0x2a0   : > { %s4330_s26 = scalar_lea.hbm %s4910_s28, 48  ;;  %s4334_s16 = scalar_lea.hbm %s5041_s8, 96 }
 0x2a1   : > { %p4331_p3 = scmp.ne.s32.totalorder %s4910_s28, %s4330_s26  ;;  %p4335_p8 = scmp.lt.s32.totalorder %s4910_s28, %s5041_s8 }
 0x2a2   : > { %p4336_p9 = scmp.lt.s32.totalorder %s4334_s16, %s4330_s26 }
 0x2a3   : > { %p4332_p4 = pnand %p4331_p3, %p4507_p5 }
 0x2a4   : > { %p4337_p10 = por %p4336_p9, %p4335_p8 }
 0x2a5   : > { %p4333_p7 = pneg %p4332_p4 }
 0x2a7   : > { %p4338_p11 = pnand %p4337_p10, %p4333_p7 }
 0x2a9   : > { %4341 = shalt.err (!%p4338_p11)
}
 0x2aa   : > { %s5045_s14 = smov 16   ;;  %s5046_s17 = smov 1   ;;  %vm3626_vm7 = vcmp.eq.s32.totalorder %v4837_v10, 1  ;;  %vm3621_vm8 = vcmp.eq.s32.totalorder %v4835_v9, 0  ;;  %vm3622_vm9 = vcmp.eq.s32.totalorder %v4837_v10, 0  ;;  %vm3631_vm10 = vcmp.eq.s32.totalorder %v4837_v10, 2 }
 0x2ab   : > { %s5052_s25 = scalar_lea.sflag [#allocation3], %s4875_s21  ;;  %s5053_s22 = smul.u32 3, %s4875_s21  ;;  %vm4962_vm11 = vmand %vm3621_vm8, %vm3626_vm7 }
 0x2ac   : > { %4234 = dma.vmem_to_hbm [thread:$0]  (%p4507_p5), %s4903_s24, 48, %s4910_s28, %s5052_s25, %s5045_s14, %s5045_s14, %s5046_s17   ;;  %vm4970_vm12 = vmand %vm3621_vm8, %vm3622_vm9 }
 0x2ad   : > { %s373_s24 = scalar_lea.vmem [#allocation6], %s5053_s22  ;;  %s4940_s29 = spop %4222 }
 0x2ae   : > { %s3684_s28 = sshll.u32 %s373_s24, 4  ;;  %p386_p12 = scmp.lt.s32.totalorder %s4490_s13, 1  ;;  %s4950_s28 = int_to_ptr.vmem [resolvable:$true] %s3684_s28 }
 0x2af   : > { %s5054_s26 = smul.u32 48, %s4490_s13  ;;  %s3652_s22 = scalar_lea.sflag [#allocation7], %s4875_s21 }
 0x2b0   : > { %s4418_s27 = smov [#allocation6]  }
 0x2b1   : > { %s4944_s23 = spop %4224  ;;  %s4957_s25 = scalar_lea.hbm %s5042_s9, %s5054_s26 }
 0x2b2   : > { %v3628_v46 = vstv %s4944_s23  ;;  %s4342_s26 = scalar_lea.vmem %s4950_s28, 48  ;;  %s4346_s16 = sshll.u32 %s4418_s27, 4  ;;  %s4347_s16 = int_to_ptr.vmem [resolvable:$false] %s4346_s16 }
 0x2b3   : > { %p4343_p13 = scmp.ne.s32.totalorder %s4950_s28, %s4342_s26  ;;  %s4348_s14 = scalar_lea.vmem %s4347_s16, 96 }
 0x2b4   : > { %p4349_p2 = scmp.lt.s32.totalorder %s4950_s28, %s4347_s16  ;;  %p4350_p3 = scmp.lt.s32.totalorder %s4348_s14, %s4342_s26 }
 0x2b5   : > { %p4344_p0 = pnand %p4343_p13, %p4507_p5 }
 0x2b6   : > { %p4351_p4 = por %p4350_p3, %p4349_p2 }
 0x2b7   : > { %p4345_p1 = pneg %p4344_p0 }
 0x2b9   : > { %p4352_p7 = pnand %p4351_p4, %p4345_p1 }
 0x323   : > { %v3599_v1 = vpop.xlane.xlu1 %3598 }
 0x324   : > { %v3600_v49 = vrot.slane %v3599_v1, 4 }
 0x326   : > { %v3601_v18 = vmin.f32 %v3599_v1, %v3600_v49 }
 0x327   : > { %v3613_v19 = vpop.xlane.xlu1 %3612 }
 0x328   : > { %v3602_v7 = vrot.slane %v3601_v18, 2  ;;  %v3614_v20 = vrot.slane %v3613_v19, 4 }
 0x32a   : > { %v3615_v21 = vmax.f32 %v3613_v19, %v3614_v20  ;;  %v3603_v22 = vmin.f32 %v3601_v18, %v3602_v7 }
 0x32c   : > { %v3616_v23 = vrot.slane %v3615_v21, 2  ;;  %v3604_v24 = vrot.slane %v3603_v22, 1 }
 0x32e   : > { %v3617_v25 = vmax.f32 %v3615_v21, %v3616_v23  ;;  %v3605_v26 = vmin.f32 %v3603_v22, %v3604_v24 }
 0x330   : > { %4226 = vpush %v3605_v26  ;;  %v3618_v27 = vrot.slane %v3617_v25, 1 }
 0x332   : > { %v3619_v28 = vmax.f32 %v3617_v25, %v3618_v27 }
 0x334   : > { %4228 = vpush %v3619_v28 }
 0x359   : > { %v3436_v29 = vpop.f32.mrf.mxu1  ;;  %v3509_v30 = vpop.f32.mrf.mxu0 }
 0x35a   : > { %3590 = vst.msk [vmem:[%s373_s24] sm:$0x1] %vm3586_vm6, %v3436_v29  ;;  %3591 = vst.msk [vmem:[%s373_s24 + $0x1] sm:$0x1] %vm3586_vm6, %v3509_v30 }
 0x35b   : > { %v4210_v31 = vpop.f32.mrf.mxu1  ;;  %v4215_v32 = vpop.f32.mrf.mxu0 }
 0x35d   : > { %v3582_v33 = vpop.f32.mrf.mxu1 }
 0x35e   : > { %3592 = vst.msk [vmem:[%s373_s24 + $0x2] sm:$0x1] %vm3586_vm6, %v3582_v33 }
 0x35f   : > { %v4220_v36 = vpop.f32.mrf.mxu1 }
 0x360   : > { %4355 = shalt.err (!%p4352_p7)
}
 0x361   : > { %s4356_s24 = scalar_lea.hbm %s4957_s25, 48  ;;  %s4360_s27 = scalar_lea.hbm %s5042_s9, 96 }
 0x362   : > { %p4357_p8 = scmp.ne.s32.totalorder %s4957_s25, %s4356_s24  ;;  %p4361_p11 = scmp.lt.s32.totalorder %s4957_s25, %s5042_s9 }
 0x363   : > { %p4362_p13 = scmp.lt.s32.totalorder %s4360_s27, %s4356_s24 }
 0x364   : > { %p4358_p9 = pnand %p4357_p8, %p4507_p5 }
 0x365   : > { %p4363_p0 = por %p4362_p13, %p4361_p11 }
 0x366   : > { %p4359_p10 = pneg %p4358_p9 }
 0x368   : > { %p4364_p1 = pnand %p4363_p0, %p4359_p10 }
 0x36a   : > { %4367 = shalt.err (!%p4364_p1)
}
 0x36b   : > { %s5059_s14 = smov 1   ;;  %s5060_s26 = smov 16   ;;  %v3624_v37 = vstv %s4940_s29  ;;  %vm3632_vm13 = vmand %vm3621_vm8, %vm3631_vm10  ;;  %v3629_v38 = vsel %vm4962_vm11, %v3628_v46, 0.0  ;;  %vm3636_vm14 = vcmp.eq.s32.totalorder %v4837_v10, 3 }
 0x36c   : > { %4235 = dma.vmem_to_hbm [thread:$0]  (%p4507_p5), %s4950_s28, 48, %s4957_s25, %s3652_s22, %s5060_s26, %s5060_s26, %s5059_s14   ;;  %v3625_v40 = vsel %vm4970_vm12, %v3624_v37, 0.0  ;;  %vm3637_vm15 = vmand %vm3621_vm8, %vm3636_vm14 }
 0x36d   : > { %s5068_s13 = smov (!%p386_p12, %s4490_s13), 1  ;;  %s4227_s0 = spop %4226  ;;  %v3630_v42 = vadd.f32 %v3629_v38, %v3625_v40 }
 0x36e   : > { %v3633_v39 = vstv %s4227_s0  ;;  %s3834_s19 = sshll.u32 %s5068_s13, 3  ;;  %s4229_s17 = spop %4228 }
 0x36f   : > { %v3634_v41 = vsel %vm3632_vm13, %v3633_v39, 0.0  ;;  %v3638_v44 = vstv %s4229_s17  ;;  %s389_s25 = scalar_lea.vmem %s5040_s7, %s3834_s19 }
 0x370   : > { %v3635_v43 = vadd.f32 %v3634_v41, %v3630_v42  ;;  %v3639_v45 = vsel %vm3637_vm15, %v3638_v44, 0.0 }
 0x372   : > { %v3640_v47 = vadd.f32 %v3639_v45, %v3635_v43 }
 0x374   : > { %3641 = vst [vmem:[%s389_s25] sm:$0xff] %v3640_v47 }
 0x375 PF: > { %p4251_p5 = scmp.ge.s32.totalorder %s4410_s12, 2  ;;  %s3706_s22 = sand.u32 1, %s4398_s30  }
 0x376   : > { %s3707_s13 = scalar_lea.sflag [#allocation3], %s3706_s22 }
 0x377   : > { %p4243_p12 = pnand %p4251_p5, %p4511_p6 }
 0x379   : > { %p4244_p2 = pneg %p4243_p12 }
 0x37b   : > { %4389 = dma.done.wait (%p4244_p2), %s3707_s13, 48  }
 0x37c   : > { %4391 = vsyncadd (%p4244_p2), %s3707_s13, 4294967248  ;;  %s3716_s16 = scalar_lea.sflag [#allocation7], %s3706_s22 }
 0x37d   : > { %4393 = dma.done.wait (%p4244_p2), %s3716_s16, 48  }
 0x37e   : > { %4395 = vsyncadd (%p4244_p2), %s3716_s16, 4294967248  ;;  %p24_p3 = scmp.ge.s32.totalorder %s4494_s15, 4   ;;  %s5061_s30 = smov %s4402_s10 }
 0x37f   : > { %s5062_s10 = smov %s4406_s11  ;;  %s5063_s11 = smov %s4505_s18 }
 0x380   : > { %s5064_s12 = smov %s4494_s15  ;;  %26 = sbr.rel (!%p24_p3) target bundleno = 8 (0x8), region = 120 }
 0x385   :  { %3721 = vsyncpa [#allocation3], 1 }
 0x386   :  { %3723 = vsyncpa [#allocation3 + $0x1], 1 }
 0x387   :  { %3724 = vsyncpa [#allocation7], 1 }
 0x388   :  { %3726 = vsyncpa [#allocation7 + $0x1], 1 }
 0x389   :  { %3727 = vsyncpa [#allocation4], 1 }
 0x38a   :  { %3729 = vsyncpa [#allocation4 + $0x1], 1 }

</bundles_post_ra>
